<compile_context>
chip_gen: v7x
topology: tpu7x:2x2x1
jax: 0.10.0
libtpu: 0.0.40
codegen_flags: <defaults>
</compile_context>

<pallas_src>
import jax
import jax.numpy as jnp
from jax.experimental import pallas as pl
from jax.experimental.pallas import tpu as pltpu

# bf16 inputs to the MXU (f32 accumulation). Set to jnp.float32 for a
# full-precision matmul path (e.g. when validating at tight tolerances).
MATMUL_DTYPE = jnp.bfloat16


def _refine_kernel(x_ref, w1, b1, w2, b2, w3, b3, w4, b4,
                   out_ref, pad_ref, patch_ref):
    """One batch element per grid step.

    pad_ref   : (H+2, W+2, 32) f32 VMEM — zero-halo activation slab, reused by
                every layer (interior fully rewritten each layer).
    patch_ref : (H*W, 9*32) MATMUL_DTYPE VMEM — im2col slab for the MXU.
    """
    H = x_ref.shape[1]
    W = x_ref.shape[2]

    # Zero only the 1-pixel halo, once per grid step. Interiors are fully
    # overwritten by every layer before they are read, so no full-slab zero.
    zrow = jnp.zeros((1, W + 2, 32), jnp.float32)
    zcol = jnp.zeros((H + 2, 1, 32), jnp.float32)
    pad_ref[0:1, :, :] = zrow
    pad_ref[H + 1:H + 2, :, :] = zrow
    pad_ref[:, 0:1, :] = zcol
    pad_ref[:, W + 1:W + 2, :] = zcol

    # Seed the interior with concat(img, depth_init) (4 channels).
    pad_ref[1:H + 1, 1:W + 1, 0:4] = x_ref[0]

    def conv_bn_relu(cin, cout, w_ref, b_ref):
        # im2col: gather the 9 shifted windows into one (H*W, 9*cin) slab,
        # then a single MXU matmul with K = 9*cin.
        for ky in range(3):
            for kx in range(3):
                t = ky * 3 + kx
                xs = pad_ref[ky:ky + H, kx:kx + W, 0:cin].reshape(H * W, cin)
                patch_ref[:, t * cin:(t + 1) * cin] = xs.astype(patch_ref.dtype)
        acc = jnp.dot(patch_ref[:, 0:9 * cin], w_ref[...],
                      preferred_element_type=jnp.float32)   # (H*W, cout) f32
        # BN scale is folded into w; epilogue is bias + ReLU only.
        y = jnp.maximum(acc + b_ref[0], 0.0)
        # Write the activation straight back into the slab interior — the next
        # layer reads it from there (no extra activation copy).
        pad_ref[1:H + 1, 1:W + 1, 0:cout] = y.reshape(H, W, cout)

    conv_bn_relu(4, 32, w1, b1)
    conv_bn_relu(32, 32, w2, b2)
    conv_bn_relu(32, 32, w3, b3)

    # Final ConvBnReLU(32 -> 1): weighted channel reduction on the VPU/XLU
    # (an N=1 MXU matmul would waste >99% of the result lanes). Kept in f32.
    acc4 = pad_ref[0:H, 0:W, :] * w4[0]
    for t in range(1, 9):
        ky, kx = divmod(t, 3)
        acc4 = acc4 + pad_ref[ky:ky + H, kx:kx + W, :] * w4[t]
    res = jnp.maximum(jnp.sum(acc4, axis=-1, keepdims=True) + b4[...], 0.0)

    # depth_refined = depth_init + residual; depth_init is channel 3 of x_cat,
    # so no separate depth input stream is needed.
    out_ref[0] = x_ref[0][:, :, 3:4] + res


def refine_net(img, depth_init, packed_params):
    """img: (B, H, W, 3) f32, depth_init: (B, H, W, 1) f32.
    packed_params: output of pack_kernel_params()."""
    B, H, W, _ = img.shape
    x_cat = jnp.concatenate([img, depth_init], axis=-1)   # (B, H, W, 4)

    (w1, b1), (w2, b2), (w3, b3), (w4, b4) = packed_params

    def full_spec(arr):
        return pl.BlockSpec(arr.shape, lambda b, _n=arr.ndim: (0,) * _n)

    grid_spec = pltpu.PrefetchScalarGridSpec(
        num_scalar_prefetch=0,
        grid=(B,),
        in_specs=[
            pl.BlockSpec((1, H, W, 4), lambda b: (b, 0, 0, 0)),
            full_spec(w1), full_spec(b1),
            full_spec(w2), full_spec(b2),
            full_spec(w3), full_spec(b3),
            full_spec(w4), full_spec(b4),
        ],
        out_specs=pl.BlockSpec((1, H, W, 1), lambda b: (b, 0, 0, 0)),
        scratch_shapes=[
            pltpu.VMEM((H + 2, W + 2, 32), jnp.float32),   # padded activation slab
            pltpu.VMEM((H * W, 9 * 32), MATMUL_DTYPE),     # im2col slab
        ],
    )

    return pl.pallas_call(
        _refine_kernel,
        out_shape=jax.ShapeDtypeStruct((B, H, W, 1), jnp.float32),
        grid_spec=grid_spec,
        compiler_params=pltpu.CompilerParams(
            dimension_semantics=("parallel",)),            # megacore-shardable batch
    )(x_cat, w1, b1, w2, b2, w3, b3, w4, b4)


def make_params(key):
    """Deterministic synthetic params; returns [(w_oihw, scale, bias)] per
    ConvBnReLU layer (BatchNorm already folded to eval-mode scale/bias)."""
    layers = [(4, 32), (32, 32), (32, 32), (32, 1)]
    params = []
    for cin, cout in layers:
        k_w, k_g, k_b, k_m, k_v, key = jax.random.split(key, 6)
        w = 0.1 * jax.random.normal(k_w, (cout, cin, 3, 3), jnp.float32)  # torch OIHW
        gamma = 1.0 + 0.1 * jax.random.normal(k_g, (cout,), jnp.float32)
        beta = 0.1 * jax.random.normal(k_b, (cout,), jnp.float32)
        mean = 0.1 * jax.random.normal(k_m, (cout,), jnp.float32)
        var = 0.5 + 0.5 * jax.nn.softplus(jax.random.normal(k_v, (cout,), jnp.float32))
        scale = gamma / jnp.sqrt(var + 1e-5)        # fold BN (eval mode)
        bias = beta - mean * scale
        params.append((w, scale, bias))
    return params


def pack_kernel_params(params):
    """Repack torch OIHW weights for the kernel:
       layers 1-3: (9*cin, cout) matmul weights with BN scale folded in (bf16),
       layer 4   : (9, 32) per-tap channel weights (f32); biases stay f32."""
    packed = []
    for li, (w, scale, bias) in enumerate(params):
        cout, cin = w.shape[0], w.shape[1]
        w_scaled = w * scale[:, None, None, None]              # fold BN scale
        w_taps = jnp.transpose(w_scaled, (2, 3, 1, 0))          # (ky, kx, cin, cout)
        if li < 3:
            wm = w_taps.reshape(9 * cin, cout).astype(MATMUL_DTYPE)
            packed.append((wm, bias.reshape(1, cout).astype(jnp.float32)))
        else:  # residual head, cout == 1, stays f32 (VPU path)
            wt = w_taps.reshape(9, cin).astype(jnp.float32)
            packed.append((wt, bias.reshape(1, 1).astype(jnp.float32)))
    return packed


def refine_net_ref(img, depth_init, params):
    """Pure-JAX reference (NHWC) for correctness checking."""
    x = jnp.concatenate([img, depth_init], axis=-1)
    for (w, scale, bias) in params:
        y = jax.lax.conv_general_dilated(
            x, w, window_strides=(1, 1), padding="SAME",
            dimension_numbers=("NHWC", "OIHW", "NHWC"))
        x = jnp.maximum(y * scale + bias, 0.0)
    return depth_init + x


if __name__ == "__main__":
    key = jax.random.PRNGKey(0)
    k_img, k_d, k_p = jax.random.split(key, 3)
    B, H, W = 2, 16, 16
    img = jax.random.normal(k_img, (B, H, W, 3), jnp.float32)
    depth_init = jax.random.uniform(k_d, (B, H, W, 1), jnp.float32,
                                    minval=0.5, maxval=2.0)
    params = make_params(k_p)
    packed = pack_kernel_params(params)

    out = refine_net(img, depth_init, packed)
    out = jax.block_until_ready(out)

    ref = refine_net_ref(img, depth_init, params)
    assert out.shape == (B, H, W, 1)
    max_err = float(jnp.max(jnp.abs(out - ref)))
    # 3e-2 abs tolerance on O(1) depths accounts for bf16 MXU inputs
    # (f32 accumulation) in the three 32-channel layers.
    if max_err > 3e-2:
        raise SystemExit(f"mismatch vs reference: max abs err = {max_err}")
    print("KERNEL_OK")
</pallas_src>

<mosaic_0001>
module attributes {stable_mosaic.version = 11 : i64} {
  func.func @_refine_kernel(%arg0: i32, %arg1: memref<1x16x16x4xf32, #tpu.memory_space<vmem>>, %arg2: memref<36x32xbf16, #tpu.memory_space<vmem>>, %arg3: memref<1x32xf32, #tpu.memory_space<vmem>>, %arg4: memref<288x32xbf16, #tpu.memory_space<vmem>>, %arg5: memref<1x32xf32, #tpu.memory_space<vmem>>, %arg6: memref<288x32xbf16, #tpu.memory_space<vmem>>, %arg7: memref<1x32xf32, #tpu.memory_space<vmem>>, %arg8: memref<9x32xf32, #tpu.memory_space<vmem>>, %arg9: memref<1x1xf32, #tpu.memory_space<vmem>>, %arg10: memref<1x16x16x1xf32, #tpu.memory_space<vmem>>, %arg11: memref<18x18x32xf32, #tpu.memory_space<vmem>>, %arg12: memref<256x288xbf16, #tpu.memory_space<vmem>>) attributes {dimension_semantics = [#tpu.dimension_semantics<parallel>], iteration_bounds = array<i64: 2>, scalar_prefetch = 0 : i64, scratch_operands = 2 : i64, tpu.core_type = #tpu.core_type<tc>, window_params = [{transform_indices = @transform_0, window_bounds = array<i64: 1, 16, 16, 4>}, {pipeline_mode = #tpu.pipeline_mode<synchronous>, transform_indices = @transform_1, window_bounds = array<i64: 36, 32>}, {pipeline_mode = #tpu.pipeline_mode<synchronous>, transform_indices = @transform_2, window_bounds = array<i64: 1, 32>}, {pipeline_mode = #tpu.pipeline_mode<synchronous>, transform_indices = @transform_3, window_bounds = array<i64: 288, 32>}, {pipeline_mode = #tpu.pipeline_mode<synchronous>, transform_indices = @transform_4, window_bounds = array<i64: 1, 32>}, {pipeline_mode = #tpu.pipeline_mode<synchronous>, transform_indices = @transform_5, window_bounds = array<i64: 288, 32>}, {pipeline_mode = #tpu.pipeline_mode<synchronous>, transform_indices = @transform_6, window_bounds = array<i64: 1, 32>}, {pipeline_mode = #tpu.pipeline_mode<synchronous>, transform_indices = @transform_7, window_bounds = array<i64: 9, 32>}, {pipeline_mode = #tpu.pipeline_mode<synchronous>, transform_indices = @transform_8, window_bounds = array<i64: 1, 1>}, {transform_indices = @transform_9, window_bounds = array<i64: 1, 16, 16, 1>}]} {
    %cst = arith.constant 0.000000e+00 : f32
    %0 = vector.broadcast %cst : f32 to vector<1x18x32xf32>
    %cst_0 = arith.constant 0.000000e+00 : f32
    %1 = vector.broadcast %cst_0 : f32 to vector<18x1x32xf32>
    %c0 = arith.constant 0 : index
    %c0_1 = arith.constant 0 : index
    %c0_2 = arith.constant 0 : index
    %2 = vector.load %arg11[%c0, %c0_1, %c0_2] : memref<18x18x32xf32, #tpu.memory_space<vmem>>, vector<1x18x32xf32>
    tpu.vector_store %arg11[%c0, %c0_1, %c0_2], %0 {strides = array<i32>} : memref<18x18x32xf32, #tpu.memory_space<vmem>>, vector<1x18x32xf32>,
    %c17 = arith.constant 17 : index
    %c0_3 = arith.constant 0 : index
    %c0_4 = arith.constant 0 : index
    %3 = vector.load %arg11[%c17, %c0_3, %c0_4] : memref<18x18x32xf32, #tpu.memory_space<vmem>>, vector<1x18x32xf32>
    tpu.vector_store %arg11[%c17, %c0_3, %c0_4], %0 {strides = array<i32>} : memref<18x18x32xf32, #tpu.memory_space<vmem>>, vector<1x18x32xf32>,
    %c0_5 = arith.constant 0 : index
    %c0_6 = arith.constant 0 : index
    %c0_7 = arith.constant 0 : index
    %4 = vector.load %arg11[%c0_5, %c0_6, %c0_7] : memref<18x18x32xf32, #tpu.memory_space<vmem>>, vector<18x1x32xf32>
    tpu.vector_store %arg11[%c0_5, %c0_6, %c0_7], %1 {strides = array<i32>} : memref<18x18x32xf32, #tpu.memory_space<vmem>>, vector<18x1x32xf32>,
    %c0_8 = arith.constant 0 : index
    %c17_9 = arith.constant 17 : index
    %c0_10 = arith.constant 0 : index
    %5 = vector.load %arg11[%c0_8, %c17_9, %c0_10] : memref<18x18x32xf32, #tpu.memory_space<vmem>>, vector<18x1x32xf32>
    tpu.vector_store %arg11[%c0_8, %c17_9, %c0_10], %1 {strides = array<i32>} : memref<18x18x32xf32, #tpu.memory_space<vmem>>, vector<18x1x32xf32>,
    %c0_11 = arith.constant 0 : index
    %c0_12 = arith.constant 0 : index
    %c0_13 = arith.constant 0 : index
    %c0_14 = arith.constant 0 : index
    %6 = vector.load %arg1[%c0_11, %c0_12, %c0_13, %c0_14] : memref<1x16x16x4xf32, #tpu.memory_space<vmem>>, vector<1x16x16x4xf32>
    %7 = vector.shape_cast %6 : vector<1x16x16x4xf32> to vector<16x16x4xf32>
    %c1 = arith.constant 1 : index
    %c1_15 = arith.constant 1 : index
    %c0_16 = arith.constant 0 : index
    %8 = vector.load %arg11[%c1, %c1_15, %c0_16] : memref<18x18x32xf32, #tpu.memory_space<vmem>>, vector<16x16x4xf32>
    tpu.vector_store %arg11[%c1, %c1_15, %c0_16], %7 {strides = array<i32>} : memref<18x18x32xf32, #tpu.memory_space<vmem>>, vector<16x16x4xf32>,
    %c0_17 = arith.constant 0 : index
    %c0_18 = arith.constant 0 : index
    %c0_19 = arith.constant 0 : index
    %9 = vector.load %arg11[%c0_17, %c0_18, %c0_19] : memref<18x18x32xf32, #tpu.memory_space<vmem>>, vector<16x16x4xf32>
    %10 = vector.shape_cast %9 : vector<16x16x4xf32> to vector<256x4xf32>
    %11 = arith.truncf %10 : vector<256x4xf32> to vector<256x4xbf16>
    %c0_20 = arith.constant 0 : index
    %c0_21 = arith.constant 0 : index
    %12 = vector.load %arg12[%c0_20, %c0_21] : memref<256x288xbf16, #tpu.memory_space<vmem>>, vector<256x4xbf16>
    tpu.vector_store %arg12[%c0_20, %c0_21], %11 {strides = array<i32>} : memref<256x288xbf16, #tpu.memory_space<vmem>>, vector<256x4xbf16>,
    %c0_22 = arith.constant 0 : index
    %c1_23 = arith.constant 1 : index
    %c0_24 = arith.constant 0 : index
    %13 = vector.load %arg11[%c0_22, %c1_23, %c0_24] : memref<18x18x32xf32, #tpu.memory_space<vmem>>, vector<16x16x4xf32>
    %14 = vector.shape_cast %13 : vector<16x16x4xf32> to vector<256x4xf32>
    %15 = arith.truncf %14 : vector<256x4xf32> to vector<256x4xbf16>
    %c0_25 = arith.constant 0 : index
    %c4 = arith.constant 4 : index
    %16 = vector.load %arg12[%c0_25, %c4] : memref<256x288xbf16, #tpu.memory_space<vmem>>, vector<256x4xbf16>
    tpu.vector_store %arg12[%c0_25, %c4], %15 {strides = array<i32>} : memref<256x288xbf16, #tpu.memory_space<vmem>>, vector<256x4xbf16>,
    %c0_26 = arith.constant 0 : index
    %c2 = arith.constant 2 : index
    %c0_27 = arith.constant 0 : index
    %17 = vector.load %arg11[%c0_26, %c2, %c0_27] : memref<18x18x32xf32, #tpu.memory_space<vmem>>, vector<16x16x4xf32>
    %18 = vector.shape_cast %17 : vector<16x16x4xf32> to vector<256x4xf32>
    %19 = arith.truncf %18 : vector<256x4xf32> to vector<256x4xbf16>
    %c0_28 = arith.constant 0 : index
    %c8 = arith.constant 8 : index
    %20 = vector.load %arg12[%c0_28, %c8] : memref<256x288xbf16, #tpu.memory_space<vmem>>, vector<256x4xbf16>
    tpu.vector_store %arg12[%c0_28, %c8], %19 {strides = array<i32>} : memref<256x288xbf16, #tpu.memory_space<vmem>>, vector<256x4xbf16>,
    %c1_29 = arith.constant 1 : index
    %c0_30 = arith.constant 0 : index
    %c0_31 = arith.constant 0 : index
    %21 = vector.load %arg11[%c1_29, %c0_30, %c0_31] : memref<18x18x32xf32, #tpu.memory_space<vmem>>, vector<16x16x4xf32>
    %22 = vector.shape_cast %21 : vector<16x16x4xf32> to vector<256x4xf32>
    %23 = arith.truncf %22 : vector<256x4xf32> to vector<256x4xbf16>
    %c0_32 = arith.constant 0 : index
    %c12 = arith.constant 12 : index
    %24 = vector.load %arg12[%c0_32, %c12] : memref<256x288xbf16, #tpu.memory_space<vmem>>, vector<256x4xbf16>
    tpu.vector_store %arg12[%c0_32, %c12], %23 {strides = array<i32>} : memref<256x288xbf16, #tpu.memory_space<vmem>>, vector<256x4xbf16>,
    %c1_33 = arith.constant 1 : index
    %c1_34 = arith.constant 1 : index
    %c0_35 = arith.constant 0 : index
    %25 = vector.load %arg11[%c1_33, %c1_34, %c0_35] : memref<18x18x32xf32, #tpu.memory_space<vmem>>, vector<16x16x4xf32>
    %26 = vector.shape_cast %25 : vector<16x16x4xf32> to vector<256x4xf32>
    %27 = arith.truncf %26 : vector<256x4xf32> to vector<256x4xbf16>
    %c0_36 = arith.constant 0 : index
    %c16 = arith.constant 16 : index
    %28 = vector.load %arg12[%c0_36, %c16] : memref<256x288xbf16, #tpu.memory_space<vmem>>, vector<256x4xbf16>
    tpu.vector_store %arg12[%c0_36, %c16], %27 {strides = array<i32>} : memref<256x288xbf16, #tpu.memory_space<vmem>>, vector<256x4xbf16>,
    %c1_37 = arith.constant 1 : index
    %c2_38 = arith.constant 2 : index
    %c0_39 = arith.constant 0 : index
    %29 = vector.load %arg11[%c1_37, %c2_38, %c0_39] : memref<18x18x32xf32, #tpu.memory_space<vmem>>, vector<16x16x4xf32>
    %30 = vector.shape_cast %29 : vector<16x16x4xf32> to vector<256x4xf32>
    %31 = arith.truncf %30 : vector<256x4xf32> to vector<256x4xbf16>
    %c0_40 = arith.constant 0 : index
    %c20 = arith.constant 20 : index
    %32 = vector.load %arg12[%c0_40, %c20] : memref<256x288xbf16, #tpu.memory_space<vmem>>, vector<256x4xbf16>
    tpu.vector_store %arg12[%c0_40, %c20], %31 {strides = array<i32>} : memref<256x288xbf16, #tpu.memory_space<vmem>>, vector<256x4xbf16>,
    %c2_41 = arith.constant 2 : index
    %c0_42 = arith.constant 0 : index
    %c0_43 = arith.constant 0 : index
    %33 = vector.load %arg11[%c2_41, %c0_42, %c0_43] : memref<18x18x32xf32, #tpu.memory_space<vmem>>, vector<16x16x4xf32>
    %34 = vector.shape_cast %33 : vector<16x16x4xf32> to vector<256x4xf32>
    %35 = arith.truncf %34 : vector<256x4xf32> to vector<256x4xbf16>
    %c0_44 = arith.constant 0 : index
    %c24 = arith.constant 24 : index
    %36 = vector.load %arg12[%c0_44, %c24] : memref<256x288xbf16, #tpu.memory_space<vmem>>, vector<256x4xbf16>
    tpu.vector_store %arg12[%c0_44, %c24], %35 {strides = array<i32>} : memref<256x288xbf16, #tpu.memory_space<vmem>>, vector<256x4xbf16>,
    %c2_45 = arith.constant 2 : index
    %c1_46 = arith.constant 1 : index
    %c0_47 = arith.constant 0 : index
    %37 = vector.load %arg11[%c2_45, %c1_46, %c0_47] : memref<18x18x32xf32, #tpu.memory_space<vmem>>, vector<16x16x4xf32>
    %38 = vector.shape_cast %37 : vector<16x16x4xf32> to vector<256x4xf32>
    %39 = arith.truncf %38 : vector<256x4xf32> to vector<256x4xbf16>
    %c0_48 = arith.constant 0 : index
    %c28 = arith.constant 28 : index
    %40 = vector.load %arg12[%c0_48, %c28] : memref<256x288xbf16, #tpu.memory_space<vmem>>, vector<256x4xbf16>
    tpu.vector_store %arg12[%c0_48, %c28], %39 {strides = array<i32>} : memref<256x288xbf16, #tpu.memory_space<vmem>>, vector<256x4xbf16>,
    %c2_49 = arith.constant 2 : index
    %c2_50 = arith.constant 2 : index
    %c0_51 = arith.constant 0 : index
    %41 = vector.load %arg11[%c2_49, %c2_50, %c0_51] : memref<18x18x32xf32, #tpu.memory_space<vmem>>, vector<16x16x4xf32>
    %42 = vector.shape_cast %41 : vector<16x16x4xf32> to vector<256x4xf32>
    %43 = arith.truncf %42 : vector<256x4xf32> to vector<256x4xbf16>
    %c0_52 = arith.constant 0 : index
    %c32 = arith.constant 32 : index
    %44 = vector.load %arg12[%c0_52, %c32] : memref<256x288xbf16, #tpu.memory_space<vmem>>, vector<256x4xbf16>
    tpu.vector_store %arg12[%c0_52, %c32], %43 {strides = array<i32>} : memref<256x288xbf16, #tpu.memory_space<vmem>>, vector<256x4xbf16>,
    %c0_53 = arith.constant 0 : index
    %c0_54 = arith.constant 0 : index
    %45 = vector.load %arg12[%c0_53, %c0_54] : memref<256x288xbf16, #tpu.memory_space<vmem>>, vector<256x36xbf16>
    %c0_55 = arith.constant 0 : index
    %c0_56 = arith.constant 0 : index
    %46 = vector.load %arg2[%c0_55, %c0_56] : memref<36x32xbf16, #tpu.memory_space<vmem>>, vector<36x32xbf16>
    %cst_57 = arith.constant dense<0.000000e+00> : vector<256x32xf32>
    %47 = tpu.matmul %45, %46, %cst_57 {dimension_numbers = #tpu.dot_dimension_numbers<[1], [0], [0], [1], [0, 0, 1, 1], [], []>} : vector<256x36xbf16>, vector<36x32xbf16>, vector<256x32xf32> -> vector<256x32xf32>
    %c0_58 = arith.constant 0 : index
    %c0_59 = arith.constant 0 : index
    %48 = vector.load %arg3[%c0_58, %c0_59] : memref<1x32xf32, #tpu.memory_space<vmem>>, vector<1x32xf32>
    %49 = vector.shape_cast %48 : vector<1x32xf32> to vector<32xf32>
    %50 = vector.shape_cast %49 : vector<32xf32> to vector<1x32xf32>
    %51 = vector.broadcast %50 : vector<1x32xf32> to vector<256x32xf32>
    %52 = arith.addf %47, %51 : vector<256x32xf32>
    %cst_60 = arith.constant 0.000000e+00 : f32
    %53 = vector.broadcast %cst_60 : f32 to vector<256x32xf32>
    %54 = arith.maximumf %52, %53 : vector<256x32xf32>
    %55 = vector.shape_cast %54 : vector<256x32xf32> to vector<16x16x32xf32>
    %c1_61 = arith.constant 1 : index
    %c1_62 = arith.constant 1 : index
    %c0_63 = arith.constant 0 : index
    %56 = vector.load %arg11[%c1_61, %c1_62, %c0_63] : memref<18x18x32xf32, #tpu.memory_space<vmem>>, vector<16x16x32xf32>
    tpu.vector_store %arg11[%c1_61, %c1_62, %c0_63], %55 {strides = array<i32>} : memref<18x18x32xf32, #tpu.memory_space<vmem>>, vector<16x16x32xf32>,
    %c0_64 = arith.constant 0 : index
    %c0_65 = arith.constant 0 : index
    %c0_66 = arith.constant 0 : index
    %57 = vector.load %arg11[%c0_64, %c0_65, %c0_66] : memref<18x18x32xf32, #tpu.memory_space<vmem>>, vector<16x16x32xf32>
    %58 = vector.shape_cast %57 : vector<16x16x32xf32> to vector<256x32xf32>
    %59 = arith.truncf %58 : vector<256x32xf32> to vector<256x32xbf16>
    %c0_67 = arith.constant 0 : index
    %c0_68 = arith.constant 0 : index
    %60 = vector.load %arg12[%c0_67, %c0_68] : memref<256x288xbf16, #tpu.memory_space<vmem>>, vector<256x32xbf16>
    tpu.vector_store %arg12[%c0_67, %c0_68], %59 {strides = array<i32>} : memref<256x288xbf16, #tpu.memory_space<vmem>>, vector<256x32xbf16>,
    %c0_69 = arith.constant 0 : index
    %c1_70 = arith.constant 1 : index
    %c0_71 = arith.constant 0 : index
    %61 = vector.load %arg11[%c0_69, %c1_70, %c0_71] : memref<18x18x32xf32, #tpu.memory_space<vmem>>, vector<16x16x32xf32>
    %62 = vector.shape_cast %61 : vector<16x16x32xf32> to vector<256x32xf32>
    %63 = arith.truncf %62 : vector<256x32xf32> to vector<256x32xbf16>
    %c0_72 = arith.constant 0 : index
    %c32_73 = arith.constant 32 : index
    %64 = vector.load %arg12[%c0_72, %c32_73] : memref<256x288xbf16, #tpu.memory_space<vmem>>, vector<256x32xbf16>
    tpu.vector_store %arg12[%c0_72, %c32_73], %63 {strides = array<i32>} : memref<256x288xbf16, #tpu.memory_space<vmem>>, vector<256x32xbf16>,
    %c0_74 = arith.constant 0 : index
    %c2_75 = arith.constant 2 : index
    %c0_76 = arith.constant 0 : index
    %65 = vector.load %arg11[%c0_74, %c2_75, %c0_76] : memref<18x18x32xf32, #tpu.memory_space<vmem>>, vector<16x16x32xf32>
    %66 = vector.shape_cast %65 : vector<16x16x32xf32> to vector<256x32xf32>
    %67 = arith.truncf %66 : vector<256x32xf32> to vector<256x32xbf16>
    %c0_77 = arith.constant 0 : index
    %c64 = arith.constant 64 : index
    %68 = vector.load %arg12[%c0_77, %c64] : memref<256x288xbf16, #tpu.memory_space<vmem>>, vector<256x32xbf16>
    tpu.vector_store %arg12[%c0_77, %c64], %67 {strides = array<i32>} : memref<256x288xbf16, #tpu.memory_space<vmem>>, vector<256x32xbf16>,
    %c1_78 = arith.constant 1 : index
    %c0_79 = arith.constant 0 : index
    %c0_80 = arith.constant 0 : index
    %69 = vector.load %arg11[%c1_78, %c0_79, %c0_80] : memref<18x18x32xf32, #tpu.memory_space<vmem>>, vector<16x16x32xf32>
    %70 = vector.shape_cast %69 : vector<16x16x32xf32> to vector<256x32xf32>
    %71 = arith.truncf %70 : vector<256x32xf32> to vector<256x32xbf16>
    %c0_81 = arith.constant 0 : index
    %c96 = arith.constant 96 : index
    %72 = vector.load %arg12[%c0_81, %c96] : memref<256x288xbf16, #tpu.memory_space<vmem>>, vector<256x32xbf16>
    tpu.vector_store %arg12[%c0_81, %c96], %71 {strides = array<i32>} : memref<256x288xbf16, #tpu.memory_space<vmem>>, vector<256x32xbf16>,
    %c1_82 = arith.constant 1 : index
    %c1_83 = arith.constant 1 : index
    %c0_84 = arith.constant 0 : index
    %73 = vector.load %arg11[%c1_82, %c1_83, %c0_84] : memref<18x18x32xf32, #tpu.memory_space<vmem>>, vector<16x16x32xf32>
    %74 = vector.shape_cast %73 : vector<16x16x32xf32> to vector<256x32xf32>
    %75 = arith.truncf %74 : vector<256x32xf32> to vector<256x32xbf16>
    %c0_85 = arith.constant 0 : index
    %c128 = arith.constant 128 : index
    %76 = vector.load %arg12[%c0_85, %c128] : memref<256x288xbf16, #tpu.memory_space<vmem>>, vector<256x32xbf16>
    tpu.vector_store %arg12[%c0_85, %c128], %75 {strides = array<i32>} : memref<256x288xbf16, #tpu.memory_space<vmem>>, vector<256x32xbf16>,
    %c1_86 = arith.constant 1 : index
    %c2_87 = arith.constant 2 : index
    %c0_88 = arith.constant 0 : index
    %77 = vector.load %arg11[%c1_86, %c2_87, %c0_88] : memref<18x18x32xf32, #tpu.memory_space<vmem>>, vector<16x16x32xf32>
    %78 = vector.shape_cast %77 : vector<16x16x32xf32> to vector<256x32xf32>
    %79 = arith.truncf %78 : vector<256x32xf32> to vector<256x32xbf16>
    %c0_89 = arith.constant 0 : index
    %c160 = arith.constant 160 : index
    %80 = vector.load %arg12[%c0_89, %c160] : memref<256x288xbf16, #tpu.memory_space<vmem>>, vector<256x32xbf16>
    tpu.vector_store %arg12[%c0_89, %c160], %79 {strides = array<i32>} : memref<256x288xbf16, #tpu.memory_space<vmem>>, vector<256x32xbf16>,
    %c2_90 = arith.constant 2 : index
    %c0_91 = arith.constant 0 : index
    %c0_92 = arith.constant 0 : index
    %81 = vector.load %arg11[%c2_90, %c0_91, %c0_92] : memref<18x18x32xf32, #tpu.memory_space<vmem>>, vector<16x16x32xf32>
    %82 = vector.shape_cast %81 : vector<16x16x32xf32> to vector<256x32xf32>
    %83 = arith.truncf %82 : vector<256x32xf32> to vector<256x32xbf16>
    %c0_93 = arith.constant 0 : index
    %c192 = arith.constant 192 : index
    %84 = vector.load %arg12[%c0_93, %c192] : memref<256x288xbf16, #tpu.memory_space<vmem>>, vector<256x32xbf16>
    tpu.vector_store %arg12[%c0_93, %c192], %83 {strides = array<i32>} : memref<256x288xbf16, #tpu.memory_space<vmem>>, vector<256x32xbf16>,
    %c2_94 = arith.constant 2 : index
    %c1_95 = arith.constant 1 : index
    %c0_96 = arith.constant 0 : index
    %85 = vector.load %arg11[%c2_94, %c1_95, %c0_96] : memref<18x18x32xf32, #tpu.memory_space<vmem>>, vector<16x16x32xf32>
    %86 = vector.shape_cast %85 : vector<16x16x32xf32> to vector<256x32xf32>
    %87 = arith.truncf %86 : vector<256x32xf32> to vector<256x32xbf16>
    %c0_97 = arith.constant 0 : index
    %c224 = arith.constant 224 : index
    %88 = vector.load %arg12[%c0_97, %c224] : memref<256x288xbf16, #tpu.memory_space<vmem>>, vector<256x32xbf16>
    tpu.vector_store %arg12[%c0_97, %c224], %87 {strides = array<i32>} : memref<256x288xbf16, #tpu.memory_space<vmem>>, vector<256x32xbf16>,
    %c2_98 = arith.constant 2 : index
    %c2_99 = arith.constant 2 : index
    %c0_100 = arith.constant 0 : index
    %89 = vector.load %arg11[%c2_98, %c2_99, %c0_100] : memref<18x18x32xf32, #tpu.memory_space<vmem>>, vector<16x16x32xf32>
    %90 = vector.shape_cast %89 : vector<16x16x32xf32> to vector<256x32xf32>
    %91 = arith.truncf %90 : vector<256x32xf32> to vector<256x32xbf16>
    %c0_101 = arith.constant 0 : index
    %c256 = arith.constant 256 : index
    %92 = vector.load %arg12[%c0_101, %c256] : memref<256x288xbf16, #tpu.memory_space<vmem>>, vector<256x32xbf16>
    tpu.vector_store %arg12[%c0_101, %c256], %91 {strides = array<i32>} : memref<256x288xbf16, #tpu.memory_space<vmem>>, vector<256x32xbf16>,
    %c0_102 = arith.constant 0 : index
    %c0_103 = arith.constant 0 : index
    %93 = vector.load %arg12[%c0_102, %c0_103] : memref<256x288xbf16, #tpu.memory_space<vmem>>, vector<256x288xbf16>
    %c0_104 = arith.constant 0 : index
    %c0_105 = arith.constant 0 : index
    %94 = vector.load %arg4[%c0_104, %c0_105] : memref<288x32xbf16, #tpu.memory_space<vmem>>, vector<288x32xbf16>
    %cst_106 = arith.constant dense<0.000000e+00> : vector<256x32xf32>
    %95 = tpu.matmul %93, %94, %cst_106 {dimension_numbers = #tpu.dot_dimension_numbers<[1], [0], [0], [1], [0, 0, 1, 1], [], []>} : vector<256x288xbf16>, vector<288x32xbf16>, vector<256x32xf32> -> vector<256x32xf32>
    %c0_107 = arith.constant 0 : index
    %c0_108 = arith.constant 0 : index
    %96 = vector.load %arg5[%c0_107, %c0_108] : memref<1x32xf32, #tpu.memory_space<vmem>>, vector<1x32xf32>
    %97 = vector.shape_cast %96 : vector<1x32xf32> to vector<32xf32>
    %98 = vector.shape_cast %97 : vector<32xf32> to vector<1x32xf32>
    %99 = vector.broadcast %98 : vector<1x32xf32> to vector<256x32xf32>
    %100 = arith.addf %95, %99 : vector<256x32xf32>
    %cst_109 = arith.constant 0.000000e+00 : f32
    %101 = vector.broadcast %cst_109 : f32 to vector<256x32xf32>
    %102 = arith.maximumf %100, %101 : vector<256x32xf32>
    %103 = vector.shape_cast %102 : vector<256x32xf32> to vector<16x16x32xf32>
    %c1_110 = arith.constant 1 : index
    %c1_111 = arith.constant 1 : index
    %c0_112 = arith.constant 0 : index
    %104 = vector.load %arg11[%c1_110, %c1_111, %c0_112] : memref<18x18x32xf32, #tpu.memory_space<vmem>>, vector<16x16x32xf32>
    tpu.vector_store %arg11[%c1_110, %c1_111, %c0_112], %103 {strides = array<i32>} : memref<18x18x32xf32, #tpu.memory_space<vmem>>, vector<16x16x32xf32>,
    %c0_113 = arith.constant 0 : index
    %c0_114 = arith.constant 0 : index
    %c0_115 = arith.constant 0 : index
    %105 = vector.load %arg11[%c0_113, %c0_114, %c0_115] : memref<18x18x32xf32, #tpu.memory_space<vmem>>, vector<16x16x32xf32>
    %106 = vector.shape_cast %105 : vector<16x16x32xf32> to vector<256x32xf32>
    %107 = arith.truncf %106 : vector<256x32xf32> to vector<256x32xbf16>
    %c0_116 = arith.constant 0 : index
    %c0_117 = arith.constant 0 : index
    %108 = vector.load %arg12[%c0_116, %c0_117] : memref<256x288xbf16, #tpu.memory_space<vmem>>, vector<256x32xbf16>
    tpu.vector_store %arg12[%c0_116, %c0_117], %107 {strides = array<i32>} : memref<256x288xbf16, #tpu.memory_space<vmem>>, vector<256x32xbf16>,
    %c0_118 = arith.constant 0 : index
    %c1_119 = arith.constant 1 : index
    %c0_120 = arith.constant 0 : index
    %109 = vector.load %arg11[%c0_118, %c1_119, %c0_120] : memref<18x18x32xf32, #tpu.memory_space<vmem>>, vector<16x16x32xf32>
    %110 = vector.shape_cast %109 : vector<16x16x32xf32> to vector<256x32xf32>
    %111 = arith.truncf %110 : vector<256x32xf32> to vector<256x32xbf16>
    %c0_121 = arith.constant 0 : index
    %c32_122 = arith.constant 32 : index
    %112 = vector.load %arg12[%c0_121, %c32_122] : memref<256x288xbf16, #tpu.memory_space<vmem>>, vector<256x32xbf16>
    tpu.vector_store %arg12[%c0_121, %c32_122], %111 {strides = array<i32>} : memref<256x288xbf16, #tpu.memory_space<vmem>>, vector<256x32xbf16>,
    %c0_123 = arith.constant 0 : index
    %c2_124 = arith.constant 2 : index
    %c0_125 = arith.constant 0 : index
    %113 = vector.load %arg11[%c0_123, %c2_124, %c0_125] : memref<18x18x32xf32, #tpu.memory_space<vmem>>, vector<16x16x32xf32>
    %114 = vector.shape_cast %113 : vector<16x16x32xf32> to vector<256x32xf32>
    %115 = arith.truncf %114 : vector<256x32xf32> to vector<256x32xbf16>
    %c0_126 = arith.constant 0 : index
    %c64_127 = arith.constant 64 : index
    %116 = vector.load %arg12[%c0_126, %c64_127] : memref<256x288xbf16, #tpu.memory_space<vmem>>, vector<256x32xbf16>
    tpu.vector_store %arg12[%c0_126, %c64_127], %115 {strides = array<i32>} : memref<256x288xbf16, #tpu.memory_space<vmem>>, vector<256x32xbf16>,
    %c1_128 = arith.constant 1 : index
    %c0_129 = arith.constant 0 : index
    %c0_130 = arith.constant 0 : index
    %117 = vector.load %arg11[%c1_128, %c0_129, %c0_130] : memref<18x18x32xf32, #tpu.memory_space<vmem>>, vector<16x16x32xf32>
    %118 = vector.shape_cast %117 : vector<16x16x32xf32> to vector<256x32xf32>
    %119 = arith.truncf %118 : vector<256x32xf32> to vector<256x32xbf16>
    %c0_131 = arith.constant 0 : index
    %c96_132 = arith.constant 96 : index
    %120 = vector.load %arg12[%c0_131, %c96_132] : memref<256x288xbf16, #tpu.memory_space<vmem>>, vector<256x32xbf16>
    tpu.vector_store %arg12[%c0_131, %c96_132], %119 {strides = array<i32>} : memref<256x288xbf16, #tpu.memory_space<vmem>>, vector<256x32xbf16>,
    %c1_133 = arith.constant 1 : index
    %c1_134 = arith.constant 1 : index
    %c0_135 = arith.constant 0 : index
    %121 = vector.load %arg11[%c1_133, %c1_134, %c0_135] : memref<18x18x32xf32, #tpu.memory_space<vmem>>, vector<16x16x32xf32>
    %122 = vector.shape_cast %121 : vector<16x16x32xf32> to vector<256x32xf32>
    %123 = arith.truncf %122 : vector<256x32xf32> to vector<256x32xbf16>
    %c0_136 = arith.constant 0 : index
    %c128_137 = arith.constant 128 : index
    %124 = vector.load %arg12[%c0_136, %c128_137] : memref<256x288xbf16, #tpu.memory_space<vmem>>, vector<256x32xbf16>
    tpu.vector_store %arg12[%c0_136, %c128_137], %123 {strides = array<i32>} : memref<256x288xbf16, #tpu.memory_space<vmem>>, vector<256x32xbf16>,
    %c1_138 = arith.constant 1 : index
    %c2_139 = arith.constant 2 : index
    %c0_140 = arith.constant 0 : index
    %125 = vector.load %arg11[%c1_138, %c2_139, %c0_140] : memref<18x18x32xf32, #tpu.memory_space<vmem>>, vector<16x16x32xf32>
    %126 = vector.shape_cast %125 : vector<16x16x32xf32> to vector<256x32xf32>
    %127 = arith.truncf %126 : vector<256x32xf32> to vector<256x32xbf16>
    %c0_141 = arith.constant 0 : index
    %c160_142 = arith.constant 160 : index
    %128 = vector.load %arg12[%c0_141, %c160_142] : memref<256x288xbf16, #tpu.memory_space<vmem>>, vector<256x32xbf16>
    tpu.vector_store %arg12[%c0_141, %c160_142], %127 {strides = array<i32>} : memref<256x288xbf16, #tpu.memory_space<vmem>>, vector<256x32xbf16>,
    %c2_143 = arith.constant 2 : index
    %c0_144 = arith.constant 0 : index
    %c0_145 = arith.constant 0 : index
    %129 = vector.load %arg11[%c2_143, %c0_144, %c0_145] : memref<18x18x32xf32, #tpu.memory_space<vmem>>, vector<16x16x32xf32>
    %130 = vector.shape_cast %129 : vector<16x16x32xf32> to vector<256x32xf32>
    %131 = arith.truncf %130 : vector<256x32xf32> to vector<256x32xbf16>
    %c0_146 = arith.constant 0 : index
    %c192_147 = arith.constant 192 : index
    %132 = vector.load %arg12[%c0_146, %c192_147] : memref<256x288xbf16, #tpu.memory_space<vmem>>, vector<256x32xbf16>
    tpu.vector_store %arg12[%c0_146, %c192_147], %131 {strides = array<i32>} : memref<256x288xbf16, #tpu.memory_space<vmem>>, vector<256x32xbf16>,
    %c2_148 = arith.constant 2 : index
    %c1_149 = arith.constant 1 : index
    %c0_150 = arith.constant 0 : index
    %133 = vector.load %arg11[%c2_148, %c1_149, %c0_150] : memref<18x18x32xf32, #tpu.memory_space<vmem>>, vector<16x16x32xf32>
    %134 = vector.shape_cast %133 : vector<16x16x32xf32> to vector<256x32xf32>
    %135 = arith.truncf %134 : vector<256x32xf32> to vector<256x32xbf16>
    %c0_151 = arith.constant 0 : index
    %c224_152 = arith.constant 224 : index
    %136 = vector.load %arg12[%c0_151, %c224_152] : memref<256x288xbf16, #tpu.memory_space<vmem>>, vector<256x32xbf16>
    tpu.vector_store %arg12[%c0_151, %c224_152], %135 {strides = array<i32>} : memref<256x288xbf16, #tpu.memory_space<vmem>>, vector<256x32xbf16>,
    %c2_153 = arith.constant 2 : index
    %c2_154 = arith.constant 2 : index
    %c0_155 = arith.constant 0 : index
    %137 = vector.load %arg11[%c2_153, %c2_154, %c0_155] : memref<18x18x32xf32, #tpu.memory_space<vmem>>, vector<16x16x32xf32>
    %138 = vector.shape_cast %137 : vector<16x16x32xf32> to vector<256x32xf32>
    %139 = arith.truncf %138 : vector<256x32xf32> to vector<256x32xbf16>
    %c0_156 = arith.constant 0 : index
    %c256_157 = arith.constant 256 : index
    %140 = vector.load %arg12[%c0_156, %c256_157] : memref<256x288xbf16, #tpu.memory_space<vmem>>, vector<256x32xbf16>
    tpu.vector_store %arg12[%c0_156, %c256_157], %139 {strides = array<i32>} : memref<256x288xbf16, #tpu.memory_space<vmem>>, vector<256x32xbf16>,
    %c0_158 = arith.constant 0 : index
    %c0_159 = arith.constant 0 : index
    %141 = vector.load %arg12[%c0_158, %c0_159] : memref<256x288xbf16, #tpu.memory_space<vmem>>, vector<256x288xbf16>
    %c0_160 = arith.constant 0 : index
    %c0_161 = arith.constant 0 : index
    %142 = vector.load %arg6[%c0_160, %c0_161] : memref<288x32xbf16, #tpu.memory_space<vmem>>, vector<288x32xbf16>
    %cst_162 = arith.constant dense<0.000000e+00> : vector<256x32xf32>
    %143 = tpu.matmul %141, %142, %cst_162 {dimension_numbers = #tpu.dot_dimension_numbers<[1], [0], [0], [1], [0, 0, 1, 1], [], []>} : vector<256x288xbf16>, vector<288x32xbf16>, vector<256x32xf32> -> vector<256x32xf32>
    %c0_163 = arith.constant 0 : index
    %c0_164 = arith.constant 0 : index
    %144 = vector.load %arg7[%c0_163, %c0_164] : memref<1x32xf32, #tpu.memory_space<vmem>>, vector<1x32xf32>
    %145 = vector.shape_cast %144 : vector<1x32xf32> to vector<32xf32>
    %146 = vector.shape_cast %145 : vector<32xf32> to vector<1x32xf32>
    %147 = vector.broadcast %146 : vector<1x32xf32> to vector<256x32xf32>
    %148 = arith.addf %143, %147 : vector<256x32xf32>
    %cst_165 = arith.constant 0.000000e+00 : f32
    %149 = vector.broadcast %cst_165 : f32 to vector<256x32xf32>
    %150 = arith.maximumf %148, %149 : vector<256x32xf32>
    %151 = vector.shape_cast %150 : vector<256x32xf32> to vector<16x16x32xf32>
    %c1_166 = arith.constant 1 : index
    %c1_167 = arith.constant 1 : index
    %c0_168 = arith.constant 0 : index
    %152 = vector.load %arg11[%c1_166, %c1_167, %c0_168] : memref<18x18x32xf32, #tpu.memory_space<vmem>>, vector<16x16x32xf32>
    tpu.vector_store %arg11[%c1_166, %c1_167, %c0_168], %151 {strides = array<i32>} : memref<18x18x32xf32, #tpu.memory_space<vmem>>, vector<16x16x32xf32>,
    %c0_169 = arith.constant 0 : index
    %c0_170 = arith.constant 0 : index
    %c0_171 = arith.constant 0 : index
    %153 = vector.load %arg11[%c0_169, %c0_170, %c0_171] : memref<18x18x32xf32, #tpu.memory_space<vmem>>, vector<16x16x32xf32>
    %c0_172 = arith.constant 0 : index
    %c0_173 = arith.constant 0 : index
    %154 = vector.load %arg8[%c0_172, %c0_173] : memref<9x32xf32, #tpu.memory_space<vmem>>, vector<1x32xf32>
    %155 = vector.shape_cast %154 : vector<1x32xf32> to vector<32xf32>
    %156 = vector.shape_cast %155 : vector<32xf32> to vector<1x1x32xf32>
    %157 = vector.broadcast %156 : vector<1x1x32xf32> to vector<16x16x32xf32>
    %158 = arith.mulf %153, %157 : vector<16x16x32xf32>
    %c0_174 = arith.constant 0 : index
    %c1_175 = arith.constant 1 : index
    %c0_176 = arith.constant 0 : index
    %159 = vector.load %arg11[%c0_174, %c1_175, %c0_176] : memref<18x18x32xf32, #tpu.memory_space<vmem>>, vector<16x16x32xf32>
    %c1_177 = arith.constant 1 : index
    %c0_178 = arith.constant 0 : index
    %160 = vector.load %arg8[%c1_177, %c0_178] : memref<9x32xf32, #tpu.memory_space<vmem>>, vector<1x32xf32>
    %161 = vector.shape_cast %160 : vector<1x32xf32> to vector<32xf32>
    %162 = vector.shape_cast %161 : vector<32xf32> to vector<1x1x32xf32>
    %163 = vector.broadcast %162 : vector<1x1x32xf32> to vector<16x16x32xf32>
    %164 = arith.mulf %159, %163 : vector<16x16x32xf32>
    %165 = arith.addf %158, %164 : vector<16x16x32xf32>
    %c0_179 = arith.constant 0 : index
    %c2_180 = arith.constant 2 : index
    %c0_181 = arith.constant 0 : index
    %166 = vector.load %arg11[%c0_179, %c2_180, %c0_181] : memref<18x18x32xf32, #tpu.memory_space<vmem>>, vector<16x16x32xf32>
    %c2_182 = arith.constant 2 : index
    %c0_183 = arith.constant 0 : index
    %167 = vector.load %arg8[%c2_182, %c0_183] : memref<9x32xf32, #tpu.memory_space<vmem>>, vector<1x32xf32>
    %168 = vector.shape_cast %167 : vector<1x32xf32> to vector<32xf32>
    %169 = vector.shape_cast %168 : vector<32xf32> to vector<1x1x32xf32>
    %170 = vector.broadcast %169 : vector<1x1x32xf32> to vector<16x16x32xf32>
    %171 = arith.mulf %166, %170 : vector<16x16x32xf32>
    %172 = arith.addf %165, %171 : vector<16x16x32xf32>
    %c1_184 = arith.constant 1 : index
    %c0_185 = arith.constant 0 : index
    %c0_186 = arith.constant 0 : index
    %173 = vector.load %arg11[%c1_184, %c0_185, %c0_186] : memref<18x18x32xf32, #tpu.memory_space<vmem>>, vector<16x16x32xf32>
    %c3 = arith.constant 3 : index
    %c0_187 = arith.constant 0 : index
    %174 = vector.load %arg8[%c3, %c0_187] : memref<9x32xf32, #tpu.memory_space<vmem>>, vector<1x32xf32>
    %175 = vector.shape_cast %174 : vector<1x32xf32> to vector<32xf32>
    %176 = vector.shape_cast %175 : vector<32xf32> to vector<1x1x32xf32>
    %177 = vector.broadcast %176 : vector<1x1x32xf32> to vector<16x16x32xf32>
    %178 = arith.mulf %173, %177 : vector<16x16x32xf32>
    %179 = arith.addf %172, %178 : vector<16x16x32xf32>
    %c1_188 = arith.constant 1 : index
    %c1_189 = arith.constant 1 : index
    %c0_190 = arith.constant 0 : index
    %180 = vector.load %arg11[%c1_188, %c1_189, %c0_190] : memref<18x18x32xf32, #tpu.memory_space<vmem>>, vector<16x16x32xf32>
    %c4_191 = arith.constant 4 : index
    %c0_192 = arith.constant 0 : index
    %181 = vector.load %arg8[%c4_191, %c0_192] : memref<9x32xf32, #tpu.memory_space<vmem>>, vector<1x32xf32>
    %182 = vector.shape_cast %181 : vector<1x32xf32> to vector<32xf32>
    %183 = vector.shape_cast %182 : vector<32xf32> to vector<1x1x32xf32>
    %184 = vector.broadcast %183 : vector<1x1x32xf32> to vector<16x16x32xf32>
    %185 = arith.mulf %180, %184 : vector<16x16x32xf32>
    %186 = arith.addf %179, %185 : vector<16x16x32xf32>
    %c1_193 = arith.constant 1 : index
    %c2_194 = arith.constant 2 : index
    %c0_195 = arith.constant 0 : index
    %187 = vector.load %arg11[%c1_193, %c2_194, %c0_195] : memref<18x18x32xf32, #tpu.memory_space<vmem>>, vector<16x16x32xf32>
    %c5 = arith.constant 5 : index
    %c0_196 = arith.constant 0 : index
    %188 = vector.load %arg8[%c5, %c0_196] : memref<9x32xf32, #tpu.memory_space<vmem>>, vector<1x32xf32>
    %189 = vector.shape_cast %188 : vector<1x32xf32> to vector<32xf32>
    %190 = vector.shape_cast %189 : vector<32xf32> to vector<1x1x32xf32>
    %191 = vector.broadcast %190 : vector<1x1x32xf32> to vector<16x16x32xf32>
    %192 = arith.mulf %187, %191 : vector<16x16x32xf32>
    %193 = arith.addf %186, %192 : vector<16x16x32xf32>
    %c2_197 = arith.constant 2 : index
    %c0_198 = arith.constant 0 : index
    %c0_199 = arith.constant 0 : index
    %194 = vector.load %arg11[%c2_197, %c0_198, %c0_199] : memref<18x18x32xf32, #tpu.memory_space<vmem>>, vector<16x16x32xf32>
    %c6 = arith.constant 6 : index
    %c0_200 = arith.constant 0 : index
    %195 = vector.load %arg8[%c6, %c0_200] : memref<9x32xf32, #tpu.memory_space<vmem>>, vector<1x32xf32>
    %196 = vector.shape_cast %195 : vector<1x32xf32> to vector<32xf32>
    %197 = vector.shape_cast %196 : vector<32xf32> to vector<1x1x32xf32>
    %198 = vector.broadcast %197 : vector<1x1x32xf32> to vector<16x16x32xf32>
    %199 = arith.mulf %194, %198 : vector<16x16x32xf32>
    %200 = arith.addf %193, %199 : vector<16x16x32xf32>
    %c2_201 = arith.constant 2 : index
    %c1_202 = arith.constant 1 : index
    %c0_203 = arith.constant 0 : index
    %201 = vector.load %arg11[%c2_201, %c1_202, %c0_203] : memref<18x18x32xf32, #tpu.memory_space<vmem>>, vector<16x16x32xf32>
    %c7 = arith.constant 7 : index
    %c0_204 = arith.constant 0 : index
    %202 = vector.load %arg8[%c7, %c0_204] : memref<9x32xf32, #tpu.memory_space<vmem>>, vector<1x32xf32>
    %203 = vector.shape_cast %202 : vector<1x32xf32> to vector<32xf32>
    %204 = vector.shape_cast %203 : vector<32xf32> to vector<1x1x32xf32>
    %205 = vector.broadcast %204 : vector<1x1x32xf32> to vector<16x16x32xf32>
    %206 = arith.mulf %201, %205 : vector<16x16x32xf32>
    %207 = arith.addf %200, %206 : vector<16x16x32xf32>
    %c2_205 = arith.constant 2 : index
    %c2_206 = arith.constant 2 : index
    %c0_207 = arith.constant 0 : index
    %208 = vector.load %arg11[%c2_205, %c2_206, %c0_207] : memref<18x18x32xf32, #tpu.memory_space<vmem>>, vector<16x16x32xf32>
    %c8_208 = arith.constant 8 : index
    %c0_209 = arith.constant 0 : index
    %209 = vector.load %arg8[%c8_208, %c0_209] : memref<9x32xf32, #tpu.memory_space<vmem>>, vector<1x32xf32>
    %210 = vector.shape_cast %209 : vector<1x32xf32> to vector<32xf32>
    %211 = vector.shape_cast %210 : vector<32xf32> to vector<1x1x32xf32>
    %212 = vector.broadcast %211 : vector<1x1x32xf32> to vector<16x16x32xf32>
    %213 = arith.mulf %208, %212 : vector<16x16x32xf32>
    %214 = arith.addf %207, %213 : vector<16x16x32xf32>
    %cst_210 = arith.constant dense<0.000000e+00> : vector<16x16xf32>
    %215 = vector.multi_reduction <add>, %214, %cst_210 [2] : vector<16x16x32xf32> to vector<16x16xf32>
    %216 = vector.shape_cast %215 : vector<16x16xf32> to vector<16x16x1xf32>
    %c0_211 = arith.constant 0 : index
    %c0_212 = arith.constant 0 : index
    %217 = vector.load %arg9[%c0_211, %c0_212] : memref<1x1xf32, #tpu.memory_space<vmem>>, vector<1x1xf32>
    %218 = vector.shape_cast %217 : vector<1x1xf32> to vector<1x1x1xf32>
    %219 = vector.broadcast %218 : vector<1x1x1xf32> to vector<16x16x1xf32>
    %220 = arith.addf %216, %219 : vector<16x16x1xf32>
    %cst_213 = arith.constant 0.000000e+00 : f32
    %221 = vector.broadcast %cst_213 : f32 to vector<16x16x1xf32>
    %222 = arith.maximumf %220, %221 : vector<16x16x1xf32>
    %c0_214 = arith.constant 0 : index
    %c0_215 = arith.constant 0 : index
    %c0_216 = arith.constant 0 : index
    %c0_217 = arith.constant 0 : index
    %223 = vector.load %arg1[%c0_214, %c0_215, %c0_216, %c0_217] : memref<1x16x16x4xf32, #tpu.memory_space<vmem>>, vector<1x16x16x4xf32>
    %224 = vector.shape_cast %223 : vector<1x16x16x4xf32> to vector<16x16x4xf32>
    %225 = vector.extract_strided_slice %224 {offsets = [0, 0, 3], sizes = [16, 16, 1], strides = [1, 1, 1]} : vector<16x16x4xf32> to vector<16x16x1xf32>
    %226 = arith.addf %225, %222 : vector<16x16x1xf32>
    %c0_218 = arith.constant 0 : index
    %c0_219 = arith.constant 0 : index
    %c0_220 = arith.constant 0 : index
    %c0_221 = arith.constant 0 : index
    %227 = vector.load %arg10[%c0_218, %c0_219, %c0_220, %c0_221] : memref<1x16x16x1xf32, #tpu.memory_space<vmem>>, vector<1x16x16x1xf32>
    %228 = vector.shape_cast %227 : vector<1x16x16x1xf32> to vector<16x16x1xf32>
    %229 = vector.shape_cast %226 : vector<16x16x1xf32> to vector<1x16x16x1xf32>
    tpu.vector_store %arg10[%c0_218, %c0_219, %c0_220, %c0_221], %229 {strides = array<i32>} : memref<1x16x16x1xf32, #tpu.memory_space<vmem>>, vector<1x16x16x1xf32>,
    return
  }
  func.func @transform_0(%arg0: i32) -> (i32, i32, i32, i32) {
    %c0_i32 = arith.constant 0 : i32
    %c0_i32_0 = arith.constant 0 : i32
    %c0_i32_1 = arith.constant 0 : i32
    %c0_i32_2 = arith.constant 0 : i32
    return %arg0, %c0_i32, %c0_i32_0, %c0_i32_1 : i32, i32, i32, i32
  }
  func.func @transform_1(%arg0: i32) -> (i32, i32) {
    %c0_i32 = arith.constant 0 : i32
    %c0_i32_0 = arith.constant 0 : i32
    %c0_i32_1 = arith.constant 0 : i32
    return %c0_i32, %c0_i32_0 : i32, i32
  }
  func.func @transform_2(%arg0: i32) -> (i32, i32) {
    %c0_i32 = arith.constant 0 : i32
    %c0_i32_0 = arith.constant 0 : i32
    %c0_i32_1 = arith.constant 0 : i32
    return %c0_i32, %c0_i32_0 : i32, i32
  }
  func.func @transform_3(%arg0: i32) -> (i32, i32) {
    %c0_i32 = arith.constant 0 : i32
    %c0_i32_0 = arith.constant 0 : i32
    %c0_i32_1 = arith.constant 0 : i32
    return %c0_i32, %c0_i32_0 : i32, i32
  }
  func.func @transform_4(%arg0: i32) -> (i32, i32) {
    %c0_i32 = arith.constant 0 : i32
    %c0_i32_0 = arith.constant 0 : i32
    %c0_i32_1 = arith.constant 0 : i32
    return %c0_i32, %c0_i32_0 : i32, i32
  }
  func.func @transform_5(%arg0: i32) -> (i32, i32) {
    %c0_i32 = arith.constant 0 : i32
    %c0_i32_0 = arith.constant 0 : i32
    %c0_i32_1 = arith.constant 0 : i32
    return %c0_i32, %c0_i32_0 : i32, i32
  }
  func.func @transform_6(%arg0: i32) -> (i32, i32) {
    %c0_i32 = arith.constant 0 : i32
    %c0_i32_0 = arith.constant 0 : i32
    %c0_i32_1 = arith.constant 0 : i32
    return %c0_i32, %c0_i32_0 : i32, i32
  }
  func.func @transform_7(%arg0: i32) -> (i32, i32) {
    %c0_i32 = arith.constant 0 : i32
    %c0_i32_0 = arith.constant 0 : i32
    %c0_i32_1 = arith.constant 0 : i32
    return %c0_i32, %c0_i32_0 : i32, i32
  }
  func.func @transform_8(%arg0: i32) -> (i32, i32) {
    %c0_i32 = arith.constant 0 : i32
    %c0_i32_0 = arith.constant 0 : i32
    %c0_i32_1 = arith.constant 0 : i32
    return %c0_i32, %c0_i32_0 : i32, i32
  }
  func.func @transform_9(%arg0: i32) -> (i32, i32, i32, i32) {
    %c0_i32 = arith.constant 0 : i32
    %c0_i32_0 = arith.constant 0 : i32
    %c0_i32_1 = arith.constant 0 : i32
    %c0_i32_2 = arith.constant 0 : i32
    return %arg0, %c0_i32, %c0_i32_0, %c0_i32_1 : i32, i32, i32, i32
  }
}

</mosaic_0001>

<bundles_post_ra>
// kernel: tpu_custom_call.1
= control target key start
LH: loop header
LB: loop body
LE: loop exit
PB: predicated region body
PF: predicated region fallthrough
CT: control target
= control target key end

     0   :  { %s7162_s11 = smov 0   ;;  %s9626_s0 = inlined_call_operand.vmem [shape: f32[2,16,16,4], index: 0, kind: input, shape index: {}]   ;;  %s9627_s1 = inlined_call_operand.vmem [shape: bf16[36,32], index: 1, kind: input, shape index: {}]   ;;  %s9628_s2 = inlined_call_operand.vmem [shape: f32[1,32], index: 2, kind: input, shape index: {}]   ;;  %s9629_s3 = inlined_call_operand.vmem [shape: bf16[288,32], index: 3, kind: input, shape index: {}]   ;;  %s9630_s4 = inlined_call_operand.vmem [shape: f32[1,32], index: 4, kind: input, shape index: {}]   ;;  %s9631_s5 = inlined_call_operand.vmem [shape: bf16[288,32], index: 5, kind: input, shape index: {}]   ;;  %s9632_s6 = inlined_call_operand.vmem [shape: f32[1,32], index: 6, kind: input, shape index: {}]   ;;  %s9633_s7 = inlined_call_operand.vmem [shape: f32[9,32], index: 7, kind: input, shape index: {}]   ;;  %s9634_s8 = inlined_call_operand.<no memory space> [shape: f32[1,1], index: 8, kind: input, shape index: {}]   ;;  %s9635_s9 = inlined_call_operand.vmem [shape: f32[2,16,16,1], index: 9, kind: output, shape index: {}]  }
   0x1   :  { %v14_v0 = vstv %s9634_s8 }
   0x2   :  { %15 = vst [vmem:[#allocation4] sm:$0x1] %v14_v0 }
   0x3 LB: > { %s6507_s12 = sadd.s32 4294967295, %s7094_s11   ;;  %p6511_p0 = scmp.ge.s32.totalorder %s7094_s11, 1  ;;  %s7094_s11 = sphi %s7162_s11, %s21_s11  }
   0x4   : > { %p289_p1 = scmp.lt.s32.totalorder %s7094_s11, 3 }
   0x6   : > { %p290_p2 = pnand %p6511_p0, %p289_p1 }
   0x7   : > { %vm336_vm0 = vcmask (!%p290_p2), 261120   ;;  %vm339_vm1 = vcmask (!%p290_p2), 254976   ;;  %vm345_vm2 = vcmask (!%p290_p2), 253952   ;;  %v7096_v1 = vmov (!%p290_p2), 0.0   ;;  %p325_p3 = scmp.lt.s32.totalorder (!%p290_p2), %s6507_s12, 1  ;;  %s7097_s16 = smov (!%p290_p2), 4  }
   0x8   : > { %293 = sbr.rel (%p290_p2) target bundleno = 1884 (0x75c), region = 56  ;;  %337 = vst.msk [vmem:[#allocation2] sm:$0xff] (!%p290_p2), %vm336_vm0, %v7096_v1  ;;  %338 = vst.msk [vmem:[#allocation2 + $0x8] sm:$0xff] (!%p290_p2), %vm336_vm0, %v7096_v1  ;;  %vm415_vm3 = vcmask (!%p290_p2), 31744   ;;  %s7098_s17 = smov (!%p290_p2), 8   ;;  %vm1637_vm4 = vcmask (!%p290_p2), 1041408  }
   0x9   : > { %340 = vst.msk [vmem:[#allocation2 + $0x10] sm:$0x3] (!%p290_p2), %vm339_vm1, %v7096_v1  ;;  %344 = vst.msk [vmem:[#allocation2 + $0x1a8] sm:$0x3] (!%p290_p2), %vm339_vm1, %v7096_v1  ;;  %s7099_s18 = smov (!%p290_p2), 12   ;;  %s7100_s19 = smov (!%p290_p2), 16  }
   0xa   : > { %342 = vst.msk [vmem:[#allocation2 + $0x198] sm:$0xff] (!%p290_p2), %vm336_vm0, %v7096_v1  ;;  %343 = vst.msk [vmem:[#allocation2 + $0x1a0] sm:$0xff] (!%p290_p2), %vm336_vm0, %v7096_v1  ;;  %s7101_s20 = smov (!%p290_p2), 20   ;;  %s7102_s23 = smov (!%p290_p2), 24   ;;  %vm624_vm5 = vcmask (!%p290_p2), 64544   ;;  %vm753_vm6 = vcmask (!%p290_p2), 97344  }
   0xb   : > { %347 = vst.msk [vmem:[#allocation2 + $0x18] sm:$0x1] (!%p290_p2), %vm345_vm2, %v7096_v1  ;;  %348 = vst.msk [vmem:[#allocation2 + $0x30] sm:$0x1] (!%p290_p2), %vm345_vm2, %v7096_v1  ;;  %s7103_s28 = smov (!%p290_p2), 28   ;;  %s7104_s29 = smov (!%p290_p2), 32  }
   0xc   : > { %349 = vst.msk [vmem:[#allocation2 + $0x48] sm:$0x1] (!%p290_p2), %vm345_vm2, %v7096_v1  ;;  %350 = vst.msk [vmem:[#allocation2 + $0x60] sm:$0x1] (!%p290_p2), %vm345_vm2, %v7096_v1  ;;  %vm882_vm7 = vcmask (!%p290_p2), 130144   ;;  %vm1011_vm8 = vcmask (!%p290_p2), 162944  }
   0xd   : > { %351 = vst.msk [vmem:[#allocation2 + $0x78] sm:$0x1] (!%p290_p2), %vm345_vm2, %v7096_v1  ;;  %352 = vst.msk [vmem:[#allocation2 + $0x90] sm:$0x1] (!%p290_p2), %vm345_vm2, %v7096_v1  ;;  %vm1140_vm9 = vcmask (!%p290_p2), 195744   ;;  %vm1270_vm10 = vcmask (!%p290_p2), 228544  }
   0xe   : > { %353 = vst.msk [vmem:[#allocation2 + $0xa8] sm:$0x1] (!%p290_p2), %vm345_vm2, %v7096_v1  ;;  %354 = vst.msk [vmem:[#allocation2 + $0xc0] sm:$0x1] (!%p290_p2), %vm345_vm2, %v7096_v1  ;;  %vm1399_vm11 = vcmask (!%p290_p2), 261344   ;;  %vm1528_vm12 = vcmask (!%p290_p2), 294144  }
   0xf   : > { %355 = vst.msk [vmem:[#allocation2 + $0xd8] sm:$0x1] %vm345_vm2, %v7096_v1  ;;  %356 = vst.msk [vmem:[#allocation2 + $0xf0] sm:$0x1] %vm345_vm2, %v7096_v1  ;;  %s9637_s12 = smov (!%p325_p3, %s6507_s12), 1  ;;  %v512_v5 = vld [vmem:[#allocation2 + $0x1] sm:$0xff] }
  0x10   : > { %357 = vst.msk [vmem:[#allocation2 + $0x108] sm:$0x1] %vm345_vm2, %v7096_v1  ;;  %358 = vst.msk [vmem:[#allocation2 + $0x120] sm:$0x1] %vm345_vm2, %v7096_v1  ;;  %s6618_s8 = sshll.u32 %s9637_s12, 8  ;;  %v513_v6 = vld [vmem:[#allocation2 + $0x9] sm:$0xff] }
  0x11   : > { %359 = vst.msk [vmem:[#allocation2 + $0x138] sm:$0x1] %vm345_vm2, %v7096_v1  ;;  %360 = vst.msk [vmem:[#allocation2 + $0x150] sm:$0x1] %vm345_vm2, %v7096_v1  ;;  %s7222_s15 = scalar_lea.vmem %s9626_s0, %s6618_s8  ;;  %v641_v7 = vld [vmem:[#allocation2 + $0x2] sm:$0xff]  ;;  %v544_v8 = vpack.c.bf16 %v513_v6, %v512_v5  ;;  %vm1588_vm13 = vcmask 293888  }
  0x12   : > { %361 = vst.msk [vmem:[#allocation2 + $0x168] sm:$0x1] %vm345_vm2, %v7096_v1  ;;  %362 = vst.msk [vmem:[#allocation2 + $0x180] sm:$0x1] %vm345_vm2, %v7096_v1  ;;  %v382_v2 = vld [vmem:[%s7222_s15] sm:$0xff]  ;;  %v383_v3 = vld [vmem:[%s7222_s15 + $0x8] sm:$0xff] }
  0x13   : > { %365 = vst.msk [vmem:[#allocation2 + $0x29] sm:$0x1] %vm345_vm2, %v7096_v1  ;;  %366 = vst.msk [vmem:[#allocation2 + $0x41] sm:$0x1] %vm345_vm2, %v7096_v1  ;;  %v384_v4 = vld [vmem:[%s7222_s15 + $0x10] sm:$0xff]  ;;  %v385_v10 = vld [vmem:[%s7222_s15 + $0x18] sm:$0xff]  ;;  %576 = vrot.lane.b32.xlu0 %v544_v8, %s7097_s16 }
  0x14   : > { %367 = vst.msk [vmem:[#allocation2 + $0x59] sm:$0x1] %vm345_vm2, %v7096_v1  ;;  %368 = vst.msk [vmem:[#allocation2 + $0x71] sm:$0x1] %vm345_vm2, %v7096_v1  ;;  %v386_v11 = vld [vmem:[%s7222_s15 + $0x20] sm:$0xff]  ;;  %v387_v13 = vld [vmem:[%s7222_s15 + $0x28] sm:$0xff] }
  0x15   : > { %369 = vst.msk [vmem:[#allocation2 + $0x89] sm:$0x1] %vm345_vm2, %v7096_v1  ;;  %370 = vst.msk [vmem:[#allocation2 + $0xa1] sm:$0x1] %vm345_vm2, %v7096_v1  ;;  %v388_v14 = vld [vmem:[%s7222_s15 + $0x30] sm:$0xff]  ;;  %v389_v15 = vld [vmem:[%s7222_s15 + $0x38] sm:$0xff] }
  0x16   : > { %371 = vst.msk [vmem:[#allocation2 + $0xb9] sm:$0x1] %vm345_vm2, %v7096_v1  ;;  %372 = vst.msk [vmem:[#allocation2 + $0xd1] sm:$0x1] %vm345_vm2, %v7096_v1  ;;  %v390_v16 = vld [vmem:[%s7222_s15 + $0x40] sm:$0xff]  ;;  %v391_v17 = vld [vmem:[%s7222_s15 + $0x48] sm:$0xff] }
  0x17   : > { %373 = vst.msk [vmem:[#allocation2 + $0xe9] sm:$0x1] %vm345_vm2, %v7096_v1  ;;  %374 = vst.msk [vmem:[#allocation2 + $0x101] sm:$0x1] %vm345_vm2, %v7096_v1  ;;  %v392_v18 = vld [vmem:[%s7222_s15 + $0x50] sm:$0xff]  ;;  %v393_v19 = vld [vmem:[%s7222_s15 + $0x58] sm:$0xff] }
  0x18   : > { %375 = vst.msk [vmem:[#allocation2 + $0x119] sm:$0x1] %vm345_vm2, %v7096_v1  ;;  %376 = vst.msk [vmem:[#allocation2 + $0x131] sm:$0x1] %vm345_vm2, %v7096_v1  ;;  %v394_v20 = vld [vmem:[%s7222_s15 + $0x60] sm:$0xff]  ;;  %v395_v21 = vld [vmem:[%s7222_s15 + $0x68] sm:$0xff] }
  0x19   : > { %377 = vst.msk [vmem:[#allocation2 + $0x149] sm:$0x1] %vm345_vm2, %v7096_v1  ;;  %378 = vst.msk [vmem:[#allocation2 + $0x161] sm:$0x1] %vm345_vm2, %v7096_v1  ;;  %v396_v22 = vld [vmem:[%s7222_s15 + $0x70] sm:$0xff]  ;;  %v397_v23 = vld [vmem:[%s7222_s15 + $0x78] sm:$0xff] }
  0x1a   : > { %379 = vst.msk [vmem:[#allocation2 + $0x179] sm:$0x1] %vm345_vm2, %v7096_v1  ;;  %380 = vst.msk [vmem:[#allocation2 + $0x191] sm:$0x1] %vm345_vm2, %v7096_v1  ;;  %v449_v24 = vld [vmem:[#allocation2 + $0x8] sm:$0xff]  ;;  %v398_v26 = vld [vmem:[%s7222_s15 + $0x80] sm:$0xff] }
  0x1b   : > { %364 = vst.msk [vmem:[#allocation2 + $0x11] sm:$0x1] %vm345_vm2, %v7096_v1  ;;  %346 = vst.msk [vmem:[#allocation2] sm:$0x1] %vm345_vm2, %v7096_v1  ;;  %v399_v27 = vld [vmem:[%s7222_s15 + $0x88] sm:$0xff]  ;;  %v400_v6 = vld [vmem:[%s7222_s15 + $0x90] sm:$0xff] }
  0x1c   : > { %363 = vst.msk [vmem:[#allocation2 + $0x198] sm:$0x1] %vm345_vm2, %v7096_v1  ;;  %381 = vst.msk [vmem:[#allocation2 + $0x1a9] sm:$0x1] %vm345_vm2, %v7096_v1  ;;  %v7038_v8 = vld [vmem:[%s9627_s1] sm:$0xff]   ;;  %s7105_s30 = smov 64  }
  0x1d   : > { %416 = vst.msk [vmem:[#allocation2 + $0x19] sm:$0xff] %vm415_vm3, %v382_v2  ;;  %417 = vst.msk [vmem:[#allocation2 + $0x21] sm:$0xff] %vm415_vm3, %v383_v3  ;;  %6899 = vmatprep.subr.bf16.mxu0 %v7038_v8  ;;  %7009 = vmatprep.subr.bf16.mxu1 %v7038_v8  ;;  %vm2042_vm14 = vcmask 523520   ;;  %vm2171_vm15 = vcmask 785920   ;;  %s7106_s27 = smov 96   ;;  %vm2300_vm1 = vcmask 1048320  }
  0x1e   : > { %418 = vst.msk [vmem:[#allocation2 + $0x31] sm:$0xff] %vm415_vm3, %v384_v4  ;;  %419 = vst.msk [vmem:[#allocation2 + $0x39] sm:$0xff] %vm415_vm3, %v385_v10  ;;  %v7039_v10 = vld [vmem:[%s9627_s1 + $0x8] sm:$0xff]   ;;  %6900 = vmatpush3.bf16.msra.mxu0 %v7038_v8  ;;  %7012 = vmatpush3.bf16.msra.mxu1 %v7038_v8 }
  0x1f   : > { %420 = vst.msk [vmem:[#allocation2 + $0x49] sm:$0xff] %vm415_vm3, %v386_v11  ;;  %421 = vst.msk [vmem:[#allocation2 + $0x51] sm:$0xff] %vm415_vm3, %v387_v13  ;;  %v402_v11 = vld [vmem:[%s7222_s15 + $0xa0] sm:$0xff]  ;;  %v7040_v13 = vld [vmem:[%s9627_s1 + $0x10] ss:$0 sps:$4 sm:$0x33]   ;;  %6901 = vmatprep.subr.bf16.mxu0 %v7039_v10  ;;  %7010 = vmatprep.subr.bf16.mxu1 %v7039_v10 }
  0x20   : > { %422 = vst.msk [vmem:[#allocation2 + $0x61] sm:$0xff] %vm415_vm3, %v388_v14  ;;  %423 = vst.msk [vmem:[#allocation2 + $0x69] sm:$0xff] %vm415_vm3, %v389_v15  ;;  %v403_v14 = vld [vmem:[%s7222_s15 + $0xa8] sm:$0xff] }
  0x21   : > { %424 = vst.msk [vmem:[#allocation2 + $0x79] sm:$0xff] %vm415_vm3, %v390_v16  ;;  %425 = vst.msk [vmem:[#allocation2 + $0x81] sm:$0xff] %vm415_vm3, %v391_v17 }
  0x22   : > { %v642_v9 = vld [vmem:[#allocation2 + $0xa] sm:$0xff]  ;;  %426 = vst.msk [vmem:[#allocation2 + $0x91] sm:$0xff] %vm415_vm3, %v392_v18  ;;  %427 = vst.msk [vmem:[#allocation2 + $0x99] sm:$0xff] %vm415_vm3, %v393_v19  ;;  %v448_v25 = vld [vmem:[#allocation2] sm:$0xff]  ;;  %6902 = vmatpush3.bf16.msra.mxu0 %v7039_v10  ;;  %v1639_v19 = vsel %vm1637_vm4, %v7040_v13, 0  ;;  %7013 = vmatpush3.bf16.msra.mxu1 %v7039_v10 }
  0x23   : > { %v673_v12 = vpack.c.bf16 %v642_v9, %v641_v7  ;;  %428 = vst.msk [vmem:[#allocation2 + $0xa9] sm:$0xff] %vm415_vm3, %v394_v20  ;;  %429 = vst.msk [vmem:[#allocation2 + $0xb1] sm:$0xff] %vm415_vm3, %v395_v21  ;;  %v480_v31 = vpack.c.bf16 %v449_v24, %v448_v25  ;;  %v401_v7 = vld [vmem:[%s7222_s15 + $0x98] sm:$0xff]  ;;  %7015 = vmatprep.subr.msk.bf16.mxu0 %vm1637_vm4, %v7040_v13  ;;  %7016 = vmatprep.subr.msk.bf16.mxu1 %vm1637_vm4, %v7040_v13 }
  0x24   : > { %430 = vst.msk [vmem:[#allocation2 + $0xc1] sm:$0xff] %vm415_vm3, %v396_v22  ;;  %431 = vst.msk [vmem:[#allocation2 + $0xc9] sm:$0xff] %vm415_vm3, %v397_v23  ;;  %v514_v28 = vld [vmem:[#allocation2 + $0x19] sm:$0xff]  ;;  %v515_v29 = vld [vmem:[#allocation2 + $0x21] sm:$0xff] }
  0x25   : > { %705 = vrot.lane.b32.xlu1 %v673_v12, %s7098_s17  ;;  %v643_v30 = vld [vmem:[#allocation2 + $0x1a] sm:$0xff]  ;;  %432 = vst.msk [vmem:[#allocation2 + $0xd9] sm:$0xff] %vm415_vm3, %v398_v26  ;;  %433 = vst.msk [vmem:[#allocation2 + $0xe1] sm:$0xff] %vm415_vm3, %v399_v27  ;;  %v545_v32 = vpack.c.bf16 %v515_v29, %v514_v28  ;;  %v644_v33 = vld [vmem:[#allocation2 + $0x22] sm:$0xff] }
  0x26   : > { %v770_v34 = vld [vmem:[#allocation2 + $0x18] sm:$0xff]  ;;  %v771_v35 = vld [vmem:[#allocation2 + $0x20] sm:$0xff]  ;;  %v674_v36 = vpack.c.bf16 %v644_v33, %v643_v30  ;;  %v772_v38 = vld [vmem:[#allocation2 + $0x30] sm:$0xff]  ;;  %496 = vst.msk [vmem:[#allocation3] sm:$0xff] %vm415_vm3, %v480_v31  ;;  %6904 = vmatpush3.bf16.msra.mxu0 %v1639_v19  ;;  %7014 = vmatpush3.bf16.msra.mxu1 %v1639_v19 }
  0x27   : > { %v802_v37 = vpack.c.bf16 %v771_v35, %v770_v34  ;;  %v773_v39 = vld [vmem:[#allocation2 + $0x38] sm:$0xff]  ;;  %578 = vrot.lane.b32.xlu0 %v545_v32, %s7097_s16  ;;  %v1160_v41 = vld [vmem:[#allocation2 + $0x48] sm:$0xff]  ;;  %v1161_v42 = vld [vmem:[#allocation2 + $0x50] sm:$0xff]  ;;  %434 = vst.msk [vmem:[#allocation2 + $0xf1] sm:$0xff] %vm415_vm3, %v400_v6 }
  0x28   : > { %v803_v40 = vpack.c.bf16 %v773_v39, %v772_v38  ;;  %v901_v43 = vld [vmem:[#allocation2 + $0x31] sm:$0xff]  ;;  %v902_v44 = vld [vmem:[#allocation2 + $0x39] sm:$0xff]  ;;  %v7266_v45 = vpack.c.bf16 %v1161_v42, %v1160_v41  ;;  %v777_v47 = vld [vmem:[#allocation2 + $0x68] sm:$0xff]  ;;  %435 = vst.msk [vmem:[#allocation2 + $0xf9] sm:$0xff] %vm415_vm3, %v401_v7 }
  0x29   : > { %707 = vrot.lane.b32.xlu1 %v674_v36, %s7098_s17  ;;  %497 = vst.msk [vmem:[#allocation3 + $0x18] sm:$0xff] %vm415_vm3, %v802_v37  ;;  %v776_v46 = vld [vmem:[#allocation2 + $0x60] sm:$0xff]  ;;  %v7275_v49 = vpack.c.bf16 %v902_v44, %v901_v43  ;;  %v1164_v50 = vld [vmem:[#allocation2 + $0x78] sm:$0xff]  ;;  %v780_v55 = vld [vmem:[#allocation2 + $0x90] sm:$0xff] }
  0x2a   : > { %498 = vst.msk [vmem:[#allocation3 + $0x30] sm:$0xff] %vm415_vm3, %v803_v40  ;;  %v7270_v48 = vpack.c.bf16 %v777_v47, %v776_v46  ;;  %499 = vst.msk [vmem:[#allocation3 + $0x48] sm:$0xff] %vm415_vm3, %v7266_v45  ;;  %v1165_v51 = vld [vmem:[#allocation2 + $0x80] sm:$0xff]  ;;  %v1030_v52 = vld [vmem:[#allocation2 + $0x32] sm:$0xff] }
  0x2b   : > { %834 = vrot.lane.b32.xlu0 %v802_v37, %s7099_s18  ;;  %v1031_v53 = vld [vmem:[#allocation2 + $0x3a] sm:$0xff]  ;;  %v7277_v54 = vpack.c.bf16 %v1165_v51, %v1164_v50  ;;  %v1168_v59 = vld [vmem:[#allocation2 + $0xa8] sm:$0xff]  ;;  %v1169_v60 = vld [vmem:[#allocation2 + $0xb0] sm:$0xff]  ;;  %436 = vst.msk [vmem:[#allocation2 + $0x109] sm:$0xff] %vm415_vm3, %v402_v11 }
  0x2c   : > { %500 = vst.msk [vmem:[#allocation3 + $0x60] sm:$0xff] %vm415_vm3, %v7270_v48  ;;  %v781_v56 = vld [vmem:[#allocation2 + $0x98] sm:$0xff]  ;;  %v7288_v58 = vpack.c.bf16 %v1031_v53, %v1030_v52  ;;  %v7290_v61 = vpack.c.bf16 %v1169_v60, %v1168_v59  ;;  %v784_v62 = vld [vmem:[#allocation2 + $0xc0] sm:$0xff]  ;;  %v785_v63 = vld [vmem:[#allocation2 + $0xc8] sm:$0xff] }
  0x2d   : > { %836 = vrot.lane.b32.xlu1 %v803_v40, %s7099_s18  ;;  %v7282_v57 = vpack.c.bf16 %v781_v56, %v780_v55  ;;  %501 = vst.msk [vmem:[#allocation3 + $0x78] sm:$0xff] %vm415_vm3, %v7277_v54  ;;  %v7295_v0 = vpack.c.bf16 %v785_v63, %v784_v62  ;;  %v1172_v1 = vld [vmem:[#allocation2 + $0xd8] sm:$0xff]  ;;  %v1173_v2 = vld [vmem:[#allocation2 + $0xe0] sm:$0xff]  ;;  %v1289_v3 = vld [vmem:[#allocation2 + $0x49] sm:$0xff] }
  0x2e   : > { %503 = vst.msk [vmem:[#allocation3 + $0xa8] sm:$0xff] %vm415_vm3, %v7290_v61  ;;  %v1290_v4 = vld [vmem:[#allocation2 + $0x51] sm:$0xff]  ;;  %v7301_v5 = vpack.c.bf16 %v1173_v2, %v1172_v1  ;;  %437 = vst.msk [vmem:[#allocation2 + $0x111] sm:$0xff] %vm415_vm3, %v403_v14  ;;  %v905_v24 = vld [vmem:[#allocation2 + $0x61] sm:$0xff] }
  0x2f   : > { %963 = vrot.lane.b32.xlu0 %v545_v32, %s7100_s19  ;;  %502 = vst.msk [vmem:[#allocation3 + $0x90] sm:$0xff] %vm415_vm3, %v7282_v57  ;;  %504 = vst.msk [vmem:[#allocation3 + $0xc0] sm:$0xff] %vm415_vm3, %v7295_v0  ;;  %v1418_v9 = vld [vmem:[#allocation2 + $0x4a] sm:$0xff]  ;;  %v1320_v12 = vpack.c.bf16 %v1290_v4, %v1289_v3  ;;  %v1419_v15 = vld [vmem:[#allocation2 + $0x52] sm:$0xff] }
  0x30   : > { %505 = vst.msk [vmem:[#allocation3 + $0xd8] sm:$0xff] %vm415_vm3, %v7301_v5  ;;  %v1449_v16 = vpack.c.bf16 %v1419_v15, %v1418_v9  ;;  %v788_v17 = vld [vmem:[#allocation2 + $0xf0] sm:$0xff]  ;;  %v789_v18 = vld [vmem:[#allocation2 + $0xf8] sm:$0xff]  ;;  %v1034_v28 = vld [vmem:[#allocation2 + $0x62] sm:$0xff] }
  0x31   : > { %965 = vrot.lane.b32.xlu1 %v7275_v49, %s7100_s19  ;;  %v7334_v20 = vpack.c.bf16 %v789_v18, %v788_v17  ;;  %v906_v25 = vld [vmem:[#allocation2 + $0x69] sm:$0xff]  ;;  %v405_v27 = vld [vmem:[%s7222_s15 + $0xb8] sm:$0xff]  ;;  %v406_v37 = vld [vmem:[%s7222_s15 + $0xc0] sm:$0xff] }
  0x32   : > { %v1176_v21 = vld [vmem:[#allocation2 + $0x108] sm:$0xff]  ;;  %v404_v26 = vld [vmem:[%s7222_s15 + $0xb0] sm:$0xff]  ;;  %439 = vst.msk [vmem:[#allocation2 + $0x129] sm:$0xff] %vm415_vm3, %v405_v27  ;;  %v934_v30 = vpack.c.bf16 %v906_v25, %v905_v24  ;;  %v1293_v35 = vld [vmem:[#allocation2 + $0x79] sm:$0xff] }
  0x33   : > { %1092 = vrot.lane.b32.xlu0 %v674_v36, %s7101_s20  ;;  %506 = vst.msk [vmem:[#allocation3 + $0xf0] sm:$0xff] %vm415_vm3, %v7334_v20  ;;  %v1035_v29 = vld [vmem:[#allocation2 + $0x6a] sm:$0xff]  ;;  %438 = vst.msk [vmem:[#allocation2 + $0x121] sm:$0xff] %vm415_vm3, %v404_v26  ;;  %v1294_v36 = vld [vmem:[#allocation2 + $0x81] sm:$0xff] }
  0x34   : > { %v1063_v31 = vpack.c.bf16 %v1035_v29, %v1034_v28  ;;  %v407_v38 = vld [vmem:[%s7222_s15 + $0xc8] sm:$0xff]  ;;  %440 = vst.msk [vmem:[#allocation2 + $0x139] sm:$0xff] %vm415_vm3, %v406_v37  ;;  %v1322_v39 = vpack.c.bf16 %v1294_v36, %v1293_v35  ;;  %v909_v46 = vld [vmem:[#allocation2 + $0x91] sm:$0xff]  ;;  %v910_v47 = vld [vmem:[#allocation2 + $0x99] sm:$0xff] }
  0x35   : > { %1094 = vrot.lane.b32.xlu1 %v7288_v58, %s7101_s20  ;;  %v1177_v22 = vld [vmem:[#allocation2 + $0x110] sm:$0xff]  ;;  %441 = vst.msk [vmem:[#allocation2 + $0x141] sm:$0xff] %vm415_vm3, %v407_v38  ;;  %v1423_v41 = vld [vmem:[#allocation2 + $0x82] sm:$0xff]  ;;  %v1039_v50 = vld [vmem:[#allocation2 + $0x9a] sm:$0xff] }
  0x36   : > { %v7338_v23 = vpack.c.bf16 %v1177_v22, %v1176_v21  ;;  %v1297_v52 = vld [vmem:[#allocation2 + $0xa9] sm:$0xff]  ;;  %v1298_v53 = vld [vmem:[#allocation2 + $0xb1] sm:$0xff]  ;;  %v1301_v3 = vld [vmem:[#allocation2 + $0xd9] sm:$0xff] }
  0x37   : > { %1222 = vrot.lane.b32.xlu0 %v803_v40, %s7102_s23  ;;  %v1422_v40 = vld [vmem:[#allocation2 + $0x7a] sm:$0xff]  ;;  %v1426_v55 = vld [vmem:[#allocation2 + $0xaa] sm:$0xff]  ;;  %v1427_v56 = vld [vmem:[#allocation2 + $0xb2] sm:$0xff] }
  0x38   : > { %507 = vst.msk [vmem:[#allocation3 + $0x108] sm:$0xff] %vm415_vm3, %v7338_v23  ;;  %v1451_v42 = vpack.c.bf16 %v1423_v41, %v1422_v40  ;;  %v914_v59 = vld [vmem:[#allocation2 + $0xc9] sm:$0xff]  ;;  %v1302_v4 = vld [vmem:[#allocation2 + $0xe1] sm:$0xff]  ;;  %v409_v7 = vld [vmem:[%s7222_s15 + $0xd8] sm:$0xff] }
  0x39   : > { %1224 = vrot.lane.b32.xlu1 %v7266_v45, %s7102_s23  ;;  %v1042_v62 = vld [vmem:[#allocation2 + $0xc2] sm:$0xff]  ;;  %v1043_v63 = vld [vmem:[#allocation2 + $0xca] sm:$0xff]  ;;  %443 = vst.msk [vmem:[#allocation2 + $0x159] sm:$0xff] %vm415_vm3, %v409_v7  ;;  %v1326_v8 = vpack.c.bf16 %v1302_v4, %v1301_v3  ;;  %v1430_v10 = vld [vmem:[#allocation2 + $0xda] sm:$0xff] }
  0x3a   : > { %v792_v32 = vld [vmem:[#allocation2 + $0x120] sm:$0xff]  ;;  %v793_v33 = vld [vmem:[#allocation2 + $0x128] sm:$0xff]  ;;  %v1067_v1 = vpack.c.bf16 %v1043_v63, %v1042_v62  ;;  %v408_v6 = vld [vmem:[%s7222_s15 + $0xd0] sm:$0xff] }
  0x3b   : > { %1351 = vrot.lane.b32.xlu0 %v7275_v49, %s7103_s28  ;;  %v7361_v34 = vpack.c.bf16 %v793_v33, %v792_v32  ;;  %v1180_v43 = vld [vmem:[#allocation2 + $0x138] sm:$0xff]  ;;  %442 = vst.msk [vmem:[#allocation2 + $0x151] sm:$0xff] %vm415_vm3, %v408_v6  ;;  %v1431_v11 = vld [vmem:[#allocation2 + $0xe2] sm:$0xff]  ;;  %v1051_v6 = vld [vmem:[#allocation2 + $0x12a] sm:$0xff] }
  0x3c   : > { %v1181_v44 = vld [vmem:[#allocation2 + $0x140] sm:$0xff]  ;;  %v1455_v13 = vpack.c.bf16 %v1431_v11, %v1430_v10  ;;  %v411_v22 = vld [vmem:[%s7222_s15 + $0xe8] sm:$0xff]  ;;  %v917_v27 = vld [vmem:[#allocation2 + $0xf1] sm:$0xff] }
  0x3d   : > { %1353 = vrot.lane.b32.xlu1 %v1320_v12, %s7103_s28  ;;  %508 = vst.msk [vmem:[#allocation3 + $0x120] sm:$0xff] %vm415_vm3, %v7361_v34  ;;  %v410_v19 = vld [vmem:[%s7222_s15 + $0xe0] sm:$0xff]  ;;  %445 = vst.msk [vmem:[#allocation2 + $0x171] sm:$0xff] %vm415_vm3, %v411_v22  ;;  %v1046_v36 = vld [vmem:[#allocation2 + $0xf2] sm:$0xff] }
  0x3e   : > { %444 = vst.msk [vmem:[#allocation2 + $0x169] sm:$0xff] %vm415_vm3, %v410_v19  ;;  %v918_v28 = vld [vmem:[#allocation2 + $0xf9] sm:$0xff]  ;;  %v1305_v41 = vld [vmem:[#allocation2 + $0x109] sm:$0xff]  ;;  %v921_v63 = vld [vmem:[#allocation2 + $0x121] sm:$0xff] }
  0x3f   : > { %1480 = vrot.lane.b32.xlu0 %v7288_v58, %s7104_s29  ;;  %v940_v33 = vpack.c.bf16 %v918_v28, %v917_v27  ;;  %v1047_v37 = vld [vmem:[#allocation2 + $0xfa] sm:$0xff]  ;;  %v1050_v4 = vld [vmem:[#allocation2 + $0x122] sm:$0xff] }
  0x40   : > { %v1309_v11 = vld [vmem:[#allocation2 + $0x139] sm:$0xff] }
  0x41   : > { %1482 = vrot.lane.b32.xlu1 %v1449_v16, %s7104_s29 }
  0x42   : > { %v796_v14 = vld [vmem:[#allocation2 + $0x150] sm:$0xff]  ;;  %v797_v15 = vld [vmem:[#allocation2 + $0x158] sm:$0xff] }
  0x43   : > { %580 = vrot.lane.b32.xlu0 %v7275_v49, %s7097_s16  ;;  %v1038_v49 = vld [vmem:[#allocation2 + $0x92] sm:$0xff]  ;;  %v7429_v17 = vpack.c.bf16 %v797_v15, %v796_v14 }
  0x44   : > { %v1065_v51 = vpack.c.bf16 %v1039_v50, %v1038_v49 }
  0x45   : > { %582 = vrot.lane.b32.xlu1 %v1320_v12, %s7097_s16  ;;  %510 = vst.msk [vmem:[#allocation3 + $0x150] sm:$0xff] %vm415_vm3, %v7429_v17  ;;  %v1184_v29 = vld [vmem:[#allocation2 + $0x168] sm:$0xff] }
  0x47   : > { %709 = vrot.lane.b32.xlu0 %v7288_v58, %s7098_s17  ;;  %v1453_v58 = vpack.c.bf16 %v1427_v56, %v1426_v55 }
  0x49   : > { %711 = vrot.lane.b32.xlu1 %v1449_v16, %s7098_s17 }
  0x4b   : > { %838 = vrot.lane.b32.xlu0 %v7266_v45, %s7099_s18  ;;  %v7378_v45 = vpack.c.bf16 %v1181_v44, %v1180_v43  ;;  %v1306_v43 = vld [vmem:[#allocation2 + $0x111] sm:$0xff] }
  0x4c   : > { %v412_v44 = vld [vmem:[%s7222_s15 + $0xf0] sm:$0xff] }
  0x4d   : > { %840 = vrot.lane.b32.xlu1 %v7270_v48, %s7099_s18  ;;  %509 = vst.msk [vmem:[#allocation3 + $0x138] sm:$0xff] %vm415_vm3, %v7378_v45  ;;  %446 = vst.msk [vmem:[#allocation2 + $0x181] sm:$0xff] %vm415_vm3, %v412_v44 }
  0x4f   : > { %967 = vrot.lane.b32.xlu0 %v1320_v12, %s7100_s19 }
  0x51   : > { %969 = vrot.lane.b32.xlu1 %v934_v30, %s7100_s19 }
  0x53   : > { %1096 = vrot.lane.b32.xlu0 %v1449_v16, %s7101_s20 }
  0x55   : > { %1098 = vrot.lane.b32.xlu1 %v1063_v31, %s7101_s20 }
  0x57   : > { %1226 = vrot.lane.b32.xlu0 %v7270_v48, %s7102_s23  ;;  %v936_v48 = vpack.c.bf16 %v910_v47, %v909_v46  ;;  %v413_v46 = vld [vmem:[%s7222_s15 + $0xf8] sm:$0xff] }
  0x58   : > { %447 = vst.msk [vmem:[#allocation2 + $0x189] sm:$0xff] %vm415_vm3, %v413_v46 }
  0x59   : > { %1228 = vrot.lane.b32.xlu1 %v7277_v54, %s7102_s23 }
  0x5b   : > { %1355 = vrot.lane.b32.xlu0 %v934_v30, %s7103_s28 }
  0x5d   : > { %1357 = vrot.lane.b32.xlu1 %v1322_v39, %s7103_s28 }
  0x5f   : > { %1484 = vrot.lane.b32.xlu0 %v1063_v31, %s7104_s29 }
  0x61   : > { %1486 = vrot.lane.b32.xlu1 %v1451_v42, %s7104_s29 }
  0x63   : > { %584 = vrot.lane.b32.xlu0 %v934_v30, %s7097_s16 }
  0x65   : > { %586 = vrot.lane.b32.xlu1 %v1322_v39, %s7097_s16 }
  0x67   : > { %713 = vrot.lane.b32.xlu0 %v1063_v31, %s7098_s17  ;;  %v1185_v31 = vld [vmem:[#allocation2 + $0x170] sm:$0xff] }
  0x68   : > { %v7452_v32 = vpack.c.bf16 %v1185_v31, %v1184_v29  ;;  %v926_v31 = vld [vmem:[#allocation2 + $0x159] sm:$0xff] }
  0x69   : > { %715 = vrot.lane.b32.xlu1 %v1451_v42, %s7098_s17 }
  0x6a   : > { %511 = vst.msk [vmem:[#allocation3 + $0x168] sm:$0xff] %vm415_vm3, %v7452_v32 }
  0x6b   : > { %842 = vrot.lane.b32.xlu0 %v7277_v54, %s7099_s18  ;;  %v1324_v54 = vpack.c.bf16 %v1298_v53, %v1297_v52  ;;  %v1435_v52 = vld [vmem:[#allocation2 + $0x112] sm:$0xff] }
  0x6d   : > { %844 = vrot.lane.b32.xlu1 %v7282_v57, %s7099_s18 }
  0x6f   : > { %971 = vrot.lane.b32.xlu0 %v1322_v39, %s7100_s19 }
  0x71   : > { %973 = vrot.lane.b32.xlu1 %v936_v48, %s7100_s19 }
  0x73   : > { %1100 = vrot.lane.b32.xlu0 %v1451_v42, %s7101_s20 }
  0x75   : > { %1102 = vrot.lane.b32.xlu1 %v1065_v51, %s7101_s20 }
  0x77   : > { %1230 = vrot.lane.b32.xlu0 %v7282_v57, %s7102_s23  ;;  %v913_v57 = vld [vmem:[#allocation2 + $0xc1] sm:$0xff] }
  0x78   : > { %v938_v60 = vpack.c.bf16 %v914_v59, %v913_v57 }
  0x79   : > { %1232 = vrot.lane.b32.xlu1 %v7290_v61, %s7102_s23 }
  0x7b   : > { %1359 = vrot.lane.b32.xlu0 %v936_v48, %s7103_s28 }
  0x7d   : > { %1361 = vrot.lane.b32.xlu1 %v1324_v54, %s7103_s28 }
  0x7f   : > { %1488 = vrot.lane.b32.xlu0 %v1065_v51, %s7104_s29 }
  0x81   : > { %1490 = vrot.lane.b32.xlu1 %v1453_v58, %s7104_s29 }
  0x83   : > { %588 = vrot.lane.b32.xlu0 %v936_v48, %s7097_s16  ;;  %v1328_v48 = vpack.c.bf16 %v1306_v43, %v1305_v41  ;;  %v1314_v43 = vld [vmem:[#allocation2 + $0x171] sm:$0xff] }
  0x85   : > { %590 = vrot.lane.b32.xlu1 %v1324_v54, %s7097_s16  ;;  %v577_v2 = vpop.permute.xlu0 %576 }
  0x86   : > { %625 = vst.msk [vmem:[#allocation3] sm:$0xff] %vm624_vm5, %v577_v2 }
  0x87   : > { %717 = vrot.lane.b32.xlu0 %v1065_v51, %s7098_s17  ;;  %v1434_v51 = vld [vmem:[#allocation2 + $0x10a] sm:$0xff] }
  0x89   : > { %719 = vrot.lane.b32.xlu1 %v1453_v58, %s7098_s17 }
  0x8b   : > { %846 = vrot.lane.b32.xlu0 %v7290_v61, %s7099_s18 }
  0x8d   : > { %848 = vrot.lane.b32.xlu1 %v7295_v0, %s7099_s18 }
  0x8f   : > { %975 = vrot.lane.b32.xlu0 %v1324_v54, %s7100_s19 }
  0x91   : > { %977 = vrot.lane.b32.xlu1 %v938_v60, %s7100_s19 }
  0x93   : > { %1104 = vrot.lane.b32.xlu0 %v1453_v58, %s7101_s20 }
  0x95   : > { %1106 = vrot.lane.b32.xlu1 %v1067_v1, %s7101_s20 }
  0x97   : > { %v706_v61 = vpop.permute.xlu1 %705  ;;  %1234 = vrot.lane.b32.xlu0 %v7295_v0, %s7102_s23 }
  0x98   : > { %754 = vst.msk [vmem:[#allocation3] sm:$0xff] %vm753_vm6, %v706_v61 }
  0x99   : > { %1236 = vrot.lane.b32.xlu1 %v7301_v5, %s7102_s23  ;;  %v579_v9 = vpop.permute.xlu0 %578 }
  0x9a   : > { %626 = vst.msk [vmem:[#allocation3 + $0x18] sm:$0xff] %vm624_vm5, %v579_v9 }
  0x9b   : > { %v708_v12 = vpop.permute.xlu1 %707  ;;  %1363 = vrot.lane.b32.xlu0 %v938_v60, %s7103_s28 }
  0x9c   : > { %755 = vst.msk [vmem:[#allocation3 + $0x18] sm:$0xff] %vm753_vm6, %v708_v12  ;;  %v1310_v12 = vld [vmem:[#allocation2 + $0x141] sm:$0xff] }
  0x9d   : > { %1365 = vrot.lane.b32.xlu1 %v1326_v8, %s7103_s28  ;;  %v835_v0 = vpop.permute.xlu0 %834 }
  0x9e   : > { %883 = vst.msk [vmem:[#allocation3] sm:$0xff] %vm882_vm7, %v835_v0  ;;  %v1330_v0 = vpack.c.bf16 %v1310_v12, %v1309_v11 }
  0x9f   : > { %v837_v16 = vpop.permute.xlu1 %836  ;;  %1492 = vrot.lane.b32.xlu0 %v1067_v1, %s7104_s29 }
  0xa0   : > { %884 = vst.msk [vmem:[#allocation3 + $0x18] sm:$0xff] %vm882_vm7, %v837_v16  ;;  %v1438_v16 = vld [vmem:[#allocation2 + $0x13a] sm:$0xff] }
  0xa1   : > { %1494 = vrot.lane.b32.xlu1 %v1455_v13, %s7104_s29  ;;  %v964_v18 = vpop.permute.xlu0 %963 }
  0xa2   : > { %1012 = vst.msk [vmem:[#allocation3] sm:$0xff] %vm1011_vm8, %v964_v18  ;;  %v1439_v18 = vld [vmem:[#allocation2 + $0x142] sm:$0xff] }
  0xa3   : > { %v966_v21 = vpop.permute.xlu1 %965  ;;  %592 = vrot.lane.b32.xlu0 %v938_v60, %s7097_s16 }
  0xa4   : > { %1013 = vst.msk [vmem:[#allocation3 + $0x18] sm:$0xff] %vm1011_vm8, %v966_v21 }
  0xa5   : > { %594 = vrot.lane.b32.xlu1 %v1326_v8, %s7097_s16  ;;  %v1093_v24 = vpop.permute.xlu0 %1092 }
  0xa6   : > { %1141 = vst.msk [vmem:[#allocation3] sm:$0xff] %vm1140_vm9, %v1093_v24 }
  0xa7   : > { %v1095_v25 = vpop.permute.xlu1 %1094  ;;  %721 = vrot.lane.b32.xlu0 %v1067_v1, %s7098_s17  ;;  %v922_v1 = vld [vmem:[#allocation2 + $0x129] sm:$0xff] }
  0xa8   : > { %1142 = vst.msk [vmem:[#allocation3 + $0x18] sm:$0xff] %vm1140_vm9, %v1095_v25  ;;  %v942_v61 = vpack.c.bf16 %v922_v1, %v921_v63  ;;  %v929_v63 = vld [vmem:[#allocation2 + $0x181] sm:$0xff]  ;;  %v930_v1 = vld [vmem:[#allocation2 + $0x189] sm:$0xff] }
  0xa9   : > { %723 = vrot.lane.b32.xlu1 %v1455_v13, %s7098_s17  ;;  %v1223_v26 = vpop.permute.xlu0 %1222 }
  0xaa   : > { %1271 = vst.msk [vmem:[#allocation3] sm:$0xff] %vm1270_vm10, %v1223_v26 }
  0xab   : > { %v1225_v30 = vpop.permute.xlu1 %1224  ;;  %850 = vrot.lane.b32.xlu0 %v7301_v5, %s7099_s18  ;;  %v1069_v5 = vpack.c.bf16 %v1047_v37, %v1046_v36  ;;  %v1054_v37 = vld [vmem:[#allocation2 + $0x152] sm:$0xff] }
  0xac   : > { %1272 = vst.msk [vmem:[#allocation3 + $0x18] sm:$0xff] %vm1270_vm10, %v1225_v30  ;;  %v925_v30 = vld [vmem:[#allocation2 + $0x151] sm:$0xff] }
  0xad   : > { %852 = vrot.lane.b32.xlu1 %v7334_v20, %s7099_s18  ;;  %v1352_v35 = vpop.permute.xlu0 %1351 }
  0xae   : > { %1400 = vst.msk [vmem:[#allocation3] sm:$0xff] %vm1399_vm11, %v1352_v35  ;;  %v944_v35 = vpack.c.bf16 %v926_v31, %v925_v30  ;;  %v2059_v31 = vld [vmem:[#allocation2 + $0x2] sm:$0xff] }
  0xaf   : > { %v1354_v38 = vpop.permute.xlu1 %1353  ;;  %979 = vrot.lane.b32.xlu0 %v1326_v8, %s7100_s19  ;;  %v1071_v8 = vpack.c.bf16 %v1051_v6, %v1050_v4  ;;  %v1058_v4 = vld [vmem:[#allocation2 + $0x182] sm:$0xff]  ;;  %v1059_v6 = vld [vmem:[#allocation2 + $0x18a] sm:$0xff] }
  0xb0   : > { %1401 = vst.msk [vmem:[#allocation3 + $0x18] sm:$0xff] %vm1399_vm11, %v1354_v38  ;;  %v1055_v38 = vld [vmem:[#allocation2 + $0x15a] sm:$0xff] }
  0xb1   : > { %981 = vrot.lane.b32.xlu1 %v940_v33, %s7100_s19  ;;  %v1481_v39 = vpop.permute.xlu0 %1480 }
  0xb2   : > { %1529 = vst.msk [vmem:[#allocation3] sm:$0xff] %vm1528_vm12, %v1481_v39  ;;  %v1073_v39 = vpack.c.bf16 %v1055_v38, %v1054_v37 }
  0xb3   : > { %v1483_v40 = vpop.permute.xlu1 %1482  ;;  %1108 = vrot.lane.b32.xlu0 %v1455_v13, %s7101_s20 }
  0xb4   : > { %1530 = vst.msk [vmem:[#allocation3 + $0x18] sm:$0xff] %vm1528_vm12, %v1483_v40 }
  0xb5   : > { %1110 = vrot.lane.b32.xlu1 %v1069_v5, %s7101_s20  ;;  %v581_v42 = vpop.permute.xlu0 %580 }
  0xb6   : > { %627 = vst.msk [vmem:[#allocation3 + $0x30] sm:$0xff] %vm624_vm5, %v581_v42  ;;  %v1313_v42 = vld [vmem:[#allocation2 + $0x169] sm:$0xff] }
  0xb7   : > { %v583_v47 = vpop.permute.xlu1 %582  ;;  %1238 = vrot.lane.b32.xlu0 %v7334_v20, %s7102_s23  ;;  %v1457_v20 = vpack.c.bf16 %v1435_v52, %v1434_v51  ;;  %v1332_v46 = vpack.c.bf16 %v1314_v43, %v1313_v42 }
  0xb8   : > { %628 = vst.msk [vmem:[#allocation3 + $0x48] sm:$0xff] %vm624_vm5, %v583_v47 }
  0xb9   : > { %1240 = vrot.lane.b32.xlu1 %v7338_v23, %s7102_s23  ;;  %v710_v49 = vpop.permute.xlu0 %709  ;;  %v1545_v50 = vld [vmem:[#allocation3] sm:$0xff] }
  0xba   : > { %756 = vst.msk [vmem:[#allocation3 + $0x30] sm:$0xff] %vm753_vm6, %v710_v49  ;;  %6905 = vmatprep.mubr.msk.bf16.mxu0 %vm1588_vm13, %v1545_v50  ;;  %v1442_v49 = vld [vmem:[#allocation2 + $0x16a] sm:$0xff]  ;;  %v1443_v50 = vld [vmem:[#allocation2 + $0x172] sm:$0xff] }
  0xbb   : > { %v712_v53 = vpop.permute.xlu1 %711  ;;  %v1546_v54 = vld [vmem:[#allocation3 + $0x18] sm:$0xff]  ;;  %1367 = vrot.lane.b32.xlu0 %v940_v33, %s7103_s28 }
  0xbc   : > { %757 = vst.msk [vmem:[#allocation3 + $0x48] sm:$0xff] %vm753_vm6, %v712_v53  ;;  %6906 = vmatmul.mubr.msk.bf16.vlgmr.msra.gmra.mrb[0].mxu0 %vm1588_vm13, %v1546_v54 }
  0xbd   : > { %1369 = vrot.lane.b32.xlu1 %v1328_v48, %s7103_s28  ;;  %v839_v55 = vpop.permute.xlu0 %838 }
  0xbe   : > { %885 = vst.msk [vmem:[#allocation3 + $0x30] sm:$0xff] %vm882_vm7, %v839_v55 }
  0xbf   : > { %v841_v56 = vpop.permute.xlu1 %840  ;;  %1496 = vrot.lane.b32.xlu0 %v1069_v5, %s7104_s29 }
  0xc0   : > { %886 = vst.msk [vmem:[#allocation3 + $0x48] sm:$0xff] %vm882_vm7, %v841_v56 }
  0xc1   : > { %1498 = vrot.lane.b32.xlu1 %v1457_v20, %s7104_s29  ;;  %v968_v58 = vpop.permute.xlu0 %967 }
  0xc2   : > { %1014 = vst.msk [vmem:[#allocation3 + $0x30] sm:$0xff] %vm1011_vm8, %v968_v58  ;;  %v800_v58 = vld [vmem:[#allocation2 + $0x180] sm:$0xff] }
  0xc3   : > { %v970_v57 = vpop.permute.xlu1 %969  ;;  %596 = vrot.lane.b32.xlu0 %v940_v33, %s7097_s16 }
  0xc4   : > { %1015 = vst.msk [vmem:[#allocation3 + $0x48] sm:$0xff] %vm1011_vm8, %v970_v57  ;;  %v801_v57 = vld [vmem:[#allocation2 + $0x188] sm:$0xff] }
  0xc5   : > { %598 = vrot.lane.b32.xlu1 %v1328_v48, %s7097_s16  ;;  %v1097_v59 = vpop.permute.xlu0 %1096 }
  0xc6   : > { %1143 = vst.msk [vmem:[#allocation3 + $0x30] sm:$0xff] %vm1140_vm9, %v1097_v59 }
  0xc7   : > { %v1099_v60 = vpop.permute.xlu1 %1098  ;;  %725 = vrot.lane.b32.xlu0 %v1069_v5, %s7098_s17 }
  0xc8   : > { %1144 = vst.msk [vmem:[#allocation3 + $0x48] sm:$0xff] %vm1140_vm9, %v1099_v60  ;;  %v817_v60 = vpack.c.bf16 %v801_v57, %v800_v58 }
  0xc9   : > { %727 = vrot.lane.b32.xlu1 %v1457_v20, %s7098_s17  ;;  %v1227_v62 = vpop.permute.xlu0 %1226 }
  0xca   : > { %1273 = vst.msk [vmem:[#allocation3 + $0x30] sm:$0xff] %vm1270_vm10, %v1227_v62 }
  0xcb   : > { %v1229_v2 = vpop.permute.xlu1 %1228  ;;  %854 = vrot.lane.b32.xlu0 %v7338_v23, %s7099_s18 }
  0xcc   : > { %1274 = vst.msk [vmem:[#allocation3 + $0x48] sm:$0xff] %vm1270_vm10, %v1229_v2 }
  0xcd   : > { %856 = vrot.lane.b32.xlu1 %v7361_v34, %s7099_s18  ;;  %v1356_v3 = vpop.permute.xlu0 %1355 }
  0xce   : > { %1402 = vst.msk [vmem:[#allocation3 + $0x30] sm:$0xff] %vm1399_vm11, %v1356_v3 }
  0xcf   : > { %v1358_v7 = vpop.permute.xlu1 %1357  ;;  %983 = vrot.lane.b32.xlu0 %v1328_v48, %s7100_s19 }
  0xd0   : > { %1403 = vst.msk [vmem:[#allocation3 + $0x48] sm:$0xff] %vm1399_vm11, %v1358_v7 }
  0xd1   : > { %985 = vrot.lane.b32.xlu1 %v942_v61, %s7100_s19  ;;  %v1485_v9 = vpop.permute.xlu0 %1484 }
  0xd2   : > { %1531 = vst.msk [vmem:[#allocation3 + $0x30] sm:$0xff] %vm1528_vm12, %v1485_v9 }
  0xd3   : > { %v1487_v23 = vpop.permute.xlu1 %1486  ;;  %1112 = vrot.lane.b32.xlu0 %v1457_v20, %s7101_s20 }
  0xd4   : > { %1532 = vst.msk [vmem:[#allocation3 + $0x48] sm:$0xff] %vm1528_vm12, %v1487_v23  ;;  %v1188_v23 = vld [vmem:[#allocation2 + $0x198] sm:$0xff] }
  0xd5   : > { %1114 = vrot.lane.b32.xlu1 %v1071_v8, %s7101_s20  ;;  %v585_v10 = vpop.permute.xlu0 %584 }
  0xd6   : > { %629 = vst.msk [vmem:[#allocation3 + $0x60] sm:$0xff] %vm624_vm5, %v585_v10  ;;  %v1189_v10 = vld [vmem:[#allocation2 + $0x1a0] sm:$0xff] }
  0xd7   : > { %v587_v13 = vpop.permute.xlu1 %586  ;;  %1242 = vrot.lane.b32.xlu0 %v7361_v34, %s7102_s23  ;;  %v1459_v34 = vpack.c.bf16 %v1439_v18, %v1438_v16  ;;  %v1205_v11 = vpack.c.bf16 %v1189_v10, %v1188_v23 }
  0xd8   : > { %630 = vst.msk [vmem:[#allocation3 + $0x78] sm:$0xff] %vm624_vm5, %v587_v13  ;;  %v1317_v13 = vld [vmem:[#allocation2 + $0x199] sm:$0xff] }
  0xd9   : > { %1244 = vrot.lane.b32.xlu1 %v7378_v45, %s7102_s23  ;;  %v714_v14 = vpop.permute.xlu0 %713  ;;  %v1547_v15 = vld [vmem:[#allocation3 + $0x30] sm:$0xff] }
  0xda   : > { %758 = vst.msk [vmem:[#allocation3 + $0x60] sm:$0xff] %vm753_vm6, %v714_v14  ;;  %6909 = vmatprep.mubr.msk.bf16.mxu0 %vm1588_vm13, %v1547_v15 }
  0xdb   : > { %v716_v19 = vpop.permute.xlu1 %715  ;;  %v1548_v21 = vld [vmem:[#allocation3 + $0x48] sm:$0xff]  ;;  %1371 = vrot.lane.b32.xlu0 %v942_v61, %s7103_s28 }
  0xdc   : > { %759 = vst.msk [vmem:[#allocation3 + $0x78] sm:$0xff] %vm753_vm6, %v716_v19  ;;  %6910 = vmatmul.mubr.msk.bf16.gmra.mrb[4].mxu0 %vm1588_vm13, %v1548_v21  ;;  %v1446_v19 = vld [vmem:[#allocation2 + $0x19a] sm:$0xff]  ;;  %v1447_v21 = vld [vmem:[#allocation2 + $0x1a2] sm:$0xff] }
  0xdd   : > { %1373 = vrot.lane.b32.xlu1 %v1330_v0, %s7103_s28  ;;  %v843_v22 = vpop.permute.xlu0 %842 }
  0xde   : > { %887 = vst.msk [vmem:[#allocation3 + $0x60] sm:$0xff] %vm882_vm7, %v843_v22 }
  0xdf   : > { %v845_v24 = vpop.permute.xlu1 %844  ;;  %1500 = vrot.lane.b32.xlu0 %v1071_v8, %s7104_s29 }
  0xe0   : > { %888 = vst.msk [vmem:[#allocation3 + $0x78] sm:$0xff] %vm882_vm7, %v845_v24  ;;  %v1463_v24 = vpack.c.bf16 %v1447_v21, %v1446_v19 }
  0xe1   : > { %1502 = vrot.lane.b32.xlu1 %v1459_v34, %s7104_s29  ;;  %v972_v25 = vpop.permute.xlu0 %971 }
  0xe2   : > { %1016 = vst.msk [vmem:[#allocation3 + $0x60] sm:$0xff] %vm1011_vm8, %v972_v25 }
  0xe3   : > { %v974_v26 = vpop.permute.xlu1 %973  ;;  %600 = vrot.lane.b32.xlu0 %v942_v61, %s7097_s16  ;;  %v946_v61 = vpack.c.bf16 %v930_v1, %v929_v63 }
  0xe4   : > { %1017 = vst.msk [vmem:[#allocation3 + $0x78] sm:$0xff] %vm1011_vm8, %v974_v26  ;;  %v1930_v26 = vld [vmem:[#allocation2 + $0x1] sm:$0xff] }
  0xe5   : > { %602 = vrot.lane.b32.xlu1 %v1330_v0, %s7097_s16  ;;  %v1101_v27 = vpop.permute.xlu0 %1100 }
  0xe6   : > { %1145 = vst.msk [vmem:[#allocation3 + $0x60] sm:$0xff] %vm1140_vm9, %v1101_v27  ;;  %v1931_v27 = vld [vmem:[#allocation2 + $0x9] sm:$0xff] }
  0xe7   : > { %v1103_v28 = vpop.permute.xlu1 %1102  ;;  %729 = vrot.lane.b32.xlu0 %v1071_v8, %s7098_s17  ;;  %v1075_v8 = vpack.c.bf16 %v1059_v6, %v1058_v4 }
  0xe8   : > { %1146 = vst.msk [vmem:[#allocation3 + $0x78] sm:$0xff] %vm1140_vm9, %v1103_v28 }
  0xe9   : > { %731 = vrot.lane.b32.xlu1 %v1459_v34, %s7098_s17  ;;  %v1231_v29 = vpop.permute.xlu0 %1230 }
  0xea   : > { %1275 = vst.msk [vmem:[#allocation3 + $0x60] sm:$0xff] %vm1270_vm10, %v1231_v29  ;;  %v1962_v29 = vpack.c.bf16 %v1931_v27, %v1930_v26 }
  0xeb   : > { %v1233_v33 = vpop.permute.xlu1 %1232  ;;  %858 = vrot.lane.b32.xlu0 %v7378_v45, %s7099_s18 }
  0xec   : > { %1276 = vst.msk [vmem:[#allocation3 + $0x78] sm:$0xff] %vm1270_vm10, %v1233_v33  ;;  %v2060_v33 = vld [vmem:[#allocation2 + $0xa] sm:$0xff] }
  0xed   : > { %860 = vrot.lane.b32.xlu1 %v7429_v17, %s7099_s18  ;;  %v1360_v36 = vpop.permute.xlu0 %1359 }
  0xee   : > { %1404 = vst.msk [vmem:[#allocation3 + $0x60] sm:$0xff] %vm1399_vm11, %v1360_v36  ;;  %v2091_v36 = vpack.c.bf16 %v2060_v33, %v2059_v31  ;;  %v1867_v31 = vld [vmem:[#allocation2 + $0x8] sm:$0xff] }
  0xef   : > { %v1362_v5 = vpop.permute.xlu1 %1361  ;;  %987 = vrot.lane.b32.xlu0 %v1330_v0, %s7100_s19  ;;  %v1318_v0 = vld [vmem:[#allocation2 + $0x1a1] sm:$0xff] }
  0xf0   : > { %1405 = vst.msk [vmem:[#allocation3 + $0x78] sm:$0xff] %vm1399_vm11, %v1362_v5  ;;  %v1334_v15 = vpack.c.bf16 %v1318_v0, %v1317_v13 }
  0xf1   : > { %989 = vrot.lane.b32.xlu1 %v944_v35, %s7100_s19  ;;  %v1489_v40 = vpop.permute.xlu0 %1488 }
  0xf2   : > { %1533 = vst.msk [vmem:[#allocation3 + $0x60] sm:$0xff] %vm1528_vm12, %v1489_v40 }
  0xf3   : > { %v1491_v45 = vpop.permute.xlu1 %1490  ;;  %1116 = vrot.lane.b32.xlu0 %v1459_v34, %s7101_s20 }
  0xf4   : > { %1534 = vst.msk [vmem:[#allocation3 + $0x78] sm:$0xff] %vm1528_vm12, %v1491_v45 }
  0xf5   : > { %1118 = vrot.lane.b32.xlu1 %v1073_v39, %s7101_s20  ;;  %v589_v41 = vpop.permute.xlu0 %588 }
  0xf6   : > { %631 = vst.msk [vmem:[#allocation3 + $0x90] sm:$0xff] %vm624_vm5, %v589_v41 }
  0xf7   : > { %v591_v44 = vpop.permute.xlu1 %590  ;;  %1246 = vrot.lane.b32.xlu0 %v7429_v17, %s7102_s23  ;;  %v1461_v17 = vpack.c.bf16 %v1443_v50, %v1442_v49 }
  0xf8   : > { %632 = vst.msk [vmem:[#allocation3 + $0xa8] sm:$0xff] %vm624_vm5, %v591_v44 }
  0xf9   : > { %1248 = vrot.lane.b32.xlu1 %v7452_v32, %s7102_s23  ;;  %v718_v47 = vpop.permute.xlu0 %717  ;;  %v1549_v48 = vld [vmem:[#allocation3 + $0x60] sm:$0xff] }
  0xfa   : > { %760 = vst.msk [vmem:[#allocation3 + $0x90] sm:$0xff] %vm753_vm6, %v718_v47  ;;  %6913 = vmatprep.mubr.msk.bf16.mxu0 %vm1588_vm13, %v1549_v48  ;;  %v7042_v47 = vld [vmem:[%s9629_s3 + $0x88] sm:$0xff]  }
  0xfb   : > { %v720_v51 = vpop.permute.xlu1 %719  ;;  %v1550_v52 = vld [vmem:[#allocation3 + $0x78] sm:$0xff]  ;;  %1375 = vrot.lane.b32.xlu0 %v944_v35, %s7103_s28 }
  0xfc   : > { %761 = vst.msk [vmem:[#allocation3 + $0xa8] sm:$0xff] %vm753_vm6, %v720_v51  ;;  %6914 = vmatmul.mubr.msk.bf16.gmra.mrb[8].mxu0 %vm1588_vm13, %v1550_v52 }
  0xfd   : > { %1377 = vrot.lane.b32.xlu1 %v1332_v46, %s7103_s28  ;;  %v847_v53 = vpop.permute.xlu0 %846 }
  0xfe   : > { %889 = vst.msk [vmem:[#allocation3 + $0x90] sm:$0xff] %vm882_vm7, %v847_v53 }
  0xff   : > { %v849_v54 = vpop.permute.xlu1 %848  ;;  %1504 = vrot.lane.b32.xlu0 %v1073_v39, %s7104_s29 }
 0x100   : > { %890 = vst.msk [vmem:[#allocation3 + $0xa8] sm:$0xff] %vm882_vm7, %v849_v54 }
 0x101   : > { %1506 = vrot.lane.b32.xlu1 %v1461_v17, %s7104_s29  ;;  %v976_v20 = vpop.permute.xlu0 %975 }
 0x102   : > { %1018 = vst.msk [vmem:[#allocation3 + $0x90] sm:$0xff] %vm1011_vm8, %v976_v20 }
 0x103   : > { %v978_v55 = vpop.permute.xlu1 %977  ;;  %604 = vrot.lane.b32.xlu0 %v944_v35, %s7097_s16 }
 0x104   : > { %1019 = vst.msk [vmem:[#allocation3 + $0xa8] sm:$0xff] %vm1011_vm8, %v978_v55 }
 0x105   : > { %606 = vrot.lane.b32.xlu1 %v1332_v46, %s7097_s16  ;;  %v1105_v56 = vpop.permute.xlu0 %1104  ;;  %s7107_s16 = smov 3  }
 0x106   : > { %1147 = vst.msk [vmem:[#allocation3 + $0x90] sm:$0xff] %vm1140_vm9, %v1105_v56 }
 0x107   : > { %v1107_v59 = vpop.permute.xlu1 %1106  ;;  %733 = vrot.lane.b32.xlu0 %v1073_v39, %s7098_s17 }
 0x108   : > { %1148 = vst.msk [vmem:[#allocation3 + $0xa8] sm:$0xff] %vm1140_vm9, %v1107_v59 }
 0x109   : > { %735 = vrot.lane.b32.xlu1 %v1461_v17, %s7098_s17  ;;  %v1235_v62 = vpop.permute.xlu0 %1234  ;;  %s7108_s17 = smov 125  }
 0x10a   : > { %1277 = vst.msk [vmem:[#allocation3 + $0x90] sm:$0xff] %vm1270_vm10, %v1235_v62 }
 0x10b   : > { %v1237_v2 = vpop.permute.xlu1 %1236  ;;  %862 = vrot.lane.b32.xlu0 %v7452_v32, %s7099_s18 }
 0x10c   : > { %1278 = vst.msk [vmem:[#allocation3 + $0xa8] sm:$0xff] %vm1270_vm10, %v1237_v2 }
 0x10d   : > { %864 = vrot.lane.b32.xlu1 %v817_v60, %s7099_s18  ;;  %v1364_v3 = vpop.permute.xlu0 %1363 }
 0x10e   : > { %1406 = vst.msk [vmem:[#allocation3 + $0x90] sm:$0xff] %vm1399_vm11, %v1364_v3 }
 0x10f   : > { %v1366_v7 = vpop.permute.xlu1 %1365  ;;  %991 = vrot.lane.b32.xlu0 %v1332_v46, %s7100_s19  ;;  %v7041_v46 = vld [vmem:[%s9629_s3 + $0x80] sm:$0xff]  }
 0x110   : > { %1407 = vst.msk [vmem:[#allocation3 + $0xa8] sm:$0xff] %vm1399_vm11, %v1366_v7  ;;  %6937 = vmatprep.subr.bf16.mxu0 %v7041_v46 }
 0x111   : > { %993 = vrot.lane.b32.xlu1 %v946_v61, %s7100_s19  ;;  %v1493_v9 = vpop.permute.xlu0 %1492  ;;  %6938 = vmatpush3.bf16.msra.mxu0 %v7041_v46 }
 0x112   : > { %1535 = vst.msk [vmem:[#allocation3 + $0x90] sm:$0xff] %vm1528_vm12, %v1493_v9  ;;  %6939 = vmatprep.subr.bf16.mxu0 %v7042_v47 }
 0x113   : > { %v1495_v32 = vpop.permute.xlu1 %1494  ;;  %1120 = vrot.lane.b32.xlu0 %v1461_v17, %s7101_s20 }
 0x114   : > { %1536 = vst.msk [vmem:[#allocation3 + $0xa8] sm:$0xff] %vm1528_vm12, %v1495_v32 }
 0x115   : > { %1122 = vrot.lane.b32.xlu1 %v1075_v8, %s7101_s20  ;;  %v593_v12 = vpop.permute.xlu0 %592  ;;  %6940 = vmatpush3.bf16.msra.mxu0 %v7042_v47  ;;  %v7047_v47 = vld [vmem:[%s9629_s3 + $0x50] sm:$0xff]   ;;  %s9553_s20 = scalar_lea.vmem %s9635_s9, %s6618_s8 }
 0x116   : > { %633 = vst.msk [vmem:[#allocation3 + $0xc0] sm:$0xff] %vm624_vm5, %v593_v12 }
 0x117   : > { %v595_v14 = vpop.permute.xlu1 %594  ;;  %1250 = vrot.lane.b32.xlu0 %v817_v60, %s7102_s23 }
 0x118   : > { %634 = vst.msk [vmem:[#allocation3 + $0xd8] sm:$0xff] %vm624_vm5, %v595_v14 }
 0x119   : > { %1252 = vrot.lane.b32.xlu1 %v1205_v11, %s7102_s23  ;;  %v722_v16 = vpop.permute.xlu0 %721  ;;  %v1551_v18 = vld [vmem:[#allocation3 + $0x90] sm:$0xff] }
 0x11a   : > { %762 = vst.msk [vmem:[#allocation3 + $0xc0] sm:$0xff] %vm753_vm6, %v722_v16  ;;  %6917 = vmatprep.mubr.msk.bf16.mxu0 %vm1588_vm13, %v1551_v18 }
 0x11b   : > { %v724_v34 = vpop.permute.xlu1 %723  ;;  %v1552_v22 = vld [vmem:[#allocation3 + $0xa8] sm:$0xff]  ;;  %1379 = vrot.lane.b32.xlu0 %v946_v61, %s7103_s28 }
 0x11c   : > { %763 = vst.msk [vmem:[#allocation3 + $0xd8] sm:$0xff] %vm753_vm6, %v724_v34  ;;  %6918 = vmatmul.mubr.msk.bf16.gmra.mrb[12].mxu0 %vm1588_vm13, %v1552_v22 }
 0x11d   : > { %1381 = vrot.lane.b32.xlu1 %v1334_v15, %s7103_s28  ;;  %v851_v25 = vpop.permute.xlu0 %850 }
 0x11e   : > { %891 = vst.msk [vmem:[#allocation3 + $0xc0] sm:$0xff] %vm882_vm7, %v851_v25 }
 0x11f   : > { %v853_v28 = vpop.permute.xlu1 %852  ;;  %1508 = vrot.lane.b32.xlu0 %v1075_v8, %s7104_s29 }
 0x120   : > { %892 = vst.msk [vmem:[#allocation3 + $0xd8] sm:$0xff] %vm882_vm7, %v853_v28 }
 0x121   : > { %1510 = vrot.lane.b32.xlu1 %v1463_v24, %s7104_s29  ;;  %v980_v30 = vpop.permute.xlu0 %979 }
 0x122   : > { %1020 = vst.msk [vmem:[#allocation3 + $0xc0] sm:$0xff] %vm1011_vm8, %v980_v30  ;;  %v1866_v30 = vld [vmem:[#allocation2] sm:$0xff] }
 0x123   : > { %v982_v35 = vpop.permute.xlu1 %981 }
 0x124   : > { %1021 = vst.msk [vmem:[#allocation3 + $0xd8] sm:$0xff] %vm1011_vm8, %v982_v35  ;;  %v1898_v35 = vpack.c.bf16 %v1867_v31, %v1866_v30 }
 0x125   : > { %1994 = vrot.lane.b32.xlu1 %v1962_v29, %s7104_s29  ;;  %v1109_v37 = vpop.permute.xlu0 %1108  ;;  %v7043_v29 = vld [vmem:[%s9629_s3 + $0x40] sm:$0xff]  }
 0x126   : > { %1149 = vst.msk [vmem:[#allocation3 + $0xc0] sm:$0xff] %vm1140_vm9, %v1109_v37  ;;  %v7045_v37 = vld [vmem:[%s9629_s3 + $0x48] sm:$0xff]   ;;  %6639 = vmatprep.subr.bf16.mxu1 %v7043_v29 }
 0x127   : > { %v1111_v38 = vpop.permute.xlu1 %1110  ;;  %1914 = vst.msk [vmem:[#allocation3] sm:$0xff] %vm336_vm0, %v1898_v35 }
 0x128   : > { %1150 = vst.msk [vmem:[#allocation3 + $0xd8] sm:$0xff] %vm1140_vm9, %v1111_v38 }
 0x129   : > { %2123 = vrot.lane.b32.xlu1 %v2091_v36, %s7105_s30  ;;  %v1239_v5 = vpop.permute.xlu0 %1238  ;;  %v7044_v36 = vld [vmem:[%s9629_s3] sm:$0xff]  }
 0x12a   : > { %1279 = vst.msk [vmem:[#allocation3 + $0xc0] sm:$0xff] %vm1270_vm10, %v1239_v5  ;;  %v7678_v5 = vld [vmem:[%s9628_s2] ss:$0 sm:$0xff] }
 0x12b   : > { %v1241_v39 = vpop.permute.xlu1 %1240 }
 0x12c   : > { %1280 = vst.msk [vmem:[#allocation3 + $0xd8] sm:$0xff] %vm1270_vm10, %v1241_v39 }
 0x12d   : > { %v1368_v40 = vpop.permute.xlu0 %1367 }
 0x12e   : > { %1408 = vst.msk [vmem:[#allocation3 + $0xc0] sm:$0xff] %vm1399_vm11, %v1368_v40  ;;  %v7046_v40 = vld [vmem:[%s9629_s3 + $0x8] sm:$0xff]  }
 0x12f   : > { %v1370_v45 = vpop.permute.xlu1 %1369 }
 0x130   : > { %1409 = vst.msk [vmem:[#allocation3 + $0xd8] sm:$0xff] %vm1399_vm11, %v1370_v45 }
 0x131   : > { %v1497_v41 = vpop.permute.xlu0 %1496 }
 0x132   : > { %1537 = vst.msk [vmem:[#allocation3 + $0xc0] sm:$0xff] %vm1528_vm12, %v1497_v41 }
 0x133   : > { %v1499_v42 = vpop.permute.xlu1 %1498 }
 0x134   : > { %1538 = vst.msk [vmem:[#allocation3 + $0xd8] sm:$0xff] %vm1528_vm12, %v1499_v42 }
 0x135   : > { %v597_v43 = vpop.permute.xlu0 %596 }
 0x136   : > { %635 = vst.msk [vmem:[#allocation3 + $0xf0] sm:$0xff] %vm624_vm5, %v597_v43 }
 0x137   : > { %v599_v44 = vpop.permute.xlu1 %598 }
 0x138   : > { %636 = vst.msk [vmem:[#allocation3 + $0x108] sm:$0xff] %vm624_vm5, %v599_v44 }
 0x139   : > { %v1553_v48 = vld [vmem:[#allocation3 + $0xc0] sm:$0xff]  ;;  %v726_v49 = vpop.permute.xlu0 %725 }
 0x13a   : > { %6921 = vmatprep.mubr.msk.bf16.mxu1 %vm1588_vm13, %v1553_v48  ;;  %764 = vst.msk [vmem:[#allocation3 + $0xf0] sm:$0xff] %vm753_vm6, %v726_v49 }
 0x13b   : > { %v1554_v50 = vld [vmem:[#allocation3 + $0xd8] sm:$0xff]  ;;  %v728_v51 = vpop.permute.xlu1 %727 }
 0x13c   : > { %6922 = vmatmul.mubr.msk.bf16.vlgmr.msra.gmra.mrb[0].mxu1 %vm1588_vm13, %v1554_v50  ;;  %765 = vst.msk [vmem:[#allocation3 + $0x108] sm:$0xff] %vm753_vm6, %v728_v51 }
 0x13d   : > { %v855_v52 = vpop.permute.xlu0 %854  ;;  %6640 = vmatpush3.bf16.msra.mxu1 %v7044_v36 }
 0x13e   : > { %893 = vst.msk [vmem:[#allocation3 + $0xf0] sm:$0xff] %vm882_vm7, %v855_v52  ;;  %6641 = vmatprep.subr.bf16.mxu1 %v7045_v37  ;;  %v7048_v52 = vld [vmem:[%s9629_s3 + $0x10] sm:$0xff]  }
 0x13f   : > { %v857_v17 = vpop.permute.xlu1 %856 }
 0x140   : > { %894 = vst.msk [vmem:[#allocation3 + $0x108] sm:$0xff] %vm882_vm7, %v857_v17 }
 0x141   : > { %v984_v53 = vpop.permute.xlu0 %983  ;;  %6642 = vmatpush3.bf16.msra.mxu1 %v7046_v40 }
 0x142   : > { %1022 = vst.msk [vmem:[#allocation3 + $0xf0] sm:$0xff] %vm1011_vm8, %v984_v53  ;;  %6643 = vmatprep.subr.bf16.mxu1 %v7047_v47 }
 0x143   : > { %v986_v54 = vpop.permute.xlu1 %985 }
 0x144   : > { %1023 = vst.msk [vmem:[#allocation3 + $0x108] sm:$0xff] %vm1011_vm8, %v986_v54 }
 0x145   : > { %v1113_v20 = vpop.permute.xlu0 %1112  ;;  %6644 = vmatpush3.bf16.msra.mxu1 %v7048_v52 }
 0x146   : > { %1151 = vst.msk [vmem:[#allocation3 + $0xf0] sm:$0xff] %vm1140_vm9, %v1113_v20 }
 0x147   : > { %v1115_v55 = vpop.permute.xlu1 %1114 }
 0x148   : > { %1152 = vst.msk [vmem:[#allocation3 + $0x108] sm:$0xff] %vm1140_vm9, %v1115_v55 }
 0x149   : > { %v1243_v56 = vpop.permute.xlu0 %1242 }
 0x14a   : > { %1281 = vst.msk [vmem:[#allocation3 + $0xf0] sm:$0xff] %vm1270_vm10, %v1243_v56  ;;  %v7049_v56 = vld [vmem:[%s9629_s3 + $0x58] sm:$0xff]  }
 0x14b   : > { %v1245_v58 = vpop.permute.xlu1 %1244  ;;  %6645 = vmatprep.subr.bf16.mxu1 %v7049_v56 }
 0x14c   : > { %1282 = vst.msk [vmem:[#allocation3 + $0x108] sm:$0xff] %vm1270_vm10, %v1245_v58  ;;  %v7050_v58 = vld [vmem:[%s9629_s3 + $0x18] sm:$0xff]  }
 0x14d   : > { %v1372_v57 = vpop.permute.xlu0 %1371  ;;  %6646 = vmatpush3.bf16.msra.mxu1 %v7050_v58 }
 0x14e   : > { %1410 = vst.msk [vmem:[#allocation3 + $0xf0] sm:$0xff] %vm1399_vm11, %v1372_v57 }
 0x14f   : > { %v1374_v59 = vpop.permute.xlu1 %1373 }
 0x150   : > { %1411 = vst.msk [vmem:[#allocation3 + $0x108] sm:$0xff] %vm1399_vm11, %v1374_v59  ;;  %v7051_v59 = vld [vmem:[%s9629_s3 + $0x60] sm:$0xff]  }
 0x151   : > { %v1501_v60 = vpop.permute.xlu0 %1500  ;;  %6647 = vmatprep.subr.bf16.mxu1 %v7051_v59 }
 0x152   : > { %1539 = vst.msk [vmem:[#allocation3 + $0xf0] sm:$0xff] %vm1528_vm12, %v1501_v60 }
 0x153   : > { %v1503_v62 = vpop.permute.xlu1 %1502 }
 0x154   : > { %1540 = vst.msk [vmem:[#allocation3 + $0x108] sm:$0xff] %vm1528_vm12, %v1503_v62  ;;  %v7052_v62 = vld [vmem:[%s9629_s3 + $0x20] sm:$0xff]  }
 0x155   : > { %v601_v63 = vpop.permute.xlu0 %600  ;;  %6648 = vmatpush3.bf16.msra.mxu1 %v7052_v62 }
 0x156   : > { %637 = vst.msk [vmem:[#allocation3 + $0x120] sm:$0xff] %vm624_vm5, %v601_v63 }
 0x157   : > { %v603_v1 = vpop.permute.xlu1 %602 }
 0x158   : > { %638 = vst.msk [vmem:[#allocation3 + $0x138] sm:$0xff] %vm624_vm5, %v603_v1 }
 0x159   : > { %v1555_v2 = vld [vmem:[#allocation3 + $0xf0] sm:$0xff]  ;;  %v730_v61 = vpop.permute.xlu0 %729 }
 0x15a   : > { %6925 = vmatprep.mubr.msk.bf16.mxu1 %vm1588_vm13, %v1555_v2  ;;  %766 = vst.msk [vmem:[#allocation3 + $0x120] sm:$0xff] %vm753_vm6, %v730_v61 }
 0x15b   : > { %v1556_v3 = vld [vmem:[#allocation3 + $0x108] sm:$0xff]  ;;  %v732_v4 = vpop.permute.xlu1 %731 }
 0x15c   : > { %6926 = vmatmul.mubr.msk.bf16.gmra.mrb[4].mxu1 %vm1588_vm13, %v1556_v3  ;;  %767 = vst.msk [vmem:[#allocation3 + $0x138] sm:$0xff] %vm753_vm6, %v732_v4  ;;  %v7053_v3 = vld [vmem:[%s9629_s3 + $0x68] sm:$0xff]  }
 0x15d   : > { %v859_v6 = vpop.permute.xlu0 %858  ;;  %6649 = vmatprep.subr.bf16.mxu1 %v7053_v3 }
 0x15e   : > { %895 = vst.msk [vmem:[#allocation3 + $0x120] sm:$0xff] %vm882_vm7, %v859_v6 }
 0x15f   : > { %v861_v7 = vpop.permute.xlu1 %860 }
 0x160   : > { %896 = vst.msk [vmem:[#allocation3 + $0x138] sm:$0xff] %vm882_vm7, %v861_v7 }
 0x161   : > { %v988_v8 = vpop.permute.xlu0 %987 }
 0x162   : > { %1024 = vst.msk [vmem:[#allocation3 + $0x120] sm:$0xff] %vm1011_vm8, %v988_v8 }
 0x163   : > { %v990_v9 = vpop.permute.xlu1 %989 }
 0x164   : > { %1025 = vst.msk [vmem:[#allocation3 + $0x138] sm:$0xff] %vm1011_vm8, %v990_v9 }
 0x165   : > { %v1117_v23 = vpop.permute.xlu0 %1116 }
 0x166   : > { %1153 = vst.msk [vmem:[#allocation3 + $0x120] sm:$0xff] %vm1140_vm9, %v1117_v23 }
 0x167   : > { %v1119_v10 = vpop.permute.xlu1 %1118 }
 0x168   : > { %1154 = vst.msk [vmem:[#allocation3 + $0x138] sm:$0xff] %vm1140_vm9, %v1119_v10 }
 0x169   : > { %v1247_v32 = vpop.permute.xlu0 %1246 }
 0x16a   : > { %1283 = vst.msk [vmem:[#allocation3 + $0x120] sm:$0xff] %vm1270_vm10, %v1247_v32 }
 0x16b   : > { %v1249_v11 = vpop.permute.xlu1 %1248 }
 0x16c   : > { %1284 = vst.msk [vmem:[#allocation3 + $0x138] sm:$0xff] %vm1270_vm10, %v1249_v11 }
 0x16d   : > { %v1376_v12 = vpop.permute.xlu0 %1375 }
 0x16e   : > { %1412 = vst.msk [vmem:[#allocation3 + $0x120] sm:$0xff] %vm1399_vm11, %v1376_v12 }
 0x16f   : > { %v1378_v13 = vpop.permute.xlu1 %1377 }
 0x170   : > { %1413 = vst.msk [vmem:[#allocation3 + $0x138] sm:$0xff] %vm1399_vm11, %v1378_v13 }
 0x171   : > { %v1505_v0 = vpop.permute.xlu0 %1504 }
 0x172   : > { %1541 = vst.msk [vmem:[#allocation3 + $0x120] sm:$0xff] %vm1528_vm12, %v1505_v0  ;;  %v7054_v0 = vld [vmem:[%s9629_s3 + $0x28] sm:$0xff]  }
 0x173   : > { %v1507_v14 = vpop.permute.xlu1 %1506  ;;  %6650 = vmatpush3.bf16.msra.mxu1 %v7054_v0 }
 0x174   : > { %1542 = vst.msk [vmem:[#allocation3 + $0x138] sm:$0xff] %vm1528_vm12, %v1507_v14 }
 0x175   : > { %v605_v15 = vpop.permute.xlu0 %604 }
 0x176   : > { %639 = vst.msk [vmem:[#allocation3 + $0x150] sm:$0xff] %vm624_vm5, %v605_v15 }
 0x177   : > { %v607_v16 = vpop.permute.xlu1 %606 }
 0x178   : > { %640 = vst.msk [vmem:[#allocation3 + $0x168] sm:$0xff] %vm624_vm5, %v607_v16  ;;  %v7055_v16 = vld [vmem:[%s9629_s3 + $0x70] sm:$0xff]  }
 0x179   : > { %v734_v18 = vpop.permute.xlu0 %733  ;;  %v1557_v19 = vld [vmem:[#allocation3 + $0x120] sm:$0xff]  ;;  %6651 = vmatprep.subr.bf16.mxu1 %v7055_v16 }
 0x17a   : > { %768 = vst.msk [vmem:[#allocation3 + $0x150] sm:$0xff] %vm753_vm6, %v734_v18  ;;  %6929 = vmatprep.mubr.msk.bf16.mxu1 %vm1588_vm13, %v1557_v19  ;;  %v7056_v18 = vld [vmem:[%s9629_s3 + $0x30] sm:$0xff]   ;;  %v7057_v19 = vld [vmem:[%s9629_s3 + $0x78] sm:$0xff]  }
 0x17b   : > { %v736_v21 = vpop.permute.xlu1 %735  ;;  %v1558_v34 = vld [vmem:[#allocation3 + $0x138] sm:$0xff]  ;;  %6652 = vmatpush3.bf16.msra.mxu1 %v7056_v18 }
 0x17c   : > { %769 = vst.msk [vmem:[#allocation3 + $0x168] sm:$0xff] %vm753_vm6, %v736_v21  ;;  %6930 = vmatmul.mubr.msk.bf16.gmra.mrb[8].mxu1 %vm1588_vm13, %v1558_v34  ;;  %v7058_v21 = vld [vmem:[%s9629_s3 + $0x38] sm:$0xff]   ;;  %6653 = vmatprep.subr.bf16.mxu1 %v7057_v19 }
 0x17d   : > { %v863_v22 = vpop.permute.xlu0 %862 }
 0x17e   : > { %897 = vst.msk [vmem:[#allocation3 + $0x150] sm:$0xff] %vm882_vm7, %v863_v22 }
 0x17f   : > { %v865_v24 = vpop.permute.xlu1 %864  ;;  %6654 = vmatpush3.bf16.msra.mxu1 %v7058_v21 }
 0x180   : > { %898 = vst.msk [vmem:[#allocation3 + $0x168] sm:$0xff] %vm882_vm7, %v865_v24 }
 0x181   : > { %v992_v25 = vpop.permute.xlu0 %991 }
 0x182   : > { %1026 = vst.msk [vmem:[#allocation3 + $0x150] sm:$0xff] %vm1011_vm8, %v992_v25 }
 0x183   : > { %v994_v26 = vpop.permute.xlu1 %993 }
 0x184   : > { %1027 = vst.msk [vmem:[#allocation3 + $0x168] sm:$0xff] %vm1011_vm8, %v994_v26 }
 0x185   : > { %v1121_v27 = vpop.permute.xlu0 %1120 }
 0x186   : > { %1155 = vst.msk [vmem:[#allocation3 + $0x150] sm:$0xff] %vm1140_vm9, %v1121_v27 }
 0x187   : > { %v1123_v28 = vpop.permute.xlu1 %1122 }
 0x188   : > { %1156 = vst.msk [vmem:[#allocation3 + $0x168] sm:$0xff] %vm1140_vm9, %v1123_v28 }
 0x189   : > { %v1251_v33 = vpop.permute.xlu0 %1250 }
 0x18a   : > { %1285 = vst.msk [vmem:[#allocation3 + $0x150] sm:$0xff] %vm1270_vm10, %v1251_v33 }
 0x18b   : > { %v1253_v38 = vpop.permute.xlu1 %1252 }
 0x18c   : > { %1286 = vst.msk [vmem:[#allocation3 + $0x168] sm:$0xff] %vm1270_vm10, %v1253_v38 }
 0x18d   : > { %v1380_v39 = vpop.permute.xlu0 %1379 }
 0x18e   : > { %1414 = vst.msk [vmem:[#allocation3 + $0x150] sm:$0xff] %vm1399_vm11, %v1380_v39 }
 0x18f   : > { %v6907_v45 = vpop.f32.mrb[0].mxu0  ;;  %v1382_v41 = vpop.permute.xlu1 %1381 }
 0x190   : > { %v1684_v42 = vadd.f32 %v6907_v45, %v7678_v5  ;;  %v1675_v43 = vpop.f32.mrb[1].mxu0  ;;  %1415 = vst.msk [vmem:[#allocation3 + $0x168] sm:$0xff] %vm1399_vm11, %v1382_v41 }
 0x191   : > { %v1676_v44 = vadd.f32 %v7678_v5, %v1675_v43  ;;  %v6908_v46 = vpop.f32.mrb[2].mxu0  ;;  %v1509_v51 = vpop.permute.xlu0 %1508 }
 0x192   : > { %v1804_v48 = vmax.f32 %v1684_v42, 0.0  ;;  %v1687_v49 = vadd.f32 %v6908_v46, %v7678_v5  ;;  %v1678_v50 = vpop.f32.mrb[3].mxu0  ;;  %1543 = vst.msk [vmem:[#allocation3 + $0x150] sm:$0xff] %vm1528_vm12, %v1509_v51 }
 0x193   : > { %v1802_v17 = vmax.f32 %v1676_v44, 0.0  ;;  %v1679_v53 = vadd.f32 %v7678_v5, %v1678_v50  ;;  %v1511_v54 = vpop.permute.xlu1 %1510 }
 0x194   : > { %1836 = vst.msk [vmem:[#allocation2 + $0x31] sm:$0xff] %vm336_vm0, %v1804_v48  ;;  %v1805_v20 = vmax.f32 %v1687_v49, 0.0 }
 0x195   : > { %1544 = vst.msk [vmem:[#allocation3 + $0x168] sm:$0xff] %vm1528_vm12, %v1511_v54  ;;  %v1803_v55 = vmax.f32 %v1679_v53, 0.0 }
 0x196   : > { %1834 = vst.msk [vmem:[#allocation2 + $0x19] sm:$0xff] %vm336_vm0, %v1802_v17  ;;  %1837 = vst.msk [vmem:[#allocation2 + $0x39] sm:$0xff] %vm336_vm0, %v1805_v20 }
 0x197   : > { %1835 = vst.msk [vmem:[#allocation2 + $0x21] sm:$0xff] %vm336_vm0, %v1803_v55  ;;  %v1995_v57 = vpop.permute.xlu1 %1994 }
 0x198   : > { %2043 = vst.msk [vmem:[#allocation3] sm:$0xff] %vm2042_vm14, %v1995_v57 }
 0x199   : > { %v1559_v60 = vld [vmem:[#allocation3 + $0x150] sm:$0xff] }
 0x19a   : > { %6933 = vmatprep.mubr.msk.bf16.mxu1 %vm1588_vm13, %v1559_v60 }
 0x19b   : > { %v2124_v1 = vpop.permute.xlu1 %2123  ;;  %v2509_v2 = vld [vmem:[#allocation2 + $0x30] sm:$0xff] }
 0x19c   : > { %v1560_v63 = vld [vmem:[#allocation3 + $0x168] sm:$0xff]  ;;  %2172 = vst.msk [vmem:[#allocation3] sm:$0xff] %vm2171_vm15, %v2124_v1 }
 0x19d   : > { %v2637_v61 = vld [vmem:[#allocation2 + $0x31] sm:$0xff]  ;;  %6934 = vmatmul.mubr.msk.bf16.gmra.mrb[12].mxu1 %vm1588_vm13, %v1560_v63  ;;  %v2638_v6 = vld [vmem:[#allocation2 + $0x39] sm:$0xff] }
 0x19e   : > { %v2510_v4 = vld [vmem:[#allocation2 + $0x38] sm:$0xff]  ;;  %v2669_v9 = vpack.c.bf16 %v2638_v6, %v2637_v61  ;;  %v2189_v12 = vld [vmem:[#allocation2 + $0x20] sm:$0xff] }
 0x19f   : > { %v2765_v7 = vld [vmem:[#allocation2 + $0x32] sm:$0xff]  ;;  %v2541_v8 = vpack.c.bf16 %v2510_v4, %v2509_v2  ;;  %v2766_v23 = vld [vmem:[#allocation2 + $0x3a] sm:$0xff]  ;;  %v2382_v22 = vld [vmem:[#allocation2 + $0x22] sm:$0xff] }
 0x1a0   : > { %v2188_v10 = vld [vmem:[#allocation2 + $0x18] sm:$0xff]  ;;  %v2797_v11 = vpack.c.bf16 %v2766_v23, %v2765_v7  ;;  %v1933_v13 = vld [vmem:[#allocation2 + $0x21] sm:$0xff]  ;;  %2366 = vst.msk [vmem:[#allocation3 + $0x20] sm:$0xff] %vm336_vm0, %v2669_v9 }
 0x1a1   : > { %v1932_v32 = vld [vmem:[#allocation2 + $0x19] sm:$0xff]  ;;  %2573 = vrot.lane.b32.xlu0 %v2541_v8, %s7105_s30  ;;  %2254 = vrot.lane.b32.xlu1 %v2541_v8, %s7106_s27  ;;  %v2220_v14 = vpack.c.bf16 %v2189_v12, %v2188_v10  ;;  %1916 = vst.msk [vmem:[#allocation3 + $0x30] sm:$0xff] %vm336_vm0, %v2541_v8 }
 0x1a2   : > { %v1963_v15 = vpack.c.bf16 %v1933_v13, %v1932_v32  ;;  %2813 = vst.msk [vmem:[#allocation3 + $0x10] sm:$0xff] %vm336_vm0, %v2797_v11  ;;  %v2381_v34 = vld [vmem:[#allocation2 + $0x1a] sm:$0xff] }
 0x1a3   : > { %1915 = vst.msk [vmem:[#allocation3 + $0x18] sm:$0xff] %vm336_vm0, %v2220_v14  ;;  %v2413_v25 = vpack.c.bf16 %v2382_v22, %v2381_v34 }
 0x1a4   : > { %2365 = vst.msk [vmem:[#allocation3 + $0x8] sm:$0xff] %vm336_vm0, %v1963_v15 }
 0x1a5   : > { %2701 = vrot.lane.b32.xlu0 %v2669_v9, %s7106_s27  ;;  %1998 = vrot.lane.b32.xlu1 %v2669_v9, %s7104_s29 }
 0x1a9   : > { %v2831_v24 = vld [vmem:[#allocation3 + $0x10] sm:$0xff]  ;;  %2447 = vrot.lane.b32.xlu0 %v2797_v11, %s7104_s29  ;;  %2127 = vrot.lane.b32.xlu1 %v2797_v11, %s7105_s30 }
 0x1aa   : > { %6941 = vmatprep.mubr.msk.bf16.mxu0 %vm336_vm0, %v2831_v24 }
 0x1ad   : > { %2445 = vrot.lane.b32.xlu0 %v2413_v25, %s7104_s29  ;;  %2252 = vrot.lane.b32.xlu1 %v2220_v14, %s7106_s27 }
 0x1af   : > { %v6911_v26 = vpop.f32.mrb[4].mxu0 }
 0x1b0   : > { %v1700_v27 = vadd.f32 %v6911_v26, %v7678_v5  ;;  %v1691_v28 = vpop.f32.mrb[5].mxu0 }
 0x1b1   : > { %1996 = vrot.lane.b32.xlu1 %v1963_v15, %s7104_s29  ;;  %v1692_v29 = vadd.f32 %v7678_v5, %v1691_v28  ;;  %v6912_v30 = vpop.f32.mrb[6].mxu0 }
 0x1b2   : > { %v1808_v31 = vmax.f32 %v1700_v27, 0.0  ;;  %v1703_v33 = vadd.f32 %v6912_v30, %v7678_v5  ;;  %v1694_v35 = vpop.f32.mrb[7].mxu0 }
 0x1b3   : > { %v1806_v36 = vmax.f32 %v1692_v29, 0.0  ;;  %v1695_v37 = vadd.f32 %v7678_v5, %v1694_v35 }
 0x1b4   : > { %1840 = vst.msk [vmem:[#allocation2 + $0x61] sm:$0xff] %vm336_vm0, %v1808_v31  ;;  %v1809_v38 = vmax.f32 %v1703_v33, 0.0 }
 0x1b5   : > { %2125 = vrot.lane.b32.xlu1 %v2413_v25, %s7105_s30  ;;  %1838 = vst.msk [vmem:[#allocation2 + $0x49] sm:$0xff] %vm336_vm0, %v1806_v36  ;;  %v1807_v39 = vmax.f32 %v1695_v37, 0.0 }
 0x1b6   : > { %1841 = vst.msk [vmem:[#allocation2 + $0x69] sm:$0xff] %vm336_vm0, %v1809_v38 }
 0x1b7   : > { %1839 = vst.msk [vmem:[#allocation2 + $0x51] sm:$0xff] %vm336_vm0, %v1807_v39 }
 0x1bb   : > { %v2194_v40 = vld [vmem:[#allocation2 + $0x60] sm:$0xff] }
 0x1bc   : > { %v1938_v45 = vld [vmem:[#allocation2 + $0x61] sm:$0xff]  ;;  %v1936_v53 = vld [vmem:[#allocation2 + $0x49] sm:$0xff] }
 0x1bd   : > { %v2769_v41 = vld [vmem:[#allocation2 + $0x62] sm:$0xff]  ;;  %v2770_v42 = vld [vmem:[#allocation2 + $0x6a] sm:$0xff] }
 0x1be   : > { %v2195_v43 = vld [vmem:[#allocation2 + $0x68] sm:$0xff]  ;;  %v2768_v47 = vld [vmem:[#allocation2 + $0x52] sm:$0xff]  ;;  %v7759_v48 = vpack.c.bf16 %v2770_v42, %v2769_v41 }
 0x1bf   : > { %v2192_v44 = vld [vmem:[#allocation2 + $0x48] sm:$0xff]  ;;  %v7761_v49 = vpack.c.bf16 %v2195_v43, %v2194_v40  ;;  %v2193_v17 = vld [vmem:[#allocation2 + $0x50] sm:$0xff] }
 0x1c0   : > { %v2767_v46 = vld [vmem:[#allocation2 + $0x4a] sm:$0xff]  ;;  %2815 = vst.msk [vmem:[#allocation3 + $0x40] sm:$0xff] %vm336_vm0, %v7759_v48  ;;  %v7769_v20 = vpack.c.bf16 %v2193_v17, %v2192_v44 }
 0x1c1   : > { %v1939_v50 = vld [vmem:[#allocation2 + $0x69] sm:$0xff]  ;;  %v7763_v51 = vpack.c.bf16 %v2768_v47, %v2767_v46  ;;  %v1937_v54 = vld [vmem:[#allocation2 + $0x51] sm:$0xff]  ;;  %1918 = vst.msk [vmem:[#allocation3 + $0x60] sm:$0xff] %vm336_vm0, %v7761_v49 }
 0x1c2   : > { %v7765_v52 = vpack.c.bf16 %v1939_v50, %v1938_v45  ;;  %v7771_v55 = vpack.c.bf16 %v1937_v54, %v1936_v53  ;;  %1917 = vst.msk [vmem:[#allocation3 + $0x48] sm:$0xff] %vm336_vm0, %v7769_v20 }
 0x1c3   : > { %2814 = vst.msk [vmem:[#allocation3 + $0x28] sm:$0xff] %vm336_vm0, %v7763_v51 }
 0x1c4   : > { %2368 = vst.msk [vmem:[#allocation3 + $0x50] sm:$0xff] %vm336_vm0, %v7765_v52  ;;  %2367 = vst.msk [vmem:[#allocation3 + $0x38] sm:$0xff] %vm336_vm0, %v7771_v55 }
 0x1c7   : > { %v2837_v58 = vld [vmem:[#allocation3 + $0x40] sm:$0xff] }
 0x1ca   : > { %v2834_v56 = vld [vmem:[#allocation3 + $0x28] sm:$0xff] }
 0x1cb   : > { %6942 = vmatmul.mubr.msk.bf16.vlgmr.msra.gmra.mrb[16].mxu0 %vm336_vm0, %v2834_v56 }
 0x1cc   : > { %6945 = vmatprep.mubr.msk.bf16.mxu0 %vm336_vm0, %v2837_v58 }
 0x1cf   : > { %v6915_v57 = vpop.f32.mrb[8].mxu0 }
 0x1d0   : > { %v1716_v59 = vadd.f32 %v6915_v57, %v7678_v5  ;;  %v1707_v60 = vpop.f32.mrb[9].mxu0 }
 0x1d1   : > { %v1708_v62 = vadd.f32 %v7678_v5, %v1707_v60  ;;  %v6916_v63 = vpop.f32.mrb[10].mxu0 }
 0x1d2   : > { %v1812_v1 = vmax.f32 %v1716_v59, 0.0  ;;  %v1719_v2 = vadd.f32 %v6916_v63, %v7678_v5  ;;  %v1710_v61 = vpop.f32.mrb[11].mxu0 }
 0x1d3   : > { %v1810_v3 = vmax.f32 %v1708_v62, 0.0  ;;  %v1711_v4 = vadd.f32 %v7678_v5, %v1710_v61 }
 0x1d4   : > { %1844 = vst.msk [vmem:[#allocation2 + $0x91] sm:$0xff] %vm336_vm0, %v1812_v1  ;;  %v1813_v6 = vmax.f32 %v1719_v2, 0.0 }
 0x1d5   : > { %1842 = vst.msk [vmem:[#allocation2 + $0x79] sm:$0xff] %vm336_vm0, %v1810_v3  ;;  %v1811_v7 = vmax.f32 %v1711_v4, 0.0 }
 0x1d6   : > { %1845 = vst.msk [vmem:[#allocation2 + $0x99] sm:$0xff] %vm336_vm0, %v1813_v6 }
 0x1d7   : > { %1843 = vst.msk [vmem:[#allocation2 + $0x81] sm:$0xff] %vm336_vm0, %v1811_v7 }
 0x1db   : > { %v2198_v8 = vld [vmem:[#allocation2 + $0x90] sm:$0xff] }
 0x1dc   : > { %v1942_v9 = vld [vmem:[#allocation2 + $0x91] sm:$0xff]  ;;  %v1940_v21 = vld [vmem:[#allocation2 + $0x79] sm:$0xff] }
 0x1dd   : > { %v2773_v23 = vld [vmem:[#allocation2 + $0x92] sm:$0xff]  ;;  %v2774_v10 = vld [vmem:[#allocation2 + $0x9a] sm:$0xff] }
 0x1de   : > { %v2199_v32 = vld [vmem:[#allocation2 + $0x98] sm:$0xff]  ;;  %v2772_v13 = vld [vmem:[#allocation2 + $0x82] sm:$0xff]  ;;  %v7793_v0 = vpack.c.bf16 %v2774_v10, %v2773_v23 }
 0x1df   : > { %v2196_v11 = vld [vmem:[#allocation2 + $0x78] sm:$0xff]  ;;  %v7795_v14 = vpack.c.bf16 %v2199_v32, %v2198_v8  ;;  %v2197_v19 = vld [vmem:[#allocation2 + $0x80] sm:$0xff] }
 0x1e0   : > { %v2771_v12 = vld [vmem:[#allocation2 + $0x7a] sm:$0xff]  ;;  %2817 = vst.msk [vmem:[#allocation3 + $0x70] sm:$0xff] %vm336_vm0, %v7793_v0  ;;  %v7803_v22 = vpack.c.bf16 %v2197_v19, %v2196_v11 }
 0x1e1   : > { %v1943_v15 = vld [vmem:[#allocation2 + $0x99] sm:$0xff]  ;;  %v7797_v16 = vpack.c.bf16 %v2772_v13, %v2771_v12  ;;  %v1941_v34 = vld [vmem:[#allocation2 + $0x81] sm:$0xff]  ;;  %1920 = vst.msk [vmem:[#allocation3 + $0x90] sm:$0xff] %vm336_vm0, %v7795_v14 }
 0x1e2   : > { %v7799_v18 = vpack.c.bf16 %v1943_v15, %v1942_v9  ;;  %v7805_v24 = vpack.c.bf16 %v1941_v34, %v1940_v21  ;;  %1919 = vst.msk [vmem:[#allocation3 + $0x78] sm:$0xff] %vm336_vm0, %v7803_v22 }
 0x1e3   : > { %2816 = vst.msk [vmem:[#allocation3 + $0x58] sm:$0xff] %vm336_vm0, %v7797_v16 }
 0x1e4   : > { %2370 = vst.msk [vmem:[#allocation3 + $0x80] sm:$0xff] %vm336_vm0, %v7799_v18  ;;  %2369 = vst.msk [vmem:[#allocation3 + $0x68] sm:$0xff] %vm336_vm0, %v7805_v24 }
 0x1e7   : > { %v2843_v26 = vld [vmem:[#allocation3 + $0x70] sm:$0xff] }
 0x1ea   : > { %v2840_v25 = vld [vmem:[#allocation3 + $0x58] sm:$0xff] }
 0x1eb   : > { %6946 = vmatmul.mubr.msk.bf16.gmra.mrb[20].mxu0 %vm336_vm0, %v2840_v25 }
 0x1ec   : > { %6949 = vmatprep.mubr.msk.bf16.mxu0 %vm336_vm0, %v2843_v26 }
 0x1ef   : > { %v6919_v27 = vpop.f32.mrb[12].mxu0 }
 0x1f0   : > { %v1732_v28 = vadd.f32 %v6919_v27, %v7678_v5  ;;  %v1723_v29 = vpop.f32.mrb[13].mxu0 }
 0x1f1   : > { %v1724_v30 = vadd.f32 %v7678_v5, %v1723_v29  ;;  %v6920_v31 = vpop.f32.mrb[14].mxu0 }
 0x1f2   : > { %v1816_v33 = vmax.f32 %v1732_v28, 0.0  ;;  %v1735_v35 = vadd.f32 %v6920_v31, %v7678_v5  ;;  %v1726_v36 = vpop.f32.mrb[15].mxu0 }
 0x1f3   : > { %v1814_v37 = vmax.f32 %v1724_v30, 0.0  ;;  %v1727_v38 = vadd.f32 %v7678_v5, %v1726_v36 }
 0x1f4   : > { %1848 = vst.msk [vmem:[#allocation2 + $0xc1] sm:$0xff] %vm336_vm0, %v1816_v33  ;;  %v1817_v39 = vmax.f32 %v1735_v35, 0.0 }
 0x1f5   : > { %1846 = vst.msk [vmem:[#allocation2 + $0xa9] sm:$0xff] %vm336_vm0, %v1814_v37  ;;  %v1815_v40 = vmax.f32 %v1727_v38, 0.0 }
 0x1f6   : > { %1849 = vst.msk [vmem:[#allocation2 + $0xc9] sm:$0xff] %vm336_vm0, %v1817_v39 }
 0x1f7   : > { %1847 = vst.msk [vmem:[#allocation2 + $0xb1] sm:$0xff] %vm336_vm0, %v1815_v40 }
 0x1fb   : > { %v2202_v45 = vld [vmem:[#allocation2 + $0xc0] sm:$0xff] }
 0x1fc   : > { %v1946_v41 = vld [vmem:[#allocation2 + $0xc1] sm:$0xff]  ;;  %v1944_v59 = vld [vmem:[#allocation2 + $0xa9] sm:$0xff] }
 0x1fd   : > { %v2777_v42 = vld [vmem:[#allocation2 + $0xc2] sm:$0xff]  ;;  %v2778_v43 = vld [vmem:[#allocation2 + $0xca] sm:$0xff] }
 0x1fe   : > { %v2203_v44 = vld [vmem:[#allocation2 + $0xc8] sm:$0xff]  ;;  %v2776_v50 = vld [vmem:[#allocation2 + $0xb2] sm:$0xff]  ;;  %v7827_v17 = vpack.c.bf16 %v2778_v43, %v2777_v42 }
 0x1ff   : > { %v2200_v46 = vld [vmem:[#allocation2 + $0xa8] sm:$0xff]  ;;  %v7829_v53 = vpack.c.bf16 %v2203_v44, %v2202_v45  ;;  %v2201_v57 = vld [vmem:[#allocation2 + $0xb0] sm:$0xff] }
 0x200   : > { %v2775_v47 = vld [vmem:[#allocation2 + $0xaa] sm:$0xff]  ;;  %2819 = vst.msk [vmem:[#allocation3 + $0xa0] sm:$0xff] %vm336_vm0, %v7827_v17  ;;  %v7837_v62 = vpack.c.bf16 %v2201_v57, %v2200_v46 }
 0x201   : > { %v1947_v54 = vld [vmem:[#allocation2 + $0xc9] sm:$0xff]  ;;  %v7831_v56 = vpack.c.bf16 %v2776_v50, %v2775_v47  ;;  %v1945_v60 = vld [vmem:[#allocation2 + $0xb1] sm:$0xff]  ;;  %1922 = vst.msk [vmem:[#allocation3 + $0xc0] sm:$0xff] %vm336_vm0, %v7829_v53 }
 0x202   : > { %v7833_v58 = vpack.c.bf16 %v1947_v54, %v1946_v41  ;;  %v7839_v63 = vpack.c.bf16 %v1945_v60, %v1944_v59  ;;  %1921 = vst.msk [vmem:[#allocation3 + $0xa8] sm:$0xff] %vm336_vm0, %v7837_v62 }
 0x203   : > { %2818 = vst.msk [vmem:[#allocation3 + $0x88] sm:$0xff] %vm336_vm0, %v7831_v56 }
 0x204   : > { %2372 = vst.msk [vmem:[#allocation3 + $0xb0] sm:$0xff] %vm336_vm0, %v7833_v58  ;;  %2371 = vst.msk [vmem:[#allocation3 + $0x98] sm:$0xff] %vm336_vm0, %v7839_v63 }
 0x207   : > { %v2849_v2 = vld [vmem:[#allocation3 + $0xa0] sm:$0xff] }
 0x20a   : > { %v2846_v1 = vld [vmem:[#allocation3 + $0x88] sm:$0xff] }
 0x20b   : > { %6950 = vmatmul.mubr.msk.bf16.gmra.mrb[24].mxu0 %vm336_vm0, %v2846_v1 }
 0x20c   : > { %6953 = vmatprep.mubr.msk.bf16.mxu0 %vm336_vm0, %v2849_v2 }
 0x20f   : > { %v6923_v61 = vpop.f32.mrb[0].mxu1 }
 0x210   : > { %v1748_v3 = vadd.f32 %v6923_v61, %v7678_v5  ;;  %v1739_v4 = vpop.f32.mrb[1].mxu1 }
 0x211   : > { %v1740_v6 = vadd.f32 %v7678_v5, %v1739_v4  ;;  %v6924_v7 = vpop.f32.mrb[2].mxu1 }
 0x212   : > { %v1820_v8 = vmax.f32 %v1748_v3, 0.0  ;;  %v1751_v9 = vadd.f32 %v6924_v7, %v7678_v5  ;;  %v1742_v23 = vpop.f32.mrb[3].mxu1 }
 0x213   : > { %v2574_v10 = vpop.permute.xlu0 %2573  ;;  %v1818_v32 = vmax.f32 %v1740_v6, 0.0  ;;  %v1743_v11 = vadd.f32 %v7678_v5, %v1742_v23  ;;  %v2255_v12 = vpop.permute.xlu1 %2254 }
 0x214   : > { %1852 = vst.msk [vmem:[#allocation2 + $0xf1] sm:$0xff] %vm336_vm0, %v1820_v8  ;;  %v1821_v13 = vmax.f32 %v1751_v9, 0.0 }
 0x215   : > { %1850 = vst.msk [vmem:[#allocation2 + $0xd9] sm:$0xff] %vm336_vm0, %v1818_v32  ;;  %v1819_v15 = vmax.f32 %v1743_v11, 0.0 }
 0x216   : > { %1853 = vst.msk [vmem:[#allocation2 + $0xf9] sm:$0xff] %vm336_vm0, %v1821_v13 }
 0x217   : > { %v2702_v19 = vpop.permute.xlu0 %2701  ;;  %1851 = vst.msk [vmem:[#allocation2 + $0xe1] sm:$0xff] %vm336_vm0, %v1819_v15  ;;  %v1999_v21 = vpop.permute.xlu1 %1998 }
 0x218   : > { %2045 = vst.msk [vmem:[#allocation3 + $0x30] sm:$0xff] %vm2042_vm14, %v1999_v21 }
 0x21b   : > { %v2448_v34 = vpop.permute.xlu0 %2447  ;;  %v2128_v25 = vpop.permute.xlu1 %2127  ;;  %v2525_v26 = vld [vmem:[#allocation2 + $0xf0] sm:$0xff] }
 0x21c   : > { %2494 = vst.msk [vmem:[#allocation3 + $0x20] sm:$0xff] %vm2042_vm14, %v2448_v34  ;;  %v2204_v27 = vld [vmem:[#allocation2 + $0xd8] sm:$0xff]  ;;  %v1886_v35 = vld [vmem:[#allocation2 + $0xf0] sm:$0xff] }
 0x21d   : > { %2174 = vst.msk [vmem:[#allocation3 + $0x30] sm:$0xff] %vm2171_vm15, %v2128_v25  ;;  %v2653_v28 = vld [vmem:[#allocation2 + $0xf1] sm:$0xff]  ;;  %v1948_v29 = vld [vmem:[#allocation2 + $0xd9] sm:$0xff] }
 0x21e   : > { %v2526_v30 = vld [vmem:[#allocation2 + $0xf8] sm:$0xff]  ;;  %v2205_v38 = vld [vmem:[#allocation2 + $0xe0] sm:$0xff] }
 0x21f   : > { %v2654_v31 = vld [vmem:[#allocation2 + $0xf9] sm:$0xff]  ;;  %v2446_v36 = vpop.permute.xlu0 %2445  ;;  %v7864_v37 = vpack.c.bf16 %v2526_v30, %v2525_v26  ;;  %v1949_v40 = vld [vmem:[#allocation2 + $0xe1] sm:$0xff]  ;;  %v2253_v41 = vpop.permute.xlu1 %2252  ;;  %v2228_v42 = vpack.c.bf16 %v2205_v38, %v2204_v27 }
 0x220   : > { %v2399_v33 = vld [vmem:[#allocation2 + $0xf2] sm:$0xff]  ;;  %v7866_v39 = vpack.c.bf16 %v2654_v31, %v2653_v28  ;;  %v2400_v45 = vld [vmem:[#allocation2 + $0xfa] sm:$0xff]  ;;  %2493 = vst.msk [vmem:[#allocation3 + $0x8] sm:$0xff] %vm2042_vm14, %v2446_v36  ;;  %v1971_v43 = vpack.c.bf16 %v1949_v40, %v1948_v29  ;;  %v2780_v47 = vld [vmem:[#allocation2 + $0xe2] sm:$0xff] }
 0x221   : > { %v7869_v44 = vpack.c.bf16 %v2400_v45, %v2399_v33  ;;  %v2779_v46 = vld [vmem:[#allocation2 + $0xda] sm:$0xff]  ;;  %2621 = vst.msk [vmem:[#allocation3 + $0x8] sm:$0xff] %vm2171_vm15, %v2574_v10  ;;  %2589 = vrot.lane.b32.xlu0 %v7864_v37, %s7105_s30  ;;  %2268 = vrot.lane.b32.xlu1 %v2228_v42, %s7106_s27 }
 0x222   : > { %v1887_v50 = vld [vmem:[#allocation2 + $0xf8] sm:$0xff]  ;;  %2301 = vst.msk [vmem:[#allocation3] sm:$0xff] %vm2300_vm1, %v2253_v41  ;;  %v2804_v54 = vpack.c.bf16 %v2780_v47, %v2779_v46  ;;  %2749 = vst.msk [vmem:[#allocation3 + $0x8] sm:$0xff] %vm2300_vm1, %v2702_v19 }
 0x223   : > { %2374 = vst.msk [vmem:[#allocation3 + $0xe0] sm:$0xff] %vm336_vm0, %v7866_v39  ;;  %v1908_v57 = vpack.c.bf16 %v1887_v50, %v1886_v35  ;;  %2821 = vst.msk [vmem:[#allocation3 + $0xd0] sm:$0xff] %vm336_vm0, %v7869_v44  ;;  %v1997_v59 = vpop.permute.xlu1 %1996 }
 0x224   : > { %1923 = vst.msk [vmem:[#allocation3 + $0xd8] sm:$0xff] %vm336_vm0, %v2228_v42  ;;  %2373 = vst.msk [vmem:[#allocation3 + $0xc8] sm:$0xff] %vm336_vm0, %v1971_v43 }
 0x225   : > { %2820 = vst.msk [vmem:[#allocation3 + $0xb8] sm:$0xff] %vm336_vm0, %v2804_v54  ;;  %1924 = vst.msk [vmem:[#allocation3 + $0xf0] sm:$0xff] %vm336_vm0, %v1908_v57  ;;  %2717 = vrot.lane.b32.xlu0 %v7866_v39, %s7106_s27  ;;  %2012 = vrot.lane.b32.xlu1 %v1971_v43, %s7104_s29 }
 0x226   : > { %2044 = vst.msk [vmem:[#allocation3 + $0x18] sm:$0xff] %vm2042_vm14, %v1997_v59 }
 0x227   : > { %v2126_v60 = vpop.permute.xlu1 %2125 }
 0x228   : > { %2173 = vst.msk [vmem:[#allocation3 + $0x18] sm:$0xff] %vm2171_vm15, %v2126_v60 }
 0x229   : > { %2463 = vrot.lane.b32.xlu0 %v7869_v44, %s7104_s29  ;;  %v2830_v1 = vld [vmem:[#allocation3 + $0x8] sm:$0xff]  ;;  %2302 = vst.msk [vmem:[#allocation3 + $0x18] sm:$0xff] %vm2300_vm1, %v2255_v12  ;;  %2141 = vrot.lane.b32.xlu1 %v2804_v54, %s7105_s30  ;;  %v2829_v61 = vld [vmem:[#allocation3] sm:$0xff] }
 0x22a   : > { %3108 = vmatprep.mubr.bf16.mxu1 %v2830_v1  ;;  %v2855_v3 = vld [vmem:[#allocation3 + $0xd0] sm:$0xff] }
 0x22b   : > { %3109 = vmatmul.mubr.bf16.vlgmr.msra.gmra.mrb[16].mxu1 %v2829_v61 }
 0x22c   : > { %v2852_v2 = vld [vmem:[#allocation3 + $0xb8] sm:$0xff] }
 0x22d   : > { %6954 = vmatmul.mubr.msk.bf16.gmra.mrb[28].mxu0 %vm336_vm0, %v2852_v2  ;;  %2587 = vrot.lane.b32.xlu0 %v2228_v42, %s7105_s30 }
 0x22e   : > { %6957 = vmatprep.mubr.msk.bf16.mxu0 %vm336_vm0, %v2855_v3  ;;  %2258 = vrot.lane.b32.xlu1 %v7761_v49, %s7106_s27 }
 0x22f   : > { %v6927_v4 = vpop.f32.mrb[4].mxu1 }
 0x230   : > { %v1764_v6 = vadd.f32 %v6927_v4, %v7678_v5  ;;  %v1755_v7 = vpop.f32.mrb[5].mxu1 }
 0x231   : > { %2715 = vrot.lane.b32.xlu0 %v1971_v43, %s7106_s27  ;;  %v1756_v8 = vadd.f32 %v7678_v5, %v1755_v7  ;;  %v6928_v9 = vpop.f32.mrb[6].mxu1 }
 0x232   : > { %2002 = vrot.lane.b32.xlu1 %v7765_v52, %s7104_s29  ;;  %v1824_v23 = vmax.f32 %v1764_v6, 0.0  ;;  %v1767_v10 = vadd.f32 %v6928_v9, %v7678_v5  ;;  %v1758_v32 = vpop.f32.mrb[7].mxu1 }
 0x233   : > { %v1822_v11 = vmax.f32 %v1756_v8, 0.0  ;;  %v1759_v12 = vadd.f32 %v7678_v5, %v1758_v32 }
 0x234   : > { %1856 = vst.msk [vmem:[#allocation2 + $0x121] sm:$0xff] %vm336_vm0, %v1824_v23  ;;  %v1825_v13 = vmax.f32 %v1767_v10, 0.0 }
 0x235   : > { %2461 = vrot.lane.b32.xlu0 %v2804_v54, %s7104_s29  ;;  %1854 = vst.msk [vmem:[#allocation2 + $0x109] sm:$0xff] %vm336_vm0, %v1822_v11  ;;  %v1823_v15 = vmax.f32 %v1759_v12, 0.0 }
 0x236   : > { %2131 = vrot.lane.b32.xlu1 %v7759_v48, %s7105_s30  ;;  %1857 = vst.msk [vmem:[#allocation2 + $0x129] sm:$0xff] %vm336_vm0, %v1825_v13 }
 0x237   : > { %1855 = vst.msk [vmem:[#allocation2 + $0x111] sm:$0xff] %vm336_vm0, %v1823_v15 }
 0x239   : > { %2577 = vrot.lane.b32.xlu0 %v7761_v49, %s7105_s30 }
 0x23a   : > { %2256 = vrot.lane.b32.xlu1 %v7769_v20, %s7106_s27 }
 0x23b   : > { %v2529_v19 = vld [vmem:[#allocation2 + $0x120] sm:$0xff] }
 0x23c   : > { %v2527_v21 = vld [vmem:[#allocation2 + $0x108] sm:$0xff] }
 0x23d   : > { %2705 = vrot.lane.b32.xlu0 %v7765_v52, %s7106_s27  ;;  %v2655_v34 = vld [vmem:[#allocation2 + $0x109] sm:$0xff]  ;;  %v2657_v25 = vld [vmem:[#allocation2 + $0x121] sm:$0xff] }
 0x23e   : > { %2000 = vrot.lane.b32.xlu1 %v7771_v55, %s7104_s29  ;;  %v2785_v26 = vld [vmem:[#allocation2 + $0x122] sm:$0xff]  ;;  %v2786_v27 = vld [vmem:[#allocation2 + $0x12a] sm:$0xff]  ;;  %v2784_v31 = vld [vmem:[#allocation2 + $0x112] sm:$0xff] }
 0x23f   : > { %v2530_v28 = vld [vmem:[#allocation2 + $0x128] sm:$0xff]  ;;  %v2528_v29 = vld [vmem:[#allocation2 + $0x110] sm:$0xff]  ;;  %v7921_v49 = vpack.c.bf16 %v2786_v27, %v2785_v26 }
 0x240   : > { %v2783_v30 = vld [vmem:[#allocation2 + $0x10a] sm:$0xff]  ;;  %v7923_v33 = vpack.c.bf16 %v2530_v28, %v2529_v19  ;;  %v7925_v35 = vpack.c.bf16 %v2528_v29, %v2527_v21 }
 0x241   : > { %v7927_v36 = vpack.c.bf16 %v2784_v31, %v2783_v30  ;;  %v2656_v52 = vld [vmem:[#allocation2 + $0x111] sm:$0xff]  ;;  %v2658_v38 = vld [vmem:[#allocation2 + $0x129] sm:$0xff]  ;;  %2451 = vrot.lane.b32.xlu0 %v7759_v48, %s7104_s29  ;;  %2823 = vst.msk [vmem:[#allocation3 + $0x100] sm:$0xff] %vm336_vm0, %v7921_v49 }
 0x242   : > { %v7933_v40 = vpack.c.bf16 %v2656_v52, %v2655_v34  ;;  %v7935_v45 = vpack.c.bf16 %v2658_v38, %v2657_v25  ;;  %1926 = vst.msk [vmem:[#allocation3 + $0x120] sm:$0xff] %vm336_vm0, %v7923_v33  ;;  %2129 = vrot.lane.b32.xlu1 %v7763_v51, %s7105_s30  ;;  %1925 = vst.msk [vmem:[#allocation3 + $0x108] sm:$0xff] %vm336_vm0, %v7925_v35 }
 0x243   : > { %2822 = vst.msk [vmem:[#allocation3 + $0xe8] sm:$0xff] %vm336_vm0, %v7927_v36 }
 0x244   : > { %2375 = vst.msk [vmem:[#allocation3 + $0xf8] sm:$0xff] %vm336_vm0, %v7933_v40  ;;  %2376 = vst.msk [vmem:[#allocation3 + $0x110] sm:$0xff] %vm336_vm0, %v7935_v45 }
 0x245   : > { %2575 = vrot.lane.b32.xlu0 %v7769_v20, %s7105_s30 }
 0x246   : > { %2262 = vrot.lane.b32.xlu1 %v7795_v14, %s7106_s27 }
 0x248   : > { %v2861_v48 = vld [vmem:[#allocation3 + $0x100] sm:$0xff] }
 0x249   : > { %2703 = vrot.lane.b32.xlu0 %v7771_v55, %s7106_s27 }
 0x24a   : > { %v2858_v41 = vld [vmem:[#allocation3 + $0xe8] sm:$0xff]  ;;  %2006 = vrot.lane.b32.xlu1 %v7799_v18, %s7104_s29 }
 0x24b   : > { %6958 = vmatmul.mubr.msk.bf16.gmra.mrb[32].mxu0 %vm336_vm0, %v2858_v41 }
 0x24c   : > { %6961 = vmatprep.mubr.msk.bf16.mxu0 %vm336_vm0, %v2861_v48 }
 0x24d   : > { %2449 = vrot.lane.b32.xlu0 %v7763_v51, %s7104_s29 }
 0x24e   : > { %2135 = vrot.lane.b32.xlu1 %v7793_v0, %s7105_s30 }
 0x24f   : > { %v6931_v20 = vpop.f32.mrb[8].mxu1 }
 0x250   : > { %v1780_v55 = vadd.f32 %v6931_v20, %v7678_v5  ;;  %v1771_v42 = vpop.f32.mrb[9].mxu1 }
 0x251   : > { %2591 = vrot.lane.b32.xlu0 %v7925_v35, %s7105_s30  ;;  %v1772_v43 = vadd.f32 %v7678_v5, %v1771_v42  ;;  %v6932_v46 = vpop.f32.mrb[10].mxu1 }
 0x252   : > { %2260 = vrot.lane.b32.xlu1 %v7803_v22, %s7106_s27  ;;  %v1828_v47 = vmax.f32 %v1780_v55, 0.0  ;;  %v1783_v50 = vadd.f32 %v6932_v46, %v7678_v5  ;;  %v1774_v51 = vpop.f32.mrb[11].mxu1 }
 0x253   : > { %v1826_v54 = vmax.f32 %v1772_v43, 0.0  ;;  %v1775_v57 = vadd.f32 %v7678_v5, %v1774_v51 }
 0x254   : > { %1860 = vst.msk [vmem:[#allocation2 + $0x151] sm:$0xff] %vm336_vm0, %v1828_v47  ;;  %v1829_v59 = vmax.f32 %v1783_v50, 0.0 }
 0x255   : > { %2581 = vrot.lane.b32.xlu0 %v7795_v14, %s7105_s30  ;;  %1858 = vst.msk [vmem:[#allocation2 + $0x139] sm:$0xff] %vm336_vm0, %v1826_v54  ;;  %v1827_v60 = vmax.f32 %v1775_v57, 0.0 }
 0x256   : > { %2004 = vrot.lane.b32.xlu1 %v7805_v24, %s7104_s29  ;;  %1861 = vst.msk [vmem:[#allocation2 + $0x159] sm:$0xff] %vm336_vm0, %v1829_v59 }
 0x257   : > { %1859 = vst.msk [vmem:[#allocation2 + $0x141] sm:$0xff] %vm336_vm0, %v1827_v60 }
 0x259   : > { %2709 = vrot.lane.b32.xlu0 %v7799_v18, %s7106_s27 }
 0x25a   : > { %2133 = vrot.lane.b32.xlu1 %v7797_v16, %s7105_s30 }
 0x25b   : > { %v2533_v14 = vld [vmem:[#allocation2 + $0x150] sm:$0xff] }
 0x25c   : > { %v2661_v1 = vld [vmem:[#allocation2 + $0x151] sm:$0xff]  ;;  %v2659_v61 = vld [vmem:[#allocation2 + $0x139] sm:$0xff] }
 0x25d   : > { %2455 = vrot.lane.b32.xlu0 %v7793_v0, %s7104_s29  ;;  %v2531_v2 = vld [vmem:[#allocation2 + $0x138] sm:$0xff] }
 0x25e   : > { %2266 = vrot.lane.b32.xlu1 %v7829_v53, %s7106_s27  ;;  %v2534_v3 = vld [vmem:[#allocation2 + $0x158] sm:$0xff]  ;;  %v2532_v7 = vld [vmem:[#allocation2 + $0x140] sm:$0xff] }
 0x25f   : > { %v2662_v4 = vld [vmem:[#allocation2 + $0x159] sm:$0xff]  ;;  %v2660_v8 = vld [vmem:[#allocation2 + $0x141] sm:$0xff]  ;;  %v7987_v18 = vpack.c.bf16 %v2534_v3, %v2533_v14  ;;  %v7991_v10 = vpack.c.bf16 %v2532_v7, %v2531_v2 }
 0x260   : > { %v2407_v6 = vld [vmem:[#allocation2 + $0x152] sm:$0xff]  ;;  %v2405_v9 = vld [vmem:[#allocation2 + $0x13a] sm:$0xff]  ;;  %v7989_v23 = vpack.c.bf16 %v2662_v4, %v2661_v1  ;;  %v7993_v32 = vpack.c.bf16 %v2660_v8, %v2659_v61  ;;  %v2406_v0 = vld [vmem:[#allocation2 + $0x142] sm:$0xff] }
 0x261   : > { %v2408_v11 = vld [vmem:[#allocation2 + $0x15a] sm:$0xff]  ;;  %2579 = vrot.lane.b32.xlu0 %v7803_v22, %s7105_s30  ;;  %v7997_v12 = vpack.c.bf16 %v2406_v0, %v2405_v9  ;;  %1928 = vst.msk [vmem:[#allocation3 + $0x150] sm:$0xff] %vm336_vm0, %v7987_v18  ;;  %1927 = vst.msk [vmem:[#allocation3 + $0x138] sm:$0xff] %vm336_vm0, %v7991_v10  ;;  %v3527_v0 = vld [vmem:[#allocation2 + $0x9] sm:$0xff] }
 0x262   : > { %v7999_v13 = vpack.c.bf16 %v2408_v11, %v2407_v6  ;;  %2378 = vst.msk [vmem:[#allocation3 + $0x140] sm:$0xff] %vm336_vm0, %v7989_v23  ;;  %2010 = vrot.lane.b32.xlu1 %v7833_v58, %s7104_s29  ;;  %2377 = vst.msk [vmem:[#allocation3 + $0x128] sm:$0xff] %vm336_vm0, %v7993_v32 }
 0x263   : > { %2824 = vst.msk [vmem:[#allocation3 + $0x118] sm:$0xff] %vm336_vm0, %v7997_v12 }
 0x264   : > { %2825 = vst.msk [vmem:[#allocation3 + $0x130] sm:$0xff] %vm336_vm0, %v7999_v13 }
 0x265   : > { %2707 = vrot.lane.b32.xlu0 %v7805_v24, %s7106_s27 }
 0x266   : > { %2139 = vrot.lane.b32.xlu1 %v7827_v17, %s7105_s30 }
 0x269   : > { %2453 = vrot.lane.b32.xlu0 %v7797_v16, %s7104_s29 }
 0x26a   : > { %2270 = vrot.lane.b32.xlu1 %v7864_v37, %s7106_s27  ;;  %v2864_v22 = vld [vmem:[#allocation3 + $0x118] sm:$0xff] }
 0x26b   : > { %v2867_v15 = vld [vmem:[#allocation3 + $0x130] sm:$0xff]  ;;  %6962 = vmatmul.mubr.msk.bf16.gmra.mrb[36].mxu0 %vm336_vm0, %v2864_v22 }
 0x26c   : > { %6965 = vmatprep.mubr.msk.bf16.mxu0 %vm336_vm0, %v2867_v15 }
 0x26d   : > { %2585 = vrot.lane.b32.xlu0 %v7829_v53, %s7105_s30 }
 0x26e   : > { %2014 = vrot.lane.b32.xlu1 %v7866_v39, %s7104_s29 }
 0x270   : > { %v6935_v24 = vpop.f32.mrb[12].mxu1 }
 0x271   : > { %2713 = vrot.lane.b32.xlu0 %v7833_v58, %s7106_s27  ;;  %v1796_v16 = vadd.f32 %v6935_v24, %v7678_v5  ;;  %v1787_v19 = vpop.f32.mrb[13].mxu1 }
 0x272   : > { %2264 = vrot.lane.b32.xlu1 %v7837_v62, %s7106_s27  ;;  %v1788_v37 = vadd.f32 %v7678_v5, %v1787_v19  ;;  %v6936_v21 = vpop.f32.mrb[14].mxu1  ;;  %v3655_v19 = vld [vmem:[#allocation2 + $0xa] sm:$0xff] }
 0x273   : > { %v1832_v34 = vmax.f32 %v1796_v16, 0.0  ;;  %v1799_v25 = vadd.f32 %v6936_v21, %v7678_v5  ;;  %v1790_v53 = vpop.f32.mrb[15].mxu1  ;;  %v3654_v16 = vld [vmem:[#allocation2 + $0x2] sm:$0xff] }
 0x274   : > { %v1830_v26 = vmax.f32 %v1788_v37, 0.0  ;;  %v1791_v39 = vadd.f32 %v7678_v5, %v1790_v53  ;;  %v3686_v53 = vpack.c.bf16 %v3655_v19, %v3654_v16 }
 0x275   : > { %2459 = vrot.lane.b32.xlu0 %v7827_v17, %s7104_s29  ;;  %1864 = vst.msk [vmem:[#allocation2 + $0x181] sm:$0xff] %vm336_vm0, %v1832_v34  ;;  %v1833_v58 = vmax.f32 %v1799_v25, 0.0  ;;  %v2539_v34 = vld [vmem:[#allocation2 + $0x198] sm:$0xff]  ;;  %v2540_v25 = vld [vmem:[#allocation2 + $0x1a0] sm:$0xff] }
 0x276   : > { %2008 = vrot.lane.b32.xlu1 %v7839_v63, %s7104_s29  ;;  %1862 = vst.msk [vmem:[#allocation2 + $0x169] sm:$0xff] %vm336_vm0, %v1830_v26  ;;  %v1831_v27 = vmax.f32 %v1791_v39, 0.0 }
 0x277   : > { %1865 = vst.msk [vmem:[#allocation2 + $0x189] sm:$0xff] %vm336_vm0, %v1833_v58 }
 0x278   : > { %1863 = vst.msk [vmem:[#allocation2 + $0x171] sm:$0xff] %vm336_vm0, %v1831_v27  ;;  %v2832_v27 = vld [vmem:[#allocation3 + $0x18] sm:$0xff] }
 0x279   : > { %2583 = vrot.lane.b32.xlu0 %v7837_v62, %s7105_s30 }
 0x27a   : > { %2137 = vrot.lane.b32.xlu1 %v7831_v56, %s7105_s30 }
 0x27c   : > { %v2665_v5 = vld [vmem:[#allocation2 + $0x181] sm:$0xff] }
 0x27d   : > { %2711 = vrot.lane.b32.xlu0 %v7839_v63, %s7106_s27  ;;  %v2535_v17 = vld [vmem:[#allocation2 + $0x168] sm:$0xff]  ;;  %v2537_v7 = vld [vmem:[#allocation2 + $0x180] sm:$0xff] }
 0x27e   : > { %v2663_v28 = vld [vmem:[#allocation2 + $0x169] sm:$0xff]  ;;  %2143 = vrot.lane.b32.xlu1 %v7869_v44, %s7105_s30 }
 0x27f   : > { %v2666_v29 = vld [vmem:[#allocation2 + $0x189] sm:$0xff]  ;;  %v2664_v52 = vld [vmem:[#allocation2 + $0x171] sm:$0xff] }
 0x280   : > { %v2411_v30 = vld [vmem:[#allocation2 + $0x182] sm:$0xff]  ;;  %v2536_v31 = vld [vmem:[#allocation2 + $0x170] sm:$0xff]  ;;  %v8053_v48 = vpack.c.bf16 %v2666_v29, %v2665_v5  ;;  %v8057_v41 = vpack.c.bf16 %v2664_v52, %v2663_v28  ;;  %v2556_v5 = vpack.c.bf16 %v2540_v25, %v2539_v34  ;;  %v2795_v29 = vld [vmem:[#allocation2 + $0x19a] sm:$0xff] }
 0x281   : > { %v2409_v38 = vld [vmem:[#allocation2 + $0x16a] sm:$0xff]  ;;  %v8055_v62 = vpack.c.bf16 %v2536_v31, %v2535_v17  ;;  %v2410_v20 = vld [vmem:[#allocation2 + $0x172] sm:$0xff]  ;;  %2457 = vrot.lane.b32.xlu0 %v7831_v56, %s7104_s29  ;;  %v2668_v28 = vld [vmem:[#allocation2 + $0x1a1] sm:$0xff] }
 0x282   : > { %v2412_v55 = vld [vmem:[#allocation2 + $0x18a] sm:$0xff]  ;;  %v8061_v63 = vpack.c.bf16 %v2410_v20, %v2409_v38  ;;  %2380 = vst.msk [vmem:[#allocation3 + $0x170] sm:$0xff] %vm336_vm0, %v8053_v48  ;;  %2272 = vrot.lane.b32.xlu1 %v7925_v35, %s7106_s27  ;;  %2379 = vst.msk [vmem:[#allocation3 + $0x158] sm:$0xff] %vm336_vm0, %v8057_v41  ;;  %v2667_v17 = vld [vmem:[#allocation2 + $0x199] sm:$0xff] }
 0x283   : > { %v8063_v42 = vpack.c.bf16 %v2412_v55, %v2411_v30  ;;  %1929 = vst.msk [vmem:[#allocation3 + $0x168] sm:$0xff] %vm336_vm0, %v8055_v62  ;;  %v2538_v8 = vld [vmem:[#allocation2 + $0x188] sm:$0xff] }
 0x284   : > { %2826 = vst.msk [vmem:[#allocation3 + $0x148] sm:$0xff] %vm336_vm0, %v8061_v63  ;;  %v2796_v30 = vld [vmem:[#allocation2 + $0x1a2] sm:$0xff] }
 0x285   : > { %2827 = vst.msk [vmem:[#allocation3 + $0x160] sm:$0xff] %vm336_vm0, %v8063_v42  ;;  %2719 = vrot.lane.b32.xlu0 %v7933_v40, %s7106_s27  ;;  %v2812_v52 = vpack.c.bf16 %v2796_v30, %v2795_v29  ;;  %v3463_v20 = vld [vmem:[#allocation2 + $0x8] sm:$0xff] }
 0x286   : > { %2016 = vrot.lane.b32.xlu1 %v7933_v40, %s7104_s29 }
 0x287   : > { %2828 = vst.msk [vmem:[#allocation3 + $0x178] sm:$0xff] %vm336_vm0, %v2812_v52 }
 0x289   : > { %2465 = vrot.lane.b32.xlu0 %v7927_v36, %s7104_s29 }
 0x28a   : > { %2145 = vrot.lane.b32.xlu1 %v7927_v36, %s7105_s30 }
 0x28b   : > { %v2870_v56 = vld [vmem:[#allocation3 + $0x148] sm:$0xff] }
 0x28c   : > { %v2873_v44 = vld [vmem:[#allocation3 + $0x160] sm:$0xff]  ;;  %6966 = vmatmul.mubr.msk.bf16.gmra.mrb[40].mxu0 %vm336_vm0, %v2870_v56 }
 0x28d   : > { %6969 = vmatprep.mubr.msk.bf16.mxu0 %vm336_vm0, %v2873_v44  ;;  %2593 = vrot.lane.b32.xlu0 %v7923_v33, %s7105_s30 }
 0x28e   : > { %2274 = vrot.lane.b32.xlu1 %v7923_v33, %s7106_s27 }
 0x291   : > { %2721 = vrot.lane.b32.xlu0 %v7935_v45, %s7106_s27 }
 0x292   : > { %2018 = vrot.lane.b32.xlu1 %v7935_v45, %s7104_s29 }
 0x293   : > { %v2590_v35 = vpop.permute.xlu0 %2589  ;;  %v8095_v36 = vpop.permute.xlu1 %2268 }
 0x295   : > { %2467 = vrot.lane.b32.xlu0 %v7921_v49, %s7104_s29 }
 0x296   : > { %2147 = vrot.lane.b32.xlu1 %v7921_v49, %s7105_s30 }
 0x297   : > { %v2718_v40 = vpop.permute.xlu0 %2717  ;;  %v2013_v43 = vpop.permute.xlu1 %2012 }
 0x298   : > { %2052 = vst.msk [vmem:[#allocation3 + $0xd8] sm:$0xff] %vm2042_vm14, %v2013_v43 }
 0x299   : > { %2595 = vrot.lane.b32.xlu0 %v7991_v10, %s7105_s30 }
 0x29a   : > { %2276 = vrot.lane.b32.xlu1 %v7991_v10, %s7106_s27 }
 0x29b   : > { %v2464_v33 = vpop.permute.xlu0 %2463  ;;  %v2142_v45 = vpop.permute.xlu1 %2141 }
 0x29c   : > { %2502 = vst.msk [vmem:[#allocation3 + $0xe0] sm:$0xff] %vm2042_vm14, %v2464_v33 }
 0x29d   : > { %2181 = vst.msk [vmem:[#allocation3 + $0xd8] sm:$0xff] %vm2171_vm15, %v2142_v45  ;;  %2723 = vrot.lane.b32.xlu0 %v7993_v32, %s7106_s27 }
 0x29e   : > { %v8108_v46 = vpop.f32.mrb[16].mxu0  ;;  %2020 = vrot.lane.b32.xlu1 %v7993_v32, %s7104_s29  ;;  %v3526_v32 = vld [vmem:[#allocation2 + $0x1] sm:$0xff] }
 0x29f   : > { %v8112_v49 = vpop.f32.mrb[17].mxu0  ;;  %v8118_v50 = vpop.permute.xlu0 %2587  ;;  %v3558_v22 = vpack.c.bf16 %v3527_v0, %v3526_v32 }
 0x2a0   : > { %v8116_v47 = vpop.f32.mrb[18].mxu0  ;;  %v2259_v54 = vpop.permute.xlu1 %2258 }
 0x2a1   : > { %v8120_v51 = vpop.f32.mrb[19].mxu0  ;;  %2469 = vrot.lane.b32.xlu0 %v7997_v12, %s7104_s29 }
 0x2a2   : > { %2149 = vrot.lane.b32.xlu1 %v7997_v12, %s7105_s30 }
 0x2a3   : > { %v8126_v57 = vpop.permute.xlu0 %2715 }
 0x2a4   : > { %v2003_v59 = vpop.permute.xlu1 %2002 }
 0x2a5   : > { %2047 = vst.msk [vmem:[#allocation3 + $0x60] sm:$0xff] %vm2042_vm14, %v2003_v59  ;;  %2597 = vrot.lane.b32.xlu0 %v7987_v18, %s7105_s30 }
 0x2a6   : > { %2278 = vrot.lane.b32.xlu1 %v7987_v18, %s7106_s27 }
 0x2a7   : > { %v2462_v60 = vpop.permute.xlu0 %2461 }
 0x2a8   : > { %2501 = vst.msk [vmem:[#allocation3 + $0xc8] sm:$0xff] %vm2042_vm14, %v2462_v60  ;;  %v2132_v14 = vpop.permute.xlu1 %2131 }
 0x2a9   : > { %2629 = vst.msk [vmem:[#allocation3 + $0xc8] sm:$0xff] %vm2171_vm15, %v2590_v35  ;;  %2176 = vst.msk [vmem:[#allocation3 + $0x60] sm:$0xff] %vm2171_vm15, %v2132_v14  ;;  %2725 = vrot.lane.b32.xlu0 %v7989_v23, %s7106_s27 }
 0x2aa   : > { %2757 = vst.msk [vmem:[#allocation3 + $0xc8] sm:$0xff] %vm2300_vm1, %v2718_v40  ;;  %2022 = vrot.lane.b32.xlu1 %v7989_v23, %s7104_s29  ;;  %v2555_v23 = vpack.c.bf16 %v2538_v8, %v2537_v7  ;;  %v2876_v40 = vld [vmem:[#allocation3 + $0x178] sm:$0xff] }
 0x2ab   : > { %v2578_v1 = vpop.permute.xlu0 %2577  ;;  %6970 = vmatmul.mubr.msk.bf16.gmra.mrb[44].mxu0 %vm336_vm0, %v2876_v40  ;;  %4421 = vst.msk [vmem:[#allocation3 + $0x178] sm:$0xff] %vm336_vm0, %v2812_v52 }
 0x2ac   : > { %v2257_v2 = vpop.permute.xlu1 %2256 }
 0x2ad   : > { %2303 = vst.msk [vmem:[#allocation3 + $0x30] sm:$0xff] %vm2300_vm1, %v2257_v2  ;;  %2471 = vrot.lane.b32.xlu0 %v7999_v13, %s7104_s29 }
 0x2ae   : > { %2151 = vrot.lane.b32.xlu1 %v7999_v13, %s7105_s30 }
 0x2af   : > { %v2706_v61 = vpop.permute.xlu0 %2705 }
 0x2b0   : > { %v2001_v3 = vpop.permute.xlu1 %2000 }
 0x2b1   : > { %2046 = vst.msk [vmem:[#allocation3 + $0x48] sm:$0xff] %vm2042_vm14, %v2001_v3  ;;  %2599 = vrot.lane.b32.xlu0 %v8055_v62, %s7105_s30 }
 0x2b2   : > { %2280 = vrot.lane.b32.xlu1 %v8055_v62, %s7106_s27  ;;  %v2684_v62 = vpack.c.bf16 %v2668_v28, %v2667_v17  ;;  %v8250_v17 = vld [vmem:[%s9630_s4] ss:$0 sm:$0xff] }
 0x2b3   : > { %v2452_v4 = vpop.permute.xlu0 %2451 }
 0x2b4   : > { %2496 = vst.msk [vmem:[#allocation3 + $0x50] sm:$0xff] %vm2042_vm14, %v2452_v4  ;;  %v2130_v6 = vpop.permute.xlu1 %2129  ;;  %v2835_v56 = vld [vmem:[#allocation3 + $0x30] sm:$0xff] }
 0x2b5   : > { %2175 = vst.msk [vmem:[#allocation3 + $0x48] sm:$0xff] %vm2171_vm15, %v2130_v6  ;;  %2727 = vrot.lane.b32.xlu0 %v8057_v41, %s7106_s27 }
 0x2b6   : > { %2304 = vst.msk [vmem:[#allocation3 + $0x48] sm:$0xff] %vm2300_vm1, %v2259_v54  ;;  %2024 = vrot.lane.b32.xlu1 %v8057_v41, %s7104_s29  ;;  %v3462_v41 = vld [vmem:[#allocation2] sm:$0xff] }
 0x2b7   : > { %v2576_v9 = vpop.permute.xlu0 %2575  ;;  %v3494_v55 = vpack.c.bf16 %v3463_v20, %v3462_v41 }
 0x2b8   : > { %2622 = vst.msk [vmem:[#allocation3 + $0x20] sm:$0xff] %vm2171_vm15, %v2576_v9  ;;  %v8159_v18 = vpop.permute.xlu1 %2262 }
 0x2b9   : > { %2473 = vrot.lane.b32.xlu0 %v8061_v63, %s7104_s29  ;;  %3510 = vst.msk [vmem:[#allocation3] sm:$0xff] %vm336_vm0, %v3494_v55 }
 0x2ba   : > { %2153 = vrot.lane.b32.xlu1 %v8061_v63, %s7105_s30 }
 0x2bb   : > { %v2704_v10 = vpop.permute.xlu0 %2703 }
 0x2bc   : > { %2750 = vst.msk [vmem:[#allocation3 + $0x20] sm:$0xff] %vm2300_vm1, %v2704_v10  ;;  %v2007_v11 = vpop.permute.xlu1 %2006 }
 0x2bd   : > { %2049 = vst.msk [vmem:[#allocation3 + $0x90] sm:$0xff] %vm2042_vm14, %v2007_v11  ;;  %2601 = vrot.lane.b32.xlu0 %v2555_v23, %s7105_s30  ;;  %v2838_v6 = vld [vmem:[#allocation3 + $0x48] sm:$0xff] }
 0x2be   : > { %v8167_v12 = vpop.f32.mrb[20].mxu0  ;;  %2282 = vrot.lane.b32.xlu1 %v2555_v23, %s7106_s27 }
 0x2bf   : > { %v8170_v13 = vpop.f32.mrb[21].mxu0  ;;  %v2450_v24 = vpop.permute.xlu0 %2449 }
 0x2c0   : > { %v8173_v15 = vpop.f32.mrb[22].mxu0  ;;  %2495 = vst.msk [vmem:[#allocation3 + $0x38] sm:$0xff] %vm2042_vm14, %v2450_v24  ;;  %v2136_v21 = vpop.permute.xlu1 %2135 }
 0x2c1   : > { %v8176_v37 = vpop.f32.mrb[23].mxu0  ;;  %2623 = vst.msk [vmem:[#allocation3 + $0x38] sm:$0xff] %vm2171_vm15, %v2578_v1  ;;  %2178 = vst.msk [vmem:[#allocation3 + $0x90] sm:$0xff] %vm2171_vm15, %v2136_v21  ;;  %2729 = vrot.lane.b32.xlu0 %v8053_v48, %s7106_s27 }
 0x2c2   : > { %2751 = vst.msk [vmem:[#allocation3 + $0x38] sm:$0xff] %vm2300_vm1, %v2706_v61  ;;  %3590 = vrot.lane.b32.xlu1 %v3558_v22, %s7104_s29 }
 0x2c3   : > { %v2592_v26 = vpop.permute.xlu0 %2591  ;;  %v2833_v39 = vld [vmem:[#allocation3 + $0x20] sm:$0xff] }
 0x2c4   : > { %2630 = vst.msk [vmem:[#allocation3 + $0xe0] sm:$0xff] %vm2171_vm15, %v2592_v26  ;;  %3116 = vmatprep.mubr.bf16.mxu1 %v2833_v39  ;;  %v2261_v58 = vpop.permute.xlu1 %2260 }
 0x2c5   : > { %2305 = vst.msk [vmem:[#allocation3 + $0x60] sm:$0xff] %vm2300_vm1, %v2261_v58  ;;  %3117 = vmatmul.mubr.bf16.gmra.mrb[20].mxu1 %v2832_v27  ;;  %2475 = vrot.lane.b32.xlu0 %v8063_v42, %s7104_s29 }
 0x2c6   : > { %3718 = vrot.lane.b32.xlu1 %v3686_v53, %s7105_s30 }
 0x2c7   : > { %v2582_v31 = vpop.permute.xlu0 %2581 }
 0x2c8   : > { %v2005_v38 = vpop.permute.xlu1 %2004 }
 0x2c9   : > { %2048 = vst.msk [vmem:[#allocation3 + $0x78] sm:$0xff] %vm2042_vm14, %v2005_v38  ;;  %v2836_v48 = vld [vmem:[#allocation3 + $0x38] sm:$0xff]  ;;  %2603 = vrot.lane.b32.xlu0 %v2556_v5, %s7105_s30 }
 0x2ca   : > { %3124 = vmatprep.mubr.bf16.mxu1 %v2836_v48 }
 0x2cb   : > { %v2710_v63 = vpop.permute.xlu0 %2709 }
 0x2cc   : > { %v2134_v42 = vpop.permute.xlu1 %2133  ;;  %v2841_v10 = vld [vmem:[#allocation3 + $0x60] sm:$0xff] }
 0x2cd   : > { %2177 = vst.msk [vmem:[#allocation3 + $0x78] sm:$0xff] %vm2171_vm15, %v2134_v42  ;;  %3125 = vmatmul.mubr.bf16.gmra.mrb[24].mxu1 %v2835_v56  ;;  %2731 = vrot.lane.b32.xlu0 %v2684_v62, %s7106_s27 }
 0x2ce   : > { %2306 = vst.msk [vmem:[#allocation3 + $0x78] sm:$0xff] %vm2300_vm1, %v8159_v18 }
 0x2cf   : > { %v2456_v44 = vpop.permute.xlu0 %2455 }
 0x2d0   : > { %2498 = vst.msk [vmem:[#allocation3 + $0x80] sm:$0xff] %vm2042_vm14, %v2456_v44  ;;  %v2267_v35 = vpop.permute.xlu1 %2266 }
 0x2d1   : > { %4196 = vrot.lane.b32.xlu0 %v2556_v5, %s7105_s30 }
 0x2d3   : > { %v2580_v43 = vpop.permute.xlu0 %2579 }
 0x2d4   : > { %2624 = vst.msk [vmem:[#allocation3 + $0x50] sm:$0xff] %vm2171_vm15, %v2580_v43  ;;  %v2011_v33 = vpop.permute.xlu1 %2010 }
 0x2d5   : > { %2051 = vst.msk [vmem:[#allocation3 + $0xc0] sm:$0xff] %vm2042_vm14, %v2011_v33  ;;  %v2844_v21 = vld [vmem:[#allocation3 + $0x78] sm:$0xff] }
 0x2d7   : > { %v2708_v45 = vpop.permute.xlu0 %2707 }
 0x2d8   : > { %2752 = vst.msk [vmem:[#allocation3 + $0x50] sm:$0xff] %vm2300_vm1, %v2708_v45  ;;  %v2140_v54 = vpop.permute.xlu1 %2139  ;;  %v2854_v45 = vld [vmem:[#allocation3 + $0xc8] sm:$0xff] }
 0x2d9   : > { %2180 = vst.msk [vmem:[#allocation3 + $0xc0] sm:$0xff] %vm2171_vm15, %v2140_v54 }
 0x2da   : > { %2309 = vst.msk [vmem:[#allocation3 + $0xc0] sm:$0xff] %vm2300_vm1, %v8095_v36 }
 0x2db   : > { %v2454_v59 = vpop.permute.xlu0 %2453 }
 0x2dc   : > { %2497 = vst.msk [vmem:[#allocation3 + $0x68] sm:$0xff] %vm2042_vm14, %v2454_v59  ;;  %v2271_v60 = vpop.permute.xlu1 %2270 }
 0x2dd   : > { %2625 = vst.msk [vmem:[#allocation3 + $0x68] sm:$0xff] %vm2171_vm15, %v2582_v31 }
 0x2de   : > { %2310 = vst.msk [vmem:[#allocation3 + $0xd8] sm:$0xff] %vm2300_vm1, %v2271_v60  ;;  %v8210_v14 = vpop.f32.mrb[24].mxu0  ;;  %2753 = vst.msk [vmem:[#allocation3 + $0x68] sm:$0xff] %vm2300_vm1, %v2710_v63 }
 0x2df   : > { %v8213_v1 = vpop.f32.mrb[25].mxu0  ;;  %v2586_v61 = vpop.permute.xlu0 %2585  ;;  %v2839_v3 = vld [vmem:[#allocation3 + $0x50] sm:$0xff] }
 0x2e0   : > { %v8215_v2 = vpop.f32.mrb[26].mxu0  ;;  %v2015_v36 = vpop.permute.xlu1 %2014  ;;  %3132 = vmatprep.mubr.bf16.mxu1 %v2839_v3 }
 0x2e1   : > { %v8217_v4 = vpop.f32.mrb[27].mxu0  ;;  %2053 = vst.msk [vmem:[#allocation3 + $0xf0] sm:$0xff] %vm2042_vm14, %v2015_v36  ;;  %3133 = vmatmul.mubr.bf16.gmra.mrb[28].mxu1 %v2838_v6  ;;  %v2853_v60 = vld [vmem:[#allocation3 + $0xc0] sm:$0xff] }
 0x2e3   : > { %v2714_v7 = vpop.permute.xlu0 %2713 }
 0x2e4   : > { %v2265_v8 = vpop.permute.xlu1 %2264 }
 0x2e5   : > { %2307 = vst.msk [vmem:[#allocation3 + $0x90] sm:$0xff] %vm2300_vm1, %v2265_v8  ;;  %v2842_v9 = vld [vmem:[#allocation3 + $0x68] sm:$0xff] }
 0x2e6   : > { %3140 = vmatprep.mubr.bf16.mxu1 %v2842_v9 }
 0x2e7   : > { %v2460_v18 = vpop.permute.xlu0 %2459 }
 0x2e8   : > { %2500 = vst.msk [vmem:[#allocation3 + $0xb0] sm:$0xff] %vm2042_vm14, %v2460_v18  ;;  %v2009_v23 = vpop.permute.xlu1 %2008 }
 0x2e9   : > { %2628 = vst.msk [vmem:[#allocation3 + $0xb0] sm:$0xff] %vm2171_vm15, %v8118_v50  ;;  %3141 = vmatmul.mubr.bf16.gmra.mrb[32].mxu1 %v2841_v10 }
 0x2ea   : > { %2050 = vst.msk [vmem:[#allocation3 + $0xa8] sm:$0xff] %vm2042_vm14, %v2009_v23 }
 0x2eb   : > { %2756 = vst.msk [vmem:[#allocation3 + $0xb0] sm:$0xff] %vm2300_vm1, %v8126_v57  ;;  %v2584_v32 = vpop.permute.xlu0 %2583 }
 0x2ec   : > { %2626 = vst.msk [vmem:[#allocation3 + $0x80] sm:$0xff] %vm2171_vm15, %v2584_v32  ;;  %v2138_v0 = vpop.permute.xlu1 %2137  ;;  %v2847_v29 = vld [vmem:[#allocation3 + $0x90] sm:$0xff] }
 0x2ed   : > { %2179 = vst.msk [vmem:[#allocation3 + $0xa8] sm:$0xff] %vm2171_vm15, %v2138_v0 }
 0x2ee   : > { %2308 = vst.msk [vmem:[#allocation3 + $0xa8] sm:$0xff] %vm2300_vm1, %v2267_v35 }
 0x2ef   : > { %v2712_v11 = vpop.permute.xlu0 %2711 }
 0x2f0   : > { %2754 = vst.msk [vmem:[#allocation3 + $0x80] sm:$0xff] %vm2300_vm1, %v2712_v11  ;;  %v2144_v22 = vpop.permute.xlu1 %2143 }
 0x2f1   : > { %2182 = vst.msk [vmem:[#allocation3 + $0xf0] sm:$0xff] %vm2171_vm15, %v2144_v22 }
 0x2f2   : > { %v2851_v38 = vld [vmem:[#allocation3 + $0xb0] sm:$0xff] }
 0x2f3   : > { %v2458_v50 = vpop.permute.xlu0 %2457 }
 0x2f4   : > { %2499 = vst.msk [vmem:[#allocation3 + $0x98] sm:$0xff] %vm2042_vm14, %v2458_v50  ;;  %v2273_v24 = vpop.permute.xlu1 %2272  ;;  %v2856_v50 = vld [vmem:[#allocation3 + $0xd8] sm:$0xff] }
 0x2f5   : > { %2627 = vst.msk [vmem:[#allocation3 + $0x98] sm:$0xff] %vm2171_vm15, %v2586_v61  ;;  %v2850_v43 = vld [vmem:[#allocation3 + $0xa8] sm:$0xff] }
 0x2f6   : > { %2311 = vst.msk [vmem:[#allocation3 + $0xf0] sm:$0xff] %vm2300_vm1, %v2273_v24  ;;  %2755 = vst.msk [vmem:[#allocation3 + $0x98] sm:$0xff] %vm2300_vm1, %v2714_v7 }
 0x2f7   : > { %v2720_v57 = vpop.permute.xlu0 %2719  ;;  %v2845_v16 = vld [vmem:[#allocation3 + $0x80] sm:$0xff] }
 0x2f8   : > { %2758 = vst.msk [vmem:[#allocation3 + $0xe0] sm:$0xff] %vm2300_vm1, %v2720_v57  ;;  %v2017_v19 = vpop.permute.xlu1 %2016  ;;  %3148 = vmatprep.mubr.bf16.mxu1 %v2845_v16 }
 0x2f9   : > { %2054 = vst.msk [vmem:[#allocation3 + $0x108] sm:$0xff] %vm2042_vm14, %v2017_v19  ;;  %3149 = vmatmul.mubr.bf16.gmra.mrb[36].mxu1 %v2844_v21 }
 0x2fb   : > { %v2466_v34 = vpop.permute.xlu0 %2465 }
 0x2fc   : > { %2503 = vst.msk [vmem:[#allocation3 + $0xf8] sm:$0xff] %vm2042_vm14, %v2466_v34  ;;  %v2146_v25 = vpop.permute.xlu1 %2145 }
 0x2fd   : > { %2183 = vst.msk [vmem:[#allocation3 + $0x108] sm:$0xff] %vm2171_vm15, %v2146_v25  ;;  %v2848_v53 = vld [vmem:[#allocation3 + $0x98] sm:$0xff] }
 0x2fe   : > { %v6655_v39 = vpop.f32.mrb[16].mxu1  ;;  %3156 = vmatprep.mubr.bf16.mxu1 %v2848_v53 }
 0x2ff   : > { %v2594_v27 = vpop.permute.xlu0 %2593  ;;  %v6656_v28 = vpop.f32.mrb[17].mxu1  ;;  %v2857_v61 = vld [vmem:[#allocation3 + $0xe0] sm:$0xff] }
 0x300   : > { %v8240_v26 = vpop.f32.mrb[28].mxu0  ;;  %2631 = vst.msk [vmem:[#allocation3 + $0xf8] sm:$0xff] %vm2171_vm15, %v2594_v27  ;;  %v6657_v30 = vadd.f32 %v6656_v28, %v6655_v39  ;;  %v6658_v31 = vpop.f32.mrb[18].mxu1  ;;  %v2859_v27 = vld [vmem:[#allocation3 + $0xf0] sm:$0xff] }
 0x301   : > { %v8242_v58 = vpop.f32.mrb[29].mxu0  ;;  %3157 = vmatmul.mubr.bf16.gmra.mrb[40].mxu1 %v2847_v29  ;;  %v2275_v48 = vpop.permute.xlu1 %2274 }
 0x302   : > { %v8244_v5 = vpop.f32.mrb[30].mxu0  ;;  %v6659_v62 = vpop.f32.mrb[19].mxu1  ;;  %3164 = vmatprep.mubr.bf16.mxu1 %v2851_v38  ;;  %v3111_v41 = vadd.f32 %v6657_v30, %v8250_v17  ;;  %2312 = vst.msk [vmem:[#allocation3 + $0x108] sm:$0xff] %vm2300_vm1, %v2275_v48 }
 0x303   : > { %v8252_v52 = vpop.f32.mrb[31].mxu0  ;;  %v6660_v20 = vadd.f32 %v6659_v62, %v6658_v31  ;;  %v2722_v55 = vpop.permute.xlu0 %2721 }
 0x304   : > { %2759 = vst.msk [vmem:[#allocation3 + $0xf8] sm:$0xff] %vm2300_vm1, %v2722_v55  ;;  %v3272_v63 = vadd.f32 %v8112_v49, %v3111_v41 }
 0x305   : > { %v3114_v42 = vadd.f32 %v6660_v20, %v8250_v17  ;;  %v2019_v56 = vpop.permute.xlu1 %2018 }
 0x306   : > { %v3398_v44 = vmax.f32 %v3272_v63, 0.0  ;;  %2055 = vst.msk [vmem:[#allocation3 + $0x120] sm:$0xff] %vm2042_vm14, %v2019_v56 }
 0x307   : > { %v3275_v35 = vadd.f32 %v8120_v51, %v3114_v42  ;;  %v2468_v40 = vpop.permute.xlu0 %2467 }
 0x308   : > { %2504 = vst.msk [vmem:[#allocation3 + $0x110] sm:$0xff] %vm2042_vm14, %v2468_v40 }
 0x309   : > { %3430 = vst.msk [vmem:[#allocation2 + $0x19] sm:$0xff] %vm336_vm0, %v3398_v44  ;;  %v3399_v33 = vmax.f32 %v3275_v35, 0.0  ;;  %3165 = vmatmul.mubr.bf16.gmra.mrb[44].mxu1 %v2850_v43  ;;  %v2148_v54 = vpop.permute.xlu1 %2147  ;;  %v2862_v62 = vld [vmem:[#allocation3 + $0x108] sm:$0xff]  ;;  %v7059_v43 = vld [vmem:[%s9631_s5 + $0x80] sm:$0xff]  }
 0x30a   : > { %3172 = vmatprep.mubr.bf16.mxu1 %v2854_v45  ;;  %2184 = vst.msk [vmem:[#allocation3 + $0x120] sm:$0xff] %vm2171_vm15, %v2148_v54  ;;  %6973 = vmatprep.subr.bf16.mxu1 %v7059_v43 }
 0x30b   : > { %3431 = vst.msk [vmem:[#allocation2 + $0x21] sm:$0xff] %vm336_vm0, %v3399_v33  ;;  %v2596_v49 = vpop.permute.xlu0 %2595  ;;  %v2860_v24 = vld [vmem:[#allocation3 + $0xf8] sm:$0xff]  ;;  %6974 = vmatpush3.bf16.msra.mxu1 %v7059_v43 }
 0x30c   : > { %2632 = vst.msk [vmem:[#allocation3 + $0x110] sm:$0xff] %vm2171_vm15, %v2596_v49  ;;  %v7060_v49 = vld [vmem:[%s9631_s5 + $0x88] sm:$0xff]  }
 0x30d   : > { %v2277_v51 = vpop.permute.xlu1 %2276  ;;  %6975 = vmatprep.subr.bf16.mxu1 %v7060_v49 }
 0x30e   : > { %2313 = vst.msk [vmem:[#allocation3 + $0x120] sm:$0xff] %vm2300_vm1, %v2277_v51 }
 0x30f   : > { %v2724_v59 = vpop.permute.xlu0 %2723  ;;  %6976 = vmatpush3.bf16.msra.mxu1 %v7060_v49 }
 0x310   : > { %2760 = vst.msk [vmem:[#allocation3 + $0x110] sm:$0xff] %vm2300_vm1, %v2724_v59  ;;  %v3782_v3 = vld [vmem:[#allocation2 + $0x18] sm:$0xff] }
 0x311   : > { %3173 = vmatmul.mubr.bf16.gmra.mrb[48].mxu1 %v2853_v60  ;;  %v2021_v8 = vpop.permute.xlu1 %2020  ;;  %v3528_v10 = vld [vmem:[#allocation2 + $0x19] sm:$0xff] }
 0x312   : > { %3180 = vmatprep.mubr.bf16.mxu1 %v2857_v61  ;;  %v3974_v36 = vld [vmem:[#allocation2 + $0x1a] sm:$0xff]  ;;  %v3975_v6 = vld [vmem:[#allocation2 + $0x22] sm:$0xff]  ;;  %2056 = vst.msk [vmem:[#allocation3 + $0x138] sm:$0xff] %vm2042_vm14, %v2021_v8 }
 0x313   : > { %v3783_v7 = vld [vmem:[#allocation2 + $0x20] sm:$0xff]  ;;  %v4006_v9 = vpack.c.bf16 %v3975_v6, %v3974_v36  ;;  %v2470_v23 = vpop.permute.xlu0 %2469 }
 0x314   : > { %v3814_v18 = vpack.c.bf16 %v3783_v7, %v3782_v3  ;;  %v3529_v32 = vld [vmem:[#allocation2 + $0x21] sm:$0xff]  ;;  %2505 = vst.msk [vmem:[#allocation3 + $0x128] sm:$0xff] %vm2042_vm14, %v2470_v23 }
 0x315   : > { %v3559_v0 = vpack.c.bf16 %v3529_v32, %v3528_v10  ;;  %4038 = vrot.lane.b32.xlu0 %v4006_v9, %s7104_s29  ;;  %v2150_v11 = vpop.permute.xlu1 %2149  ;;  %v2865_v55 = vld [vmem:[#allocation3 + $0x120] sm:$0xff] }
 0x316   : > { %3846 = vrot.lane.b32.xlu1 %v3814_v18, %s7106_s27  ;;  %3511 = vst.msk [vmem:[#allocation3 + $0x18] sm:$0xff] %vm336_vm0, %v3814_v18 }
 0x317   : > { %3958 = vst.msk [vmem:[#allocation3 + $0x8] sm:$0xff] %vm336_vm0, %v3559_v0  ;;  %v2598_v22 = vpop.permute.xlu0 %2597  ;;  %v2863_v39 = vld [vmem:[#allocation3 + $0x110] sm:$0xff] }
 0x318   : > { %2185 = vst.msk [vmem:[#allocation3 + $0x138] sm:$0xff] %vm2171_vm15, %v2150_v11  ;;  %2633 = vst.msk [vmem:[#allocation3 + $0x128] sm:$0xff] %vm2171_vm15, %v2598_v22 }
 0x319   : > { %3181 = vmatmul.mubr.bf16.gmra.mrb[52].mxu1 %v2856_v50  ;;  %v2279_v57 = vpop.permute.xlu1 %2278 }
 0x31a   : > { %3592 = vrot.lane.b32.xlu1 %v3559_v0, %s7104_s29  ;;  %3188 = vmatprep.mubr.bf16.mxu1 %v2860_v24  ;;  %2314 = vst.msk [vmem:[#allocation3 + $0x138] sm:$0xff] %vm2300_vm1, %v2279_v57  ;;  %v7061_v24 = vld [vmem:[%s9631_s5 + $0x40] sm:$0xff]  }
 0x31b   : > { %v2726_v16 = vpop.permute.xlu0 %2725  ;;  %6769 = vmatprep.subr.bf16.mxu0 %v7061_v24 }
 0x31c   : > { %2761 = vst.msk [vmem:[#allocation3 + $0x128] sm:$0xff] %vm2300_vm1, %v2726_v16  ;;  %v7062_v16 = vld [vmem:[%s9631_s5] sm:$0xff]  }
 0x31d   : > { %v2023_v21 = vpop.permute.xlu1 %2022  ;;  %6770 = vmatpush3.bf16.msra.mxu0 %v7062_v16 }
 0x31e   : > { %3720 = vrot.lane.b32.xlu1 %v4006_v9, %s7105_s30  ;;  %v8280_v19 = vpop.f32.mrb[32].mxu0  ;;  %2057 = vst.msk [vmem:[#allocation3 + $0x150] sm:$0xff] %vm2042_vm14, %v2023_v21  ;;  %v7063_v21 = vld [vmem:[%s9631_s5 + $0x48] sm:$0xff]  }
 0x31f   : > { %v8282_v34 = vpop.f32.mrb[33].mxu0  ;;  %v2472_v25 = vpop.permute.xlu0 %2471  ;;  %6771 = vmatprep.subr.bf16.mxu0 %v7063_v21 }
 0x320   : > { %v8285_v53 = vpop.f32.mrb[34].mxu0  ;;  %2506 = vst.msk [vmem:[#allocation3 + $0x140] sm:$0xff] %vm2042_vm14, %v2472_v25  ;;  %v7064_v25 = vld [vmem:[%s9631_s5 + $0x8] sm:$0xff]  }
 0x321   : > { %v8288_v28 = vpop.f32.mrb[35].mxu0  ;;  %3189 = vmatmul.mubr.bf16.gmra.mrb[56].mxu1 %v2859_v27  ;;  %v2152_v29 = vpop.permute.xlu1 %2151  ;;  %v2868_v45 = vld [vmem:[#allocation3 + $0x138] sm:$0xff]  ;;  %6772 = vmatpush3.bf16.msra.mxu0 %v7064_v25  ;;  %v7066_v27 = vld [vmem:[%s9631_s5 + $0x10] sm:$0xff]  }
 0x322   : > { %3196 = vmatprep.mubr.bf16.mxu1 %v2863_v39  ;;  %2186 = vst.msk [vmem:[#allocation3 + $0x150] sm:$0xff] %vm2171_vm15, %v2152_v29  ;;  %v7065_v39 = vld [vmem:[%s9631_s5 + $0x50] sm:$0xff]  }
 0x323   : > { %v2600_v30 = vpop.permute.xlu0 %2599  ;;  %v2866_v48 = vld [vmem:[#allocation3 + $0x128] sm:$0xff]  ;;  %6773 = vmatprep.subr.bf16.mxu0 %v7065_v39 }
 0x324   : > { %2634 = vst.msk [vmem:[#allocation3 + $0x140] sm:$0xff] %vm2171_vm15, %v2600_v30  ;;  %v7067_v30 = vld [vmem:[%s9631_s5 + $0x58] sm:$0xff]  }
 0x325   : > { %v2281_v31 = vpop.permute.xlu1 %2280  ;;  %6774 = vmatpush3.bf16.msra.mxu0 %v7066_v27  ;;  %v7075_v27 = vld [vmem:[%s9631_s5 + $0x78] sm:$0xff]  }
 0x326   : > { %2315 = vst.msk [vmem:[#allocation3 + $0x150] sm:$0xff] %vm2300_vm1, %v2281_v31  ;;  %6775 = vmatprep.subr.bf16.mxu0 %v7067_v30 }
 0x327   : > { %v2728_v38 = vpop.permute.xlu0 %2727 }
 0x328   : > { %2762 = vst.msk [vmem:[#allocation3 + $0x140] sm:$0xff] %vm2300_vm1, %v2728_v38 }
 0x329   : > { %3197 = vmatmul.mubr.bf16.gmra.mrb[60].mxu1 %v2862_v62  ;;  %v2025_v41 = vpop.permute.xlu1 %2024 }
 0x32a   : > { %3204 = vmatprep.mubr.bf16.mxu1 %v2866_v48  ;;  %2058 = vst.msk [vmem:[#allocation3 + $0x168] sm:$0xff] %vm2042_vm14, %v2025_v41  ;;  %v7068_v41 = vld [vmem:[%s9631_s5 + $0x18] sm:$0xff]  }
 0x32b   : > { %v2474_v20 = vpop.permute.xlu0 %2473  ;;  %6776 = vmatpush3.bf16.msra.mxu0 %v7068_v41 }
 0x32c   : > { %2507 = vst.msk [vmem:[#allocation3 + $0x158] sm:$0xff] %vm2042_vm14, %v2474_v20  ;;  %v7069_v20 = vld [vmem:[%s9631_s5 + $0x60] sm:$0xff]  }
 0x32d   : > { %v2154_v63 = vpop.permute.xlu1 %2153  ;;  %v2871_v60 = vld [vmem:[#allocation3 + $0x150] sm:$0xff]  ;;  %6777 = vmatprep.subr.bf16.mxu0 %v7069_v20 }
 0x32e   : > { %2187 = vst.msk [vmem:[#allocation3 + $0x168] sm:$0xff] %vm2171_vm15, %v2154_v63 }
 0x32f   : > { %v2602_v42 = vpop.permute.xlu0 %2601  ;;  %v2869_v56 = vld [vmem:[#allocation3 + $0x140] sm:$0xff] }
 0x330   : > { %2635 = vst.msk [vmem:[#allocation3 + $0x158] sm:$0xff] %vm2171_vm15, %v2602_v42 }
 0x331   : > { %3205 = vmatmul.mubr.bf16.gmra.mrb[64].mxu1 %v2865_v55  ;;  %v2283_v44 = vpop.permute.xlu1 %2282 }
 0x332   : > { %3212 = vmatprep.mubr.bf16.mxu1 %v2869_v56  ;;  %2316 = vst.msk [vmem:[#allocation3 + $0x168] sm:$0xff] %vm2300_vm1, %v2283_v44  ;;  %v7070_v44 = vld [vmem:[%s9631_s5 + $0x20] sm:$0xff]  }
 0x333   : > { %v2730_v35 = vpop.permute.xlu0 %2729  ;;  %6778 = vmatpush3.bf16.msra.mxu0 %v7070_v44 }
 0x334   : > { %2763 = vst.msk [vmem:[#allocation3 + $0x158] sm:$0xff] %vm2300_vm1, %v2730_v35 }
 0x335   : > { %v3591_v40 = vpop.permute.xlu1 %3590 }
 0x336   : > { %3638 = vst.msk [vmem:[#allocation3] sm:$0xff] %vm2042_vm14, %v3591_v40 }
 0x337   : > { %v2476_v33 = vpop.permute.xlu0 %2475 }
 0x338   : > { %2508 = vst.msk [vmem:[#allocation3 + $0x170] sm:$0xff] %vm2042_vm14, %v2476_v33 }
 0x339   : > { %3213 = vmatmul.mubr.bf16.gmra.mrb[68].mxu1 %v2868_v45  ;;  %v3719_v54 = vpop.permute.xlu1 %3718  ;;  %v2874_v8 = vld [vmem:[#allocation3 + $0x168] sm:$0xff] }
 0x33a   : > { %3766 = vst.msk [vmem:[#allocation3] sm:$0xff] %vm2171_vm15, %v3719_v54 }
 0x33b   : > { %v2604_v51 = vpop.permute.xlu0 %2603  ;;  %v2872_v59 = vld [vmem:[#allocation3 + $0x158] sm:$0xff] }
 0x33c   : > { %2636 = vst.msk [vmem:[#allocation3 + $0x170] sm:$0xff] %vm2171_vm15, %v2604_v51  ;;  %3220 = vmatprep.mubr.bf16.mxu1 %v2872_v59  ;;  %v7072_v59 = vld [vmem:[%s9631_s5 + $0x28] sm:$0xff]  }
 0x33e   : > { %v8310_v61 = vpop.f32.mrb[36].mxu0 }
 0x33f   : > { %v2732_v3 = vpop.permute.xlu0 %2731  ;;  %v8312_v36 = vpop.f32.mrb[37].mxu0 }
 0x340   : > { %2764 = vst.msk [vmem:[#allocation3 + $0x170] sm:$0xff] %vm2300_vm1, %v2732_v3  ;;  %v8315_v6 = vpop.f32.mrb[38].mxu0 }
 0x341   : > { %3221 = vmatmul.mubr.bf16.gmra.mrb[72].mxu1 %v2871_v60  ;;  %v8317_v7 = vpop.f32.mrb[39].mxu0 }
 0x343   : > { %v8327_v0 = vpop.permute.xlu0 %4196 }
 0x347   : > { %v2875_v9 = vld [vmem:[#allocation3 + $0x170] sm:$0xff] }
 0x348   : > { %3228 = vmatprep.mubr.bf16.mxu1 %v2875_v9 }
 0x349   : > { %3229 = vmatmul.mubr.bf16.gmra.mrb[76].mxu1 %v2874_v8 }
 0x35f   : > { %v8319_v18 = vpop.f32.mrb[40].mxu0 }
 0x360   : > { %v8321_v23 = vpop.f32.mrb[41].mxu0 }
 0x361   : > { %v8323_v10 = vpop.f32.mrb[42].mxu0 }
 0x362   : > { %v8325_v32 = vpop.f32.mrb[43].mxu0 }
 0x37e   : > { %v8376_v3 = vpop.f32.mrb[44].mxu0 }
 0x37f   : > { %v8378_v8 = vpop.f32.mrb[45].mxu0 }
 0x387   : > { %v4039_v11 = vpop.permute.xlu0 %4038 }
 0x388   : > { %v3847_v22 = vpop.permute.xlu1 %3846  ;;  %4086 = vst.msk [vmem:[#allocation3 + $0x8] sm:$0xff] %vm2042_vm14, %v4039_v11 }
 0x389   : > { %3894 = vst.msk [vmem:[#allocation3] sm:$0xff] %vm2300_vm1, %v3847_v22  ;;  %v8382_v22 = vpop.f32.mrb[46].mxu0 }
 0x38a   : > { %v8387_v24 = vpop.f32.mrb[47].mxu0 }
 0x38c   : > { %v3593_v50 = vpop.permute.xlu1 %3592 }
 0x38d   : > { %3639 = vst.msk [vmem:[#allocation3 + $0x18] sm:$0xff] %vm2042_vm14, %v3593_v50  ;;  %v7073_v50 = vld [vmem:[%s9631_s5 + $0x70] sm:$0xff]  }
 0x390   : > { %v3721_v57 = vpop.permute.xlu1 %3720 }
 0x391   : > { %3767 = vst.msk [vmem:[#allocation3 + $0x18] sm:$0xff] %vm2171_vm15, %v3721_v57  ;;  %v7074_v57 = vld [vmem:[%s9631_s5 + $0x30] sm:$0xff]  }
 0x398   : > { %v6661_v29 = vpop.f32.mrb[20].mxu1 }
 0x399   : > { %v6662_v31 = vpop.f32.mrb[21].mxu1 }
 0x39a   : > { %v6663_v38 = vadd.f32 %v6662_v31, %v6661_v29  ;;  %v6664_v48 = vpop.f32.mrb[22].mxu1 }
 0x39b   : > { %v6665_v62 = vpop.f32.mrb[23].mxu1 }
 0x39c   : > { %v3119_v55 = vadd.f32 %v6663_v38, %v8250_v17  ;;  %v6666_v63 = vadd.f32 %v6665_v62, %v6664_v48 }
 0x39e   : > { %v3280_v42 = vadd.f32 %v8108_v46, %v3119_v55  ;;  %v3122_v56 = vadd.f32 %v6666_v63, %v8250_v17  ;;  %v7071_v46 = vld [vmem:[%s9631_s5 + $0x68] sm:$0xff]  }
 0x39f   : > { %6779 = vmatprep.subr.bf16.mxu0 %v7071_v46 }
 0x3a0   : > { %v3400_v35 = vmax.f32 %v3280_v42, 0.0  ;;  %v3283_v40 = vadd.f32 %v8116_v47, %v3122_v56  ;;  %v6667_v43 = vpop.f32.mrb[24].mxu1  ;;  %6780 = vmatpush3.bf16.msra.mxu0 %v7072_v59  ;;  %v7076_v42 = vld [vmem:[%s9631_s5 + $0x38] sm:$0xff]  }
 0x3a1   : > { %v6668_v33 = vpop.f32.mrb[25].mxu1  ;;  %6781 = vmatprep.subr.bf16.mxu0 %v7073_v50 }
 0x3a2   : > { %3432 = vst.msk [vmem:[#allocation2 + $0x31] sm:$0xff] %vm336_vm0, %v3400_v35  ;;  %v3401_v45 = vmax.f32 %v3283_v40, 0.0  ;;  %v6669_v54 = vadd.f32 %v6668_v33, %v6667_v43  ;;  %v6670_v49 = vpop.f32.mrb[26].mxu1 }
 0x3a3   : > { %v6671_v51 = vpop.f32.mrb[27].mxu1 }
 0x3a4   : > { %3433 = vst.msk [vmem:[#allocation2 + $0x39] sm:$0xff] %vm336_vm0, %v3401_v45  ;;  %v3127_v47 = vadd.f32 %v6669_v54, %v8250_v17  ;;  %v6672_v60 = vadd.f32 %v6671_v51, %v6670_v49  ;;  %6782 = vmatpush3.bf16.msra.mxu0 %v7074_v57 }
 0x3a5   : > { %6783 = vmatprep.subr.bf16.mxu0 %v7075_v27 }
 0x3a6   : > { %v3288_v9 = vadd.f32 %v8170_v13, %v3127_v47  ;;  %v3130_v11 = vadd.f32 %v6672_v60, %v8250_v17 }
 0x3a8   : > { %v3402_v16 = vmax.f32 %v3288_v9, 0.0  ;;  %v3291_v21 = vadd.f32 %v8176_v37, %v3130_v11  ;;  %6784 = vmatpush3.bf16.msra.mxu0 %v7076_v42 }
 0x3a9   : > { %v4102_v25 = vld [vmem:[#allocation2 + $0x30] sm:$0xff] }
 0x3aa   : > { %3434 = vst.msk [vmem:[#allocation2 + $0x49] sm:$0xff] %vm336_vm0, %v3402_v16  ;;  %v3403_v13 = vmax.f32 %v3291_v21, 0.0  ;;  %v3466_v39 = vld [vmem:[#allocation2 + $0x30] sm:$0xff] }
 0x3ab   : > { %v4103_v29 = vld [vmem:[#allocation2 + $0x38] sm:$0xff] }
 0x3ac   : > { %v4358_v30 = vld [vmem:[#allocation2 + $0x32] sm:$0xff]  ;;  %3435 = vst.msk [vmem:[#allocation2 + $0x51] sm:$0xff] %vm336_vm0, %v3403_v13  ;;  %v4134_v38 = vpack.c.bf16 %v4103_v29, %v4102_v25  ;;  %v4359_v48 = vld [vmem:[#allocation2 + $0x3a] sm:$0xff] }
 0x3ad   : > { %v3912_v31 = vld [vmem:[#allocation2 + $0x31] sm:$0xff]  ;;  %v3913_v37 = vld [vmem:[#allocation2 + $0x39] sm:$0xff]  ;;  %v4390_v20 = vpack.c.bf16 %v4359_v48, %v4358_v30 }
 0x3ae   : > { %v3467_v62 = vld [vmem:[#allocation2 + $0x38] sm:$0xff]  ;;  %v3943_v63 = vpack.c.bf16 %v3913_v37, %v3912_v31  ;;  %4166 = vrot.lane.b32.xlu0 %v4134_v38, %s7105_s30  ;;  %3848 = vrot.lane.b32.xlu1 %v4134_v38, %s7106_s27 }
 0x3af   : > { %v4231_v41 = vld [vmem:[#allocation2 + $0x39] sm:$0xff]  ;;  %v3496_v55 = vpack.c.bf16 %v3467_v62, %v3466_v39  ;;  %v4230_v56 = vld [vmem:[#allocation2 + $0x31] sm:$0xff]  ;;  %4406 = vst.msk [vmem:[#allocation3 + $0x10] sm:$0xff] %vm336_vm0, %v4390_v20 }
 0x3b0   : > { %3959 = vst.msk [vmem:[#allocation3 + $0x20] sm:$0xff] %vm336_vm0, %v3943_v63  ;;  %v4262_v44 = vpack.c.bf16 %v4231_v41, %v4230_v56 }
 0x3b1   : > { %3512 = vst.msk [vmem:[#allocation3 + $0x30] sm:$0xff] %vm336_vm0, %v3496_v55  ;;  %v3468_v43 = vld [vmem:[#allocation2 + $0x48] sm:$0xff] }
 0x3b2   : > { %4294 = vrot.lane.b32.xlu0 %v4262_v44, %s7106_s27  ;;  %3594 = vrot.lane.b32.xlu1 %v4262_v44, %s7104_s29  ;;  %v3914_v49 = vld [vmem:[#allocation2 + $0x49] sm:$0xff] }
 0x3b3   : > { %v4360_v35 = vld [vmem:[#allocation2 + $0x4a] sm:$0xff]  ;;  %v4361_v40 = vld [vmem:[#allocation2 + $0x52] sm:$0xff] }
 0x3b4   : > { %v6673_v33 = vpop.f32.mrb[28].mxu1  ;;  %v4391_v45 = vpack.c.bf16 %v4361_v40, %v4360_v35  ;;  %v3469_v54 = vld [vmem:[#allocation2 + $0x50] sm:$0xff]  ;;  %v4104_v16 = vld [vmem:[#allocation2 + $0x48] sm:$0xff] }
 0x3b5   : > { %v3915_v46 = vld [vmem:[#allocation2 + $0x51] sm:$0xff]  ;;  %v6674_v51 = vpop.f32.mrb[29].mxu1  ;;  %v3497_v47 = vpack.c.bf16 %v3469_v54, %v3468_v43  ;;  %v4232_v30 = vld [vmem:[#allocation2 + $0x49] sm:$0xff] }
 0x3b6   : > { %v4105_v59 = vld [vmem:[#allocation2 + $0x50] sm:$0xff]  ;;  %v3944_v60 = vpack.c.bf16 %v3915_v46, %v3914_v49  ;;  %v6675_v9 = vadd.f32 %v6674_v51, %v6673_v33  ;;  %v6676_v11 = vpop.f32.mrb[30].mxu1  ;;  %v4424_v50 = vld [vmem:[#allocation3 + $0x10] sm:$0xff]  ;;  %4040 = vrot.lane.b32.xlu0 %v4390_v20, %s7104_s29  ;;  %3722 = vrot.lane.b32.xlu1 %v4390_v20, %s7105_s30  ;;  %4407 = vst.msk [vmem:[#allocation3 + $0x28] sm:$0xff] %vm336_vm0, %v4391_v45 }
 0x3b7   : > { %6977 = vmatprep.mubr.msk.bf16.mxu1 %vm336_vm0, %v4424_v50  ;;  %v6677_v57 = vpop.f32.mrb[31].mxu1  ;;  %3513 = vst.msk [vmem:[#allocation3 + $0x48] sm:$0xff] %vm336_vm0, %v3497_v47  ;;  %v4135_v25 = vpack.c.bf16 %v4105_v59, %v4104_v16  ;;  %v4233_v39 = vld [vmem:[#allocation2 + $0x51] sm:$0xff] }
 0x3b8   : > { %3960 = vst.msk [vmem:[#allocation3 + $0x38] sm:$0xff] %vm336_vm0, %v3944_v60  ;;  %v3135_v21 = vadd.f32 %v6675_v9, %v8250_v17  ;;  %v6678_v13 = vadd.f32 %v6677_v57, %v6676_v11  ;;  %v4263_v62 = vpack.c.bf16 %v4233_v39, %v4232_v30 }
 0x3ba   : > { %v3296_v27 = vadd.f32 %v8167_v12, %v3135_v21  ;;  %v3138_v29 = vadd.f32 %v6678_v13, %v8250_v17  ;;  %4168 = vrot.lane.b32.xlu0 %v4135_v25, %s7105_s30  ;;  %3850 = vrot.lane.b32.xlu1 %v4135_v25, %s7106_s27 }
 0x3bc   : > { %v3404_v31 = vmax.f32 %v3296_v27, 0.0  ;;  %v3299_v38 = vadd.f32 %v8173_v15, %v3138_v29  ;;  %v6679_v48 = vpop.f32.mrb[32].mxu1 }
 0x3bd   : > { %v6680_v37 = vpop.f32.mrb[33].mxu1  ;;  %v4427_v41 = vld [vmem:[#allocation3 + $0x28] sm:$0xff] }
 0x3be   : > { %3436 = vst.msk [vmem:[#allocation2 + $0x61] sm:$0xff] %vm336_vm0, %v3404_v31  ;;  %v3405_v20 = vmax.f32 %v3299_v38, 0.0  ;;  %v6681_v55 = vadd.f32 %v6680_v37, %v6679_v48  ;;  %v6682_v63 = vpop.f32.mrb[34].mxu1  ;;  %6978 = vmatmul.mubr.msk.bf16.vlgmr.msra.gmra.mrb[80].mxu1 %vm336_vm0, %v4427_v41  ;;  %4296 = vrot.lane.b32.xlu0 %v4263_v62, %s7106_s27 }
 0x3bf   : > { %3596 = vrot.lane.b32.xlu1 %v4263_v62, %s7104_s29  ;;  %v6683_v12 = vpop.f32.mrb[35].mxu1 }
 0x3c0   : > { %3437 = vst.msk [vmem:[#allocation2 + $0x69] sm:$0xff] %vm336_vm0, %v3405_v20  ;;  %v3143_v15 = vadd.f32 %v6681_v55, %v8250_v17  ;;  %v6684_v42 = vadd.f32 %v6683_v12, %v6682_v63 }
 0x3c2   : > { %v3304_v56 = vadd.f32 %v8213_v1, %v3143_v15  ;;  %v3146_v44 = vadd.f32 %v6684_v42, %v8250_v17  ;;  %4042 = vrot.lane.b32.xlu0 %v4391_v45, %s7104_s29 }
 0x3c3   : > { %3724 = vrot.lane.b32.xlu1 %v4391_v45, %s7105_s30 }
 0x3c4   : > { %v3406_v35 = vmax.f32 %v3304_v56, 0.0  ;;  %v3307_v40 = vadd.f32 %v8217_v4, %v3146_v44 }
 0x3c5   : > { %v4106_v33 = vld [vmem:[#allocation2 + $0x60] sm:$0xff] }
 0x3c6   : > { %3438 = vst.msk [vmem:[#allocation2 + $0x79] sm:$0xff] %vm336_vm0, %v3406_v35  ;;  %v3407_v43 = vmax.f32 %v3307_v40, 0.0  ;;  %v3470_v54 = vld [vmem:[#allocation2 + $0x60] sm:$0xff] }
 0x3c7   : > { %v4107_v49 = vld [vmem:[#allocation2 + $0x68] sm:$0xff] }
 0x3c8   : > { %v4362_v46 = vld [vmem:[#allocation2 + $0x62] sm:$0xff]  ;;  %3439 = vst.msk [vmem:[#allocation2 + $0x81] sm:$0xff] %vm336_vm0, %v3407_v43  ;;  %v4136_v1 = vpack.c.bf16 %v4107_v49, %v4106_v33  ;;  %v4363_v59 = vld [vmem:[#allocation2 + $0x6a] sm:$0xff] }
 0x3c9   : > { %v3916_v51 = vld [vmem:[#allocation2 + $0x61] sm:$0xff]  ;;  %v3917_v60 = vld [vmem:[#allocation2 + $0x69] sm:$0xff]  ;;  %v4392_v11 = vpack.c.bf16 %v4363_v59, %v4362_v46 }
 0x3ca   : > { %v3471_v47 = vld [vmem:[#allocation2 + $0x68] sm:$0xff]  ;;  %v3945_v50 = vpack.c.bf16 %v3917_v60, %v3916_v51  ;;  %4170 = vrot.lane.b32.xlu0 %v4136_v1, %s7105_s30  ;;  %3852 = vrot.lane.b32.xlu1 %v4136_v1, %s7106_s27 }
 0x3cb   : > { %v4235_v9 = vld [vmem:[#allocation2 + $0x69] sm:$0xff]  ;;  %v3498_v45 = vpack.c.bf16 %v3471_v47, %v3470_v54  ;;  %v4234_v4 = vld [vmem:[#allocation2 + $0x61] sm:$0xff]  ;;  %4408 = vst.msk [vmem:[#allocation3 + $0x40] sm:$0xff] %vm336_vm0, %v4392_v11 }
 0x3cc   : > { %3961 = vst.msk [vmem:[#allocation3 + $0x50] sm:$0xff] %vm336_vm0, %v3945_v50  ;;  %v6685_v57 = vpop.f32.mrb[36].mxu1  ;;  %v4264_v16 = vpack.c.bf16 %v4235_v9, %v4234_v4 }
 0x3cd   : > { %3514 = vst.msk [vmem:[#allocation3 + $0x60] sm:$0xff] %vm336_vm0, %v3498_v45  ;;  %v6686_v21 = vpop.f32.mrb[37].mxu1  ;;  %v3472_v30 = vld [vmem:[#allocation2 + $0x78] sm:$0xff] }
 0x3ce   : > { %v6687_v13 = vadd.f32 %v6686_v21, %v6685_v57  ;;  %v6688_v25 = vpop.f32.mrb[38].mxu1  ;;  %4298 = vrot.lane.b32.xlu0 %v4264_v16, %s7106_s27  ;;  %3598 = vrot.lane.b32.xlu1 %v4264_v16, %s7104_s29  ;;  %v3918_v37 = vld [vmem:[#allocation2 + $0x79] sm:$0xff] }
 0x3cf   : > { %v6689_v39 = vpop.f32.mrb[39].mxu1  ;;  %v4364_v27 = vld [vmem:[#allocation2 + $0x7a] sm:$0xff]  ;;  %v4365_v29 = vld [vmem:[#allocation2 + $0x82] sm:$0xff] }
 0x3d0   : > { %v3151_v31 = vadd.f32 %v6687_v13, %v8250_v17  ;;  %v6690_v38 = vadd.f32 %v6689_v39, %v6688_v25  ;;  %v4393_v48 = vpack.c.bf16 %v4365_v29, %v4364_v27  ;;  %v3473_v62 = vld [vmem:[#allocation2 + $0x80] sm:$0xff]  ;;  %v4108_v56 = vld [vmem:[#allocation2 + $0x78] sm:$0xff] }
 0x3d1   : > { %v3919_v41 = vld [vmem:[#allocation2 + $0x81] sm:$0xff]  ;;  %v3499_v55 = vpack.c.bf16 %v3473_v62, %v3472_v30  ;;  %v4236_v1 = vld [vmem:[#allocation2 + $0x79] sm:$0xff] }
 0x3d2   : > { %v4109_v20 = vld [vmem:[#allocation2 + $0x80] sm:$0xff]  ;;  %v3946_v63 = vpack.c.bf16 %v3919_v41, %v3918_v37  ;;  %v3312_v12 = vadd.f32 %v8210_v14, %v3151_v31  ;;  %v3154_v15 = vadd.f32 %v6690_v38, %v8250_v17  ;;  %v4430_v42 = vld [vmem:[#allocation3 + $0x40] sm:$0xff]  ;;  %4044 = vrot.lane.b32.xlu0 %v4392_v11, %s7104_s29  ;;  %3726 = vrot.lane.b32.xlu1 %v4392_v11, %s7105_s30 }
 0x3d3   : > { %4409 = vst.msk [vmem:[#allocation3 + $0x58] sm:$0xff] %vm336_vm0, %v4393_v48  ;;  %6981 = vmatprep.mubr.msk.bf16.mxu1 %vm336_vm0, %v4430_v42  ;;  %3515 = vst.msk [vmem:[#allocation3 + $0x78] sm:$0xff] %vm336_vm0, %v3499_v55  ;;  %v4137_v40 = vpack.c.bf16 %v4109_v20, %v4108_v56  ;;  %v4237_v33 = vld [vmem:[#allocation2 + $0x81] sm:$0xff] }
 0x3d4   : > { %3962 = vst.msk [vmem:[#allocation3 + $0x68] sm:$0xff] %vm336_vm0, %v3946_v63  ;;  %v3408_v44 = vmax.f32 %v3312_v12, 0.0  ;;  %v3315_v35 = vadd.f32 %v8215_v2, %v3154_v15  ;;  %v6691_v14 = vpop.f32.mrb[40].mxu1  ;;  %v4265_v47 = vpack.c.bf16 %v4237_v33, %v4236_v1 }
 0x3d5   : > { %v6692_v43 = vpop.f32.mrb[41].mxu1 }
 0x3d6   : > { %3440 = vst.msk [vmem:[#allocation2 + $0x91] sm:$0xff] %vm336_vm0, %v3408_v44  ;;  %v3409_v54 = vmax.f32 %v3315_v35, 0.0  ;;  %v6693_v49 = vadd.f32 %v6692_v43, %v6691_v14  ;;  %v6694_v46 = vpop.f32.mrb[42].mxu1  ;;  %4172 = vrot.lane.b32.xlu0 %v4137_v40, %s7105_s30  ;;  %3854 = vrot.lane.b32.xlu1 %v4137_v40, %s7106_s27 }
 0x3d7   : > { %v6695_v51 = vpop.f32.mrb[43].mxu1 }
 0x3d8   : > { %3441 = vst.msk [vmem:[#allocation2 + $0x99] sm:$0xff] %vm336_vm0, %v3409_v54  ;;  %v3159_v59 = vadd.f32 %v6693_v49, %v8250_v17  ;;  %v6696_v2 = vadd.f32 %v6695_v51, %v6694_v46 }
 0x3da   : > { %v4433_v60 = vld [vmem:[#allocation3 + $0x58] sm:$0xff]  ;;  %v3320_v9 = vadd.f32 %v8242_v58, %v3159_v59  ;;  %v3162_v11 = vadd.f32 %v6696_v2, %v8250_v17  ;;  %4300 = vrot.lane.b32.xlu0 %v4265_v47, %s7106_s27  ;;  %3600 = vrot.lane.b32.xlu1 %v4265_v47, %s7104_s29 }
 0x3db   : > { %6982 = vmatmul.mubr.msk.bf16.gmra.mrb[84].mxu1 %vm336_vm0, %v4433_v60 }
 0x3dc   : > { %v3410_v45 = vmax.f32 %v3320_v9, 0.0  ;;  %v3323_v50 = vadd.f32 %v8252_v52, %v3162_v11  ;;  %v6697_v4 = vpop.f32.mrb[44].mxu1 }
 0x3dd   : > { %v6698_v57 = vpop.f32.mrb[45].mxu1  ;;  %v4110_v58 = vld [vmem:[#allocation2 + $0x90] sm:$0xff] }
 0x3de   : > { %3442 = vst.msk [vmem:[#allocation2 + $0xa9] sm:$0xff] %vm336_vm0, %v3410_v45  ;;  %v3411_v16 = vmax.f32 %v3323_v50, 0.0  ;;  %v6699_v21 = vadd.f32 %v6698_v57, %v6697_v4  ;;  %v6700_v13 = vpop.f32.mrb[46].mxu1  ;;  %4046 = vrot.lane.b32.xlu0 %v4393_v48, %s7104_s29  ;;  %v3474_v25 = vld [vmem:[#allocation2 + $0x90] sm:$0xff]  ;;  %3728 = vrot.lane.b32.xlu1 %v4393_v48, %s7105_s30 }
 0x3df   : > { %v6701_v39 = vpop.f32.mrb[47].mxu1  ;;  %v4111_v27 = vld [vmem:[#allocation2 + $0x98] sm:$0xff] }
 0x3e0   : > { %v4366_v29 = vld [vmem:[#allocation2 + $0x92] sm:$0xff]  ;;  %3443 = vst.msk [vmem:[#allocation2 + $0xb1] sm:$0xff] %vm336_vm0, %v3411_v16  ;;  %v3167_v52 = vadd.f32 %v6699_v21, %v8250_v17  ;;  %v6702_v31 = vadd.f32 %v6701_v39, %v6700_v13  ;;  %v4138_v38 = vpack.c.bf16 %v4111_v27, %v4110_v58  ;;  %v4367_v62 = vld [vmem:[#allocation2 + $0x9a] sm:$0xff] }
 0x3e1   : > { %v3920_v30 = vld [vmem:[#allocation2 + $0x91] sm:$0xff]  ;;  %v3921_v41 = vld [vmem:[#allocation2 + $0x99] sm:$0xff]  ;;  %v4394_v55 = vpack.c.bf16 %v4367_v62, %v4366_v29 }
 0x3e2   : > { %v3475_v37 = vld [vmem:[#allocation2 + $0x98] sm:$0xff]  ;;  %v3947_v12 = vpack.c.bf16 %v3921_v41, %v3920_v30  ;;  %v3328_v15 = vadd.f32 %v8240_v26, %v3167_v52  ;;  %v3170_v48 = vadd.f32 %v6702_v31, %v8250_v17  ;;  %4174 = vrot.lane.b32.xlu0 %v4138_v38, %s7105_s30  ;;  %3856 = vrot.lane.b32.xlu1 %v4138_v38, %s7106_s27 }
 0x3e3   : > { %v4239_v20 = vld [vmem:[#allocation2 + $0x99] sm:$0xff]  ;;  %v3500_v63 = vpack.c.bf16 %v3475_v37, %v3474_v25  ;;  %v4238_v42 = vld [vmem:[#allocation2 + $0x91] sm:$0xff]  ;;  %4410 = vst.msk [vmem:[#allocation3 + $0x70] sm:$0xff] %vm336_vm0, %v4394_v55 }
 0x3e4   : > { %3963 = vst.msk [vmem:[#allocation3 + $0x80] sm:$0xff] %vm336_vm0, %v3947_v12  ;;  %v3412_v56 = vmax.f32 %v3328_v15, 0.0  ;;  %v3331_v44 = vadd.f32 %v8244_v5, %v3170_v48  ;;  %v6703_v35 = vpop.f32.mrb[48].mxu1  ;;  %v4266_v14 = vpack.c.bf16 %v4239_v20, %v4238_v42 }
 0x3e5   : > { %3516 = vst.msk [vmem:[#allocation3 + $0x90] sm:$0xff] %vm336_vm0, %v3500_v63  ;;  %v6704_v40 = vpop.f32.mrb[49].mxu1  ;;  %v3476_v51 = vld [vmem:[#allocation2 + $0xa8] sm:$0xff] }
 0x3e6   : > { %3444 = vst.msk [vmem:[#allocation2 + $0xc1] sm:$0xff] %vm336_vm0, %v3412_v56  ;;  %v3413_v26 = vmax.f32 %v3331_v44, 0.0  ;;  %v6705_v43 = vadd.f32 %v6704_v40, %v6703_v35  ;;  %v6706_v33 = vpop.f32.mrb[50].mxu1  ;;  %4302 = vrot.lane.b32.xlu0 %v4266_v14, %s7106_s27  ;;  %3602 = vrot.lane.b32.xlu1 %v4266_v14, %s7104_s29  ;;  %v3922_v47 = vld [vmem:[#allocation2 + $0xa9] sm:$0xff] }
 0x3e7   : > { %v6707_v54 = vpop.f32.mrb[51].mxu1  ;;  %v4368_v49 = vld [vmem:[#allocation2 + $0xaa] sm:$0xff]  ;;  %v4369_v46 = vld [vmem:[#allocation2 + $0xb2] sm:$0xff] }
 0x3e8   : > { %3445 = vst.msk [vmem:[#allocation2 + $0xc9] sm:$0xff] %vm336_vm0, %v3413_v26  ;;  %v3175_v5 = vadd.f32 %v6705_v43, %v8250_v17  ;;  %v6708_v1 = vadd.f32 %v6707_v54, %v6706_v33  ;;  %v8479_v59 = vpack.c.bf16 %v4369_v46, %v4368_v49  ;;  %v3477_v2 = vld [vmem:[#allocation2 + $0xb0] sm:$0xff]  ;;  %v4112_v16 = vld [vmem:[#allocation2 + $0xa8] sm:$0xff] }
 0x3e9   : > { %v3923_v60 = vld [vmem:[#allocation2 + $0xb1] sm:$0xff]  ;;  %v3501_v11 = vpack.c.bf16 %v3477_v2, %v3476_v51  ;;  %v4240_v52 = vld [vmem:[#allocation2 + $0xa9] sm:$0xff] }
 0x3ea   : > { %v4113_v9 = vld [vmem:[#allocation2 + $0xb0] sm:$0xff]  ;;  %v3948_v45 = vpack.c.bf16 %v3923_v60, %v3922_v47  ;;  %v3336_v50 = vadd.f32 %v8282_v34, %v3175_v5  ;;  %v3178_v4 = vadd.f32 %v6708_v1, %v8250_v17  ;;  %v4436_v57 = vld [vmem:[#allocation3 + $0x70] sm:$0xff]  ;;  %4048 = vrot.lane.b32.xlu0 %v4394_v55, %s7104_s29  ;;  %4411 = vst.msk [vmem:[#allocation3 + $0x88] sm:$0xff] %vm336_vm0, %v8479_v59 }
 0x3eb   : > { %6985 = vmatprep.mubr.msk.bf16.mxu1 %vm336_vm0, %v4436_v57  ;;  %3730 = vrot.lane.b32.xlu1 %v4394_v55, %s7105_s30  ;;  %3517 = vst.msk [vmem:[#allocation3 + $0xa8] sm:$0xff] %vm336_vm0, %v3501_v11  ;;  %v4139_v58 = vpack.c.bf16 %v4113_v9, %v4112_v16  ;;  %v4241_v39 = vld [vmem:[#allocation2 + $0xb1] sm:$0xff] }
 0x3ec   : > { %3964 = vst.msk [vmem:[#allocation3 + $0x98] sm:$0xff] %vm336_vm0, %v3948_v45  ;;  %v3414_v21 = vmax.f32 %v3336_v50, 0.0  ;;  %v3339_v34 = vadd.f32 %v8288_v28, %v3178_v4  ;;  %v6709_v13 = vpop.f32.mrb[52].mxu1  ;;  %v4267_v20 = vpack.c.bf16 %v4241_v39, %v4240_v52 }
 0x3ed   : > { %v6710_v25 = vpop.f32.mrb[53].mxu1  ;;  %v3478_v37 = vld [vmem:[#allocation2 + $0xc0] sm:$0xff] }
 0x3ee   : > { %3446 = vst.msk [vmem:[#allocation2 + $0xd9] sm:$0xff] %vm336_vm0, %v3414_v21  ;;  %v3415_v27 = vmax.f32 %v3339_v34, 0.0  ;;  %v6711_v29 = vadd.f32 %v6710_v25, %v6709_v13  ;;  %v6712_v30 = vpop.f32.mrb[54].mxu1  ;;  %4176 = vrot.lane.b32.xlu0 %v4139_v58, %s7105_s30  ;;  %v3924_v12 = vld [vmem:[#allocation2 + $0xc1] sm:$0xff] }
 0x3ef   : > { %3858 = vrot.lane.b32.xlu1 %v4139_v58, %s7106_s27  ;;  %v6713_v31 = vpop.f32.mrb[55].mxu1  ;;  %v4370_v38 = vld [vmem:[#allocation2 + $0xc2] sm:$0xff]  ;;  %v4371_v62 = vld [vmem:[#allocation2 + $0xca] sm:$0xff] }
 0x3f0   : > { %3447 = vst.msk [vmem:[#allocation2 + $0xe1] sm:$0xff] %vm336_vm0, %v3415_v27  ;;  %v3183_v28 = vadd.f32 %v6711_v29, %v8250_v17  ;;  %v6714_v41 = vadd.f32 %v6713_v31, %v6712_v30  ;;  %v8496_v55 = vpack.c.bf16 %v4371_v62, %v4370_v38  ;;  %v3479_v63 = vld [vmem:[#allocation2 + $0xc8] sm:$0xff]  ;;  %v4114_v46 = vld [vmem:[#allocation2 + $0xc0] sm:$0xff] }
 0x3f1   : > { %v3925_v15 = vld [vmem:[#allocation2 + $0xc9] sm:$0xff]  ;;  %v4439_v48 = vld [vmem:[#allocation3 + $0x88] sm:$0xff]  ;;  %v3502_v42 = vpack.c.bf16 %v3479_v63, %v3478_v37  ;;  %v4242_v13 = vld [vmem:[#allocation2 + $0xc1] sm:$0xff] }
 0x3f2   : > { %v3949_v56 = vpack.c.bf16 %v3925_v15, %v3924_v12  ;;  %v3344_v44 = vadd.f32 %v8280_v19, %v3183_v28  ;;  %v3186_v35 = vadd.f32 %v6714_v41, %v8250_v17  ;;  %6986 = vmatmul.mubr.msk.bf16.gmra.mrb[88].mxu1 %vm336_vm0, %v4439_v48  ;;  %4304 = vrot.lane.b32.xlu0 %v4267_v20, %s7106_s27  ;;  %v4115_v43 = vld [vmem:[#allocation2 + $0xc8] sm:$0xff] }
 0x3f3   : > { %4412 = vst.msk [vmem:[#allocation3 + $0xa0] sm:$0xff] %vm336_vm0, %v8496_v55  ;;  %3604 = vrot.lane.b32.xlu1 %v4267_v20, %s7104_s29  ;;  %3518 = vst.msk [vmem:[#allocation3 + $0xc0] sm:$0xff] %vm336_vm0, %v3502_v42  ;;  %v4140_v60 = vpack.c.bf16 %v4115_v43, %v4114_v46  ;;  %v4243_v57 = vld [vmem:[#allocation2 + $0xc9] sm:$0xff] }
 0x3f4   : > { %3965 = vst.msk [vmem:[#allocation3 + $0xb0] sm:$0xff] %vm336_vm0, %v3949_v56  ;;  %v3416_v14 = vmax.f32 %v3344_v44, 0.0  ;;  %v3347_v40 = vadd.f32 %v8285_v53, %v3186_v35  ;;  %v6715_v26 = vpop.f32.mrb[56].mxu1 }
 0x3f5   : > { %v6716_v19 = vpop.f32.mrb[57].mxu1  ;;  %v4244_v2 = vld [vmem:[#allocation2 + $0xd9] sm:$0xff] }
 0x3f6   : > { %3448 = vst.msk [vmem:[#allocation2 + $0xf1] sm:$0xff] %vm336_vm0, %v3416_v14  ;;  %v3417_v33 = vmax.f32 %v3347_v40, 0.0  ;;  %v6717_v54 = vadd.f32 %v6716_v19, %v6715_v26  ;;  %v6718_v49 = vpop.f32.mrb[58].mxu1  ;;  %4050 = vrot.lane.b32.xlu0 %v8479_v59, %s7104_s29  ;;  %v3480_v45 = vld [vmem:[#allocation2 + $0xd8] sm:$0xff] }
 0x3f7   : > { %3732 = vrot.lane.b32.xlu1 %v8479_v59, %s7105_s30  ;;  %v6719_v51 = vpop.f32.mrb[59].mxu1  ;;  %v4372_v5 = vld [vmem:[#allocation2 + $0xda] sm:$0xff]  ;;  %v4373_v1 = vld [vmem:[#allocation2 + $0xe2] sm:$0xff] }
 0x3f8   : > { %3449 = vst.msk [vmem:[#allocation2 + $0xf9] sm:$0xff] %vm336_vm0, %v3417_v33  ;;  %v3191_v53 = vadd.f32 %v6717_v54, %v8250_v17  ;;  %v6720_v47 = vadd.f32 %v6719_v51, %v6718_v49  ;;  %v8515_v9 = vpack.c.bf16 %v4373_v1, %v4372_v5  ;;  %v4245_v11 = vld [vmem:[#allocation2 + $0xe1] sm:$0xff]  ;;  %v4116_v14 = vld [vmem:[#allocation2 + $0xd8] sm:$0xff] }
 0x3f9   : > { %v3481_v50 = vld [vmem:[#allocation2 + $0xe0] sm:$0xff]  ;;  %v8517_v16 = vpack.c.bf16 %v4245_v11, %v4244_v2 }
 0x3fa   : > { %v4442_v4 = vld [vmem:[#allocation3 + $0xa0] sm:$0xff]  ;;  %v3503_v59 = vpack.c.bf16 %v3481_v50, %v3480_v45  ;;  %v3352_v21 = vadd.f32 %v8312_v36, %v3191_v53  ;;  %v3194_v34 = vadd.f32 %v6720_v47, %v8250_v17  ;;  %4178 = vrot.lane.b32.xlu0 %v4140_v60, %s7105_s30  ;;  %4413 = vst.msk [vmem:[#allocation3 + $0xb8] sm:$0xff] %vm336_vm0, %v8515_v9  ;;  %v4117_v42 = vld [vmem:[#allocation2 + $0xe0] sm:$0xff] }
 0x3fb   : > { %6989 = vmatprep.mubr.msk.bf16.mxu1 %vm336_vm0, %v4442_v4  ;;  %3860 = vrot.lane.b32.xlu1 %v4140_v60, %s7106_s27  ;;  %3966 = vst.msk [vmem:[#allocation3 + $0xc8] sm:$0xff] %vm336_vm0, %v8517_v16  ;;  %v4268_v17 = vpack.c.bf16 %v4243_v57, %v4242_v13  ;;  %v4141_v19 = vpack.c.bf16 %v4117_v42, %v4116_v14 }
 0x3fc   : > { %3519 = vst.msk [vmem:[#allocation3 + $0xd8] sm:$0xff] %vm336_vm0, %v3503_v59  ;;  %v3418_v58 = vmax.f32 %v3352_v21, 0.0  ;;  %v3355_v36 = vadd.f32 %v8317_v7, %v3194_v34  ;;  %v6721_v25 = vpop.f32.mrb[60].mxu1  ;;  %v8537_v7 = vld [vmem:[%s9630_s4] ss:$0 sm:$0xff] }
 0x3fd   : > { %v6722_v39 = vpop.f32.mrb[61].mxu1  ;;  %v4118_v52 = vld [vmem:[#allocation2 + $0xf0] sm:$0xff] }
 0x3fe   : > { %3450 = vst.msk [vmem:[#allocation2 + $0x109] sm:$0xff] %vm336_vm0, %v3418_v58  ;;  %v3419_v27 = vmax.f32 %v3355_v36, 0.0  ;;  %v6723_v29 = vadd.f32 %v6722_v39, %v6721_v25  ;;  %v6724_v30 = vpop.f32.mrb[62].mxu1  ;;  %4306 = vrot.lane.b32.xlu0 %v4268_v17, %s7106_s27  ;;  %v4246_v12 = vld [vmem:[#allocation2 + $0xf1] sm:$0xff] }
 0x3ff   : > { %3606 = vrot.lane.b32.xlu1 %v4268_v17, %s7104_s29  ;;  %v6725_v31 = vpop.f32.mrb[63].mxu1  ;;  %v4374_v38 = vld [vmem:[#allocation2 + $0xf2] sm:$0xff]  ;;  %v4375_v62 = vld [vmem:[#allocation2 + $0xfa] sm:$0xff] }
 0x400   : > { %v4119_v37 = vld [vmem:[#allocation2 + $0xf8] sm:$0xff]  ;;  %3451 = vst.msk [vmem:[#allocation2 + $0x111] sm:$0xff] %vm336_vm0, %v3419_v27  ;;  %v3199_v28 = vadd.f32 %v8537_v7, %v6723_v29  ;;  %v6726_v41 = vadd.f32 %v6725_v31, %v6724_v30  ;;  %v8540_v20 = vpack.c.bf16 %v4375_v62, %v4374_v38 }
 0x401   : > { %v8542_v63 = vpack.c.bf16 %v4119_v37, %v4118_v52  ;;  %v4247_v15 = vld [vmem:[#allocation2 + $0xf9] sm:$0xff]  ;;  %v4445_v48 = vld [vmem:[#allocation3 + $0xb8] sm:$0xff] }
 0x402   : > { %v8544_v56 = vpack.c.bf16 %v4247_v15, %v4246_v12  ;;  %v3360_v44 = vadd.f32 %v8310_v61, %v3199_v28  ;;  %v3202_v35 = vadd.f32 %v8537_v7, %v6726_v41  ;;  %6990 = vmatmul.mubr.msk.bf16.gmra.mrb[92].mxu1 %vm336_vm0, %v4445_v48  ;;  %4052 = vrot.lane.b32.xlu0 %v8496_v55, %s7104_s29 }
 0x403   : > { %4414 = vst.msk [vmem:[#allocation3 + $0xd0] sm:$0xff] %vm336_vm0, %v8540_v20  ;;  %3520 = vst.msk [vmem:[#allocation3 + $0xf0] sm:$0xff] %vm336_vm0, %v8542_v63  ;;  %3734 = vrot.lane.b32.xlu1 %v8496_v55, %s7105_s30 }
 0x404   : > { %3967 = vst.msk [vmem:[#allocation3 + $0xe0] sm:$0xff] %vm336_vm0, %v8544_v56  ;;  %v3420_v61 = vmax.f32 %v3360_v44, 0.0  ;;  %v3363_v40 = vadd.f32 %v8315_v6, %v3202_v35  ;;  %v6727_v26 = vpop.f32.mrb[64].mxu1 }
 0x405   : > { %v6728_v43 = vpop.f32.mrb[65].mxu1  ;;  %v4120_v46 = vld [vmem:[#allocation2 + $0x108] sm:$0xff] }
 0x406   : > { %3452 = vst.msk [vmem:[#allocation2 + $0x121] sm:$0xff] %vm336_vm0, %v3420_v61  ;;  %v3421_v33 = vmax.f32 %v3363_v40, 0.0  ;;  %v6729_v54 = vadd.f32 %v6728_v43, %v6727_v26  ;;  %v6730_v49 = vpop.f32.mrb[66].mxu1  ;;  %4180 = vrot.lane.b32.xlu0 %v4141_v19, %s7105_s30  ;;  %v4248_v60 = vld [vmem:[#allocation2 + $0x109] sm:$0xff] }
 0x407   : > { %3862 = vrot.lane.b32.xlu1 %v4141_v19, %s7106_s27  ;;  %v6731_v55 = vpop.f32.mrb[67].mxu1  ;;  %v4376_v51 = vld [vmem:[#allocation2 + $0x10a] sm:$0xff]  ;;  %v4377_v5 = vld [vmem:[#allocation2 + $0x112] sm:$0xff] }
 0x408   : > { %v4121_v1 = vld [vmem:[#allocation2 + $0x110] sm:$0xff]  ;;  %3453 = vst.msk [vmem:[#allocation2 + $0x129] sm:$0xff] %vm336_vm0, %v3421_v33  ;;  %v3207_v6 = vadd.f32 %v8537_v7, %v6729_v54  ;;  %v6732_v2 = vadd.f32 %v6731_v55, %v6730_v49  ;;  %v8565_v53 = vpack.c.bf16 %v4377_v5, %v4376_v51 }
 0x409   : > { %v8567_v47 = vpack.c.bf16 %v4121_v1, %v4120_v46  ;;  %v4249_v11 = vld [vmem:[#allocation2 + $0x111] sm:$0xff] }
 0x40a   : > { %v4448_v45 = vld [vmem:[#allocation3 + $0xd0] sm:$0xff]  ;;  %v8569_v50 = vpack.c.bf16 %v4249_v11, %v4248_v60  ;;  %v3368_v4 = vadd.f32 %v8321_v23, %v3207_v6  ;;  %v3210_v57 = vadd.f32 %v8537_v7, %v6732_v2  ;;  %4308 = vrot.lane.b32.xlu0 %v8517_v16, %s7106_s27  ;;  %4415 = vst.msk [vmem:[#allocation3 + $0xe8] sm:$0xff] %vm336_vm0, %v8565_v53 }
 0x40b   : > { %6993 = vmatprep.mubr.msk.bf16.mxu1 %vm336_vm0, %v4448_v45  ;;  %3521 = vst.msk [vmem:[#allocation3 + $0x108] sm:$0xff] %vm336_vm0, %v8567_v47  ;;  %3608 = vrot.lane.b32.xlu1 %v8517_v16, %s7104_s29 }
 0x40c   : > { %3968 = vst.msk [vmem:[#allocation3 + $0xf8] sm:$0xff] %vm336_vm0, %v8569_v50  ;;  %v3422_v23 = vmax.f32 %v3368_v4, 0.0  ;;  %v3371_v59 = vadd.f32 %v8325_v32, %v3210_v57  ;;  %v6733_v21 = vpop.f32.mrb[68].mxu1 }
 0x40d   : > { %v6734_v34 = vpop.f32.mrb[69].mxu1  ;;  %v4122_v25 = vld [vmem:[#allocation2 + $0x120] sm:$0xff] }
 0x40e   : > { %3454 = vst.msk [vmem:[#allocation2 + $0x139] sm:$0xff] %vm336_vm0, %v3422_v23  ;;  %v3423_v13 = vmax.f32 %v3371_v59, 0.0  ;;  %v6735_v58 = vadd.f32 %v6734_v34, %v6733_v21  ;;  %v6736_v36 = vpop.f32.mrb[70].mxu1  ;;  %4054 = vrot.lane.b32.xlu0 %v8515_v9, %s7104_s29  ;;  %v4250_v31 = vld [vmem:[#allocation2 + $0x121] sm:$0xff] }
 0x40f   : > { %3736 = vrot.lane.b32.xlu1 %v8515_v9, %s7105_s30  ;;  %v6737_v16 = vpop.f32.mrb[71].mxu1  ;;  %v4378_v17 = vld [vmem:[#allocation2 + $0x122] sm:$0xff]  ;;  %v4379_v39 = vld [vmem:[#allocation2 + $0x12a] sm:$0xff] }
 0x410   : > { %v4123_v27 = vld [vmem:[#allocation2 + $0x128] sm:$0xff]  ;;  %3455 = vst.msk [vmem:[#allocation2 + $0x141] sm:$0xff] %vm336_vm0, %v3423_v13  ;;  %v3215_v32 = vadd.f32 %v8537_v7, %v6735_v58  ;;  %v6738_v29 = vadd.f32 %v6737_v16, %v6736_v36  ;;  %v8592_v30 = vpack.c.bf16 %v4379_v39, %v4378_v17 }
 0x411   : > { %v8594_v52 = vpack.c.bf16 %v4123_v27, %v4122_v25  ;;  %v4251_v38 = vld [vmem:[#allocation2 + $0x129] sm:$0xff]  ;;  %v4451_v62 = vld [vmem:[#allocation3 + $0xe8] sm:$0xff] }
 0x412   : > { %v8596_v37 = vpack.c.bf16 %v4251_v38, %v4250_v31  ;;  %v3376_v9 = vadd.f32 %v8319_v18, %v3215_v32  ;;  %v3218_v28 = vadd.f32 %v8537_v7, %v6738_v29  ;;  %6994 = vmatmul.mubr.msk.bf16.gmra.mrb[96].mxu1 %vm336_vm0, %v4451_v62  ;;  %4182 = vrot.lane.b32.xlu0 %v8542_v63, %s7105_s30 }
 0x413   : > { %4416 = vst.msk [vmem:[#allocation3 + $0x100] sm:$0xff] %vm336_vm0, %v8592_v30  ;;  %3522 = vst.msk [vmem:[#allocation3 + $0x120] sm:$0xff] %vm336_vm0, %v8594_v52  ;;  %3864 = vrot.lane.b32.xlu1 %v8542_v63, %s7106_s27 }
 0x414   : > { %3969 = vst.msk [vmem:[#allocation3 + $0x110] sm:$0xff] %vm336_vm0, %v8596_v37  ;;  %v3424_v18 = vmax.f32 %v3376_v9, 0.0  ;;  %v3379_v41 = vadd.f32 %v8323_v10, %v3218_v28  ;;  %v6739_v12 = vpop.f32.mrb[72].mxu1 }
 0x415   : > { %v6740_v15 = vpop.f32.mrb[73].mxu1  ;;  %v4124_v35 = vld [vmem:[#allocation2 + $0x138] sm:$0xff] }
 0x416   : > { %3456 = vst.msk [vmem:[#allocation2 + $0x151] sm:$0xff] %vm336_vm0, %v3424_v18  ;;  %v3425_v48 = vmax.f32 %v3379_v41, 0.0  ;;  %4310 = vrot.lane.b32.xlu0 %v8544_v56, %s7106_s27  ;;  %v6741_v42 = vadd.f32 %v6740_v15, %v6739_v12  ;;  %v6742_v44 = vpop.f32.mrb[74].mxu1  ;;  %v4252_v33 = vld [vmem:[#allocation2 + $0x139] sm:$0xff] }
 0x417   : > { %3610 = vrot.lane.b32.xlu1 %v8544_v56, %s7104_s29  ;;  %v6743_v63 = vpop.f32.mrb[75].mxu1  ;;  %v4380_v14 = vld [vmem:[#allocation2 + $0x13a] sm:$0xff]  ;;  %v4381_v61 = vld [vmem:[#allocation2 + $0x142] sm:$0xff] }
 0x418   : > { %v4125_v40 = vld [vmem:[#allocation2 + $0x140] sm:$0xff]  ;;  %3457 = vst.msk [vmem:[#allocation2 + $0x159] sm:$0xff] %vm336_vm0, %v3425_v48  ;;  %v6744_v10 = vadd.f32 %v6743_v63, %v6742_v44  ;;  %v8618_v26 = vpack.c.bf16 %v4381_v61, %v4380_v14  ;;  %v3223_v19 = vadd.f32 %v8537_v7, %v6741_v42  ;;  %v4422_v44 = vld [vmem:[#allocation3] sm:$0xff] }
 0x419   : > { %v8621_v43 = vpack.c.bf16 %v4125_v40, %v4124_v35  ;;  %v4253_v54 = vld [vmem:[#allocation2 + $0x141] sm:$0xff] }
 0x41a   : > { %v4454_v49 = vld [vmem:[#allocation3 + $0x100] sm:$0xff]  ;;  %v8623_v46 = vpack.c.bf16 %v4253_v54, %v4252_v33  ;;  %4056 = vrot.lane.b32.xlu0 %v8540_v20, %s7104_s29  ;;  %4417 = vst.msk [vmem:[#allocation3 + $0x118] sm:$0xff] %vm336_vm0, %v8618_v26  ;;  %v3384_v56 = vadd.f32 %v8378_v8, %v3223_v19  ;;  %v3226_v55 = vadd.f32 %v8537_v7, %v6744_v10 }
 0x41b   : > { %6997 = vmatprep.mubr.msk.bf16.mxu1 %vm336_vm0, %v4454_v49  ;;  %3523 = vst.msk [vmem:[#allocation3 + $0x138] sm:$0xff] %vm336_vm0, %v8621_v43  ;;  %3738 = vrot.lane.b32.xlu1 %v8540_v20, %s7105_s30 }
 0x41c   : > { %3970 = vst.msk [vmem:[#allocation3 + $0x128] sm:$0xff] %vm336_vm0, %v8623_v46  ;;  %v6745_v51 = vpop.f32.mrb[76].mxu1  ;;  %v3426_v5 = vmax.f32 %v3384_v56, 0.0  ;;  %v3387_v1 = vadd.f32 %v8387_v24, %v3226_v55 }
 0x41d   : > { %v6746_v6 = vpop.f32.mrb[77].mxu1  ;;  %v4126_v11 = vld [vmem:[#allocation2 + $0x150] sm:$0xff] }
 0x41e   : > { %4184 = vrot.lane.b32.xlu0 %v8567_v47, %s7105_s30  ;;  %v6747_v8 = vadd.f32 %v6746_v6, %v6745_v51  ;;  %v6748_v2 = vpop.f32.mrb[78].mxu1  ;;  %3458 = vst.msk [vmem:[#allocation2 + $0x169] sm:$0xff] %vm336_vm0, %v3426_v5  ;;  %v3427_v60 = vmax.f32 %v3387_v1, 0.0  ;;  %v4254_v58 = vld [vmem:[#allocation2 + $0x151] sm:$0xff] }
 0x41f   : > { %3866 = vrot.lane.b32.xlu1 %v8567_v47, %s7106_s27  ;;  %v6749_v20 = vpop.f32.mrb[79].mxu1  ;;  %v4382_v45 = vld [vmem:[#allocation2 + $0x152] sm:$0xff]  ;;  %v4383_v4 = vld [vmem:[#allocation2 + $0x15a] sm:$0xff] }
 0x420   : > { %v4127_v57 = vld [vmem:[#allocation2 + $0x158] sm:$0xff]  ;;  %v4167_v23 = vpop.permute.xlu0 %4166  ;;  %v3849_v59 = vpop.permute.xlu1 %3848  ;;  %v3231_v24 = vadd.f32 %v8537_v7, %v6747_v8  ;;  %v6750_v21 = vadd.f32 %v6749_v20, %v6748_v2  ;;  %3459 = vst.msk [vmem:[#allocation2 + $0x171] sm:$0xff] %vm336_vm0, %v3427_v60  ;;  %v8646_v34 = vpack.c.bf16 %v4383_v4, %v4382_v45 }
 0x421   : > { %v8648_v13 = vpack.c.bf16 %v4127_v57, %v4126_v11  ;;  %v4255_v36 = vld [vmem:[#allocation2 + $0x159] sm:$0xff]  ;;  %4214 = vst.msk [vmem:[#allocation3 + $0x8] sm:$0xff] %vm2171_vm15, %v4167_v23  ;;  %v4457_v47 = vld [vmem:[#allocation3 + $0x118] sm:$0xff] }
 0x422   : > { %3895 = vst.msk [vmem:[#allocation3 + $0x18] sm:$0xff] %vm2300_vm1, %v3849_v59  ;;  %v8652_v25 = vpack.c.bf16 %v4255_v36, %v4254_v58  ;;  %v3392_v16 = vadd.f32 %v8376_v3, %v3231_v24  ;;  %6998 = vmatmul.mubr.msk.bf16.gmra.mrb[100].mxu1 %vm336_vm0, %v4457_v47  ;;  %4312 = vrot.lane.b32.xlu0 %v8569_v50, %s7106_s27  ;;  %v4469_v36 = vld [vmem:[#allocation3 + $0x178] sm:$0xff] }
 0x423   : > { %v3234_v17 = vadd.f32 %v8537_v7, %v6750_v21  ;;  %4418 = vst.msk [vmem:[#allocation3 + $0x130] sm:$0xff] %vm336_vm0, %v8646_v34  ;;  %3524 = vst.msk [vmem:[#allocation3 + $0x150] sm:$0xff] %vm336_vm0, %v8648_v13  ;;  %3612 = vrot.lane.b32.xlu1 %v8569_v50, %s7104_s29 }
 0x424   : > { %3971 = vst.msk [vmem:[#allocation3 + $0x140] sm:$0xff] %vm336_vm0, %v8652_v25  ;;  %v3428_v3 = vmax.f32 %v3392_v16, 0.0  ;;  %v4295_v27 = vpop.permute.xlu0 %4294  ;;  %v3595_v32 = vpop.permute.xlu1 %3594  ;;  %v4260_v16 = vld [vmem:[#allocation2 + $0x199] sm:$0xff] }
 0x425   : > { %v3395_v39 = vadd.f32 %v8382_v22, %v3234_v17  ;;  %4342 = vst.msk [vmem:[#allocation3 + $0x8] sm:$0xff] %vm2300_vm1, %v4295_v27  ;;  %v4128_v7 = vld [vmem:[#allocation2 + $0x168] sm:$0xff] }
 0x426   : > { %3640 = vst.msk [vmem:[#allocation3 + $0x30] sm:$0xff] %vm2042_vm14, %v3595_v32  ;;  %4058 = vrot.lane.b32.xlu0 %v8565_v53, %s7104_s29  ;;  %v4256_v50 = vld [vmem:[#allocation2 + $0x169] sm:$0xff]  ;;  %v4261_v17 = vld [vmem:[#allocation2 + $0x1a1] sm:$0xff] }
 0x427   : > { %3460 = vst.msk [vmem:[#allocation2 + $0x181] sm:$0xff] %vm336_vm0, %v3428_v3  ;;  %v3429_v29 = vmax.f32 %v3395_v39, 0.0  ;;  %3740 = vrot.lane.b32.xlu1 %v8565_v53, %s7105_s30  ;;  %v4384_v31 = vld [vmem:[#allocation2 + $0x16a] sm:$0xff]  ;;  %v4385_v38 = vld [vmem:[#allocation2 + $0x172] sm:$0xff] }
 0x428   : > { %v4129_v22 = vld [vmem:[#allocation2 + $0x170] sm:$0xff]  ;;  %v4041_v62 = vpop.permute.xlu0 %4040  ;;  %v3723_v9 = vpop.permute.xlu1 %3722  ;;  %v8676_v28 = vpack.c.bf16 %v4385_v38, %v4384_v31 }
 0x429   : > { %3461 = vst.msk [vmem:[#allocation2 + $0x189] sm:$0xff] %vm336_vm0, %v3429_v29  ;;  %v8678_v18 = vpack.c.bf16 %v4129_v22, %v4128_v7  ;;  %v4257_v41 = vld [vmem:[#allocation2 + $0x171] sm:$0xff]  ;;  %v4425_v56 = vld [vmem:[#allocation3 + $0x18] sm:$0xff]  ;;  %v4277_v7 = vpack.c.bf16 %v4261_v17, %v4260_v16 }
 0x42a   : > { %4087 = vst.msk [vmem:[#allocation3 + $0x20] sm:$0xff] %vm2042_vm14, %v4041_v62  ;;  %v4460_v12 = vld [vmem:[#allocation3 + $0x130] sm:$0xff]  ;;  %v8682_v15 = vpack.c.bf16 %v4257_v41, %v4256_v50  ;;  %4186 = vrot.lane.b32.xlu0 %v8594_v52, %s7105_s30 }
 0x42b   : > { %3768 = vst.msk [vmem:[#allocation3 + $0x30] sm:$0xff] %vm2171_vm15, %v3723_v9  ;;  %7001 = vmatprep.mubr.msk.bf16.mxu1 %vm336_vm0, %v4460_v12  ;;  %3868 = vrot.lane.b32.xlu1 %v8594_v52, %s7106_s27 }
 0x42c   : > { %4419 = vst.msk [vmem:[#allocation3 + $0x148] sm:$0xff] %vm336_vm0, %v8676_v28  ;;  %3525 = vst.msk [vmem:[#allocation3 + $0x168] sm:$0xff] %vm336_vm0, %v8678_v18  ;;  %v4169_v53 = vpop.permute.xlu0 %4168  ;;  %v3851_v48 = vpop.permute.xlu1 %3850  ;;  %v4423_v42 = vld [vmem:[#allocation3 + $0x8] sm:$0xff] }
 0x42d   : > { %3972 = vst.msk [vmem:[#allocation3 + $0x158] sm:$0xff] %vm336_vm0, %v8682_v15  ;;  %4701 = vmatprep.mubr.bf16.mxu0 %v4423_v42 }
 0x42e   : > { %4215 = vst.msk [vmem:[#allocation3 + $0x20] sm:$0xff] %vm2171_vm15, %v4169_v53  ;;  %4702 = vmatmul.mubr.bf16.vlgmr.msra.gmra.mrb[48].mxu0 %v4422_v44  ;;  %4314 = vrot.lane.b32.xlu0 %v8596_v37, %s7106_s27  ;;  %v4258_v35 = vld [vmem:[#allocation2 + $0x181] sm:$0xff] }
 0x42f   : > { %3896 = vst.msk [vmem:[#allocation3 + $0x30] sm:$0xff] %vm2300_vm1, %v3851_v48  ;;  %3614 = vrot.lane.b32.xlu1 %v8596_v37, %s7104_s29  ;;  %v4130_v24 = vld [vmem:[#allocation2 + $0x180] sm:$0xff] }
 0x430   : > { %v4386_v52 = vld [vmem:[#allocation2 + $0x182] sm:$0xff]  ;;  %v4387_v63 = vld [vmem:[#allocation2 + $0x18a] sm:$0xff]  ;;  %v4297_v14 = vpop.permute.xlu0 %4296 }
 0x431   : > { %v8701_v61 = vpack.c.bf16 %v4387_v63, %v4386_v52  ;;  %v4259_v40 = vld [vmem:[#allocation2 + $0x189] sm:$0xff]  ;;  %4343 = vst.msk [vmem:[#allocation3 + $0x20] sm:$0xff] %vm2300_vm1, %v4297_v14  ;;  %v3597_v10 = vpop.permute.xlu1 %3596 }
 0x432   : > { %v8704_v33 = vpack.c.bf16 %v4259_v40, %v4258_v35  ;;  %3641 = vst.msk [vmem:[#allocation3 + $0x48] sm:$0xff] %vm2042_vm14, %v3597_v10  ;;  %4060 = vrot.lane.b32.xlu0 %v8592_v30, %s7104_s29  ;;  %v4131_v21 = vld [vmem:[#allocation2 + $0x188] sm:$0xff] }
 0x433   : > { %v4463_v19 = vld [vmem:[#allocation3 + $0x148] sm:$0xff]  ;;  %4420 = vst.msk [vmem:[#allocation3 + $0x160] sm:$0xff] %vm336_vm0, %v8701_v61  ;;  %3742 = vrot.lane.b32.xlu1 %v8592_v30, %s7105_s30 }
 0x434   : > { %7002 = vmatmul.mubr.msk.bf16.gmra.mrb[104].mxu1 %vm336_vm0, %v4463_v19  ;;  %3973 = vst.msk [vmem:[#allocation3 + $0x170] sm:$0xff] %vm336_vm0, %v8704_v33  ;;  %v4043_v37 = vpop.permute.xlu0 %4042 }
 0x435   : > { %4088 = vst.msk [vmem:[#allocation3 + $0x38] sm:$0xff] %vm2042_vm14, %v4043_v37  ;;  %v3725_v54 = vpop.permute.xlu1 %3724 }
 0x436   : > { %3769 = vst.msk [vmem:[#allocation3 + $0x48] sm:$0xff] %vm2171_vm15, %v3725_v54  ;;  %4188 = vrot.lane.b32.xlu0 %v8621_v43, %s7105_s30  ;;  %v4428_v2 = vld [vmem:[#allocation3 + $0x30] sm:$0xff] }
 0x437   : > { %3870 = vrot.lane.b32.xlu1 %v8621_v43, %s7106_s27 }
 0x438   : > { %v4426_v49 = vld [vmem:[#allocation3 + $0x20] sm:$0xff] }
 0x439   : > { %4709 = vmatprep.mubr.bf16.mxu0 %v4426_v49 }
 0x43a   : > { %v4466_v55 = vld [vmem:[#allocation3 + $0x160] sm:$0xff]  ;;  %4316 = vrot.lane.b32.xlu0 %v8623_v46, %s7106_s27  ;;  %4710 = vmatmul.mubr.bf16.gmra.mrb[52].mxu0 %v4425_v56 }
 0x43b   : > { %3616 = vrot.lane.b32.xlu1 %v8623_v46, %s7104_s29  ;;  %7005 = vmatprep.mubr.msk.bf16.mxu1 %vm336_vm0, %v4466_v55 }
 0x43c   : > { %v4171_v30 = vpop.permute.xlu0 %4170  ;;  %v3853_v51 = vpop.permute.xlu1 %3852  ;;  %7006 = vmatmul.mubr.msk.bf16.gmra.mrb[108].mxu1 %vm336_vm0, %v4469_v36 }
 0x43d   : > { %4216 = vst.msk [vmem:[#allocation3 + $0x38] sm:$0xff] %vm2171_vm15, %v4171_v30 }
 0x43e   : > { %3897 = vst.msk [vmem:[#allocation3 + $0x48] sm:$0xff] %vm2300_vm1, %v3853_v51  ;;  %4062 = vrot.lane.b32.xlu0 %v8618_v26, %s7104_s29 }
 0x43f   : > { %3744 = vrot.lane.b32.xlu1 %v8618_v26, %s7105_s30 }
 0x440   : > { %v4299_v43 = vpop.permute.xlu0 %4298  ;;  %v3599_v5 = vpop.permute.xlu1 %3598 }
 0x441   : > { %4344 = vst.msk [vmem:[#allocation3 + $0x38] sm:$0xff] %vm2300_vm1, %v4299_v43 }
 0x442   : > { %3642 = vst.msk [vmem:[#allocation3 + $0x60] sm:$0xff] %vm2042_vm14, %v3599_v5  ;;  %4190 = vrot.lane.b32.xlu0 %v8648_v13, %s7105_s30 }
 0x443   : > { %3872 = vrot.lane.b32.xlu1 %v8648_v13, %s7106_s27  ;;  %v4148_v13 = vpack.c.bf16 %v4131_v21, %v4130_v24 }
 0x444   : > { %v4045_v46 = vpop.permute.xlu0 %4044  ;;  %v3727_v1 = vpop.permute.xlu1 %3726 }
 0x445   : > { %4089 = vst.msk [vmem:[#allocation3 + $0x50] sm:$0xff] %vm2042_vm14, %v4045_v46  ;;  %v4431_v59 = vld [vmem:[#allocation3 + $0x48] sm:$0xff] }
 0x446   : > { %3770 = vst.msk [vmem:[#allocation3 + $0x60] sm:$0xff] %vm2171_vm15, %v3727_v1  ;;  %4318 = vrot.lane.b32.xlu0 %v8652_v25, %s7106_s27 }
 0x447   : > { %3618 = vrot.lane.b32.xlu1 %v8652_v25, %s7104_s29 }
 0x448   : > { %v4173_v26 = vpop.permute.xlu0 %4172  ;;  %v3855_v6 = vpop.permute.xlu1 %3854  ;;  %v4429_v8 = vld [vmem:[#allocation3 + $0x38] sm:$0xff] }
 0x449   : > { %4217 = vst.msk [vmem:[#allocation3 + $0x50] sm:$0xff] %vm2171_vm15, %v4173_v26  ;;  %4717 = vmatprep.mubr.bf16.mxu0 %v4429_v8 }
 0x44a   : > { %3898 = vst.msk [vmem:[#allocation3 + $0x60] sm:$0xff] %vm2300_vm1, %v3855_v6  ;;  %4064 = vrot.lane.b32.xlu0 %v8646_v34, %s7104_s29  ;;  %4718 = vmatmul.mubr.bf16.gmra.mrb[56].mxu0 %v4428_v2 }
 0x44b   : > { %3746 = vrot.lane.b32.xlu1 %v8646_v34, %s7105_s30 }
 0x44c   : > { %v4301_v60 = vpop.permute.xlu0 %4300  ;;  %v3601_v11 = vpop.permute.xlu1 %3600 }
 0x44d   : > { %4345 = vst.msk [vmem:[#allocation3 + $0x50] sm:$0xff] %vm2300_vm1, %v4301_v60 }
 0x44e   : > { %3643 = vst.msk [vmem:[#allocation3 + $0x78] sm:$0xff] %vm2042_vm14, %v3601_v11  ;;  %4192 = vrot.lane.b32.xlu0 %v8678_v18, %s7105_s30 }
 0x44f   : > { %3874 = vrot.lane.b32.xlu1 %v8678_v18, %s7106_s27 }
 0x450   : > { %v4047_v20 = vpop.permute.xlu0 %4046  ;;  %v3729_v45 = vpop.permute.xlu1 %3728 }
 0x451   : > { %4090 = vst.msk [vmem:[#allocation3 + $0x68] sm:$0xff] %vm2042_vm14, %v4047_v20  ;;  %v4434_v32 = vld [vmem:[#allocation3 + $0x60] sm:$0xff] }
 0x452   : > { %3771 = vst.msk [vmem:[#allocation3 + $0x78] sm:$0xff] %vm2171_vm15, %v3729_v45  ;;  %4320 = vrot.lane.b32.xlu0 %v8682_v15, %s7106_s27 }
 0x453   : > { %3620 = vrot.lane.b32.xlu1 %v8682_v15, %s7104_s29 }
 0x454   : > { %v4175_v4 = vpop.permute.xlu0 %4174  ;;  %v4432_v57 = vld [vmem:[#allocation3 + $0x50] sm:$0xff]  ;;  %v3857_v23 = vpop.permute.xlu1 %3856 }
 0x455   : > { %4218 = vst.msk [vmem:[#allocation3 + $0x68] sm:$0xff] %vm2171_vm15, %v4175_v4  ;;  %4725 = vmatprep.mubr.bf16.mxu0 %v4432_v57 }
 0x456   : > { %3899 = vst.msk [vmem:[#allocation3 + $0x78] sm:$0xff] %vm2300_vm1, %v3857_v23  ;;  %4066 = vrot.lane.b32.xlu0 %v8676_v28, %s7104_s29  ;;  %4726 = vmatmul.mubr.bf16.gmra.mrb[60].mxu0 %v4431_v59 }
 0x457   : > { %3748 = vrot.lane.b32.xlu1 %v8676_v28, %s7105_s30 }
 0x458   : > { %v4303_v34 = vpop.permute.xlu0 %4302  ;;  %v3603_v58 = vpop.permute.xlu1 %3602 }
 0x459   : > { %4346 = vst.msk [vmem:[#allocation3 + $0x68] sm:$0xff] %vm2300_vm1, %v4303_v34 }
 0x45a   : > { %3644 = vst.msk [vmem:[#allocation3 + $0x90] sm:$0xff] %vm2042_vm14, %v3603_v58  ;;  %4194 = vrot.lane.b32.xlu0 %v4148_v13, %s7105_s30 }
 0x45b   : > { %3876 = vrot.lane.b32.xlu1 %v4148_v13, %s7106_s27 }
 0x45c   : > { %v4049_v47 = vpop.permute.xlu0 %4048 }
 0x45d   : > { %4091 = vst.msk [vmem:[#allocation3 + $0x80] sm:$0xff] %vm2042_vm14, %v4049_v47  ;;  %v3731_v25 = vpop.permute.xlu1 %3730  ;;  %v4437_v28 = vld [vmem:[#allocation3 + $0x78] sm:$0xff] }
 0x45e   : > { %3772 = vst.msk [vmem:[#allocation3 + $0x90] sm:$0xff] %vm2171_vm15, %v3731_v25  ;;  %4322 = vrot.lane.b32.xlu0 %v8704_v33, %s7106_s27 }
 0x460   : > { %v4177_v3 = vpop.permute.xlu0 %4176  ;;  %v4435_v39 = vld [vmem:[#allocation3 + $0x68] sm:$0xff] }
 0x461   : > { %4219 = vst.msk [vmem:[#allocation3 + $0x80] sm:$0xff] %vm2171_vm15, %v4177_v3  ;;  %v3859_v27 = vpop.permute.xlu1 %3858  ;;  %4733 = vmatprep.mubr.bf16.mxu0 %v4435_v39 }
 0x462   : > { %3900 = vst.msk [vmem:[#allocation3 + $0x90] sm:$0xff] %vm2300_vm1, %v3859_v27  ;;  %4068 = vrot.lane.b32.xlu0 %v8701_v61, %s7104_s29  ;;  %4734 = vmatmul.mubr.bf16.gmra.mrb[64].mxu0 %v4434_v32 }
 0x464   : > { %v4305_v29 = vpop.permute.xlu0 %4304 }
 0x465   : > { %4347 = vst.msk [vmem:[#allocation3 + $0x80] sm:$0xff] %vm2300_vm1, %v4305_v29  ;;  %v3605_v50 = vpop.permute.xlu1 %3604 }
 0x466   : > { %3645 = vst.msk [vmem:[#allocation3 + $0xa8] sm:$0xff] %vm2042_vm14, %v3605_v50  ;;  %4324 = vrot.lane.b32.xlu0 %v4277_v7, %s7106_s27 }
 0x468   : > { %v4051_v31 = vpop.permute.xlu0 %4050 }
 0x469   : > { %4092 = vst.msk [vmem:[#allocation3 + $0x98] sm:$0xff] %vm2042_vm14, %v4051_v31  ;;  %v3733_v38 = vpop.permute.xlu1 %3732  ;;  %v4440_v44 = vld [vmem:[#allocation3 + $0x90] sm:$0xff] }
 0x46a   : > { %3773 = vst.msk [vmem:[#allocation3 + $0xa8] sm:$0xff] %vm2171_vm15, %v3733_v38 }
 0x46c   : > { %v4179_v22 = vpop.permute.xlu0 %4178  ;;  %v4438_v62 = vld [vmem:[#allocation3 + $0x80] sm:$0xff] }
 0x46d   : > { %4220 = vst.msk [vmem:[#allocation3 + $0x98] sm:$0xff] %vm2171_vm15, %v4179_v22  ;;  %v3861_v9 = vpop.permute.xlu1 %3860  ;;  %4741 = vmatprep.mubr.bf16.mxu0 %v4438_v62 }
 0x46e   : > { %3901 = vst.msk [vmem:[#allocation3 + $0xa8] sm:$0xff] %vm2300_vm1, %v3861_v9  ;;  %4742 = vmatmul.mubr.bf16.gmra.mrb[68].mxu0 %v4437_v28 }
 0x470   : > { %v4307_v18 = vpop.permute.xlu0 %4306 }
 0x471   : > { %4348 = vst.msk [vmem:[#allocation3 + $0x98] sm:$0xff] %vm2300_vm1, %v4307_v18  ;;  %v3607_v41 = vpop.permute.xlu1 %3606 }
 0x472   : > { %3646 = vst.msk [vmem:[#allocation3 + $0xc0] sm:$0xff] %vm2042_vm14, %v3607_v41 }
 0x474   : > { %v4053_v12 = vpop.permute.xlu0 %4052 }
 0x475   : > { %4093 = vst.msk [vmem:[#allocation3 + $0xb0] sm:$0xff] %vm2042_vm14, %v4053_v12  ;;  %v3735_v15 = vpop.permute.xlu1 %3734  ;;  %v4443_v19 = vld [vmem:[#allocation3 + $0xa8] sm:$0xff] }
 0x476   : > { %3774 = vst.msk [vmem:[#allocation3 + $0xc0] sm:$0xff] %vm2171_vm15, %v3735_v15 }
 0x478   : > { %v4181_v53 = vpop.permute.xlu0 %4180  ;;  %v4441_v48 = vld [vmem:[#allocation3 + $0x98] sm:$0xff] }
 0x479   : > { %4221 = vst.msk [vmem:[#allocation3 + $0xb0] sm:$0xff] %vm2171_vm15, %v4181_v53  ;;  %v3863_v42 = vpop.permute.xlu1 %3862  ;;  %4749 = vmatprep.mubr.bf16.mxu0 %v4441_v48 }
 0x47a   : > { %3902 = vst.msk [vmem:[#allocation3 + $0xc0] sm:$0xff] %vm2300_vm1, %v3863_v42  ;;  %4750 = vmatmul.mubr.bf16.gmra.mrb[72].mxu0 %v4440_v44 }
 0x47c   : > { %v4309_v35 = vpop.permute.xlu0 %4308 }
 0x47d   : > { %4349 = vst.msk [vmem:[#allocation3 + $0xb0] sm:$0xff] %vm2300_vm1, %v4309_v35  ;;  %v3609_v52 = vpop.permute.xlu1 %3608 }
 0x47e   : > { %3647 = vst.msk [vmem:[#allocation3 + $0xd8] sm:$0xff] %vm2042_vm14, %v3609_v52 }
 0x480   : > { %v4055_v63 = vpop.permute.xlu0 %4054 }
 0x481   : > { %4094 = vst.msk [vmem:[#allocation3 + $0xc8] sm:$0xff] %vm2042_vm14, %v4055_v63  ;;  %v3737_v14 = vpop.permute.xlu1 %3736  ;;  %v4446_v43 = vld [vmem:[#allocation3 + $0xc0] sm:$0xff] }
 0x482   : > { %3775 = vst.msk [vmem:[#allocation3 + $0xd8] sm:$0xff] %vm2171_vm15, %v3737_v14 }
 0x484   : > { %v4183_v61 = vpop.permute.xlu0 %4182  ;;  %v4444_v40 = vld [vmem:[#allocation3 + $0xb0] sm:$0xff] }
 0x485   : > { %4222 = vst.msk [vmem:[#allocation3 + $0xc8] sm:$0xff] %vm2171_vm15, %v4183_v61  ;;  %v3865_v10 = vpop.permute.xlu1 %3864  ;;  %4757 = vmatprep.mubr.bf16.mxu0 %v4444_v40 }
 0x486   : > { %3903 = vst.msk [vmem:[#allocation3 + $0xd8] sm:$0xff] %vm2300_vm1, %v3865_v10  ;;  %4758 = vmatmul.mubr.bf16.gmra.mrb[76].mxu0 %v4443_v19 }
 0x488   : > { %v4311_v33 = vpop.permute.xlu0 %4310 }
 0x489   : > { %4350 = vst.msk [vmem:[#allocation3 + $0xc8] sm:$0xff] %vm2300_vm1, %v4311_v33  ;;  %v3611_v37 = vpop.permute.xlu1 %3610 }
 0x48a   : > { %3648 = vst.msk [vmem:[#allocation3 + $0xf0] sm:$0xff] %vm2042_vm14, %v3611_v37 }
 0x48c   : > { %v4057_v54 = vpop.permute.xlu0 %4056 }
 0x48d   : > { %4095 = vst.msk [vmem:[#allocation3 + $0xe0] sm:$0xff] %vm2042_vm14, %v4057_v54  ;;  %v3739_v49 = vpop.permute.xlu1 %3738  ;;  %v4449_v45 = vld [vmem:[#allocation3 + $0xd8] sm:$0xff] }
 0x48e   : > { %3776 = vst.msk [vmem:[#allocation3 + $0xf0] sm:$0xff] %vm2171_vm15, %v3739_v49 }
 0x490   : > { %v4185_v56 = vpop.permute.xlu0 %4184  ;;  %v4447_v55 = vld [vmem:[#allocation3 + $0xc8] sm:$0xff] }
 0x491   : > { %4223 = vst.msk [vmem:[#allocation3 + $0xe0] sm:$0xff] %vm2171_vm15, %v4185_v56  ;;  %v3867_v30 = vpop.permute.xlu1 %3866  ;;  %4765 = vmatprep.mubr.bf16.mxu0 %v4447_v55  ;;  %v8806_v51 = vpop.f32.mrb[80].mxu1 }
 0x492   : > { %3904 = vst.msk [vmem:[#allocation3 + $0xf0] sm:$0xff] %vm2300_vm1, %v3867_v30  ;;  %4766 = vmatmul.mubr.bf16.gmra.mrb[80].mxu0 %v4446_v43  ;;  %v8809_v5 = vpop.f32.mrb[81].mxu1 }
 0x493   : > { %v8811_v46 = vpop.f32.mrb[82].mxu1 }
 0x494   : > { %v8813_v1 = vpop.f32.mrb[83].mxu1  ;;  %v4313_v26 = vpop.permute.xlu0 %4312 }
 0x495   : > { %4351 = vst.msk [vmem:[#allocation3 + $0xe0] sm:$0xff] %vm2300_vm1, %v4313_v26  ;;  %v3613_v6 = vpop.permute.xlu1 %3612 }
 0x496   : > { %3649 = vst.msk [vmem:[#allocation3 + $0x108] sm:$0xff] %vm2042_vm14, %v3613_v6 }
 0x498   : > { %v4059_v8 = vpop.permute.xlu0 %4058 }
 0x499   : > { %4096 = vst.msk [vmem:[#allocation3 + $0xf8] sm:$0xff] %vm2042_vm14, %v4059_v8  ;;  %v3741_v2 = vpop.permute.xlu1 %3740  ;;  %v4452_v13 = vld [vmem:[#allocation3 + $0xf0] sm:$0xff] }
 0x49a   : > { %3777 = vst.msk [vmem:[#allocation3 + $0x108] sm:$0xff] %vm2171_vm15, %v3741_v2 }
 0x49c   : > { %v4187_v60 = vpop.permute.xlu0 %4186  ;;  %v4450_v11 = vld [vmem:[#allocation3 + $0xe0] sm:$0xff] }
 0x49d   : > { %4224 = vst.msk [vmem:[#allocation3 + $0xf8] sm:$0xff] %vm2171_vm15, %v4187_v60  ;;  %v3869_v20 = vpop.permute.xlu1 %3868  ;;  %4773 = vmatprep.mubr.bf16.mxu0 %v4450_v11 }
 0x49e   : > { %3905 = vst.msk [vmem:[#allocation3 + $0x108] sm:$0xff] %vm2300_vm1, %v3869_v20  ;;  %4774 = vmatmul.mubr.bf16.gmra.mrb[84].mxu0 %v4449_v45 }
 0x4a0   : > { %v4315_v4 = vpop.permute.xlu0 %4314 }
 0x4a1   : > { %4352 = vst.msk [vmem:[#allocation3 + $0xf8] sm:$0xff] %vm2300_vm1, %v4315_v4  ;;  %v3615_v57 = vpop.permute.xlu1 %3614  ;;  %v8893_v4 = vld [vmem:[%s9632_s6] ss:$0 sm:$0xff] }
 0x4a2   : > { %3650 = vst.msk [vmem:[#allocation3 + $0x120] sm:$0xff] %vm2042_vm14, %v3615_v57 }
 0x4a4   : > { %v4061_v23 = vpop.permute.xlu0 %4060 }
 0x4a5   : > { %4097 = vst.msk [vmem:[#allocation3 + $0x110] sm:$0xff] %vm2042_vm14, %v4061_v23  ;;  %v3743_v59 = vpop.permute.xlu1 %3742  ;;  %v4455_v29 = vld [vmem:[#allocation3 + $0x108] sm:$0xff] }
 0x4a6   : > { %3778 = vst.msk [vmem:[#allocation3 + $0x120] sm:$0xff] %vm2171_vm15, %v3743_v59 }
 0x4a8   : > { %v4189_v24 = vpop.permute.xlu0 %4188  ;;  %v4453_v21 = vld [vmem:[#allocation3 + $0xf8] sm:$0xff] }
 0x4a9   : > { %4225 = vst.msk [vmem:[#allocation3 + $0x110] sm:$0xff] %vm2171_vm15, %v4189_v24  ;;  %v3871_v34 = vpop.permute.xlu1 %3870  ;;  %4781 = vmatprep.mubr.bf16.mxu0 %v4453_v21 }
 0x4aa   : > { %3906 = vst.msk [vmem:[#allocation3 + $0x120] sm:$0xff] %vm2300_vm1, %v3871_v34  ;;  %4782 = vmatmul.mubr.bf16.gmra.mrb[88].mxu0 %v4452_v13 }
 0x4ac   : > { %v4317_v58 = vpop.permute.xlu0 %4316 }
 0x4ad   : > { %4353 = vst.msk [vmem:[#allocation3 + $0x110] sm:$0xff] %vm2300_vm1, %v4317_v58  ;;  %v3617_v36 = vpop.permute.xlu1 %3616 }
 0x4ae   : > { %v8828_v47 = vpop.f32.mrb[84].mxu1  ;;  %3651 = vst.msk [vmem:[#allocation3 + $0x138] sm:$0xff] %vm2042_vm14, %v3617_v36 }
 0x4af   : > { %v8831_v25 = vpop.f32.mrb[85].mxu1 }
 0x4b0   : > { %v8833_v16 = vpop.f32.mrb[86].mxu1  ;;  %v4063_v3 = vpop.permute.xlu0 %4062 }
 0x4b1   : > { %v8835_v17 = vpop.f32.mrb[87].mxu1  ;;  %4098 = vst.msk [vmem:[#allocation3 + $0x128] sm:$0xff] %vm2042_vm14, %v4063_v3  ;;  %v3745_v39 = vpop.permute.xlu1 %3744  ;;  %v4458_v18 = vld [vmem:[#allocation3 + $0x120] sm:$0xff] }
 0x4b2   : > { %3779 = vst.msk [vmem:[#allocation3 + $0x138] sm:$0xff] %vm2171_vm15, %v3745_v39 }
 0x4b4   : > { %v4191_v27 = vpop.permute.xlu0 %4190  ;;  %v4456_v32 = vld [vmem:[#allocation3 + $0x110] sm:$0xff] }
 0x4b5   : > { %4226 = vst.msk [vmem:[#allocation3 + $0x128] sm:$0xff] %vm2171_vm15, %v4191_v27  ;;  %v3873_v7 = vpop.permute.xlu1 %3872  ;;  %4789 = vmatprep.mubr.bf16.mxu0 %v4456_v32  ;;  %v5055_v27 = vld [vmem:[#allocation2] sm:$0xff] }
 0x4b6   : > { %3907 = vst.msk [vmem:[#allocation3 + $0x138] sm:$0xff] %vm2300_vm1, %v3873_v7  ;;  %4790 = vmatmul.mubr.bf16.gmra.mrb[92].mxu0 %v4455_v29  ;;  %v8909_v7 = vld [vmem:[%s9633_s7] ss:$0 sm:$0xff]  ;;  %v5124_v29 = vld [vmem:[#allocation2 + $0x1] sm:$0xff] }
 0x4b8   : > { %v4319_v50 = vpop.permute.xlu0 %4318 }
 0x4b9   : > { %4354 = vst.msk [vmem:[#allocation3 + $0x128] sm:$0xff] %vm2300_vm1, %v4319_v50  ;;  %v3619_v31 = vpop.permute.xlu1 %3618  ;;  %v8914_v50 = vld [vmem:[%s9633_s7 + $0x1] ss:$0 sm:$0xff] }
 0x4ba   : > { %3652 = vst.msk [vmem:[#allocation3 + $0x150] sm:$0xff] %vm2042_vm14, %v3619_v31 }
 0x4bc   : > { %v4065_v38 = vpop.permute.xlu0 %4064 }
 0x4bd   : > { %4099 = vst.msk [vmem:[#allocation3 + $0x140] sm:$0xff] %vm2042_vm14, %v4065_v38  ;;  %v3747_v22 = vpop.permute.xlu1 %3746  ;;  %v4461_v61 = vld [vmem:[#allocation3 + $0x138] sm:$0xff] }
 0x4be   : > { %3780 = vst.msk [vmem:[#allocation3 + $0x150] sm:$0xff] %vm2171_vm15, %v3747_v22  ;;  %v5092_v22 = vmul.f32 %v8909_v7, %v5055_v27  ;;  %v8943_v27 = vld [vmem:[%s9633_s7 + $0x4] ss:$0 sm:$0xff] }
 0x4c0   : > { %v4193_v62 = vpop.permute.xlu0 %4192  ;;  %v4459_v9 = vld [vmem:[#allocation3 + $0x128] sm:$0xff] }
 0x4c1   : > { %4227 = vst.msk [vmem:[#allocation3 + $0x140] sm:$0xff] %vm2171_vm15, %v4193_v62  ;;  %v3875_v28 = vpop.permute.xlu1 %3874  ;;  %4797 = vmatprep.mubr.bf16.mxu0 %v4459_v9  ;;  %v5161_v62 = vmul.f32 %v8914_v50, %v5124_v29  ;;  %v5056_v9 = vld [vmem:[#allocation2 + $0x8] sm:$0xff] }
 0x4c2   : > { %3908 = vst.msk [vmem:[#allocation3 + $0x150] sm:$0xff] %vm2300_vm1, %v3875_v28  ;;  %4798 = vmatmul.mubr.bf16.gmra.mrb[96].mxu0 %v4458_v18  ;;  %v5125_v28 = vld [vmem:[#allocation2 + $0x9] sm:$0xff] }
 0x4c3   : > { %v5225_v18 = vld [vmem:[#allocation2 + $0x2] sm:$0xff] }
 0x4c4   : > { %v4321_v41 = vpop.permute.xlu0 %4320 }
 0x4c5   : > { %4355 = vst.msk [vmem:[#allocation3 + $0x140] sm:$0xff] %vm2300_vm1, %v4321_v41  ;;  %v3621_v12 = vpop.permute.xlu1 %3620  ;;  %v8848_v15 = vpop.f32.mrb[88].mxu1  ;;  %v8923_v41 = vld [vmem:[%s9633_s7 + $0x2] ss:$0 sm:$0xff] }
 0x4c6   : > { %3653 = vst.msk [vmem:[#allocation3 + $0x168] sm:$0xff] %vm2042_vm14, %v3621_v12  ;;  %v8851_v53 = vpop.f32.mrb[89].mxu1 }
 0x4c7   : > { %v8853_v48 = vpop.f32.mrb[90].mxu1 }
 0x4c8   : > { %v8855_v42 = vpop.f32.mrb[91].mxu1  ;;  %v4067_v44 = vpop.permute.xlu0 %4066 }
 0x4c9   : > { %4100 = vst.msk [vmem:[#allocation3 + $0x158] sm:$0xff] %vm2042_vm14, %v4067_v44  ;;  %v3749_v35 = vpop.permute.xlu1 %3748  ;;  %v4464_v55 = vld [vmem:[#allocation3 + $0x150] sm:$0xff] }
 0x4ca   : > { %3781 = vst.msk [vmem:[#allocation3 + $0x168] sm:$0xff] %vm2171_vm15, %v3749_v35  ;;  %v5162_v35 = vmul.f32 %v8914_v50, %v5125_v28 }
 0x4cc   : > { %v4195_v52 = vpop.permute.xlu0 %4194  ;;  %v4462_v63 = vld [vmem:[#allocation3 + $0x140] sm:$0xff] }
 0x4cd   : > { %4228 = vst.msk [vmem:[#allocation3 + $0x158] sm:$0xff] %vm2171_vm15, %v4195_v52  ;;  %v3877_v14 = vpop.permute.xlu1 %3876  ;;  %4805 = vmatprep.mubr.bf16.mxu0 %v4462_v63 }
 0x4ce   : > { %3909 = vst.msk [vmem:[#allocation3 + $0x168] sm:$0xff] %vm2300_vm1, %v3877_v14  ;;  %4806 = vmatmul.mubr.bf16.gmra.mrb[100].mxu0 %v4461_v61  ;;  %v5193_v14 = vadd.f32 %v5161_v62, %v5092_v22  ;;  %v5262_v61 = vmul.f32 %v8923_v41, %v5225_v18  ;;  %v8957_v18 = vld [vmem:[%s9633_s7 + $0x6] ss:$0 sm:$0xff] }
 0x4d0   : > { %v4323_v40 = vpop.permute.xlu0 %4322 }
 0x4d1   : > { %4356 = vst.msk [vmem:[#allocation3 + $0x158] sm:$0xff] %vm2300_vm1, %v4323_v40  ;;  %v5226_v40 = vld [vmem:[#allocation2 + $0xa] sm:$0xff] }
 0x4d4   : > { %v4069_v10 = vpop.permute.xlu0 %4068 }
 0x4d5   : > { %4101 = vst.msk [vmem:[#allocation3 + $0x170] sm:$0xff] %vm2042_vm14, %v4069_v10  ;;  %v8863_v19 = vpop.f32.mrb[92].mxu1  ;;  %v4467_v43 = vld [vmem:[#allocation3 + $0x168] sm:$0xff] }
 0x4d6   : > { %4229 = vst.msk [vmem:[#allocation3 + $0x170] sm:$0xff] %vm2171_vm15, %v8327_v0  ;;  %v8867_v33 = vpop.f32.mrb[93].mxu1 }
 0x4d7   : > { %v8869_v37 = vpop.f32.mrb[94].mxu1 }
 0x4d8   : > { %v8871_v54 = vpop.f32.mrb[95].mxu1  ;;  %v4325_v49 = vpop.permute.xlu0 %4324  ;;  %v4465_v56 = vld [vmem:[#allocation3 + $0x158] sm:$0xff] }
 0x4d9   : > { %4357 = vst.msk [vmem:[#allocation3 + $0x170] sm:$0xff] %vm2300_vm1, %v4325_v49  ;;  %4813 = vmatprep.mubr.bf16.mxu0 %v4465_v56  ;;  %v8932_v49 = vld [vmem:[%s9633_s7 + $0x3] ss:$0 sm:$0xff] }
 0x4da   : > { %4814 = vmatmul.mubr.bf16.gmra.mrb[104].mxu0 %v4464_v55 }
 0x4e0   : > { %v4468_v30 = vld [vmem:[#allocation3 + $0x170] sm:$0xff] }
 0x4e1   : > { %4821 = vmatprep.mubr.bf16.mxu0 %v4468_v30 }
 0x4e2   : > { %4822 = vmatmul.mubr.bf16.gmra.mrb[108].mxu0 %v4467_v43 }
 0x4e5   : > { %v8874_v26 = vpop.f32.mrb[96].mxu1 }
 0x4e6   : > { %v8876_v0 = vpop.f32.mrb[97].mxu1 }
 0x4e7   : > { %v8878_v6 = vpop.f32.mrb[98].mxu1 }
 0x4e8   : > { %v8880_v8 = vpop.f32.mrb[99].mxu1 }
 0x4f5   : > { %v8882_v2 = vpop.f32.mrb[100].mxu1 }
 0x4f6   : > { %v8884_v60 = vpop.f32.mrb[101].mxu1 }
 0x4f7   : > { %v8886_v11 = vpop.f32.mrb[102].mxu1 }
 0x4f8   : > { %v8888_v20 = vpop.f32.mrb[103].mxu1 }
 0x501   : > { %v6785_v45 = vpop.f32.mrb[48].mxu0 }
 0x502   : > { %v6786_v57 = vpop.f32.mrb[49].mxu0 }
 0x503   : > { %v6787_v23 = vadd.f32 %v6786_v57, %v6785_v45  ;;  %v6788_v59 = vpop.f32.mrb[50].mxu0  ;;  %v5263_v45 = vmul.f32 %v8923_v41, %v5226_v40 }
 0x504   : > { %v6789_v24 = vpop.f32.mrb[51].mxu0 }
 0x505   : > { %v4704_v21 = vadd.f32 %v6787_v23, %v8893_v4  ;;  %v6790_v34 = vadd.f32 %v6789_v24, %v6788_v59  ;;  %v5294_v59 = vadd.f32 %v5262_v61, %v5193_v14 }
 0x507   : > { %v8896_v13 = vpop.f32.mrb[104].mxu1  ;;  %v4865_v36 = vadd.f32 %v8809_v5, %v4704_v21  ;;  %v4707_v3 = vadd.f32 %v6790_v34, %v8893_v4 }
 0x508   : > { %v8898_v58 = vpop.f32.mrb[105].mxu1 }
 0x509   : > { %v8902_v39 = vpop.f32.mrb[106].mxu1  ;;  %v4991_v31 = vmax.f32 %v4865_v36, 0.0  ;;  %v4868_v5 = vadd.f32 %v8813_v1, %v4707_v3  ;;  %v5093_v1 = vmul.f32 %v8909_v7, %v5056_v9 }
 0x50a   : > { %v8904_v32 = vpop.f32.mrb[107].mxu1 }
 0x50b   : > { %5023 = vst.msk [vmem:[#allocation2 + $0x19] sm:$0xff] %vm336_vm0, %v4991_v31  ;;  %v4992_v38 = vmax.f32 %v4868_v5, 0.0  ;;  %v5194_v43 = vadd.f32 %v5162_v35, %v5093_v1 }
 0x50d   : > { %5024 = vst.msk [vmem:[#allocation2 + $0x21] sm:$0xff] %vm336_vm0, %v4992_v38  ;;  %v6791_v12 = vpop.f32.mrb[52].mxu0  ;;  %v5295_v29 = vadd.f32 %v5263_v45, %v5194_v43 }
 0x50e   : > { %v6792_v44 = vpop.f32.mrb[53].mxu0 }
 0x50f   : > { %v6793_v52 = vadd.f32 %v6792_v44, %v6791_v12  ;;  %v6794_v63 = vpop.f32.mrb[54].mxu0 }
 0x510   : > { %v6795_v10 = vpop.f32.mrb[55].mxu0 }
 0x511   : > { %v4712_v56 = vadd.f32 %v6793_v52, %v8893_v4  ;;  %v6796_v55 = vadd.f32 %v6795_v10, %v6794_v63  ;;  %v8966_v10 = vld [vmem:[%s9633_s7 + $0x7] ss:$0 sm:$0xff] }
 0x512   : > { %v5326_v30 = vld [vmem:[#allocation2 + $0x18] sm:$0xff] }
 0x513   : > { %v4873_v57 = vadd.f32 %v8806_v51, %v4712_v56  ;;  %v4715_v23 = vadd.f32 %v6796_v55, %v8893_v4  ;;  %v5363_v24 = vmul.f32 %v8932_v49, %v5326_v30  ;;  %v5427_v3 = vld [vmem:[#allocation2 + $0x19] sm:$0xff]  ;;  %v5094_v44 = vmul.f32 %v8909_v7, %v5326_v30 }
 0x514   : > { %v5327_v21 = vld [vmem:[#allocation2 + $0x20] sm:$0xff]  ;;  %v5464_v38 = vmul.f32 %v8943_v27, %v5427_v3  ;;  %v5163_v1 = vmul.f32 %v8914_v50, %v5427_v3 }
 0x515   : > { %v4993_v34 = vmax.f32 %v4873_v57, 0.0  ;;  %v4876_v36 = vadd.f32 %v8811_v46, %v4715_v23  ;;  %v5364_v31 = vmul.f32 %v8932_v49, %v5327_v21  ;;  %v5395_v5 = vadd.f32 %v5363_v24, %v5294_v59  ;;  %v5428_v22 = vld [vmem:[#allocation2 + $0x21] sm:$0xff] }
 0x516   : > { %v5528_v62 = vld [vmem:[#allocation2 + $0x1a] sm:$0xff]  ;;  %v8952_v46 = vld [vmem:[%s9633_s7 + $0x5] ss:$0 sm:$0xff]  ;;  %v5465_v12 = vmul.f32 %v8943_v27, %v5428_v22  ;;  %v5095_v55 = vmul.f32 %v8909_v7, %v5327_v21  ;;  %v5164_v43 = vmul.f32 %v8914_v50, %v5428_v22 }
 0x517   : > { %5025 = vst.msk [vmem:[#allocation2 + $0x31] sm:$0xff] %vm336_vm0, %v4993_v34  ;;  %v4994_v51 = vmax.f32 %v4876_v36, 0.0  ;;  %v5396_v9 = vadd.f32 %v5364_v31, %v5295_v29  ;;  %v5496_v28 = vadd.f32 %v5464_v38, %v5395_v5  ;;  %v5565_v52 = vmul.f32 %v8952_v46, %v5528_v62  ;;  %v5529_v63 = vld [vmem:[#allocation2 + $0x22] sm:$0xff] }
 0x518   : > { %v8974_v34 = vld [vmem:[%s9633_s7 + $0x8] ss:$0 sm:$0xff]  ;;  %v5566_v36 = vmul.f32 %v8952_v46, %v5529_v63  ;;  %v5195_v29 = vadd.f32 %v5163_v1, %v5094_v44  ;;  %v5264_v21 = vmul.f32 %v8923_v41, %v5528_v62 }
 0x519   : > { %5026 = vst.msk [vmem:[#allocation2 + $0x39] sm:$0xff] %vm336_vm0, %v4994_v51  ;;  %v5497_v56 = vadd.f32 %v5465_v12, %v5396_v9  ;;  %v5597_v57 = vadd.f32 %v5565_v52, %v5496_v28 }
 0x51b   : > { %v5598_v9 = vadd.f32 %v5566_v36, %v5497_v56 }
 0x51d   : > { %v6797_v35 = vpop.f32.mrb[56].mxu0 }
 0x51e   : > { %v6798_v14 = vpop.f32.mrb[57].mxu0  ;;  %v5629_v61 = vld [vmem:[#allocation2 + $0x30] sm:$0xff] }
 0x51f   : > { %v5730_v40 = vld [vmem:[#allocation2 + $0x31] sm:$0xff]  ;;  %v6799_v30 = vadd.f32 %v6798_v14, %v6797_v35  ;;  %v6800_v45 = vpop.f32.mrb[58].mxu0  ;;  %v5666_v23 = vmul.f32 %v8957_v18, %v5629_v61  ;;  %v5365_v12 = vmul.f32 %v8932_v49, %v5629_v61  ;;  %v5196_v35 = vadd.f32 %v5164_v43, %v5095_v55 }
 0x520   : > { %v6801_v59 = vpop.f32.mrb[59].mxu0  ;;  %v5831_v24 = vld [vmem:[#allocation2 + $0x32] sm:$0xff]  ;;  %v5767_v38 = vmul.f32 %v8966_v10, %v5730_v40  ;;  %v5832_v1 = vld [vmem:[#allocation2 + $0x3a] sm:$0xff]  ;;  %v5296_v55 = vadd.f32 %v5264_v21, %v5195_v29  ;;  %v5466_v29 = vmul.f32 %v8943_v27, %v5730_v40 }
 0x521   : > { %v5630_v3 = vld [vmem:[#allocation2 + $0x38] sm:$0xff]  ;;  %v4720_v31 = vadd.f32 %v6799_v30, %v8893_v4  ;;  %v6802_v51 = vadd.f32 %v6801_v59, %v6800_v45  ;;  %v5698_v5 = vadd.f32 %v5666_v23, %v5597_v57  ;;  %v5868_v62 = vmul.f32 %v8974_v34, %v5831_v24 }
 0x522   : > { %v5731_v22 = vld [vmem:[#allocation2 + $0x39] sm:$0xff]  ;;  %v5667_v28 = vmul.f32 %v8957_v18, %v5630_v3  ;;  %v5265_v57 = vmul.f32 %v8923_v41, %v5529_v63  ;;  %v5366_v56 = vmul.f32 %v8932_v49, %v5630_v3 }
 0x523   : > { %v4881_v52 = vadd.f32 %v8831_v25, %v4720_v31  ;;  %v4723_v14 = vadd.f32 %v6802_v51, %v8893_v4  ;;  %v5799_v44 = vadd.f32 %v5767_v38, %v5698_v5  ;;  %v5768_v45 = vmul.f32 %v8966_v10, %v5731_v22 }
 0x524   : > { %v5699_v30 = vadd.f32 %v5667_v28, %v5598_v9  ;;  %v5869_v25 = vmul.f32 %v8974_v34, %v5832_v1  ;;  %v5297_v31 = vadd.f32 %v5265_v57, %v5196_v35  ;;  %v5397_v38 = vadd.f32 %v5365_v12, %v5296_v55 }
 0x525   : > { %v4995_v23 = vmax.f32 %v4881_v52, 0.0  ;;  %v4884_v59 = vadd.f32 %v8835_v17, %v4723_v14  ;;  %v5900_v36 = vadd.f32 %v5868_v62, %v5799_v44  ;;  %v5096_v28 = vmul.f32 %v8909_v7, %v5629_v61 }
 0x526   : > { %v5800_v43 = vadd.f32 %v5768_v45, %v5699_v30  ;;  %v5398_v63 = vadd.f32 %v5366_v56, %v5297_v31  ;;  %v5165_v52 = vmul.f32 %v8914_v50, %v5730_v40  ;;  %v5467_v14 = vmul.f32 %v8943_v27, %v5731_v22 }
 0x527   : > { %5027 = vst.msk [vmem:[#allocation2 + $0x49] sm:$0xff] %vm336_vm0, %v4995_v23  ;;  %v4996_v51 = vmax.f32 %v4884_v59, 0.0  ;;  %v5932_v5 = vsel %vm336_vm0, %v5900_v36, 0.0  ;;  %v5097_v44 = vmul.f32 %v8909_v7, %v5630_v3  ;;  %v5166_v12 = vmul.f32 %v8914_v50, %v5731_v22 }
 0x528   : > { %5933 = vadd.xlane.f32.xlu0 %v5932_v5  ;;  %v5901_v9 = vadd.f32 %v5869_v25, %v5800_v43  ;;  %v5498_v61 = vadd.f32 %v5466_v29, %v5397_v38  ;;  %v5499_v57 = vadd.f32 %v5467_v14, %v5398_v63  ;;  %v5197_v56 = vadd.f32 %v5165_v52, %v5096_v28  ;;  %v9011_v14 = vpop.f32.mrb[108].mxu1 }
 0x529   : > { %5028 = vst.msk [vmem:[#allocation2 + $0x51] sm:$0xff] %vm336_vm0, %v4996_v51  ;;  %v6803_v17 = vpop.f32.mrb[60].mxu0  ;;  %v5266_v23 = vmul.f32 %v8923_v41, %v5831_v24  ;;  %v5567_v36 = vmul.f32 %v8952_v46, %v5831_v24  ;;  %v5568_v3 = vmul.f32 %v8952_v46, %v5832_v1  ;;  %v5198_v25 = vadd.f32 %v5166_v12, %v5097_v44 }
 0x52a   : > { %v5935_v21 = vsel %vm336_vm0, %v5901_v9, 0.0  ;;  %v6804_v35 = vpop.f32.mrb[61].mxu0  ;;  %v5267_v24 = vmul.f32 %v8923_v41, %v5832_v1 }
 0x52b   : > { %5936 = vadd.xlane.f32.xlu1 %v5935_v21  ;;  %v6805_v62 = vadd.f32 %v6804_v35, %v6803_v17  ;;  %v6806_v30 = vpop.f32.mrb[62].mxu0  ;;  %v5599_v51 = vadd.f32 %v5567_v36, %v5498_v61  ;;  %v5600_v9 = vadd.f32 %v5568_v3, %v5499_v57  ;;  %v5298_v28 = vadd.f32 %v5266_v23, %v5197_v56 }
 0x52c   : > { %v6807_v45 = vpop.f32.mrb[63].mxu0  ;;  %v5299_v61 = vadd.f32 %v5267_v24, %v5198_v25 }
 0x52d   : > { %v4728_v40 = vadd.f32 %v6805_v62, %v8893_v4  ;;  %v6808_v59 = vadd.f32 %v6807_v45, %v6806_v30  ;;  %v9015_v45 = vpop.f32.mrb[109].mxu1 }
 0x52e   : > { %v5631_v55 = vld [vmem:[#allocation2 + $0x48] sm:$0xff] }
 0x52f   : > { %v5732_v43 = vld [vmem:[#allocation2 + $0x49] sm:$0xff]  ;;  %v4889_v22 = vadd.f32 %v8828_v47, %v4728_v40  ;;  %v4731_v31 = vadd.f32 %v6808_v59, %v8893_v4  ;;  %v5668_v5 = vmul.f32 %v8957_v18, %v5631_v55  ;;  %v5367_v52 = vmul.f32 %v8932_v49, %v5631_v55 }
 0x530   : > { %v5833_v38 = vld [vmem:[#allocation2 + $0x4a] sm:$0xff]  ;;  %v5769_v35 = vmul.f32 %v8966_v10, %v5732_v43  ;;  %v5834_v12 = vld [vmem:[#allocation2 + $0x52] sm:$0xff]  ;;  %v5468_v30 = vmul.f32 %v8943_v27, %v5732_v43  ;;  %v5098_v59 = vmul.f32 %v8909_v7, %v5631_v55  ;;  %v5167_v36 = vmul.f32 %v8914_v50, %v5732_v43 }
 0x531   : > { %v5632_v63 = vld [vmem:[#allocation2 + $0x50] sm:$0xff]  ;;  %v4997_v17 = vmax.f32 %v4889_v22, 0.0  ;;  %v4892_v29 = vadd.f32 %v8833_v16, %v4731_v31  ;;  %v5700_v21 = vadd.f32 %v5668_v5, %v5599_v51  ;;  %v5399_v62 = vadd.f32 %v5367_v52, %v5298_v28 }
 0x532   : > { %v5733_v47 = vld [vmem:[#allocation2 + $0x51] sm:$0xff]  ;;  %v5669_v44 = vmul.f32 %v8957_v18, %v5632_v63  ;;  %v5870_v16 = vmul.f32 %v8974_v34, %v5833_v38  ;;  %v5368_v56 = vmul.f32 %v8932_v49, %v5632_v63  ;;  %v5871_v22 = vmul.f32 %v8974_v34, %v5834_v12 }
 0x533   : > { %5029 = vst.msk [vmem:[#allocation2 + $0x61] sm:$0xff] %vm336_vm0, %v4997_v17  ;;  %v4998_v1 = vmax.f32 %v4892_v29, 0.0  ;;  %v5801_v57 = vadd.f32 %v5769_v35, %v5700_v21  ;;  %v5770_v40 = vmul.f32 %v8966_v10, %v5733_v47  ;;  %v5500_v31 = vadd.f32 %v5468_v30, %v5399_v62  ;;  %v9029_v29 = vpop.f32.mrb[110].mxu1 }
 0x534   : > { %v5701_v23 = vadd.f32 %v5669_v44, %v5600_v9  ;;  %v5400_v28 = vadd.f32 %v5368_v56, %v5299_v61  ;;  %v5099_v52 = vmul.f32 %v8909_v7, %v5632_v63  ;;  %v5168_v9 = vmul.f32 %v8914_v50, %v5733_v47  ;;  %v9033_v61 = vpop.f32.mrb[111].mxu1 }
 0x535   : > { %5030 = vst.msk [vmem:[#allocation2 + $0x69] sm:$0xff] %vm336_vm0, %v4998_v1  ;;  %v6809_v3 = vpop.f32.mrb[64].mxu0  ;;  %v5902_v25 = vadd.f32 %v5870_v16, %v5801_v57  ;;  %v5569_v43 = vmul.f32 %v8952_v46, %v5833_v38  ;;  %v5469_v44 = vmul.f32 %v8943_v27, %v5733_v47  ;;  %v5199_v62 = vadd.f32 %v5167_v36, %v5098_v59 }
 0x536   : > { %v6810_v51 = vpop.f32.mrb[65].mxu0  ;;  %v5802_v5 = vadd.f32 %v5770_v40, %v5701_v23  ;;  %v5268_v30 = vmul.f32 %v8923_v41, %v5833_v38  ;;  %v5200_v40 = vadd.f32 %v5168_v9, %v5099_v52  ;;  %v5570_v59 = vmul.f32 %v8952_v46, %v5834_v12 }
 0x537   : > { %v6811_v24 = vadd.f32 %v6810_v51, %v6809_v3  ;;  %v6812_v17 = vpop.f32.mrb[66].mxu0  ;;  %v5938_v55 = vsel %vm336_vm0, %v5902_v25, 0.0  ;;  %v5601_v57 = vadd.f32 %v5569_v43, %v5500_v31  ;;  %v5501_v23 = vadd.f32 %v5469_v44, %v5400_v28 }
 0x538   : > { %v6813_v21 = vpop.f32.mrb[67].mxu0  ;;  %5939 = vadd.xlane.f32.xlu0 %v5938_v55  ;;  %v5903_v35 = vadd.f32 %v5871_v22, %v5802_v5  ;;  %v5300_v51 = vadd.f32 %v5268_v30, %v5199_v62  ;;  %v5269_v5 = vmul.f32 %v8923_v41, %v5834_v12 }
 0x539   : > { %v4736_v63 = vadd.f32 %v6811_v24, %v8893_v4  ;;  %v6814_v1 = vadd.f32 %v6813_v21, %v6812_v17  ;;  %v5602_v55 = vadd.f32 %v5570_v59, %v5501_v23 }
 0x53a   : > { %v5633_v16 = vld [vmem:[#allocation2 + $0x60] sm:$0xff]  ;;  %v5941_v22 = vsel %vm336_vm0, %v5903_v35, 0.0  ;;  %v5301_v35 = vadd.f32 %v5269_v5, %v5200_v40 }
 0x53b   : > { %v5734_v56 = vld [vmem:[#allocation2 + $0x61] sm:$0xff]  ;;  %v4897_v3 = vadd.f32 %v8851_v53, %v4736_v63  ;;  %v4739_v25 = vadd.f32 %v6814_v1, %v8893_v4  ;;  %v5670_v47 = vmul.f32 %v8957_v18, %v5633_v16  ;;  %v5369_v31 = vmul.f32 %v8932_v49, %v5633_v16 }
 0x53c   : > { %5942 = vadd.xlane.f32.xlu0 %v5941_v22  ;;  %v5835_v38 = vld [vmem:[#allocation2 + $0x62] sm:$0xff]  ;;  %v5771_v9 = vmul.f32 %v8966_v10, %v5734_v56  ;;  %v5836_v21 = vld [vmem:[#allocation2 + $0x6a] sm:$0xff]  ;;  %v5100_v1 = vmul.f32 %v8909_v7, %v5633_v16 }
 0x53d   : > { %v5634_v36 = vld [vmem:[#allocation2 + $0x68] sm:$0xff]  ;;  %v4999_v28 = vmax.f32 %v4897_v3, 0.0  ;;  %v4900_v52 = vadd.f32 %v8855_v42, %v4739_v25  ;;  %v5702_v53 = vadd.f32 %v5670_v47, %v5601_v57  ;;  %v5872_v17 = vmul.f32 %v8974_v34, %v5835_v38 }
 0x53e   : > { %v5735_v24 = vld [vmem:[#allocation2 + $0x69] sm:$0xff]  ;;  %v5671_v43 = vmul.f32 %v8957_v18, %v5634_v36  ;;  %v5401_v30 = vadd.f32 %v5369_v31, %v5300_v51  ;;  %v5370_v12 = vmul.f32 %v8932_v49, %v5634_v36  ;;  %v5169_v57 = vmul.f32 %v8914_v50, %v5734_v56 }
 0x53f   : > { %5031 = vst.msk [vmem:[#allocation2 + $0x79] sm:$0xff] %vm336_vm0, %v4999_v28  ;;  %v5000_v44 = vmax.f32 %v4900_v52, 0.0  ;;  %v5803_v62 = vadd.f32 %v5771_v9, %v5702_v53  ;;  %v5772_v42 = vmul.f32 %v8966_v10, %v5735_v24  ;;  %v5873_v40 = vmul.f32 %v8974_v34, %v5836_v21 }
 0x540   : > { %v5703_v63 = vadd.f32 %v5671_v43, %v5602_v55  ;;  %v5470_v25 = vmul.f32 %v8943_v27, %v5734_v56  ;;  %v5402_v59 = vadd.f32 %v5370_v12, %v5301_v35  ;;  %v5101_v51 = vmul.f32 %v8909_v7, %v5634_v36 }
 0x541   : > { %5032 = vst.msk [vmem:[#allocation2 + $0x81] sm:$0xff] %vm336_vm0, %v5000_v44  ;;  %v6815_v23 = vpop.f32.mrb[68].mxu0  ;;  %v5904_v3 = vadd.f32 %v5872_v17, %v5803_v62  ;;  %v5170_v31 = vmul.f32 %v8914_v50, %v5735_v24  ;;  %v5471_v17 = vmul.f32 %v8943_v27, %v5735_v24  ;;  %v5201_v55 = vadd.f32 %v5169_v57, %v5100_v1 }
 0x542   : > { %v6816_v22 = vpop.f32.mrb[69].mxu0  ;;  %v5804_v47 = vadd.f32 %v5772_v42, %v5703_v63  ;;  %v5502_v52 = vadd.f32 %v5470_v25, %v5401_v30  ;;  %v5270_v56 = vmul.f32 %v8923_v41, %v5835_v38  ;;  %v5571_v36 = vmul.f32 %v8952_v46, %v5835_v38 }
 0x543   : > { %v6817_v5 = vadd.f32 %v6816_v22, %v6815_v23  ;;  %v6818_v28 = vpop.f32.mrb[70].mxu0  ;;  %v5944_v16 = vsel %vm336_vm0, %v5904_v3, 0.0  ;;  %v5503_v63 = vadd.f32 %v5471_v17, %v5402_v59  ;;  %v5202_v42 = vadd.f32 %v5170_v31, %v5101_v51 }
 0x544   : > { %v6819_v53 = vpop.f32.mrb[71].mxu0  ;;  %5945 = vadd.xlane.f32.xlu1 %v5944_v16  ;;  %v5905_v9 = vadd.f32 %v5873_v40, %v5804_v47  ;;  %v5603_v24 = vadd.f32 %v5571_v36, %v5502_v52  ;;  %v5572_v3 = vmul.f32 %v8952_v46, %v5836_v21  ;;  %v5302_v25 = vadd.f32 %v5270_v56, %v5201_v55 }
 0x545   : > { %v4744_v43 = vadd.f32 %v6817_v5, %v8893_v4  ;;  %v6820_v35 = vadd.f32 %v6819_v53, %v6818_v28  ;;  %v5271_v22 = vmul.f32 %v8923_v41, %v5836_v21 }
 0x546   : > { %v5947_v44 = vsel %vm336_vm0, %v5905_v9, 0.0  ;;  %v5635_v62 = vld [vmem:[#allocation2 + $0x78] sm:$0xff]  ;;  %v5604_v28 = vadd.f32 %v5572_v3, %v5503_v63 }
 0x547   : > { %v5736_v12 = vld [vmem:[#allocation2 + $0x79] sm:$0xff]  ;;  %v4905_v30 = vadd.f32 %v8848_v15, %v4744_v43  ;;  %v4747_v23 = vadd.f32 %v6820_v35, %v8893_v4  ;;  %5948 = vadd.xlane.f32.xlu0 %v5947_v44  ;;  %v5672_v1 = vmul.f32 %v8957_v18, %v5635_v62  ;;  %v5371_v38 = vmul.f32 %v8932_v49, %v5635_v62 }
 0x548   : > { %v5837_v57 = vld [vmem:[#allocation2 + $0x7a] sm:$0xff]  ;;  %v5773_v15 = vmul.f32 %v8966_v10, %v5736_v12  ;;  %v5838_v52 = vld [vmem:[#allocation2 + $0x82] sm:$0xff]  ;;  %v5303_v53 = vadd.f32 %v5271_v22, %v5202_v42  ;;  %v5102_v43 = vmul.f32 %v8909_v7, %v5635_v62  ;;  %v5171_v35 = vmul.f32 %v8914_v50, %v5736_v12 }
 0x549   : > { %v5636_v40 = vld [vmem:[#allocation2 + $0x80] sm:$0xff]  ;;  %v5001_v47 = vmax.f32 %v4905_v30, 0.0  ;;  %v4908_v59 = vadd.f32 %v8853_v48, %v4747_v23  ;;  %v5704_v51 = vadd.f32 %v5672_v1, %v5603_v24  ;;  %v5874_v5 = vmul.f32 %v8974_v34, %v5837_v57 }
 0x54a   : > { %v5737_v31 = vld [vmem:[#allocation2 + $0x81] sm:$0xff]  ;;  %v5673_v16 = vmul.f32 %v8957_v18, %v5636_v40  ;;  %v5403_v55 = vadd.f32 %v5371_v38, %v5302_v25  ;;  %v5372_v21 = vmul.f32 %v8932_v49, %v5636_v40  ;;  %v5875_v63 = vmul.f32 %v8974_v34, %v5838_v52 }
 0x54b   : > { %5033 = vst.msk [vmem:[#allocation2 + $0x91] sm:$0xff] %vm336_vm0, %v5001_v47  ;;  %v5002_v9 = vmax.f32 %v4908_v59, 0.0  ;;  %v5805_v17 = vadd.f32 %v5773_v15, %v5704_v51  ;;  %v5774_v48 = vmul.f32 %v8966_v10, %v5737_v31  ;;  %v5472_v42 = vmul.f32 %v8943_v27, %v5736_v12 }
 0x54c   : > { %v5705_v56 = vadd.f32 %v5673_v16, %v5604_v28  ;;  %v5404_v24 = vadd.f32 %v5372_v21, %v5303_v53  ;;  %v5103_v1 = vmul.f32 %v8909_v7, %v5636_v40  ;;  %v5172_v3 = vmul.f32 %v8914_v50, %v5737_v31 }
 0x54d   : > { %5034 = vst.msk [vmem:[#allocation2 + $0x99] sm:$0xff] %vm336_vm0, %v5002_v9  ;;  %v6821_v36 = vpop.f32.mrb[72].mxu0  ;;  %v5906_v44 = vadd.f32 %v5874_v5, %v5805_v17  ;;  %v5504_v22 = vadd.f32 %v5472_v42, %v5403_v55  ;;  %v5473_v51 = vmul.f32 %v8943_v27, %v5737_v31  ;;  %v5203_v15 = vadd.f32 %v5171_v35, %v5102_v43 }
 0x54e   : > { %v6822_v30 = vpop.f32.mrb[73].mxu0  ;;  %v5806_v23 = vadd.f32 %v5774_v48, %v5705_v56  ;;  %v5272_v12 = vmul.f32 %v8923_v41, %v5837_v57  ;;  %v5573_v40 = vmul.f32 %v8952_v46, %v5837_v57  ;;  %v5204_v21 = vadd.f32 %v5172_v3, %v5103_v1 }
 0x54f   : > { %v6823_v25 = vadd.f32 %v6822_v30, %v6821_v36  ;;  %v6824_v38 = vpop.f32.mrb[74].mxu0  ;;  %v5950_v62 = vsel %vm336_vm0, %v5906_v44, 0.0  ;;  %v5505_v17 = vadd.f32 %v5473_v51, %v5404_v24  ;;  %v5574_v35 = vmul.f32 %v8952_v46, %v5838_v52 }
 0x550   : > { %v6825_v47 = vpop.f32.mrb[75].mxu0  ;;  %5951 = vadd.xlane.f32.xlu1 %v5950_v62  ;;  %v5907_v59 = vadd.f32 %v5875_v63, %v5806_v23  ;;  %v5605_v31 = vadd.f32 %v5573_v40, %v5504_v22  ;;  %v5304_v44 = vadd.f32 %v5272_v12, %v5203_v15  ;;  %v5273_v63 = vmul.f32 %v8923_v41, %v5838_v52 }
 0x551   : > { %v4752_v5 = vadd.f32 %v6823_v25, %v8893_v4  ;;  %v6826_v28 = vadd.f32 %v6825_v47, %v6824_v38  ;;  %v5606_v3 = vadd.f32 %v5574_v35, %v5505_v17 }
 0x552   : > { %v5953_v16 = vsel %vm336_vm0, %v5907_v59, 0.0  ;;  %v5637_v53 = vld [vmem:[#allocation2 + $0x90] sm:$0xff]  ;;  %v5305_v62 = vadd.f32 %v5273_v63, %v5204_v21 }
 0x553   : > { %v5738_v9 = vld [vmem:[#allocation2 + $0x91] sm:$0xff]  ;;  %v4913_v55 = vadd.f32 %v8867_v33, %v4752_v5  ;;  %v4755_v56 = vadd.f32 %v6826_v28, %v8893_v4  ;;  %5954 = vadd.xlane.f32.xlu0 %v5953_v16  ;;  %v5674_v48 = vmul.f32 %v8957_v18, %v5637_v53  ;;  %v5373_v57 = vmul.f32 %v8932_v49, %v5637_v53 }
 0x554   : > { %v5839_v43 = vld [vmem:[#allocation2 + $0x92] sm:$0xff]  ;;  %v5775_v33 = vmul.f32 %v8966_v10, %v5738_v9  ;;  %v5840_v38 = vld [vmem:[#allocation2 + $0x9a] sm:$0xff]  ;;  %v5104_v15 = vmul.f32 %v8909_v7, %v5637_v53  ;;  %v5173_v12 = vmul.f32 %v8914_v50, %v5738_v9  ;;  %v5474_v16 = vmul.f32 %v8943_v27, %v5738_v9 }
 0x555   : > { %v5638_v36 = vld [vmem:[#allocation2 + $0x98] sm:$0xff]  ;;  %v5003_v42 = vmax.f32 %v4913_v55, 0.0  ;;  %v4916_v30 = vadd.f32 %v8871_v54, %v4755_v56  ;;  %v5706_v23 = vadd.f32 %v5674_v48, %v5605_v31  ;;  %v5876_v1 = vmul.f32 %v8974_v34, %v5839_v43 }
 0x556   : > { %v5739_v24 = vld [vmem:[#allocation2 + $0x99] sm:$0xff]  ;;  %v5675_v25 = vmul.f32 %v8957_v18, %v5638_v36  ;;  %v5405_v59 = vadd.f32 %v5373_v57, %v5304_v44  ;;  %v5374_v52 = vmul.f32 %v8932_v49, %v5638_v36  ;;  %v5877_v40 = vmul.f32 %v8974_v34, %v5840_v38 }
 0x557   : > { %5035 = vst.msk [vmem:[#allocation2 + $0xa9] sm:$0xff] %vm336_vm0, %v5003_v42  ;;  %v5004_v22 = vmax.f32 %v4916_v30, 0.0  ;;  %v5807_v47 = vadd.f32 %v5775_v33, %v5706_v23  ;;  %v5776_v54 = vmul.f32 %v8966_v10, %v5739_v24  ;;  %v5105_v56 = vmul.f32 %v8909_v7, %v5638_v36 }
 0x558   : > { %v5707_v51 = vadd.f32 %v5675_v25, %v5606_v3  ;;  %v5406_v55 = vadd.f32 %v5374_v52, %v5305_v62  ;;  %v5174_v31 = vmul.f32 %v8914_v50, %v5739_v24  ;;  %v5506_v44 = vadd.f32 %v5474_v16, %v5405_v59 }
 0x559   : > { %5036 = vst.msk [vmem:[#allocation2 + $0xb1] sm:$0xff] %vm336_vm0, %v5004_v22  ;;  %v6827_v5 = vpop.f32.mrb[76].mxu0  ;;  %v5908_v28 = vadd.f32 %v5876_v1, %v5807_v47  ;;  %v5475_v42 = vmul.f32 %v8943_v27, %v5739_v24  ;;  %v5205_v30 = vadd.f32 %v5173_v12, %v5104_v15  ;;  %v5274_v9 = vmul.f32 %v8923_v41, %v5839_v43 }
 0x55a   : > { %v6828_v17 = vpop.f32.mrb[77].mxu0  ;;  %v5808_v21 = vadd.f32 %v5776_v54, %v5707_v51  ;;  %v5575_v36 = vmul.f32 %v8952_v46, %v5839_v43  ;;  %v5206_v22 = vadd.f32 %v5174_v31, %v5105_v56  ;;  %v5576_v54 = vmul.f32 %v8952_v46, %v5840_v38 }
 0x55b   : > { %v6829_v48 = vadd.f32 %v6828_v17, %v6827_v5  ;;  %v6830_v35 = vpop.f32.mrb[78].mxu0  ;;  %v5956_v53 = vsel %vm336_vm0, %v5908_v28, 0.0  ;;  %v5507_v62 = vadd.f32 %v5475_v42, %v5406_v55  ;;  %v5306_v12 = vadd.f32 %v5274_v9, %v5205_v30 }
 0x55c   : > { %v6831_v57 = vpop.f32.mrb[79].mxu0  ;;  %5957 = vadd.xlane.f32.xlu1 %v5956_v53  ;;  %v5909_v63 = vadd.f32 %v5877_v40, %v5808_v21  ;;  %v5607_v24 = vadd.f32 %v5575_v36, %v5506_v44  ;;  %v5275_v5 = vmul.f32 %v8923_v41, %v5840_v38 }
 0x55d   : > { %v4760_v23 = vadd.f32 %v6829_v48, %v8893_v4  ;;  %v6832_v33 = vadd.f32 %v6831_v57, %v6830_v35  ;;  %v5608_v55 = vadd.f32 %v5576_v54, %v5507_v62 }
 0x55e   : > { %v5959_v1 = vsel %vm336_vm0, %v5909_v63, 0.0  ;;  %v5639_v3 = vld [vmem:[#allocation2 + $0xa8] sm:$0xff]  ;;  %v5307_v48 = vadd.f32 %v5275_v5, %v5206_v22 }
 0x55f   : > { %v5740_v25 = vld [vmem:[#allocation2 + $0xa9] sm:$0xff]  ;;  %v4921_v47 = vadd.f32 %v8863_v19, %v4760_v23  ;;  %v4763_v59 = vadd.f32 %v6832_v33, %v8893_v4  ;;  %5960 = vadd.xlane.f32.xlu0 %v5959_v1  ;;  %v5676_v52 = vmul.f32 %v8957_v18, %v5639_v3  ;;  %v5375_v43 = vmul.f32 %v8932_v49, %v5639_v3 }
 0x560   : > { %v5841_v51 = vld [vmem:[#allocation2 + $0xaa] sm:$0xff]  ;;  %v5777_v19 = vmul.f32 %v8966_v10, %v5740_v25  ;;  %v5842_v31 = vld [vmem:[#allocation2 + $0xb2] sm:$0xff]  ;;  %v5106_v63 = vmul.f32 %v8909_v7, %v5639_v3  ;;  %v5175_v42 = vmul.f32 %v8914_v50, %v5740_v25  ;;  %v5476_v33 = vmul.f32 %v8943_v27, %v5740_v25 }
 0x561   : > { %v5640_v15 = vld [vmem:[#allocation2 + $0xb0] sm:$0xff]  ;;  %v5005_v28 = vmax.f32 %v4921_v47, 0.0  ;;  %v4924_v40 = vadd.f32 %v8869_v37, %v4763_v59  ;;  %v5708_v16 = vadd.f32 %v5676_v52, %v5607_v24  ;;  %v5878_v21 = vmul.f32 %v8974_v34, %v5841_v51 }
 0x562   : > { %v5741_v17 = vld [vmem:[#allocation2 + $0xb1] sm:$0xff]  ;;  %v5677_v56 = vmul.f32 %v8957_v18, %v5640_v15  ;;  %v5407_v44 = vadd.f32 %v5375_v43, %v5306_v12  ;;  %v5376_v38 = vmul.f32 %v8932_v49, %v5640_v15  ;;  %v5879_v23 = vmul.f32 %v8974_v34, %v5842_v31 }
 0x563   : > { %5037 = vst.msk [vmem:[#allocation2 + $0xc1] sm:$0xff] %vm336_vm0, %v5005_v28  ;;  %v5006_v35 = vmax.f32 %v4924_v40, 0.0  ;;  %v5809_v53 = vadd.f32 %v5777_v19, %v5708_v16  ;;  %v5778_v37 = vmul.f32 %v8966_v10, %v5741_v17  ;;  %v5107_v22 = vmul.f32 %v8909_v7, %v5640_v15 }
 0x564   : > { %v5709_v57 = vadd.f32 %v5677_v56, %v5608_v55  ;;  %v5408_v62 = vadd.f32 %v5376_v38, %v5307_v48  ;;  %v5176_v47 = vmul.f32 %v8914_v50, %v5741_v17  ;;  %v5508_v52 = vadd.f32 %v5476_v33, %v5407_v44 }
 0x565   : > { %5038 = vst.msk [vmem:[#allocation2 + $0xc9] sm:$0xff] %vm336_vm0, %v5006_v35  ;;  %v6833_v30 = vpop.f32.mrb[80].mxu0  ;;  %v5910_v9 = vadd.f32 %v5878_v21, %v5809_v53  ;;  %v5477_v43 = vmul.f32 %v8943_v27, %v5741_v17  ;;  %v5207_v5 = vadd.f32 %v5175_v42, %v5106_v63  ;;  %v5276_v25 = vmul.f32 %v8923_v41, %v5841_v51 }
 0x566   : > { %v6834_v36 = vpop.f32.mrb[81].mxu0  ;;  %v5810_v1 = vadd.f32 %v5778_v37, %v5709_v57  ;;  %v5577_v15 = vmul.f32 %v8952_v46, %v5841_v51  ;;  %v5208_v56 = vadd.f32 %v5176_v47, %v5107_v22  ;;  %v5578_v38 = vmul.f32 %v8952_v46, %v5842_v31 }
 0x567   : > { %v6835_v59 = vadd.f32 %v6834_v36, %v6833_v30  ;;  %v6836_v24 = vpop.f32.mrb[82].mxu0  ;;  %v5962_v3 = vsel %vm336_vm0, %v5910_v9, 0.0  ;;  %v5509_v55 = vadd.f32 %v5477_v43, %v5408_v62  ;;  %v5308_v37 = vadd.f32 %v5276_v25, %v5207_v5 }
 0x568   : > { %v6837_v54 = vpop.f32.mrb[83].mxu0  ;;  %5963 = vadd.xlane.f32.xlu1 %v5962_v3  ;;  %v5911_v12 = vadd.f32 %v5879_v23, %v5810_v1  ;;  %v5609_v17 = vadd.f32 %v5577_v15, %v5508_v52  ;;  %v5277_v63 = vmul.f32 %v8923_v41, %v5842_v31 }
 0x569   : > { %v4768_v28 = vadd.f32 %v6835_v59, %v8893_v4  ;;  %v6838_v40 = vadd.f32 %v6837_v54, %v6836_v24  ;;  %v5610_v36 = vadd.f32 %v5578_v38, %v5509_v55 }
 0x56a   : > { %v5965_v16 = vsel %vm336_vm0, %v5911_v12, 0.0  ;;  %v5641_v19 = vld [vmem:[#allocation2 + $0xc0] sm:$0xff]  ;;  %v5309_v22 = vadd.f32 %v5277_v63, %v5208_v56 }
 0x56b   : > { %v5742_v21 = vld [vmem:[#allocation2 + $0xc1] sm:$0xff]  ;;  %v4929_v48 = vadd.f32 %v8876_v0, %v4768_v28  ;;  %v4771_v35 = vadd.f32 %v6838_v40, %v8893_v4  ;;  %5966 = vadd.xlane.f32.xlu0 %v5965_v16  ;;  %v5678_v53 = vmul.f32 %v8957_v18, %v5641_v19  ;;  %v5377_v51 = vmul.f32 %v8932_v49, %v5641_v19 }
 0x56c   : > { %v5843_v44 = vld [vmem:[#allocation2 + $0xc2] sm:$0xff]  ;;  %v5779_v0 = vmul.f32 %v8966_v10, %v5742_v21  ;;  %v5844_v62 = vld [vmem:[#allocation2 + $0xca] sm:$0xff]  ;;  %v5108_v52 = vmul.f32 %v8909_v7, %v5641_v19  ;;  %v5177_v54 = vmul.f32 %v8914_v50, %v5742_v21  ;;  %v5478_v25 = vmul.f32 %v8943_v27, %v5742_v21 }
 0x56d   : > { %v5642_v57 = vld [vmem:[#allocation2 + $0xc8] sm:$0xff]  ;;  %v5007_v42 = vmax.f32 %v4929_v48, 0.0  ;;  %v4932_v30 = vadd.f32 %v8880_v8, %v4771_v35  ;;  %v5710_v9 = vadd.f32 %v5678_v53, %v5609_v17  ;;  %v5880_v33 = vmul.f32 %v8974_v34, %v5843_v44 }
 0x56e   : > { %v5743_v23 = vld [vmem:[#allocation2 + $0xc9] sm:$0xff]  ;;  %v5679_v1 = vmul.f32 %v8957_v18, %v5642_v57  ;;  %v5409_v24 = vadd.f32 %v5377_v51, %v5308_v37  ;;  %v5378_v31 = vmul.f32 %v8932_v49, %v5642_v57  ;;  %v5881_v5 = vmul.f32 %v8974_v34, %v5844_v62 }
 0x56f   : > { %5039 = vst.msk [vmem:[#allocation2 + $0xd9] sm:$0xff] %vm336_vm0, %v5007_v42  ;;  %v5008_v47 = vmax.f32 %v4932_v30, 0.0  ;;  %v5811_v59 = vadd.f32 %v5779_v0, %v5710_v9  ;;  %v5780_v8 = vmul.f32 %v8966_v10, %v5743_v23  ;;  %v5109_v16 = vmul.f32 %v8909_v7, %v5642_v57 }
 0x570   : > { %v5711_v3 = vadd.f32 %v5679_v1, %v5610_v36  ;;  %v5410_v15 = vadd.f32 %v5378_v31, %v5309_v22  ;;  %v5178_v55 = vmul.f32 %v8914_v50, %v5743_v23  ;;  %v5510_v35 = vadd.f32 %v5478_v25, %v5409_v24 }
 0x571   : > { %5040 = vst.msk [vmem:[#allocation2 + $0xe1] sm:$0xff] %vm336_vm0, %v5008_v47  ;;  %v6839_v12 = vpop.f32.mrb[84].mxu0  ;;  %v5912_v43 = vadd.f32 %v5880_v33, %v5811_v59  ;;  %v5479_v38 = vmul.f32 %v8943_v27, %v5743_v23  ;;  %v5209_v37 = vadd.f32 %v5177_v54, %v5108_v52  ;;  %v5278_v21 = vmul.f32 %v8923_v41, %v5843_v44 }
 0x572   : > { %v6840_v28 = vpop.f32.mrb[85].mxu0  ;;  %v5812_v40 = vadd.f32 %v5780_v8, %v5711_v3  ;;  %v5579_v57 = vmul.f32 %v8952_v46, %v5843_v44  ;;  %v5210_v33 = vadd.f32 %v5178_v55, %v5109_v16  ;;  %v5580_v59 = vmul.f32 %v8952_v46, %v5844_v62 }
 0x573   : > { %v6841_v56 = vadd.f32 %v6840_v28, %v6839_v12  ;;  %v6842_v48 = vpop.f32.mrb[86].mxu0  ;;  %v5968_v19 = vsel %vm336_vm0, %v5912_v43, 0.0  ;;  %v5511_v0 = vadd.f32 %v5479_v38, %v5410_v15  ;;  %v5310_v31 = vadd.f32 %v5278_v21, %v5209_v37 }
 0x574   : > { %v6843_v17 = vpop.f32.mrb[87].mxu0  ;;  %5969 = vadd.xlane.f32.xlu1 %v5968_v19  ;;  %v5913_v53 = vadd.f32 %v5881_v5, %v5812_v40  ;;  %v5611_v23 = vadd.f32 %v5579_v57, %v5510_v35  ;;  %v5279_v3 = vmul.f32 %v8923_v41, %v5844_v62 }
 0x575   : > { %v4776_v51 = vadd.f32 %v6841_v56, %v8893_v4  ;;  %v6844_v63 = vadd.f32 %v6843_v17, %v6842_v48  ;;  %v5612_v43 = vadd.f32 %v5580_v59, %v5511_v0 }
 0x576   : > { %v5971_v42 = vsel %vm336_vm0, %v5913_v53, 0.0  ;;  %v5643_v30 = vld [vmem:[#allocation2 + $0xd8] sm:$0xff]  ;;  %v5311_v28 = vadd.f32 %v5279_v3, %v5210_v33 }
 0x577   : > { %v5744_v9 = vld [vmem:[#allocation2 + $0xd9] sm:$0xff]  ;;  %v4937_v36 = vadd.f32 %v8874_v26, %v4776_v51  ;;  %v4779_v1 = vadd.f32 %v6844_v63, %v8893_v4  ;;  %5972 = vadd.xlane.f32.xlu0 %v5971_v42  ;;  %v5680_v22 = vmul.f32 %v8957_v18, %v5643_v30  ;;  %v5379_v44 = vmul.f32 %v8932_v49, %v5643_v30 }
 0x578   : > { %v5845_v47 = vld [vmem:[#allocation2 + $0xda] sm:$0xff]  ;;  %v5781_v26 = vmul.f32 %v8966_v10, %v5744_v9  ;;  %v5846_v25 = vld [vmem:[#allocation2 + $0xe2] sm:$0xff]  ;;  %v5110_v55 = vmul.f32 %v8909_v7, %v5643_v30  ;;  %v5179_v56 = vmul.f32 %v8914_v50, %v5744_v9  ;;  %v5480_v17 = vmul.f32 %v8943_v27, %v5744_v9 }
 0x579   : > { %v5644_v24 = vld [vmem:[#allocation2 + $0xe0] sm:$0xff]  ;;  %v5009_v8 = vmax.f32 %v4937_v36, 0.0  ;;  %v4940_v52 = vadd.f32 %v8878_v6, %v4779_v1  ;;  %v5712_v54 = vadd.f32 %v5680_v22, %v5611_v23  ;;  %v5882_v12 = vmul.f32 %v8974_v34, %v5845_v47 }
 0x57a   : > { %v5745_v4 = vld [vmem:[#allocation2 + $0xe1] sm:$0xff]  ;;  %v5681_v5 = vmul.f32 %v8957_v18, %v5644_v24  ;;  %v5411_v16 = vadd.f32 %v5379_v44, %v5310_v31  ;;  %v5380_v41 = vmul.f32 %v8932_v49, %v5644_v24  ;;  %v5883_v35 = vmul.f32 %v8974_v34, %v5846_v25  ;;  %v9188_v49 = vld [vmem:[%s9633_s7] ss:$0 sm:$0xff] }
 0x57b   : > { %5041 = vst.msk [vmem:[#allocation2 + $0xf1] sm:$0xff] %vm336_vm0, %v5009_v8  ;;  %v5010_v40 = vmax.f32 %v4940_v52, 0.0  ;;  %v5813_v15 = vadd.f32 %v5781_v26, %v5712_v54  ;;  %v5782_v6 = vmul.f32 %v8966_v10, %v5745_v4  ;;  %v5111_v7 = vmul.f32 %v9188_v49, %v5644_v24  ;;  %v9194_v50 = vld [vmem:[%s9633_s7 + $0x1] ss:$0 sm:$0xff]  ;;  %v9202_v36 = vld [vmem:[%s9633_s7 + $0x2] ss:$0 sm:$0xff] }
 0x57c   : > { %v5713_v62 = vadd.f32 %v5681_v5, %v5612_v43  ;;  %v5412_v37 = vadd.f32 %v5380_v41, %v5311_v28  ;;  %v5180_v21 = vmul.f32 %v9194_v50, %v5745_v4  ;;  %v5512_v42 = vadd.f32 %v5480_v17, %v5411_v16  ;;  %v9208_v23 = vld [vmem:[%s9632_s6] ss:$0 sm:$0xff] }
 0x57d   : > { %5042 = vst.msk [vmem:[#allocation2 + $0xf9] sm:$0xff] %vm336_vm0, %v5010_v40  ;;  %v6845_v48 = vpop.f32.mrb[88].mxu0  ;;  %v5914_v19 = vadd.f32 %v5882_v12, %v5813_v15  ;;  %v5481_v0 = vmul.f32 %v8943_v27, %v5745_v4  ;;  %v5211_v33 = vadd.f32 %v5179_v56, %v5110_v55  ;;  %v5280_v1 = vmul.f32 %v9202_v36, %v5845_v47 }
 0x57e   : > { %v6846_v53 = vpop.f32.mrb[89].mxu0  ;;  %v5814_v38 = vadd.f32 %v5782_v6, %v5713_v62  ;;  %v5581_v24 = vmul.f32 %v8952_v46, %v5845_v47  ;;  %v5212_v8 = vadd.f32 %v5180_v21, %v5111_v7  ;;  %v5582_v43 = vmul.f32 %v8952_v46, %v5846_v25  ;;  %v9220_v47 = vld [vmem:[%s9633_s7 + $0x3] ss:$0 sm:$0xff] }
 0x57f   : > { %v6847_v51 = vadd.f32 %v6846_v53, %v6845_v48  ;;  %v6848_v63 = vpop.f32.mrb[90].mxu0  ;;  %v5974_v57 = vsel %vm336_vm0, %v5914_v19, 0.0  ;;  %v5513_v3 = vadd.f32 %v5481_v0, %v5412_v37  ;;  %v5312_v28 = vadd.f32 %v5280_v1, %v5211_v33 }
 0x580   : > { %v6849_v30 = vpop.f32.mrb[91].mxu0  ;;  %5975 = vadd.xlane.f32.xlu1 %v5974_v57  ;;  %v5915_v9 = vadd.f32 %v5883_v35, %v5814_v38  ;;  %v5613_v26 = vadd.f32 %v5581_v24, %v5512_v42 }
 0x581   : > { %v4784_v22 = vadd.f32 %v9208_v23, %v6847_v51  ;;  %v6850_v59 = vadd.f32 %v6849_v30, %v6848_v63  ;;  %v5614_v55 = vadd.f32 %v5582_v43, %v5513_v3  ;;  %v9238_v63 = vld [vmem:[%s9633_s7 + $0x4] ss:$0 sm:$0xff] }
 0x582   : > { %v5977_v27 = vsel %vm336_vm0, %v5915_v9, 0.0  ;;  %v5645_v31 = vld [vmem:[#allocation2 + $0xf0] sm:$0xff] }
 0x583   : > { %v5746_v44 = vld [vmem:[#allocation2 + $0xf1] sm:$0xff]  ;;  %v4945_v52 = vadd.f32 %v8884_v60, %v4784_v22  ;;  %v4787_v54 = vadd.f32 %v9208_v23, %v6850_v59  ;;  %5978 = vadd.xlane.f32.xlu0 %v5977_v27  ;;  %v5682_v4 = vmul.f32 %v8957_v18, %v5645_v31  ;;  %v5381_v40 = vmul.f32 %v9220_v47, %v5645_v31 }
 0x584   : > { %v5847_v12 = vld [vmem:[#allocation2 + $0xf2] sm:$0xff]  ;;  %v5281_v60 = vmul.f32 %v9202_v36, %v5846_v25  ;;  %v5783_v62 = vmul.f32 %v8966_v10, %v5746_v44  ;;  %v5848_v48 = vld [vmem:[#allocation2 + $0xfa] sm:$0xff]  ;;  %v5112_v37 = vmul.f32 %v9188_v49, %v5645_v31  ;;  %v5181_v7 = vmul.f32 %v9194_v50, %v5746_v44 }
 0x585   : > { %v5646_v5 = vld [vmem:[#allocation2 + $0xf8] sm:$0xff]  ;;  %v5011_v15 = vmax.f32 %v4945_v52, 0.0  ;;  %v4948_v16 = vadd.f32 %v8888_v20, %v4787_v54  ;;  %v5714_v41 = vadd.f32 %v5682_v4, %v5613_v26  ;;  %v5884_v46 = vmul.f32 %v8974_v34, %v5847_v12  ;;  %v9250_v52 = vld [vmem:[%s9633_s7 + $0x5] ss:$0 sm:$0xff] }
 0x586   : > { %v5747_v6 = vld [vmem:[#allocation2 + $0xf9] sm:$0xff]  ;;  %v5683_v56 = vmul.f32 %v8957_v18, %v5646_v5  ;;  %v5313_v19 = vadd.f32 %v5281_v60, %v5212_v8  ;;  %v5413_v53 = vadd.f32 %v5381_v40, %v5312_v28  ;;  %v5382_v25 = vmul.f32 %v9220_v47, %v5646_v5 }
 0x587   : > { %5043 = vst.msk [vmem:[#allocation2 + $0x109] sm:$0xff] %vm336_vm0, %v5011_v15  ;;  %v5012_v35 = vmax.f32 %v4948_v16, 0.0  ;;  %v5815_v17 = vadd.f32 %v5783_v62, %v5714_v41  ;;  %v5784_v20 = vmul.f32 %v8966_v10, %v5747_v6  ;;  %v5885_v51 = vmul.f32 %v8974_v34, %v5848_v48  ;;  %v9259_v16 = vld [vmem:[%s9633_s7 + $0x6] ss:$0 sm:$0xff] }
 0x588   : > { %v5715_v38 = vadd.f32 %v5683_v56, %v5614_v55  ;;  %v5482_v57 = vmul.f32 %v9238_v63, %v5746_v44  ;;  %v5414_v10 = vadd.f32 %v5382_v25, %v5313_v19  ;;  %v5113_v9 = vmul.f32 %v9188_v49, %v5646_v5 }
 0x589   : > { %5044 = vst.msk [vmem:[#allocation2 + $0x111] sm:$0xff] %vm336_vm0, %v5012_v35  ;;  %v6851_v21 = vpop.f32.mrb[92].mxu0  ;;  %v5916_v18 = vadd.f32 %v5884_v46, %v5815_v17  ;;  %v5182_v0 = vmul.f32 %v9194_v50, %v5747_v6  ;;  %v5483_v27 = vmul.f32 %v9238_v63, %v5747_v6  ;;  %v5213_v31 = vadd.f32 %v5181_v7, %v5112_v37  ;;  %v9269_v17 = vld [vmem:[%s9633_s7 + $0x7] ss:$0 sm:$0xff] }
 0x58a   : > { %v6852_v42 = vpop.f32.mrb[93].mxu0  ;;  %v5816_v30 = vadd.f32 %v5784_v20, %v5715_v38  ;;  %v5514_v59 = vadd.f32 %v5482_v57, %v5413_v53  ;;  %v5282_v44 = vmul.f32 %v9202_v36, %v5847_v12  ;;  %v5583_v54 = vmul.f32 %v9250_v52, %v5847_v12  ;;  %v9275_v38 = vld [vmem:[%s9633_s7 + $0x8] ss:$0 sm:$0xff] }
 0x58b   : > { %v6853_v33 = vadd.f32 %v6852_v42, %v6851_v21  ;;  %v6854_v1 = vpop.f32.mrb[94].mxu0  ;;  %v5980_v22 = vsel %vm336_vm0, %v5916_v18, 0.0  ;;  %v5515_v5 = vadd.f32 %v5483_v27, %v5414_v10  ;;  %v5214_v28 = vadd.f32 %v5182_v0, %v5113_v9 }
 0x58c   : > { %v6855_v34 = vpop.f32.mrb[95].mxu0  ;;  %5981 = vadd.xlane.f32.xlu1 %v5980_v22  ;;  %v5917_v24 = vadd.f32 %v5885_v51, %v5816_v30  ;;  %v5615_v15 = vadd.f32 %v5583_v54, %v5514_v59  ;;  %v5584_v62 = vmul.f32 %v9250_v52, %v5848_v48  ;;  %v5314_v46 = vadd.f32 %v5282_v44, %v5213_v31 }
 0x58d   : > { %v4792_v3 = vadd.f32 %v9208_v23, %v6853_v33  ;;  %v6856_v8 = vadd.f32 %v6855_v34, %v6854_v1 }
 0x58e   : > { %v5983_v26 = vsel %vm336_vm0, %v5917_v24, 0.0  ;;  %v5647_v4 = vld [vmem:[#allocation2 + $0x108] sm:$0xff] }
 0x58f   : > { %v5748_v43 = vld [vmem:[#allocation2 + $0x109] sm:$0xff]  ;;  %v4953_v40 = vadd.f32 %v8882_v2, %v4792_v3  ;;  %v4795_v60 = vadd.f32 %v9208_v23, %v6856_v8  ;;  %5984 = vadd.xlane.f32.xlu0 %v5983_v26  ;;  %v5684_v41 = vmul.f32 %v9259_v16, %v5647_v4  ;;  %v5383_v55 = vmul.f32 %v9220_v47, %v5647_v4 }
 0x590   : > { %v5849_v12 = vld [vmem:[#allocation2 + $0x10a] sm:$0xff]  ;;  %v5283_v2 = vmul.f32 %v9202_v36, %v5848_v48  ;;  %v5785_v53 = vmul.f32 %v9269_v17, %v5748_v43  ;;  %v5616_v48 = vadd.f32 %v5584_v62, %v5515_v5  ;;  %v5114_v10 = vmul.f32 %v9188_v49, %v5647_v4 }
 0x591   : > { %v5648_v6 = vld [vmem:[#allocation2 + $0x110] sm:$0xff]  ;;  %v5013_v56 = vmax.f32 %v4953_v40, 0.0  ;;  %v4956_v19 = vadd.f32 %v8886_v11, %v4795_v60  ;;  %v5716_v35 = vadd.f32 %v5684_v41, %v5615_v15  ;;  %v5886_v20 = vmul.f32 %v9275_v38, %v5849_v12 }
 0x592   : > { %v5749_v25 = vld [vmem:[#allocation2 + $0x111] sm:$0xff]  ;;  %v5685_v37 = vmul.f32 %v9259_v16, %v5648_v6  ;;  %v5315_v7 = vadd.f32 %v5283_v2, %v5214_v28  ;;  %v5415_v51 = vadd.f32 %v5383_v55, %v5314_v46  ;;  %v5384_v57 = vmul.f32 %v9220_v47, %v5648_v6 }
 0x593   : > { %v5850_v11 = vld [vmem:[#allocation2 + $0x112] sm:$0xff]  ;;  %5045 = vst.msk [vmem:[#allocation2 + $0x121] sm:$0xff] %vm336_vm0, %v5013_v56  ;;  %v5014_v21 = vmax.f32 %v4956_v19, 0.0  ;;  %v5817_v18 = vadd.f32 %v5785_v53, %v5716_v35  ;;  %v5786_v30 = vmul.f32 %v9269_v17, %v5749_v25  ;;  %v5183_v9 = vmul.f32 %v9194_v50, %v5748_v43 }
 0x594   : > { %v5717_v42 = vadd.f32 %v5685_v37, %v5616_v48  ;;  %v5887_v1 = vmul.f32 %v9275_v38, %v5850_v11  ;;  %v5484_v22 = vmul.f32 %v9238_v63, %v5748_v43  ;;  %v5416_v24 = vadd.f32 %v5384_v57, %v5315_v7 }
 0x595   : > { %5046 = vst.msk [vmem:[#allocation2 + $0x129] sm:$0xff] %vm336_vm0, %v5014_v21  ;;  %v6857_v0 = vpop.f32.mrb[96].mxu0  ;;  %v5918_v33 = vadd.f32 %v5886_v20, %v5817_v18  ;;  %v5115_v27 = vmul.f32 %v9188_v49, %v5648_v6  ;;  %v5184_v31 = vmul.f32 %v9194_v50, %v5749_v25  ;;  %v5485_v5 = vmul.f32 %v9238_v63, %v5749_v25 }
 0x596   : > { %v6858_v59 = vpop.f32.mrb[97].mxu0  ;;  %v5818_v34 = vadd.f32 %v5786_v30, %v5717_v42  ;;  %v5516_v54 = vadd.f32 %v5484_v22, %v5415_v51  ;;  %v5215_v28 = vadd.f32 %v5183_v9, %v5114_v10  ;;  %v5284_v43 = vmul.f32 %v9202_v36, %v5849_v12 }
 0x597   : > { %v6859_v44 = vadd.f32 %v6858_v59, %v6857_v0  ;;  %v6860_v3 = vpop.f32.mrb[98].mxu0  ;;  %v5986_v8 = vsel %vm336_vm0, %v5918_v33, 0.0  ;;  %v5585_v15 = vmul.f32 %v9250_v52, %v5849_v12  ;;  %v5517_v46 = vadd.f32 %v5485_v5, %v5416_v24 }
 0x598   : > { %v6861_v26 = vpop.f32.mrb[99].mxu0  ;;  %5987 = vadd.xlane.f32.xlu1 %v5986_v8  ;;  %v5919_v4 = vadd.f32 %v5887_v1, %v5818_v34  ;;  %v5216_v55 = vadd.f32 %v5184_v31, %v5115_v27  ;;  %v5586_v25 = vmul.f32 %v9250_v52, %v5850_v11  ;;  %v5316_v48 = vadd.f32 %v5284_v43, %v5215_v28 }
 0x599   : > { %v4800_v40 = vadd.f32 %v9208_v23, %v6859_v44  ;;  %v6862_v60 = vadd.f32 %v6861_v26, %v6860_v3  ;;  %v5617_v19 = vadd.f32 %v5585_v15, %v5516_v54  ;;  %v5285_v37 = vmul.f32 %v9202_v36, %v5850_v11 }
 0x59a   : > { %v5989_v41 = vsel %vm336_vm0, %v5919_v4, 0.0  ;;  %v5649_v62 = vld [vmem:[#allocation2 + $0x120] sm:$0xff]  ;;  %v5618_v42 = vadd.f32 %v5586_v25, %v5517_v46 }
 0x59b   : > { %v5750_v6 = vld [vmem:[#allocation2 + $0x121] sm:$0xff]  ;;  %v4961_v2 = vadd.f32 %v8898_v58, %v4800_v40  ;;  %v4803_v56 = vadd.f32 %v9208_v23, %v6862_v60  ;;  %5990 = vadd.xlane.f32.xlu0 %v5989_v41  ;;  %v5686_v35 = vmul.f32 %v9259_v16, %v5649_v62  ;;  %v5385_v12 = vmul.f32 %v9220_v47, %v5649_v62 }
 0x59c   : > { %v5851_v53 = vld [vmem:[#allocation2 + $0x122] sm:$0xff]  ;;  %v5787_v58 = vmul.f32 %v9269_v17, %v5750_v6  ;;  %v5852_v10 = vld [vmem:[#allocation2 + $0x12a] sm:$0xff]  ;;  %v5317_v9 = vadd.f32 %v5285_v37, %v5216_v55  ;;  %v5116_v59 = vmul.f32 %v9188_v49, %v5649_v62  ;;  %v5185_v34 = vmul.f32 %v9194_v50, %v5750_v6 }
 0x59d   : > { %v5650_v20 = vld [vmem:[#allocation2 + $0x128] sm:$0xff]  ;;  %v5015_v7 = vmax.f32 %v4961_v2, 0.0  ;;  %v4964_v21 = vadd.f32 %v8904_v32, %v4803_v56  ;;  %v5718_v18 = vadd.f32 %v5686_v35, %v5617_v19  ;;  %v5888_v57 = vmul.f32 %v9275_v38, %v5851_v53 }
 0x59e   : > { %v5751_v51 = vld [vmem:[#allocation2 + $0x129] sm:$0xff]  ;;  %v5687_v30 = vmul.f32 %v9259_v16, %v5650_v20  ;;  %v5417_v1 = vadd.f32 %v5385_v12, %v5316_v48  ;;  %v5386_v11 = vmul.f32 %v9220_v47, %v5650_v20  ;;  %v5889_v31 = vmul.f32 %v9275_v38, %v5852_v10 }
 0x59f   : > { %5047 = vst.msk [vmem:[#allocation2 + $0x139] sm:$0xff] %vm336_vm0, %v5015_v7  ;;  %v5016_v0 = vmax.f32 %v4964_v21, 0.0  ;;  %v5819_v33 = vadd.f32 %v5787_v58, %v5718_v18  ;;  %v5788_v32 = vmul.f32 %v9269_v17, %v5751_v51  ;;  %v5486_v44 = vmul.f32 %v9238_v63, %v5750_v6 }
 0x5a0   : > { %v5719_v22 = vadd.f32 %v5687_v30, %v5618_v42  ;;  %v5418_v54 = vadd.f32 %v5386_v11, %v5317_v9  ;;  %v5117_v26 = vmul.f32 %v9188_v49, %v5650_v20  ;;  %v5186_v4 = vmul.f32 %v9194_v50, %v5751_v51 }
 0x5a1   : > { %5048 = vst.msk [vmem:[#allocation2 + $0x141] sm:$0xff] %vm336_vm0, %v5016_v0  ;;  %v6863_v24 = vpop.f32.mrb[100].mxu0  ;;  %v5920_v27 = vadd.f32 %v5888_v57, %v5819_v33  ;;  %v5518_v40 = vadd.f32 %v5486_v44, %v5417_v1  ;;  %v5487_v41 = vmul.f32 %v9238_v63, %v5751_v51  ;;  %v5217_v62 = vadd.f32 %v5185_v34, %v5116_v59 }
 0x5a2   : > { %v6864_v3 = vpop.f32.mrb[101].mxu0  ;;  %v5820_v8 = vadd.f32 %v5788_v32, %v5719_v22  ;;  %v5286_v6 = vmul.f32 %v9202_v36, %v5851_v53  ;;  %v5587_v2 = vmul.f32 %v9250_v52, %v5851_v53  ;;  %v5218_v20 = vadd.f32 %v5186_v4, %v5117_v26 }
 0x5a3   : > { %v6865_v5 = vadd.f32 %v6864_v3, %v6863_v24  ;;  %v6866_v28 = vpop.f32.mrb[102].mxu0  ;;  %v5992_v43 = vsel %vm336_vm0, %v5920_v27, 0.0  ;;  %v5519_v25 = vadd.f32 %v5487_v41, %v5418_v54  ;;  %v5588_v18 = vmul.f32 %v9250_v52, %v5852_v10 }
 0x5a4   : > { %v6867_v60 = vpop.f32.mrb[103].mxu0  ;;  %5993 = vadd.xlane.f32.xlu1 %v5992_v43  ;;  %v5921_v15 = vadd.f32 %v5889_v31, %v5820_v8  ;;  %v5619_v37 = vadd.f32 %v5587_v2, %v5518_v40  ;;  %v5318_v51 = vadd.f32 %v5286_v6, %v5217_v62  ;;  %v5287_v57 = vmul.f32 %v9202_v36, %v5852_v10 }
 0x5a5   : > { %v4808_v46 = vadd.f32 %v9208_v23, %v6865_v5  ;;  %v6868_v55 = vadd.f32 %v6867_v60, %v6866_v28  ;;  %v5620_v1 = vadd.f32 %v5588_v18, %v5519_v25 }
 0x5a6   : > { %v5995_v56 = vsel %vm336_vm0, %v5921_v15, 0.0  ;;  %v5651_v19 = vld [vmem:[#allocation2 + $0x138] sm:$0xff]  ;;  %v5319_v32 = vadd.f32 %v5287_v57, %v5218_v20 }
 0x5a7   : > { %v5752_v35 = vld [vmem:[#allocation2 + $0x139] sm:$0xff]  ;;  %v4969_v48 = vadd.f32 %v8896_v13, %v4808_v46  ;;  %v4811_v12 = vadd.f32 %v9208_v23, %v6868_v55  ;;  %5996 = vadd.xlane.f32.xlu0 %v5995_v56  ;;  %v5688_v7 = vmul.f32 %v9259_v16, %v5651_v19  ;;  %v5387_v53 = vmul.f32 %v9220_v47, %v5651_v19 }
 0x5a8   : > { %v5853_v21 = vld [vmem:[#allocation2 + $0x13a] sm:$0xff]  ;;  %v5789_v13 = vmul.f32 %v9269_v17, %v5752_v35  ;;  %v5854_v22 = vld [vmem:[#allocation2 + $0x142] sm:$0xff]  ;;  %v5118_v31 = vmul.f32 %v9188_v49, %v5651_v19  ;;  %v5187_v44 = vmul.f32 %v9194_v50, %v5752_v35  ;;  %v5488_v26 = vmul.f32 %v9238_v63, %v5752_v35 }
 0x5a9   : > { %v5652_v58 = vld [vmem:[#allocation2 + $0x140] sm:$0xff]  ;;  %v5017_v42 = vmax.f32 %v4969_v48, 0.0  ;;  %v4972_v30 = vadd.f32 %v8902_v39, %v4811_v12  ;;  %v5720_v9 = vadd.f32 %v5688_v7, %v5619_v37  ;;  %v5890_v33 = vmul.f32 %v9275_v38, %v5853_v21 }
 0x5aa   : > { %v5753_v0 = vld [vmem:[#allocation2 + $0x141] sm:$0xff]  ;;  %v5689_v11 = vmul.f32 %v9259_v16, %v5652_v58  ;;  %v5419_v24 = vadd.f32 %v5387_v53, %v5318_v51  ;;  %v5388_v10 = vmul.f32 %v9220_v47, %v5652_v58  ;;  %v5891_v54 = vmul.f32 %v9275_v38, %v5854_v22 }
 0x5ab   : > { %5049 = vst.msk [vmem:[#allocation2 + $0x151] sm:$0xff] %vm336_vm0, %v5017_v42  ;;  %v5018_v59 = vmax.f32 %v4972_v30, 0.0  ;;  %v5821_v34 = vadd.f32 %v5789_v13, %v5720_v9  ;;  %v5790_v39 = vmul.f32 %v9269_v17, %v5753_v0  ;;  %v5489_v43 = vmul.f32 %v9238_v63, %v5753_v0 }
 0x5ac   : > { %v5721_v27 = vadd.f32 %v5689_v11, %v5620_v1  ;;  %v5420_v4 = vadd.f32 %v5388_v10, %v5319_v32  ;;  %v5119_v40 = vmul.f32 %v9188_v49, %v5652_v58  ;;  %v5188_v60 = vmul.f32 %v9194_v50, %v5753_v0 }
 0x5ad   : > { %5050 = vst.msk [vmem:[#allocation2 + $0x159] sm:$0xff] %vm336_vm0, %v5018_v59  ;;  %v6869_v3 = vpop.f32.mrb[104].mxu0  ;;  %v5922_v8 = vadd.f32 %v5890_v33, %v5821_v34  ;;  %v5520_v6 = vadd.f32 %v5488_v26, %v5419_v24  ;;  %v5219_v56 = vadd.f32 %v5187_v44, %v5118_v31  ;;  %v5288_v19 = vmul.f32 %v9202_v36, %v5853_v21 }
 0x5ae   : > { %v6870_v5 = vpop.f32.mrb[105].mxu0  ;;  %v5822_v28 = vadd.f32 %v5790_v39, %v5721_v27  ;;  %v5521_v2 = vadd.f32 %v5489_v43, %v5420_v4  ;;  %v5589_v20 = vmul.f32 %v9250_v52, %v5853_v21  ;;  %v5590_v7 = vmul.f32 %v9250_v52, %v5854_v22 }
 0x5af   : > { %v6871_v15 = vadd.f32 %v6870_v5, %v6869_v3  ;;  %v6872_v41 = vpop.f32.mrb[106].mxu0  ;;  %v5998_v62 = vsel %vm336_vm0, %v5922_v8, 0.0  ;;  %v5220_v18 = vadd.f32 %v5188_v60, %v5119_v40  ;;  %v5320_v13 = vadd.f32 %v5288_v19, %v5219_v56 }
 0x5b0   : > { %v6873_v46 = vpop.f32.mrb[107].mxu0  ;;  %5999 = vadd.xlane.f32.xlu1 %v5998_v62  ;;  %v5923_v55 = vadd.f32 %v5891_v54, %v5822_v28  ;;  %v5621_v53 = vadd.f32 %v5589_v20, %v5520_v6  ;;  %v5622_v30 = vadd.f32 %v5590_v7, %v5521_v2  ;;  %v5289_v0 = vmul.f32 %v9202_v36, %v5854_v22 }
 0x5b1   : > { %v6874_v35 = vadd.f32 %v6873_v46, %v6872_v41  ;;  %v4816_v25 = vadd.f32 %v9208_v23, %v6871_v15 }
 0x5b2   : > { %v6001_v48 = vsel %vm336_vm0, %v5923_v55, 0.0  ;;  %v5653_v12 = vld [vmem:[#allocation2 + $0x150] sm:$0xff]  ;;  %v5321_v39 = vadd.f32 %v5289_v0, %v5220_v18 }
 0x5b3   : > { %v5754_v37 = vld [vmem:[#allocation2 + $0x151] sm:$0xff]  ;;  %v4977_v58 = vadd.f32 %v9015_v45, %v4816_v25  ;;  %6002 = vadd.xlane.f32.xlu0 %v6001_v48  ;;  %v4819_v51 = vadd.f32 %v9208_v23, %v6874_v35  ;;  %v5690_v57 = vmul.f32 %v9259_v16, %v5653_v12  ;;  %v5389_v21 = vmul.f32 %v9220_v47, %v5653_v12 }
 0x5b4   : > { %v5855_v42 = vld [vmem:[#allocation2 + $0x152] sm:$0xff]  ;;  %v5791_v45 = vmul.f32 %v9269_v17, %v5754_v37  ;;  %v5490_v27 = vmul.f32 %v9238_v63, %v5754_v37  ;;  %v5120_v28 = vmul.f32 %v9188_v49, %v5653_v12  ;;  %v5189_v15 = vmul.f32 %v9194_v50, %v5754_v37 }
 0x5b5   : > { %v5654_v9 = vld [vmem:[#allocation2 + $0x158] sm:$0xff]  ;;  %v5019_v33 = vmax.f32 %v4977_v58, 0.0  ;;  %v4980_v1 = vadd.f32 %v9033_v61, %v4819_v51  ;;  %v6875_v11 = vpop.f32.mrb[108].mxu0  ;;  %v5722_v32 = vadd.f32 %v5690_v57, %v5621_v53  ;;  %v5892_v24 = vmul.f32 %v9275_v38, %v5855_v42 }
 0x5b6   : > { %v5755_v59 = vld [vmem:[#allocation2 + $0x159] sm:$0xff]  ;;  %v6876_v34 = vpop.f32.mrb[109].mxu0  ;;  %v5691_v10 = vmul.f32 %v9259_v16, %v5654_v9  ;;  %v5421_v8 = vadd.f32 %v5389_v21, %v5320_v13  ;;  %v5390_v5 = vmul.f32 %v9220_v47, %v5654_v9  ;;  %v5591_v25 = vmul.f32 %v9250_v52, %v5855_v42 }
 0x5b7   : > { %5051 = vst.msk [vmem:[#allocation2 + $0x169] sm:$0xff] %vm336_vm0, %v5019_v33  ;;  %v5020_v31 = vmax.f32 %v4980_v1, 0.0  ;;  %v6877_v22 = vadd.f32 %v6876_v34, %v6875_v11  ;;  %v6878_v44 = vpop.f32.mrb[110].mxu0  ;;  %v5823_v3 = vadd.f32 %v5791_v45, %v5722_v32  ;;  %v5856_v61 = vld [vmem:[#allocation2 + $0x15a] sm:$0xff]  ;;  %v5792_v4 = vmul.f32 %v9269_v17, %v5755_v59 }
 0x5b8   : > { %v6879_v54 = vpop.f32.mrb[111].mxu0  ;;  %v5723_v26 = vadd.f32 %v5691_v10, %v5622_v30  ;;  %v5893_v62 = vmul.f32 %v9275_v38, %v5856_v61  ;;  %v5422_v6 = vadd.f32 %v5390_v5, %v5321_v39  ;;  %v5491_v46 = vmul.f32 %v9238_v63, %v5755_v59 }
 0x5b9   : > { %5052 = vst.msk [vmem:[#allocation2 + $0x171] sm:$0xff] %vm336_vm0, %v5020_v31  ;;  %v4824_v43 = vadd.f32 %v9208_v23, %v6877_v22  ;;  %v6880_v40 = vadd.f32 %v6879_v54, %v6878_v44  ;;  %v5924_v60 = vadd.f32 %v5892_v24, %v5823_v3  ;;  %v5522_v19 = vadd.f32 %v5490_v27, %v5421_v8 }
 0x5ba   : > { %v5824_v41 = vadd.f32 %v5792_v4, %v5723_v26  ;;  %v5523_v20 = vadd.f32 %v5491_v46, %v5422_v6  ;;  %v5592_v48 = vmul.f32 %v9250_v52, %v5856_v61  ;;  %v5221_v7 = vadd.f32 %v5189_v15, %v5120_v28 }
 0x5bb   : > { %v4985_v55 = vadd.f32 %v9011_v14, %v4824_v43  ;;  %v4827_v2 = vadd.f32 %v9208_v23, %v6880_v40  ;;  %v6004_v56 = vsel %vm336_vm0, %v5924_v60, 0.0  ;;  %v5290_v18 = vmul.f32 %v9202_v36, %v5855_v42 }
 0x5bc   : > { %6005 = vadd.xlane.f32.xlu1 %v6004_v56  ;;  %v5925_v35 = vadd.f32 %v5893_v62, %v5824_v41  ;;  %v5121_v51 = vmul.f32 %v9188_v49, %v5654_v9  ;;  %v5190_v53 = vmul.f32 %v9194_v50, %v5755_v59  ;;  %v5623_v30 = vadd.f32 %v5591_v25, %v5522_v19 }
 0x5bd   : > { %v5021_v12 = vmax.f32 %v4985_v55, 0.0  ;;  %v4988_v37 = vadd.f32 %v9029_v29, %v4827_v2  ;;  %v5624_v21 = vadd.f32 %v5592_v48, %v5523_v20  ;;  %v5322_v1 = vadd.f32 %v5290_v18, %v5221_v7 }
 0x5be   : > { %v6007_v14 = vsel %vm336_vm0, %v5925_v35, 0.0  ;;  %v5655_v58 = vld [vmem:[#allocation2 + $0x168] sm:$0xff]  ;;  %v5222_v32 = vadd.f32 %v5190_v53, %v5121_v51  ;;  %v5291_v24 = vmul.f32 %v9202_v36, %v5856_v61 }
 0x5bf   : > { %v5756_v23 = vld [vmem:[#allocation2 + $0x169] sm:$0xff]  ;;  %5053 = vst.msk [vmem:[#allocation2 + $0x181] sm:$0xff] %vm336_vm0, %v5021_v12  ;;  %v5022_v57 = vmax.f32 %v4988_v37, 0.0  ;;  %6008 = vadd.xlane.f32.xlu0 %v6007_v14  ;;  %v5692_v13 = vmul.f32 %v9259_v16, %v5655_v58  ;;  %v5391_v11 = vmul.f32 %v9220_v47, %v5655_v58  ;;  %v5122_v4 = vmul.f32 %v9188_v49, %v5655_v58  ;;  %v5659_v58 = vld [vmem:[#allocation2 + $0x198] sm:$0xff] }
 0x5c0   : > { %v5793_v29 = vmul.f32 %v9269_v17, %v5756_v23  ;;  %v5857_v0 = vld [vmem:[#allocation2 + $0x16a] sm:$0xff]  ;;  %v5858_v59 = vld [vmem:[#allocation2 + $0x172] sm:$0xff]  ;;  %v5492_v34 = vmul.f32 %v9238_v63, %v5756_v23  ;;  %v5323_v3 = vadd.f32 %v5291_v24, %v5222_v32  ;;  %v5191_v5 = vmul.f32 %v9194_v50, %v5756_v23  ;;  %v5861_v24 = vld [vmem:[#allocation2 + $0x19a] sm:$0xff] }
 0x5c1   : > { %v5656_v42 = vld [vmem:[#allocation2 + $0x170] sm:$0xff]  ;;  %5054 = vst.msk [vmem:[#allocation2 + $0x189] sm:$0xff] %vm336_vm0, %v5022_v57  ;;  %v5724_v9 = vadd.f32 %v5692_v13, %v5623_v30  ;;  %v5894_v10 = vmul.f32 %v9275_v38, %v5857_v0  ;;  %v5895_v39 = vmul.f32 %v9275_v38, %v5858_v59  ;;  %v5423_v31 = vadd.f32 %v5391_v11, %v5322_v1  ;;  %v5760_v11 = vld [vmem:[#allocation2 + $0x199] sm:$0xff] }
 0x5c2   : > { %v5757_v33 = vld [vmem:[#allocation2 + $0x171] sm:$0xff]  ;;  %v5693_v45 = vmul.f32 %v9259_v16, %v5656_v42  ;;  %v5392_v8 = vmul.f32 %v9220_v47, %v5656_v42  ;;  %v5593_v26 = vmul.f32 %v9250_v52, %v5857_v0  ;;  %v5292_v40 = vmul.f32 %v9202_v36, %v5857_v0 }
 0x5c3   : > { %v5794_v27 = vmul.f32 %v9269_v17, %v5757_v33  ;;  %v5825_v22 = vadd.f32 %v5793_v29, %v5724_v9  ;;  %v5524_v54 = vadd.f32 %v5492_v34, %v5423_v31  ;;  %v5493_v41 = vmul.f32 %v9238_v63, %v5757_v33 }
 0x5c4   : > { %v5725_v44 = vadd.f32 %v5693_v45, %v5624_v21  ;;  %v5424_v43 = vadd.f32 %v5392_v8, %v5323_v3  ;;  %v5223_v62 = vadd.f32 %v5191_v5, %v5122_v4  ;;  %v5594_v25 = vmul.f32 %v9250_v52, %v5858_v59 }
 0x5c5   : > { %v5926_v61 = vadd.f32 %v5894_v10, %v5825_v22  ;;  %v5625_v55 = vadd.f32 %v5593_v26, %v5524_v54  ;;  %v5123_v53 = vmul.f32 %v9188_v49, %v5656_v42  ;;  %v5696_v1 = vmul.f32 %v9259_v16, %v5659_v58  ;;  %v5660_v54 = vld [vmem:[#allocation2 + $0x1a0] sm:$0xff] }
 0x5c6   : > { %v5826_v28 = vadd.f32 %v5794_v27, %v5725_v44  ;;  %v5657_v60 = vld [vmem:[#allocation2 + $0x180] sm:$0xff]  ;;  %v5525_v35 = vadd.f32 %v5493_v41, %v5424_v43  ;;  %v5324_v14 = vadd.f32 %v5292_v40, %v5223_v62  ;;  %v5192_v32 = vmul.f32 %v9194_v50, %v5757_v33 }
 0x5c7   : > { %v5758_v15 = vld [vmem:[#allocation2 + $0x181] sm:$0xff]  ;;  %v6010_v6 = vsel %vm336_vm0, %v5926_v61, 0.0  ;;  %v5694_v2 = vmul.f32 %v9259_v16, %v5657_v60  ;;  %v5393_v48 = vmul.f32 %v9220_v47, %v5657_v60  ;;  %v5293_v27 = vmul.f32 %v9202_v36, %v5858_v59 }
 0x5c8   : > { %v5927_v46 = vadd.f32 %v5895_v39, %v5826_v28  ;;  %6011 = vadd.xlane.f32.xlu1 %v6010_v6  ;;  %v5795_v56 = vmul.f32 %v9269_v17, %v5758_v15  ;;  %v5859_v19 = vld [vmem:[#allocation2 + $0x182] sm:$0xff]  ;;  %v5626_v23 = vadd.f32 %v5594_v25, %v5525_v35  ;;  %v5860_v51 = vld [vmem:[#allocation2 + $0x18a] sm:$0xff]  ;;  %v5494_v21 = vmul.f32 %v9238_v63, %v5758_v15 }
 0x5c9   : > { %v5658_v20 = vld [vmem:[#allocation2 + $0x188] sm:$0xff]  ;;  %v5726_v37 = vadd.f32 %v5694_v2, %v5625_v55  ;;  %v5896_v30 = vmul.f32 %v9275_v38, %v5859_v19  ;;  %v5425_v13 = vadd.f32 %v5393_v48, %v5324_v14  ;;  %v5897_v45 = vmul.f32 %v9275_v38, %v5860_v51  ;;  %v5934_v55 = vpop.xlane.xlu0 %5933 }
 0x5ca   : > { %v6013_v12 = vsel %vm336_vm0, %v5927_v46, 0.0  ;;  %v5695_v7 = vmul.f32 %v9259_v16, %v5658_v20  ;;  %v5759_v18 = vld [vmem:[#allocation2 + $0x189] sm:$0xff]  ;;  %v5595_v49 = vmul.f32 %v9250_v52, %v5859_v19  ;;  %v5224_v10 = vadd.f32 %v5192_v32, %v5123_v53 }
 0x5cb   : > { %6014 = vadd.xlane.f32.xlu0 %v6013_v12  ;;  %v5827_v57 = vadd.f32 %v5795_v56, %v5726_v37  ;;  %v5796_v0 = vmul.f32 %v9269_v17, %v5759_v18  ;;  %v5526_v34 = vadd.f32 %v5494_v21, %v5425_v13  ;;  %v5394_v39 = vmul.f32 %v9220_v47, %v5658_v20  ;;  %v5761_v47 = vld [vmem:[#allocation2 + $0x1a1] sm:$0xff]  ;;  %v5937_v20 = vpop.xlane.xlu1 %5936 }
 0x5cc   : > { %v5727_v29 = vadd.f32 %v5695_v7, %v5626_v23  ;;  %v5797_v44 = vmul.f32 %v9269_v17, %v5760_v11  ;;  %v5325_v33 = vadd.f32 %v5293_v27, %v5224_v10  ;;  %v5898_v8 = vmul.f32 %v9275_v38, %v5861_v24  ;;  %v5862_v40 = vld [vmem:[#allocation2 + $0x1a2] sm:$0xff] }
 0x5cd   : > { %v5928_v9 = vadd.f32 %v5896_v30, %v5827_v57  ;;  %v5627_v22 = vadd.f32 %v5595_v49, %v5526_v34  ;;  %v5495_v5 = vmul.f32 %v9238_v63, %v5759_v18  ;;  %v5596_v61 = vmul.f32 %v9250_v52, %v5860_v51  ;;  %v9422_v52 = vld [vmem:[#allocation4] ss:$0 sm:$0xff] }
 0x5ce   : > { %v5828_v42 = vadd.f32 %v5796_v0, %v5727_v29  ;;  %v5426_v4 = vadd.f32 %v5394_v39, %v5325_v33  ;;  %v5697_v28 = vmul.f32 %v9259_v16, %v5660_v54  ;;  %v5798_v15 = vmul.f32 %v9269_v17, %v5761_v47  ;;  %v5940_v16 = vpop.xlane.xlu0 %5939 }
 0x5cf   : > { %v6016_v31 = vsel %vm336_vm0, %v5928_v9, 0.0  ;;  %v5728_v3 = vadd.f32 %v5696_v1, %v5627_v22  ;;  %v5899_v6 = vmul.f32 %v9275_v38, %v5862_v40  ;;  %v6035_v56 = vadd.f32 %v9422_v52, %v5934_v55 }
 0x5d0   : > { %6017 = vadd.xlane.f32.xlu1 %v6016_v31  ;;  %v5929_v50 = vadd.f32 %v5897_v45, %v5828_v42  ;;  %v5527_v59 = vadd.f32 %v5495_v5, %v5426_v4  ;;  %v6037_v17 = vadd.f32 %v9422_v52, %v5940_v16  ;;  %v6036_v12 = vadd.f32 %v9422_v52, %v5937_v20 }
 0x5d1   : > { %v5829_v36 = vadd.f32 %v5797_v44, %v5728_v3  ;;  %v6067_v19 = vmax.f32 %v6035_v56, 0.0  ;;  %v5946_v18 = vpop.xlane.xlu1 %5945 }
 0x5d2   : > { %v6019_v26 = vsel %vm336_vm0, %v5929_v50, 0.0  ;;  %v5628_v60 = vadd.f32 %v5596_v61, %v5527_v59  ;;  %v5943_v35 = vpop.xlane.xlu0 %5942  ;;  %v6069_v25 = vmax.f32 %v6037_v17, 0.0  ;;  %v6068_v58 = vmax.f32 %v6036_v12, 0.0 }
 0x5d3   : > { %6020 = vadd.xlane.f32.xlu0 %v6019_v26  ;;  %v5930_v43 = vadd.f32 %v5898_v8, %v5829_v36  ;;  %v6038_v38 = vadd.f32 %v9422_v52, %v5943_v35  ;;  %v6039_v23 = vadd.f32 %v9422_v52, %v5946_v18 }
 0x5d4   : > { %v5729_v62 = vadd.f32 %v5697_v28, %v5628_v60 }
 0x5d5   : > { %v6022_v41 = vsel %vm336_vm0, %v5930_v43, 0.0  ;;  %v6070_v37 = vmax.f32 %v6038_v38, 0.0  ;;  %v6071_v13 = vmax.f32 %v6039_v23, 0.0 }
 0x5d6   : > { %6023 = vadd.xlane.f32.xlu1 %v6022_v41  ;;  %v5830_v63 = vadd.f32 %v5798_v15, %v5729_v62  ;;  %v5949_v48 = vpop.xlane.xlu0 %5948 }
 0x5d7   : > { %v6040_v7 = vadd.f32 %v9422_v52, %v5949_v48 }
 0x5d8   : > { %v5931_v46 = vadd.f32 %v5899_v6, %v5830_v63 }
 0x5d9   : > { %v6072_v51 = vmax.f32 %v6040_v7, 0.0 }
 0x5da   : > { %v6025_v2 = vsel %vm336_vm0, %v5931_v46, 0.0  ;;  %vm6419_vm0 = vcmask 7168  }
 0x5db   : > { %6026 = vadd.xlane.f32.xlu0 %v6025_v2 }
 0x5dd   : > { %v5952_v57 = vpop.xlane.xlu1 %5951 }
 0x5de   : > { %v6041_v21 = vadd.f32 %v9422_v52, %v5952_v57 }
 0x5e0   : > { %v5955_v14 = vpop.xlane.xlu0 %5954  ;;  %v6073_v32 = vmax.f32 %v6041_v21, 0.0 }
 0x5e1   : > { %v6042_v53 = vadd.f32 %v9422_v52, %v5955_v14 }
 0x5e3   : > { %v6074_v29 = vmax.f32 %v6042_v53, 0.0 }
 0x5e7   : > { %6163 = vrot.lane.b32.xlu1 %v6067_v19, %s7107_s16 }
 0x5e9   : > { %v5958_v1 = vpop.xlane.xlu1 %5957 }
 0x5ea   : > { %v6043_v9 = vadd.f32 %v9422_v52, %v5958_v1 }
 0x5eb   : > { %6167 = vrot.lane.b32.xlu1 %v6069_v25, %s7107_s16 }
 0x5ec   : > { %v5961_v30 = vpop.xlane.xlu0 %5960  ;;  %v6075_v42 = vmax.f32 %v6043_v9, 0.0  ;;  %v6099_v9 = vld [vmem:[%s7222_s15] sm:$0xff] }
 0x5ed   : > { %v6044_v0 = vadd.f32 %v9422_v52, %v5961_v30 }
 0x5ef   : > { %6169 = vrot.lane.b32.xlu1 %v6070_v37, %s7107_s16  ;;  %v6076_v45 = vmax.f32 %v6044_v0, 0.0 }
 0x5f1   : > { %6165 = vrot.lane.b32.xlu0 %v6068_v58, %s7107_s16 }
 0x5f3   : > { %6173 = vrot.lane.b32.xlu1 %v6072_v51, %s7107_s16 }
 0x5f5   : > { %6171 = vrot.lane.b32.xlu0 %v6071_v13, %s7107_s16  ;;  %v5964_v49 = vpop.xlane.xlu1 %5963 }
 0x5f6   : > { %v6045_v24 = vadd.f32 %v9422_v52, %v5964_v49 }
 0x5f7   : > { %6177 = vrot.lane.b32.xlu1 %v6074_v29, %s7107_s16 }
 0x5f8   : > { %v5967_v11 = vpop.xlane.xlu0 %5966  ;;  %v6077_v31 = vmax.f32 %v6045_v24, 0.0 }
 0x5f9   : > { %v6046_v34 = vadd.f32 %v9422_v52, %v5967_v11  ;;  %6175 = vrot.lane.b32.xlu0 %v6073_v32, %s7107_s16 }
 0x5fb   : > { %6181 = vrot.lane.b32.xlu1 %v6076_v45, %s7107_s16  ;;  %v6078_v10 = vmax.f32 %v6046_v34, 0.0 }
 0x5fd   : > { %6179 = vrot.lane.b32.xlu0 %v6075_v42, %s7107_s16 }
 0x5ff   : > { %6185 = vrot.lane.b32.xlu1 %v6078_v10, %s7107_s16 }
 0x601   : > { %v5970_v27 = vpop.xlane.xlu1 %5969  ;;  %6183 = vrot.lane.b32.xlu0 %v6077_v31, %s7107_s16 }
 0x602   : > { %v6047_v39 = vadd.f32 %v9422_v52, %v5970_v27  ;;  %v6100_v27 = vld [vmem:[%s7222_s15 + $0x8] sm:$0xff] }
 0x604   : > { %v5973_v22 = vpop.xlane.xlu0 %5972  ;;  %v6079_v44 = vmax.f32 %v6047_v39, 0.0  ;;  %v6101_v39 = vld [vmem:[%s7222_s15 + $0x10] sm:$0xff] }
 0x605   : > { %v6048_v50 = vadd.f32 %v9422_v52, %v5973_v22 }
 0x606   : > { %6187 = vrot.lane.b32.xlu0 %v6079_v44, %s7107_s16 }
 0x607   : > { %v6080_v33 = vmax.f32 %v6048_v50, 0.0 }
 0x609   : > { %6189 = vrot.lane.b32.xlu1 %v6080_v33, %s7107_s16 }
 0x60d   : > { %v5976_v3 = vpop.xlane.xlu1 %5975 }
 0x60e   : > { %v6049_v8 = vadd.f32 %v9422_v52, %v5976_v3  ;;  %v6103_v3 = vld [vmem:[%s7222_s15 + $0x20] sm:$0xff] }
 0x610   : > { %v6081_v54 = vmax.f32 %v6049_v8, 0.0  ;;  %v5979_v26 = vpop.xlane.xlu0 %5978 }
 0x611   : > { %v6050_v4 = vadd.f32 %v9422_v52, %v5979_v26 }
 0x612   : > { %6191 = vrot.lane.b32.xlu0 %v6081_v54, %s7107_s16 }
 0x613   : > { %v6082_v5 = vmax.f32 %v6050_v4, 0.0 }
 0x615   : > { %6193 = vrot.lane.b32.xlu1 %v6082_v5, %s7107_s16  ;;  %v6102_v5 = vld [vmem:[%s7222_s15 + $0x18] sm:$0xff] }
 0x619   : > { %v5982_v36 = vpop.xlane.xlu1 %5981 }
 0x61a   : > { %v6051_v47 = vadd.f32 %v9422_v52, %v5982_v36  ;;  %v6105_v36 = vld [vmem:[%s7222_s15 + $0x30] sm:$0xff] }
 0x61c   : > { %v6083_v59 = vmax.f32 %v6051_v47, 0.0  ;;  %v5985_v61 = vpop.xlane.xlu0 %5984 }
 0x61d   : > { %v6052_v28 = vadd.f32 %v9422_v52, %v5985_v61 }
 0x61e   : > { %6195 = vrot.lane.b32.xlu0 %v6083_v59, %s7107_s16 }
 0x61f   : > { %v6084_v43 = vmax.f32 %v6052_v28, 0.0  ;;  %v6104_v28 = vld [vmem:[%s7222_s15 + $0x28] sm:$0xff] }
 0x621   : > { %6197 = vrot.lane.b32.xlu1 %v6084_v43, %s7107_s16  ;;  %v6107_v43 = vld [vmem:[%s7222_s15 + $0x40] sm:$0xff] }
 0x625   : > { %v5988_v40 = vpop.xlane.xlu1 %5987 }
 0x626   : > { %v6053_v60 = vadd.f32 %v9422_v52, %v5988_v40 }
 0x628   : > { %v6085_v15 = vmax.f32 %v6053_v60, 0.0  ;;  %v5991_v41 = vpop.xlane.xlu0 %5990 }
 0x629   : > { %v6054_v62 = vadd.f32 %v9422_v52, %v5991_v41 }
 0x62a   : > { %6199 = vrot.lane.b32.xlu0 %v6085_v15, %s7107_s16 }
 0x62b   : > { %v6086_v6 = vmax.f32 %v6054_v62, 0.0  ;;  %v6106_v62 = vld [vmem:[%s7222_s15 + $0x38] sm:$0xff] }
 0x62d   : > { %6201 = vrot.lane.b32.xlu1 %v6086_v6, %s7107_s16  ;;  %v6109_v6 = vld [vmem:[%s7222_s15 + $0x50] sm:$0xff] }
 0x631   : > { %v5994_v63 = vpop.xlane.xlu1 %5993 }
 0x632   : > { %v6055_v46 = vadd.f32 %v9422_v52, %v5994_v63 }
 0x634   : > { %v6087_v55 = vmax.f32 %v6055_v46, 0.0  ;;  %v5997_v2 = vpop.xlane.xlu0 %5996 }
 0x635   : > { %v6056_v16 = vadd.f32 %v9422_v52, %v5997_v2  ;;  %v6108_v2 = vld [vmem:[%s7222_s15 + $0x48] sm:$0xff] }
 0x636   : > { %6203 = vrot.lane.b32.xlu0 %v6087_v55, %s7107_s16 }
 0x637   : > { %v6088_v56 = vmax.f32 %v6056_v16, 0.0 }
 0x639   : > { %6205 = vrot.lane.b32.xlu1 %v6088_v56, %s7107_s16  ;;  %v6111_v56 = vld [vmem:[%s7222_s15 + $0x60] sm:$0xff] }
 0x63d   : > { %v6000_v19 = vpop.xlane.xlu1 %5999 }
 0x63e   : > { %v6057_v17 = vadd.f32 %v9422_v52, %v6000_v19 }
 0x640   : > { %v6089_v35 = vmax.f32 %v6057_v17, 0.0  ;;  %v6003_v25 = vpop.xlane.xlu0 %6002 }
 0x641   : > { %v6058_v38 = vadd.f32 %v9422_v52, %v6003_v25  ;;  %v6110_v25 = vld [vmem:[%s7222_s15 + $0x58] sm:$0xff] }
 0x642   : > { %6207 = vrot.lane.b32.xlu0 %v6089_v35, %s7107_s16 }
 0x643   : > { %v6090_v20 = vmax.f32 %v6058_v38, 0.0  ;;  %v6113_v38 = vld [vmem:[%s7222_s15 + $0x70] sm:$0xff] }
 0x645   : > { %6209 = vrot.lane.b32.xlu1 %v6090_v20, %s7107_s16 }
 0x649   : > { %v6006_v48 = vpop.xlane.xlu1 %6005 }
 0x64a   : > { %v6059_v12 = vadd.f32 %v9422_v52, %v6006_v48 }
 0x64c   : > { %v6091_v37 = vmax.f32 %v6059_v12, 0.0  ;;  %v6009_v7 = vpop.xlane.xlu0 %6008 }
 0x64d   : > { %v6060_v18 = vadd.f32 %v9422_v52, %v6009_v7 }
 0x64e   : > { %6211 = vrot.lane.b32.xlu0 %v6091_v37, %s7107_s16  ;;  %v6112_v37 = vld [vmem:[%s7222_s15 + $0x68] sm:$0xff] }
 0x64f   : > { %v6092_v14 = vmax.f32 %v6060_v18, 0.0 }
 0x651   : > { %6213 = vrot.lane.b32.xlu1 %v6092_v14, %s7107_s16  ;;  %v6114_v14 = vld [vmem:[%s7222_s15 + $0x78] sm:$0xff] }
 0x655   : > { %v6012_v58 = vpop.xlane.xlu1 %6011 }
 0x656   : > { %v6061_v23 = vadd.f32 %v9422_v52, %v6012_v58 }
 0x658   : > { %v6015_v51 = vpop.xlane.xlu0 %6014  ;;  %v6093_v53 = vmax.f32 %v6061_v23, 0.0  ;;  %v6115_v23 = vld [vmem:[%s7222_s15 + $0x80] sm:$0xff] }
 0x659   : > { %v6062_v57 = vadd.f32 %v9422_v52, %v6015_v51 }
 0x65a   : > { %6215 = vrot.lane.b32.xlu0 %v6093_v53, %s7107_s16 }
 0x65b   : > { %v6094_v30 = vmax.f32 %v6062_v57, 0.0 }
 0x65d   : > { %6217 = vrot.lane.b32.xlu1 %v6094_v30, %s7107_s16  ;;  %v6018_v13 = vpop.xlane.xlu1 %6017  ;;  %v6116_v30 = vld [vmem:[%s7222_s15 + $0x88] sm:$0xff] }
 0x65e   : > { %v6063_v21 = vadd.f32 %v9422_v52, %v6018_v13 }
 0x660   : > { %v6095_v29 = vmax.f32 %v6063_v21, 0.0  ;;  %v6021_v0 = vpop.xlane.xlu0 %6020 }
 0x661   : > { %v6064_v1 = vadd.f32 %v9422_v52, %v6021_v0 }
 0x662   : > { %6219 = vrot.lane.b32.xlu0 %v6095_v29, %s7107_s16  ;;  %v6117_v29 = vld [vmem:[%s7222_s15 + $0x90] sm:$0xff] }
 0x663   : > { %v6096_v11 = vmax.f32 %v6064_v1, 0.0  ;;  %v6024_v32 = vpop.xlane.xlu1 %6023 }
 0x664   : > { %v6065_v34 = vadd.f32 %v9422_v52, %v6024_v32 }
 0x665   : > { %6221 = vrot.lane.b32.xlu1 %v6096_v11, %s7107_s16  ;;  %v6118_v11 = vld [vmem:[%s7222_s15 + $0x98] sm:$0xff] }
 0x666   : > { %v6097_v10 = vmax.f32 %v6065_v34, 0.0 }
 0x667   : > { %v6164_v45 = vpop.permute.xlu1 %6163 }
 0x668   : > { %v6259_v49 = vadd.f32 %v6164_v45, %v6099_v9  ;;  %v6027_v42 = vpop.xlane.xlu0 %6026  ;;  %v6119_v45 = vld [vmem:[%s7222_s15 + $0xa0] sm:$0xff] }
 0x669   : > { %v6066_v22 = vadd.f32 %v9422_v52, %v6027_v42  ;;  %v6120_v42 = vld [vmem:[%s7222_s15 + $0xa8] sm:$0xff] }
 0x66a   : > { %6323 = vrot.lane.b32.xlu0 %v6259_v49, %s7108_s17 }
 0x66b   : > { %v6168_v24 = vpop.permute.xlu1 %6167  ;;  %v6098_v54 = vmax.f32 %v6066_v22, 0.0  ;;  %v6122_v22 = vld [vmem:[%s7222_s15 + $0xb8] sm:$0xff] }
 0x66c   : > { %v6166_v31 = vpop.permute.xlu0 %6165  ;;  %v6261_v33 = vadd.f32 %v6168_v24, %v6101_v39 }
 0x66d   : > { %v6260_v44 = vadd.f32 %v6166_v31, %v6100_v27  ;;  %v6121_v27 = vld [vmem:[%s7222_s15 + $0xb0] sm:$0xff] }
 0x66e   : > { %6223 = vrot.lane.b32.xlu0 %v6097_v10, %s7107_s16 }
 0x66f   : > { %v6170_v50 = vpop.permute.xlu1 %6169  ;;  %6325 = vrot.lane.b32.xlu1 %v6260_v44, %s7108_s17 }
 0x670   : > { %v6172_v8 = vpop.permute.xlu0 %6171  ;;  %v6262_v47 = vadd.f32 %v6170_v50, %v6102_v5  ;;  %v6125_v5 = vld [vmem:[%s7222_s15 + $0xd0] sm:$0xff] }
 0x671   : > { %v6263_v4 = vadd.f32 %v6172_v8, %v6103_v3 }
 0x672   : > { %6327 = vrot.lane.b32.xlu0 %v6261_v33, %s7108_s17  ;;  %v6123_v33 = vld [vmem:[%s7222_s15 + $0xc0] sm:$0xff] }
 0x673   : > { %v6174_v26 = vpop.permute.xlu1 %6173  ;;  %6225 = vrot.lane.b32.xlu1 %v6098_v54, %s7107_s16  ;;  %v6124_v54 = vld [vmem:[%s7222_s15 + $0xc8] sm:$0xff] }
 0x674   : > { %v6176_v52 = vpop.permute.xlu0 %6175  ;;  %v6264_v60 = vadd.f32 %v6174_v26, %v6104_v28  ;;  %v6127_v28 = vld [vmem:[%s7222_s15 + $0xe0] sm:$0xff] }
 0x675   : > { %v6265_v61 = vadd.f32 %v6176_v52, %v6105_v36  ;;  %v6126_v52 = vld [vmem:[%s7222_s15 + $0xd8] sm:$0xff] }
 0x676   : > { %6331 = vrot.lane.b32.xlu0 %v6263_v4, %s7108_s17 }
 0x677   : > { %v6178_v59 = vpop.permute.xlu1 %6177  ;;  %6329 = vrot.lane.b32.xlu1 %v6262_v47, %s7108_s17 }
 0x678   : > { %v6180_v40 = vpop.permute.xlu0 %6179  ;;  %v6266_v46 = vadd.f32 %v6178_v59, %v6106_v62 }
 0x679   : > { %v6267_v41 = vadd.f32 %v6180_v40, %v6107_v43 }
 0x67a   : > { %6335 = vrot.lane.b32.xlu0 %v6265_v61, %s7108_s17 }
 0x67b   : > { %v6182_v15 = vpop.permute.xlu1 %6181  ;;  %6333 = vrot.lane.b32.xlu1 %v6264_v60, %s7108_s17  ;;  %v6128_v60 = vld [vmem:[%s7222_s15 + $0xe8] sm:$0xff] }
 0x67c   : > { %v6184_v63 = vpop.permute.xlu0 %6183  ;;  %v6268_v17 = vadd.f32 %v6182_v15, %v6108_v2 }
 0x67d   : > { %v6269_v55 = vadd.f32 %v6184_v63, %v6109_v6  ;;  %v6129_v6 = vld [vmem:[%s7222_s15 + $0xf0] sm:$0xff] }
 0x67e   : > { %6339 = vrot.lane.b32.xlu0 %v6267_v41, %s7108_s17 }
 0x67f   : > { %v6186_v16 = vpop.permute.xlu1 %6185  ;;  %6337 = vrot.lane.b32.xlu1 %v6266_v46, %s7108_s17 }
 0x680   : > { %v6188_v19 = vpop.permute.xlu0 %6187  ;;  %v6270_v12 = vadd.f32 %v6186_v16, %v6110_v25  ;;  %v6130_v16 = vld [vmem:[%s7222_s15 + $0xf8] sm:$0xff] }
 0x681   : > { %v6271_v35 = vadd.f32 %v6188_v19, %v6111_v56 }
 0x682   : > { %6343 = vrot.lane.b32.xlu0 %v6269_v55, %s7108_s17 }
 0x683   : > { %6341 = vrot.lane.b32.xlu1 %v6268_v17, %s7108_s17  ;;  %v6190_v20 = vpop.permute.xlu1 %6189 }
 0x684   : > { %v6192_v48 = vpop.permute.xlu0 %6191  ;;  %v6272_v18 = vadd.f32 %v6190_v20, %v6112_v37 }
 0x685   : > { %v6273_v7 = vadd.f32 %v6192_v48, %v6113_v38 }
 0x686   : > { %6347 = vrot.lane.b32.xlu0 %v6271_v35, %s7108_s17 }
 0x687   : > { %6345 = vrot.lane.b32.xlu1 %v6270_v12, %s7108_s17  ;;  %v6194_v58 = vpop.permute.xlu1 %6193 }
 0x688   : > { %v6274_v53 = vadd.f32 %v6194_v58, %v6114_v14 }
 0x68a   : > { %6351 = vrot.lane.b32.xlu0 %v6273_v7, %s7108_s17 }
 0x68b   : > { %6349 = vrot.lane.b32.xlu1 %v6272_v18, %s7108_s17 }
 0x68f   : > { %6353 = vrot.lane.b32.xlu1 %v6274_v53, %s7108_s17 }
 0x690   : > { %v6196_v51 = vpop.permute.xlu0 %6195 }
 0x691   : > { %v6275_v57 = vadd.f32 %v6196_v51, %v6115_v23 }
 0x693   : > { %v6198_v13 = vpop.permute.xlu1 %6197  ;;  %6355 = vrot.lane.b32.xlu0 %v6275_v57, %s7108_s17 }
 0x694   : > { %v6276_v21 = vadd.f32 %v6198_v13, %v6116_v30 }
 0x696   : > { %6357 = vrot.lane.b32.xlu1 %v6276_v21, %s7108_s17 }
 0x69c   : > { %v6200_v0 = vpop.permute.xlu0 %6199 }
 0x69d   : > { %v6277_v1 = vadd.f32 %v6200_v0, %v6117_v29 }
 0x69f   : > { %v6202_v32 = vpop.permute.xlu1 %6201  ;;  %6359 = vrot.lane.b32.xlu0 %v6277_v1, %s7108_s17 }
 0x6a0   : > { %v6278_v9 = vadd.f32 %v6202_v32, %v6118_v11 }
 0x6a2   : > { %6361 = vrot.lane.b32.xlu1 %v6278_v9, %s7108_s17 }
 0x6a8   : > { %v6204_v34 = vpop.permute.xlu0 %6203 }
 0x6a9   : > { %v6279_v49 = vadd.f32 %v6204_v34, %v6119_v45 }
 0x6ab   : > { %v6206_v24 = vpop.permute.xlu1 %6205  ;;  %6363 = vrot.lane.b32.xlu0 %v6279_v49, %s7108_s17 }
 0x6ac   : > { %v6280_v10 = vadd.f32 %v6206_v24, %v6120_v42 }
 0x6ae   : > { %6365 = vrot.lane.b32.xlu1 %v6280_v10, %s7108_s17 }
 0x6b4   : > { %v6208_v39 = vpop.permute.xlu0 %6207 }
 0x6b5   : > { %v6281_v31 = vadd.f32 %v6208_v39, %v6121_v27 }
 0x6b7   : > { %v6210_v44 = vpop.permute.xlu1 %6209  ;;  %6367 = vrot.lane.b32.xlu0 %v6281_v31, %s7108_s17 }
 0x6b8   : > { %v6282_v50 = vadd.f32 %v6210_v44, %v6122_v22 }
 0x6ba   : > { %6369 = vrot.lane.b32.xlu1 %v6282_v50, %s7108_s17 }
 0x6c0   : > { %v6212_v3 = vpop.permute.xlu0 %6211 }
 0x6c1   : > { %v6283_v8 = vadd.f32 %v6212_v3, %v6123_v33 }
 0x6c3   : > { %v6214_v26 = vpop.permute.xlu1 %6213  ;;  %6371 = vrot.lane.b32.xlu0 %v6283_v8, %s7108_s17 }
 0x6c4   : > { %v6284_v4 = vadd.f32 %v6214_v26, %v6124_v54 }
 0x6c6   : > { %6373 = vrot.lane.b32.xlu1 %v6284_v4, %s7108_s17 }
 0x6cc   : > { %v6216_v36 = vpop.permute.xlu0 %6215 }
 0x6cd   : > { %v6285_v47 = vadd.f32 %v6216_v36, %v6125_v5 }
 0x6cf   : > { %v6218_v59 = vpop.permute.xlu1 %6217  ;;  %6375 = vrot.lane.b32.xlu0 %v6285_v47, %s7108_s17 }
 0x6d0   : > { %v6286_v61 = vadd.f32 %v6218_v59, %v6126_v52 }
 0x6d2   : > { %6377 = vrot.lane.b32.xlu1 %v6286_v61, %s7108_s17 }
 0x6d4   : > { %v6220_v43 = vpop.permute.xlu0 %6219 }
 0x6d5   : > { %v6287_v40 = vadd.f32 %v6220_v43, %v6127_v28 }
 0x6d7   : > { %v6222_v15 = vpop.permute.xlu1 %6221  ;;  %6379 = vrot.lane.b32.xlu0 %v6287_v40, %s7108_s17 }
 0x6d8   : > { %v6288_v41 = vadd.f32 %v6222_v15, %v6128_v60 }
 0x6da   : > { %6381 = vrot.lane.b32.xlu1 %v6288_v41, %s7108_s17 }
 0x6dc   : > { %v6324_v62 = vpop.permute.xlu0 %6323 }
 0x6dd   : > { %6420 = vst.msk [vmem:[%s9553_s20] sm:$0xff] %vm6419_vm0, %v6324_v62 }
 0x6e0   : > { %v6224_v63 = vpop.permute.xlu0 %6223 }
 0x6e1   : > { %v6289_v46 = vadd.f32 %v6224_v63, %v6129_v6  ;;  %v6326_v55 = vpop.permute.xlu1 %6325 }
 0x6e2   : > { %6421 = vst.msk [vmem:[%s9553_s20 + $0x8] sm:$0xff] %vm6419_vm0, %v6326_v55 }
 0x6e3   : > { %6383 = vrot.lane.b32.xlu0 %v6289_v46, %s7108_s17 }
 0x6e4   : > { %v6328_v2 = vpop.permute.xlu0 %6327 }
 0x6e5   : > { %6422 = vst.msk [vmem:[%s9553_s20 + $0x10] sm:$0xff] %vm6419_vm0, %v6328_v2  ;;  %v6226_v56 = vpop.permute.xlu1 %6225 }
 0x6e6   : > { %v6290_v19 = vadd.f32 %v6226_v56, %v6130_v16 }
 0x6e8   : > { %v6332_v17 = vpop.permute.xlu0 %6331  ;;  %6385 = vrot.lane.b32.xlu1 %v6290_v19, %s7108_s17 }
 0x6e9   : > { %6424 = vst.msk [vmem:[%s9553_s20 + $0x20] sm:$0xff] %vm6419_vm0, %v6332_v17  ;;  %v6330_v35 = vpop.permute.xlu1 %6329 }
 0x6ea   : > { %6423 = vst.msk [vmem:[%s9553_s20 + $0x18] sm:$0xff] %vm6419_vm0, %v6330_v35 }
 0x6ec   : > { %v6336_v25 = vpop.permute.xlu0 %6335 }
 0x6ed   : > { %6426 = vst.msk [vmem:[%s9553_s20 + $0x30] sm:$0xff] %vm6419_vm0, %v6336_v25  ;;  %v6334_v38 = vpop.permute.xlu1 %6333 }
 0x6ee   : > { %6425 = vst.msk [vmem:[%s9553_s20 + $0x28] sm:$0xff] %vm6419_vm0, %v6334_v38 }
 0x6f0   : > { %v6340_v20 = vpop.permute.xlu0 %6339 }
 0x6f1   : > { %6428 = vst.msk [vmem:[%s9553_s20 + $0x40] sm:$0xff] %vm6419_vm0, %v6340_v20  ;;  %v6338_v48 = vpop.permute.xlu1 %6337 }
 0x6f2   : > { %6427 = vst.msk [vmem:[%s9553_s20 + $0x38] sm:$0xff] %vm6419_vm0, %v6338_v48 }
 0x6f4   : > { %v6344_v12 = vpop.permute.xlu0 %6343 }
 0x6f5   : > { %6430 = vst.msk [vmem:[%s9553_s20 + $0x50] sm:$0xff] %vm6419_vm0, %v6344_v12  ;;  %v6342_v37 = vpop.permute.xlu1 %6341 }
 0x6f6   : > { %6429 = vst.msk [vmem:[%s9553_s20 + $0x48] sm:$0xff] %vm6419_vm0, %v6342_v37 }
 0x6f8   : > { %v6348_v7 = vpop.permute.xlu0 %6347 }
 0x6f9   : > { %6432 = vst.msk [vmem:[%s9553_s20 + $0x60] sm:$0xff] %vm6419_vm0, %v6348_v7  ;;  %v6346_v18 = vpop.permute.xlu1 %6345 }
 0x6fa   : > { %6431 = vst.msk [vmem:[%s9553_s20 + $0x58] sm:$0xff] %vm6419_vm0, %v6346_v18 }
 0x6fc   : > { %v6352_v14 = vpop.permute.xlu0 %6351 }
 0x6fd   : > { %6434 = vst.msk [vmem:[%s9553_s20 + $0x70] sm:$0xff] %vm6419_vm0, %v6352_v14  ;;  %v6350_v58 = vpop.permute.xlu1 %6349 }
 0x6fe   : > { %6433 = vst.msk [vmem:[%s9553_s20 + $0x68] sm:$0xff] %vm6419_vm0, %v6350_v58 }
 0x701   : > { %v6354_v23 = vpop.permute.xlu1 %6353 }
 0x702   : > { %6435 = vst.msk [vmem:[%s9553_s20 + $0x78] sm:$0xff] %vm6419_vm0, %v6354_v23 }
 0x705   : > { %v6356_v51 = vpop.permute.xlu0 %6355 }
 0x706   : > { %6436 = vst.msk [vmem:[%s9553_s20 + $0x80] sm:$0xff] %vm6419_vm0, %v6356_v51 }
 0x708   : > { %v6358_v53 = vpop.permute.xlu1 %6357 }
 0x709   : > { %6437 = vst.msk [vmem:[%s9553_s20 + $0x88] sm:$0xff] %vm6419_vm0, %v6358_v53 }
 0x711   : > { %v6360_v57 = vpop.permute.xlu0 %6359 }
 0x712   : > { %6438 = vst.msk [vmem:[%s9553_s20 + $0x90] sm:$0xff] %vm6419_vm0, %v6360_v57 }
 0x714   : > { %v6362_v30 = vpop.permute.xlu1 %6361 }
 0x715   : > { %6439 = vst.msk [vmem:[%s9553_s20 + $0x98] sm:$0xff] %vm6419_vm0, %v6362_v30 }
 0x71d   : > { %v6364_v13 = vpop.permute.xlu0 %6363 }
 0x71e   : > { %6440 = vst.msk [vmem:[%s9553_s20 + $0xa0] sm:$0xff] %vm6419_vm0, %v6364_v13 }
 0x720   : > { %v6366_v21 = vpop.permute.xlu1 %6365 }
 0x721   : > { %6441 = vst.msk [vmem:[%s9553_s20 + $0xa8] sm:$0xff] %vm6419_vm0, %v6366_v21 }
 0x729   : > { %v6368_v29 = vpop.permute.xlu0 %6367 }
 0x72a   : > { %6442 = vst.msk [vmem:[%s9553_s20 + $0xb0] sm:$0xff] %vm6419_vm0, %v6368_v29 }
 0x72c   : > { %v6370_v0 = vpop.permute.xlu1 %6369 }
 0x72d   : > { %6443 = vst.msk [vmem:[%s9553_s20 + $0xb8] sm:$0xff] %vm6419_vm0, %v6370_v0 }
 0x735   : > { %v6372_v1 = vpop.permute.xlu0 %6371 }
 0x736   : > { %6444 = vst.msk [vmem:[%s9553_s20 + $0xc0] sm:$0xff] %vm6419_vm0, %v6372_v1 }
 0x738   : > { %v6374_v11 = vpop.permute.xlu1 %6373 }
 0x739   : > { %6445 = vst.msk [vmem:[%s9553_s20 + $0xc8] sm:$0xff] %vm6419_vm0, %v6374_v11 }
 0x741   : > { %v6376_v32 = vpop.permute.xlu0 %6375 }
 0x742   : > { %6446 = vst.msk [vmem:[%s9553_s20 + $0xd0] sm:$0xff] %vm6419_vm0, %v6376_v32 }
 0x744   : > { %v6378_v9 = vpop.permute.xlu1 %6377 }
 0x745   : > { %6447 = vst.msk [vmem:[%s9553_s20 + $0xd8] sm:$0xff] %vm6419_vm0, %v6378_v9 }
 0x749   : > { %v6380_v45 = vpop.permute.xlu0 %6379 }
 0x74a   : > { %6448 = vst.msk [vmem:[%s9553_s20 + $0xe0] sm:$0xff] %vm6419_vm0, %v6380_v45 }
 0x74c   : > { %v6382_v34 = vpop.permute.xlu1 %6381 }
 0x74d   : > { %6449 = vst.msk [vmem:[%s9553_s20 + $0xe8] sm:$0xff] %vm6419_vm0, %v6382_v34 }
 0x755   : > { %v6384_v49 = vpop.permute.xlu0 %6383 }
 0x756   : > { %6450 = vst.msk [vmem:[%s9553_s20 + $0xf0] sm:$0xff] %vm6419_vm0, %v6384_v49 }
 0x75a   : > { %v6386_v42 = vpop.permute.xlu1 %6385 }
 0x75b   : > { %6451 = vst.msk [vmem:[%s9553_s20 + $0xf8] sm:$0xff] %vm6419_vm0, %v6386_v42 }
 0x75c PF: > { %s21_s11 = sadd.s32 1, %s7094_s11  }
 0x75d   : > { %p18_p4 = scmp.ge.s32.totalorder %s21_s11, 4  }
 0x75f   :  { %20 = sbr.rel (!%p18_p4) target bundleno = 3 (0x3), region = 89 }

</bundles_post_ra>
